<compile_context>
chip_gen: v7x
topology: tpu7x:2x2x1
jax: 0.10.0
libtpu: 0.0.40
codegen_flags: <defaults>
</compile_context>

<pallas_src>
import functools
import math

import jax
import jax.numpy as jnp
from jax.experimental import pallas as pl
from jax.experimental.pallas import tpu as pltpu

EPS = 1e-12                       # HF BERT LayerNorm eps
MXU_DTYPE = jnp.bfloat16          # MXU input dtype (accumulation stays f32)
ACT_DTYPE = jnp.bfloat16          # inter-kernel activation / weight-matrix storage
GELU_TANH = False                 # True -> tanh-approx GELU (EUP; faster on v5e)


def _vmem_limit_bytes():
    # Generation-aware scoped-VMEM cap: ~3/4 of physical, capped at 96 MiB
    # (128 MiB physical on v5e/v6e -> 96 MiB; 64 MiB on v7x -> 48 MiB).
    cap = 64 * 1024 * 1024
    try:
        info = pltpu.get_tpu_info()
        cap = int(getattr(info, "vmem_capacity_bytes", cap) or cap)
    except Exception:
        pass
    return min((cap * 3) // 4, 96 * 1024 * 1024)


_VMEM_LIMIT = _vmem_limit_bytes()


def _cparams(semantics):
    return pltpu.CompilerParams(dimension_semantics=semantics,
                                vmem_limit_bytes=_VMEM_LIMIT)


def _pick_tile(dim, prefs=(512, 256, 128), min_grid=1):
    """Largest preferred tile dividing `dim`, preferring >= min_grid grid steps."""
    for t in prefs:
        if t <= dim and dim % t == 0 and dim // t >= min_grid:
            return t
    for t in prefs:
        if t <= dim and dim % t == 0:
            return t
    # TODO(synk): for dims not divisible by 128, pad (or use pl.cdiv grids with a
    # masked tail) instead of falling back to the full dim (kills pipelining).
    return dim


# ----------------------------------------------------------------------------
# elementwise helpers (run inside kernels, f32)
# ----------------------------------------------------------------------------
def _erf_f32(x):
    # Abramowitz & Stegun 7.1.26 rational approximation of erf (|err| < 1.5e-7).
    a1, a2, a3, a4, a5 = 0.254829592, -0.284496736, 1.421413741, -1.453152027, 1.061405429
    p = 0.3275911
    s = jnp.where(x >= 0.0, 1.0, -1.0)
    ax = jnp.abs(x)
    t = 1.0 / (1.0 + p * ax)
    poly = ((((a5 * t + a4) * t + a3) * t + a2) * t + a1) * t
    return s * (1.0 - poly * jnp.exp(-ax * ax))


def _gelu_f32(y):
    if GELU_TANH:
        # tanh approximation -> single EUP tanh instead of the erf VALU chain.
        c = 0.7978845608028654  # sqrt(2/pi)
        return 0.5 * y * (1.0 + jnp.tanh(c * (y + 0.044715 * y * y * y)))
    return 0.5 * y * (1.0 + _erf_f32(y * 0.7071067811865476))


def _layernorm_f32(y, gamma, beta):
    mean = jnp.mean(y, axis=-1, keepdims=True)
    yc = y - mean
    var = jnp.mean(yc * yc, axis=-1, keepdims=True)   # biased variance (torch LayerNorm)
    return yc * jax.lax.rsqrt(var + EPS) * gamma + beta


# ----------------------------------------------------------------------------
# Row-tiled LayerNorm (embeddings)
# ----------------------------------------------------------------------------
def _layernorm_kernel(x_ref, g_ref, b_ref, o_ref):
    y = _layernorm_f32(x_ref[...].astype(jnp.float32), g_ref[...], b_ref[...])
    o_ref[...] = y.astype(o_ref.dtype)


def layernorm(x, gamma, beta):
    M, H = x.shape
    TM = _pick_tile(M, min_grid=2)
    cost = pl.CostEstimate(flops=int(8 * M * H), transcendentals=int(M),
                           bytes_accessed=int(4 * M * H + 2 * M * H + 8 * H))
    return pl.pallas_call(
        _layernorm_kernel,
        grid=(M // TM,),
        in_specs=[
            pl.BlockSpec((TM, H), lambda i: (i, 0)),
            pl.BlockSpec((1, H), lambda i: (0, 0)),
            pl.BlockSpec((1, H), lambda i: (0, 0)),
        ],
        out_specs=pl.BlockSpec((TM, H), lambda i: (i, 0)),
        out_shape=jax.ShapeDtypeStruct((M, H), ACT_DTYPE),
        compiler_params=_cparams(("parallel",)),
        cost_estimate=cost,
    )(x, gamma.reshape(1, H), beta.reshape(1, H))


# ----------------------------------------------------------------------------
# Fused QKV projection + self-attention, grid = (B, nH).
# qkv_w columns are grouped per head: head h owns cols [h*3*dH : (h+1)*3*dH]
# laid out [Q_h | K_h | V_h]  (128-lane aligned for dH a multiple of 128).
# ----------------------------------------------------------------------------
def _qkv_attention_kernel(x_ref, w_ref, b_ref, bias_ref, o_ref, *, dH, scale):
    x = x_ref[0].astype(MXU_DTYPE)                        # (S, H)
    w = w_ref[...].astype(MXU_DTYPE)                      # (H, 3*dH) per-head slab
    qkv = jnp.dot(x, w, preferred_element_type=jnp.float32) + b_ref[...]   # (S, 3*dH)
    q = qkv[:, 0 * dH:1 * dH].astype(MXU_DTYPE)
    k = qkv[:, 1 * dH:2 * dH].astype(MXU_DTYPE)
    v = qkv[:, 2 * dH:3 * dH].astype(MXU_DTYPE)
    s = jax.lax.dot_general(q, k, (((1,), (1,)), ((), ())),
                            preferred_element_type=jnp.float32) * scale + bias_ref[0]
    m = jnp.max(s, axis=-1, keepdims=True)
    p = jnp.exp(s - m)
    # approx reciprocal runs on the (otherwise idle) EUP slot; set approx=False
    # for bit-closer parity with torch softmax.
    p = p * pl.reciprocal(jnp.sum(p, axis=-1, keepdims=True), approx=True)
    ctx = jnp.dot(p.astype(MXU_DTYPE), v, preferred_element_type=jnp.float32)
    o_ref[0] = ctx.astype(o_ref.dtype)
    # TODO(synk): switch to a kv-tiled flash-style online softmax once S reaches
    # ~512 (v7x, 64 MiB VMEM) / ~1024 (v5e/v6e); full-S scores are fine here.


def qkv_attention(h, qkv_w, qkv_b, mask_bias, *, B, S, nH, dH, scale):
    H = nH * dH
    x = h.reshape(B, S, H)
    cost = pl.CostEstimate(
        flops=int(2 * B * S * H * 3 * H + 4 * B * nH * S * S * dH),
        transcendentals=int(B * nH * S * S),
        bytes_accessed=int(2 * (B * nH * S * H + H * 3 * H + B * S * H)
                           + 4 * (B * S + 3 * H)))
    return pl.pallas_call(
        functools.partial(_qkv_attention_kernel, dH=dH, scale=scale),
        grid=(B, nH),
        in_specs=[
            pl.BlockSpec((1, S, H), lambda b, hd: (b, 0, 0)),
            pl.BlockSpec((H, 3 * dH), lambda b, hd: (0, hd)),
            pl.BlockSpec((1, 3 * dH), lambda b, hd: (0, hd)),
            pl.BlockSpec((1, 1, S), lambda b, hd: (b, 0, 0)),
        ],
        out_specs=pl.BlockSpec((1, S, dH), lambda b, hd: (b, 0, hd)),
        out_shape=jax.ShapeDtypeStruct((B, S, H), ACT_DTYPE),
        compiler_params=_cparams(("parallel", "parallel")),
        cost_estimate=cost,
    )(x, qkv_w, qkv_b.reshape(1, 3 * H), mask_bias)


# ----------------------------------------------------------------------------
# Tiled dense + residual-add + LayerNorm fused epilogue (attention output proj):
#   out = LayerNorm(x @ w + b + residual) * gamma + beta
# ----------------------------------------------------------------------------
def _dense_res_ln_kernel(x_ref, w_ref, b_ref, r_ref, g_ref, be_ref, o_ref, acc_ref):
    k = pl.program_id(1)

    @pl.when(k == 0)
    def _():
        acc_ref[...] = jnp.zeros_like(acc_ref)

    acc_ref[...] += jnp.dot(x_ref[...].astype(MXU_DTYPE),
                            w_ref[...].astype(MXU_DTYPE),
                            preferred_element_type=jnp.float32)

    @pl.when(k == pl.num_programs(1) - 1)
    def _():
        y = acc_ref[...] + b_ref[...] + r_ref[...].astype(jnp.float32)
        o_ref[...] = _layernorm_f32(y, g_ref[...], be_ref[...]).astype(o_ref.dtype)


def dense_res_ln(x, w, b, residual, gamma, beta):
    M, K = x.shape
    N = w.shape[1]
    TM = _pick_tile(M, min_grid=2)
    TK = _pick_tile(K, min_grid=2)
    cost = pl.CostEstimate(
        flops=int(2 * M * K * N + 10 * M * N),
        transcendentals=int(M),
        bytes_accessed=int(2 * (M * K + K * N + 2 * M * N) + 12 * N))
    return pl.pallas_call(
        _dense_res_ln_kernel,
        grid=(M // TM, K // TK),
        in_specs=[
            pl.BlockSpec((TM, TK), lambda i, k: (i, k)),
            pl.BlockSpec((TK, N), lambda i, k: (k, 0)),
            pl.BlockSpec((1, N), lambda i, k: (0, 0)),
            pl.BlockSpec((TM, N), lambda i, k: (i, 0)),
            pl.BlockSpec((1, N), lambda i, k: (0, 0)),
            pl.BlockSpec((1, N), lambda i, k: (0, 0)),
        ],
        out_specs=pl.BlockSpec((TM, N), lambda i, k: (i, 0)),
        out_shape=jax.ShapeDtypeStruct((M, N), ACT_DTYPE),
        scratch_shapes=[pltpu.VMEM((TM, N), jnp.float32)],
        compiler_params=_cparams(("parallel", "arbitrary")),
        cost_estimate=cost,
    )(x, w, b.reshape(1, N), residual, gamma.reshape(1, N), beta.reshape(1, N))


# ----------------------------------------------------------------------------
# Fused FFN: out = LayerNorm(gelu(x @ W1 + b1) @ W2 + b2 + residual)
# Grid reduces over the intermediate dimension; the [TM, TI] GELU tile never
# leaves VMEM, so the [B*S, inter] activation never touches HBM.
# ----------------------------------------------------------------------------
def _ffn_kernel(x_ref, w1_ref, b1_ref, w2_ref, b2_ref, r_ref, g_ref, be_ref,
                o_ref, acc_ref):
    j = pl.program_id(1)

    @pl.when(j == 0)
    def _():
        acc_ref[...] = jnp.zeros_like(acc_ref)

    u = jnp.dot(x_ref[...].astype(MXU_DTYPE), w1_ref[...].astype(MXU_DTYPE),
                preferred_element_type=jnp.float32) + b1_ref[...]
    u = _gelu_f32(u)
    acc_ref[...] += jnp.dot(u.astype(MXU_DTYPE), w2_ref[...].astype(MXU_DTYPE),
                            preferred_element_type=jnp.float32)

    @pl.when(j == pl.num_programs(1) - 1)
    def _():
        y = acc_ref[...] + b2_ref[...] + r_ref[...].astype(jnp.float32)
        o_ref[...] = _layernorm_f32(y, g_ref[...], be_ref[...]).astype(o_ref.dtype)


def ffn_res_ln(x, w1, b1, w2, b2, residual, gamma, beta):
    M, H = x.shape
    I = w1.shape[1]
    TM = _pick_tile(M, min_grid=2)
    TI = _pick_tile(I, min_grid=2)
    cost = pl.CostEstimate(
        flops=int(4 * M * H * I + 10 * M * H),
        transcendentals=int(M * I + M),
        bytes_accessed=int(2 * (3 * M * H + 2 * H * I) + 4 * (I + 3 * H)))
    return pl.pallas_call(
        _ffn_kernel,
        grid=(M // TM, I // TI),
        in_specs=[
            pl.BlockSpec((TM, H), lambda i, j: (i, 0)),
            pl.BlockSpec((H, TI), lambda i, j: (0, j)),
            pl.BlockSpec((1, TI), lambda i, j: (0, j)),
            pl.BlockSpec((TI, H), lambda i, j: (j, 0)),
            pl.BlockSpec((1, H), lambda i, j: (0, 0)),
            pl.BlockSpec((TM, H), lambda i, j: (i, 0)),
            pl.BlockSpec((1, H), lambda i, j: (0, 0)),
            pl.BlockSpec((1, H), lambda i, j: (0, 0)),
        ],
        out_specs=pl.BlockSpec((TM, H), lambda i, j: (i, 0)),
        out_shape=jax.ShapeDtypeStruct((M, H), ACT_DTYPE),
        scratch_shapes=[pltpu.VMEM((TM, H), jnp.float32)],
        compiler_params=_cparams(("parallel", "arbitrary")),
        cost_estimate=cost,
    )(x, w1, b1.reshape(1, I), w2, b2.reshape(1, H), residual,
      gamma.reshape(1, H), beta.reshape(1, H))


# ----------------------------------------------------------------------------
# Final batched matmul: out[b] = transforms[b] @ sequence_outputs[b]
# ----------------------------------------------------------------------------
def _bmm_kernel(t_ref, x_ref, o_ref):
    o_ref[0] = jnp.dot(t_ref[0].astype(MXU_DTYPE), x_ref[0].astype(MXU_DTYPE),
                       preferred_element_type=jnp.float32).astype(o_ref.dtype)


def transforms_matmul(transforms, seq_out):
    B, T, S = transforms.shape
    H = seq_out.shape[-1]
    cost = pl.CostEstimate(flops=int(2 * B * T * S * H), transcendentals=0,
                           bytes_accessed=int(4 * B * T * S + 2 * B * S * H
                                              + 4 * B * T * H))
    return pl.pallas_call(
        _bmm_kernel,
        grid=(B,),
        in_specs=[
            pl.BlockSpec((1, T, S), lambda b: (b, 0, 0)),
            pl.BlockSpec((1, S, H), lambda b: (b, 0, 0)),
        ],
        out_specs=pl.BlockSpec((1, T, H), lambda b: (b, 0, 0)),
        out_shape=jax.ShapeDtypeStruct((B, T, H), jnp.float32),
        compiler_params=_cparams(("parallel",)),
        cost_estimate=cost,
    )(transforms, seq_out)


# ----------------------------------------------------------------------------
# Deterministic synthetic BERT parameters + forward
# ----------------------------------------------------------------------------
def init_params(key, vocab=64, max_pos=128, H=256, inter=512, n_layers=2):
    keys = jax.random.split(key, 3 + n_layers)
    s = 0.02
    params = {
        "word_emb": jax.random.normal(keys[0], (vocab, H), jnp.float32) * s,
        "pos_emb": jax.random.normal(keys[1], (max_pos, H), jnp.float32) * s,
        "type_emb": jax.random.normal(keys[2], (2, H), jnp.float32) * s,
        "emb_ln_g": jnp.ones((H,), jnp.float32),
        "emb_ln_b": jnp.zeros((H,), jnp.float32),
        "layers": [],
    }
    for l in range(n_layers):
        lk = jax.random.split(keys[3 + l], 4)
        params["layers"].append({
            # fused QKV projection, columns grouped PER HEAD:
            #   head h owns cols [h*3*dH : (h+1)*3*dH] laid out [Q_h | K_h | V_h].
            # (Real HF checkpoints need a one-time column permutation to this layout.)
            "qkv_w": (jax.random.normal(lk[0], (H, 3 * H), jnp.float32) * s).astype(ACT_DTYPE),
            "qkv_b": jnp.zeros((3 * H,), jnp.float32),
            "ao_w": (jax.random.normal(lk[1], (H, H), jnp.float32) * s).astype(ACT_DTYPE),
            "ao_b": jnp.zeros((H,), jnp.float32),
            "ao_ln_g": jnp.ones((H,), jnp.float32), "ao_ln_b": jnp.zeros((H,), jnp.float32),
            "i_w": (jax.random.normal(lk[2], (H, inter), jnp.float32) * s).astype(ACT_DTYPE),
            "i_b": jnp.zeros((inter,), jnp.float32),
            "o_w": (jax.random.normal(lk[3], (inter, H), jnp.float32) * s).astype(ACT_DTYPE),
            "o_b": jnp.zeros((H,), jnp.float32),
            "o_ln_g": jnp.ones((H,), jnp.float32), "o_ln_b": jnp.zeros((H,), jnp.float32),
        })
    return params


def bert_latin_forward(params, input_ids, attention_mask, transforms, *, nH):
    B, S = input_ids.shape
    H = params["word_emb"].shape[1]
    dH = H // nH
    scale = 1.0 / math.sqrt(dH)

    # --- embeddings (table gathers are glue JAX; LayerNorm runs in Pallas) ---
    emb = (params["word_emb"][input_ids]
           + params["pos_emb"][jnp.arange(S)][None, :, :]
           + params["type_emb"][0][None, None, :])          # token_type_ids == 0
    h = layernorm(emb.reshape(B * S, H), params["emb_ln_g"], params["emb_ln_b"])

    # extended attention mask: (1 - mask) * -10000  (classic HF BERT)
    mask_bias = ((1.0 - attention_mask.astype(jnp.float32)) * -10000.0).reshape(B, 1, S)

    # --- encoder layers ---
    for layer in params["layers"]:
        ctx = qkv_attention(h, layer["qkv_w"], layer["qkv_b"], mask_bias,
                            B=B, S=S, nH=nH, dH=dH, scale=scale)           # [B,S,H]
        h = dense_res_ln(ctx.reshape(B * S, H), layer["ao_w"], layer["ao_b"],
                         h, layer["ao_ln_g"], layer["ao_ln_b"])             # attn out + LN
        h = ffn_res_ln(h, layer["i_w"], layer["i_b"], layer["o_w"], layer["o_b"],
                       h, layer["o_ln_g"], layer["o_ln_b"])                 # fused FFN + LN

    seq_out = h.reshape(B, S, H)
    # TODO(synk): BertModel also computes a pooled output (tanh dense over [CLS]);
    # it is unused by BertLatin.forward, so it is skipped here.

    # out = transforms @ sequence_outputs  (batched matmul in Pallas)
    return transforms_matmul(transforms, seq_out)


# ----------------------------------------------------------------------------
# Example run
# ----------------------------------------------------------------------------
if __name__ == "__main__":
    key = jax.random.PRNGKey(0)
    k_param, k_ids, k_trans = jax.random.split(key, 3)

    # Small but (8,128)-lane-dense shapes: B=2, S=128, H=256 (nH=2, dH=128),
    # intermediate=512, T=16 transform tokens.
    B, S, T = 2, 128, 16
    H, nH, inter, vocab = 256, 2, 512, 64
    params = init_params(k_param, vocab=vocab, max_pos=S, H=H, inter=inter, n_layers=2)

    input_ids = jax.random.randint(k_ids, (B, S), 0, vocab, dtype=jnp.int32)
    lengths = jnp.array([S, S - 32], dtype=jnp.int32)
    attention_mask = (jnp.arange(S)[None, :] < lengths[:, None]).astype(jnp.int32)
    transforms = jax.random.normal(k_trans, (B, T, S), jnp.float32)

    fwd = jax.jit(functools.partial(bert_latin_forward, nH=nH))
    out = fwd(params, input_ids, attention_mask, transforms)
    out = jax.block_until_ready(out)
    assert out.shape == (B, T, H) and out.dtype == jnp.float32
    assert bool(jnp.all(jnp.isfinite(out)))
    print("KERNEL_OK")
</pallas_src>

<mosaic_0001>
module attributes {stable_mosaic.version = 11 : i64} {
  func.func @_layernorm_kernel(%arg0: i32, %arg1: memref<128x256xf32, #tpu.memory_space<vmem>>, %arg2: memref<1x256xf32, #tpu.memory_space<vmem>>, %arg3: memref<1x256xf32, #tpu.memory_space<vmem>>, %arg4: memref<128x256xbf16, #tpu.memory_space<vmem>>) attributes {dimension_semantics = [#tpu.dimension_semantics<parallel>], iteration_bounds = array<i64: 2>, scalar_prefetch = 0 : i64, scratch_operands = 0 : i64, tpu.core_type = #tpu.core_type<tc>, window_params = [{transform_indices = @transform_0, window_bounds = array<i64: 128, 256>}, {pipeline_mode = #tpu.pipeline_mode<synchronous>, transform_indices = @transform_1, window_bounds = array<i64: 1, 256>}, {pipeline_mode = #tpu.pipeline_mode<synchronous>, transform_indices = @transform_2, window_bounds = array<i64: 1, 256>}, {transform_indices = @transform_3, window_bounds = array<i64: 128, 256>}]} {
    %c0 = arith.constant 0 : index
    %c0_0 = arith.constant 0 : index
    %0 = vector.load %arg1[%c0, %c0_0] : memref<128x256xf32, #tpu.memory_space<vmem>>, vector<128x256xf32>
    %c0_1 = arith.constant 0 : index
    %c0_2 = arith.constant 0 : index
    %1 = vector.load %arg2[%c0_1, %c0_2] : memref<1x256xf32, #tpu.memory_space<vmem>>, vector<1x256xf32>
    %c0_3 = arith.constant 0 : index
    %c0_4 = arith.constant 0 : index
    %2 = vector.load %arg3[%c0_3, %c0_4] : memref<1x256xf32, #tpu.memory_space<vmem>>, vector<1x256xf32>
    %cst = arith.constant dense<0.000000e+00> : vector<128xf32>
    %3 = vector.multi_reduction <add>, %0, %cst [1] : vector<128x256xf32> to vector<128xf32>
    %4 = vector.shape_cast %3 : vector<128xf32> to vector<128x1xf32>
    %cst_5 = arith.constant 2.560000e+02 : f32
    %5 = vector.broadcast %cst_5 : f32 to vector<128x1xf32>
    %6 = arith.divf %4, %5 : vector<128x1xf32>
    %7 = vector.broadcast %6 : vector<128x1xf32> to vector<128x256xf32>
    %8 = arith.subf %0, %7 : vector<128x256xf32>
    %9 = arith.mulf %8, %8 : vector<128x256xf32>
    %cst_6 = arith.constant dense<0.000000e+00> : vector<128xf32>
    %10 = vector.multi_reduction <add>, %9, %cst_6 [1] : vector<128x256xf32> to vector<128xf32>
    %11 = vector.shape_cast %10 : vector<128xf32> to vector<128x1xf32>
    %cst_7 = arith.constant 2.560000e+02 : f32
    %12 = vector.broadcast %cst_7 : f32 to vector<128x1xf32>
    %13 = arith.divf %11, %12 : vector<128x1xf32>
    %cst_8 = arith.constant 9.99999996E-13 : f32
    %14 = vector.broadcast %cst_8 : f32 to vector<128x1xf32>
    %15 = arith.addf %13, %14 : vector<128x1xf32>
    %16 = math.rsqrt %15 : vector<128x1xf32>
    %17 = vector.broadcast %16 : vector<128x1xf32> to vector<128x256xf32>
    %18 = arith.mulf %8, %17 : vector<128x256xf32>
    %19 = vector.broadcast %1 : vector<1x256xf32> to vector<128x256xf32>
    %20 = arith.mulf %18, %19 : vector<128x256xf32>
    %21 = vector.broadcast %2 : vector<1x256xf32> to vector<128x256xf32>
    %22 = arith.addf %20, %21 : vector<128x256xf32>
    %23 = arith.truncf %22 : vector<128x256xf32> to vector<128x256xbf16>
    %c0_9 = arith.constant 0 : index
    %c0_10 = arith.constant 0 : index
    %24 = vector.load %arg4[%c0_9, %c0_10] : memref<128x256xbf16, #tpu.memory_space<vmem>>, vector<128x256xbf16>
    tpu.vector_store %arg4[%c0_9, %c0_10], %23 {strides = array<i32>} : memref<128x256xbf16, #tpu.memory_space<vmem>>, vector<128x256xbf16>,
    return
  }
  func.func @transform_0(%arg0: i32) -> (i32, i32) {
    %c0_i32 = arith.constant 0 : i32
    %c0_i32_0 = arith.constant 0 : i32
    return %arg0, %c0_i32 : i32, i32
  }
  func.func @transform_1(%arg0: i32) -> (i32, i32) {
    %c0_i32 = arith.constant 0 : i32
    %c0_i32_0 = arith.constant 0 : i32
    %c0_i32_1 = arith.constant 0 : i32
    return %c0_i32, %c0_i32_0 : i32, i32
  }
  func.func @transform_2(%arg0: i32) -> (i32, i32) {
    %c0_i32 = arith.constant 0 : i32
    %c0_i32_0 = arith.constant 0 : i32
    %c0_i32_1 = arith.constant 0 : i32
    return %c0_i32, %c0_i32_0 : i32, i32
  }
  func.func @transform_3(%arg0: i32) -> (i32, i32) {
    %c0_i32 = arith.constant 0 : i32
    %c0_i32_0 = arith.constant 0 : i32
    return %arg0, %c0_i32 : i32, i32
  }
}

module attributes {stable_mosaic.version = 11 : i64} {
  func.func @_qkv_attention_kernel(%arg0: i32, %arg1: i32, %arg2: memref<1x128x256xbf16, #tpu.memory_space<vmem>>, %arg3: memref<256x384xbf16, #tpu.memory_space<vmem>>, %arg4: memref<1x384xf32, #tpu.memory_space<vmem>>, %arg5: memref<1x1x128xf32, #tpu.memory_space<vmem>>, %arg6: memref<1x128x128xbf16, #tpu.memory_space<vmem>>) attributes {dimension_semantics = [#tpu.dimension_semantics<parallel>, #tpu.dimension_semantics<parallel>], iteration_bounds = array<i64: 2, 2>, scalar_prefetch = 0 : i64, scratch_operands = 0 : i64, tpu.core_type = #tpu.core_type<tc>, window_params = [{transform_indices = @transform_0, window_bounds = array<i64: 1, 128, 256>}, {transform_indices = @transform_1, window_bounds = array<i64: 256, 384>}, {transform_indices = @transform_2, window_bounds = array<i64: 1, 384>}, {transform_indices = @transform_3, window_bounds = array<i64: 1, 1, 128>}, {transform_indices = @transform_4, window_bounds = array<i64: 1, 128, 128>}]} {
    %c0 = arith.constant 0 : index
    %c0_0 = arith.constant 0 : index
    %c0_1 = arith.constant 0 : index
    %0 = vector.load %arg2[%c0, %c0_0, %c0_1] : memref<1x128x256xbf16, #tpu.memory_space<vmem>>, vector<1x128x256xbf16>
    %1 = vector.shape_cast %0 : vector<1x128x256xbf16> to vector<128x256xbf16>
    %c0_2 = arith.constant 0 : index
    %c0_3 = arith.constant 0 : index
    %2 = vector.load %arg3[%c0_2, %c0_3] : memref<256x384xbf16, #tpu.memory_space<vmem>>, vector<256x384xbf16>
    %cst = arith.constant dense<0.000000e+00> : vector<128x384xf32>
    %3 = tpu.matmul %1, %2, %cst {dimension_numbers = #tpu.dot_dimension_numbers<[1], [0], [0], [1], [0, 0, 1, 1], [], []>} : vector<128x256xbf16>, vector<256x384xbf16>, vector<128x384xf32> -> vector<128x384xf32>
    %c0_4 = arith.constant 0 : index
    %c0_5 = arith.constant 0 : index
    %4 = vector.load %arg4[%c0_4, %c0_5] : memref<1x384xf32, #tpu.memory_space<vmem>>, vector<1x384xf32>
    %5 = vector.broadcast %4 : vector<1x384xf32> to vector<128x384xf32>
    %6 = arith.addf %3, %5 : vector<128x384xf32>
    %7 = vector.extract_strided_slice %6 {offsets = [0, 0], sizes = [128, 128], strides = [1, 1]} : vector<128x384xf32> to vector<128x128xf32>
    %8 = arith.truncf %7 : vector<128x128xf32> to vector<128x128xbf16>
    %9 = vector.extract_strided_slice %6 {offsets = [0, 128], sizes = [128, 128], strides = [1, 1]} : vector<128x384xf32> to vector<128x128xf32>
    %10 = arith.truncf %9 : vector<128x128xf32> to vector<128x128xbf16>
    %11 = vector.extract_strided_slice %6 {offsets = [0, 256], sizes = [128, 128], strides = [1, 1]} : vector<128x384xf32> to vector<128x128xf32>
    %12 = arith.truncf %11 : vector<128x128xf32> to vector<128x128xbf16>
    %cst_6 = arith.constant dense<0.000000e+00> : vector<128x128xf32>
    %13 = tpu.matmul %8, %10, %cst_6 {dimension_numbers = #tpu.dot_dimension_numbers<[1], [1], [0], [0], [0, 0, 1, 0], [], []>} : vector<128x128xbf16>, vector<128x128xbf16>, vector<128x128xf32> -> vector<128x128xf32>
    %cst_7 = arith.constant 0.0883883461 : f32
    %14 = vector.broadcast %cst_7 : f32 to vector<128x128xf32>
    %15 = arith.mulf %13, %14 : vector<128x128xf32>
    %c0_8 = arith.constant 0 : index
    %c0_9 = arith.constant 0 : index
    %c0_10 = arith.constant 0 : index
    %16 = vector.load %arg5[%c0_8, %c0_9, %c0_10] : memref<1x1x128xf32, #tpu.memory_space<vmem>>, vector<1x1x128xf32>
    %17 = vector.shape_cast %16 : vector<1x1x128xf32> to vector<1x128xf32>
    %18 = vector.broadcast %17 : vector<1x128xf32> to vector<128x128xf32>
    %19 = arith.addf %15, %18 : vector<128x128xf32>
    %cst_11 = arith.constant dense<0xFF800000> : vector<128xf32>
    %20 = vector.multi_reduction <maximumf>, %19, %cst_11 [1] : vector<128x128xf32> to vector<128xf32>
    %21 = vector.shape_cast %20 : vector<128xf32> to vector<128x1xf32>
    %22 = vector.broadcast %21 : vector<128x1xf32> to vector<128x128xf32>
    %23 = arith.subf %19, %22 : vector<128x128xf32>
    %24 = math.exp %23 : vector<128x128xf32>
    %cst_12 = arith.constant dense<0.000000e+00> : vector<128xf32>
    %25 = vector.multi_reduction <add>, %24, %cst_12 [1] : vector<128x128xf32> to vector<128xf32>
    %26 = vector.shape_cast %25 : vector<128xf32> to vector<128x1xf32>
    %27 = tpu.reciprocal %26 {approx = true} : vector<128x1xf32> -> vector<128x1xf32>
    %28 = vector.broadcast %27 : vector<128x1xf32> to vector<128x128xf32>
    %29 = arith.mulf %24, %28 : vector<128x128xf32>
    %30 = arith.truncf %29 : vector<128x128xf32> to vector<128x128xbf16>
    %cst_13 = arith.constant dense<0.000000e+00> : vector<128x128xf32>
    %31 = tpu.matmul %30, %12, %cst_13 {dimension_numbers = #tpu.dot_dimension_numbers<[1], [0], [0], [1], [0, 0, 1, 1], [], []>} : vector<128x128xbf16>, vector<128x128xbf16>, vector<128x128xf32> -> vector<128x128xf32>
    %32 = arith.truncf %31 : vector<128x128xf32> to vector<128x128xbf16>
    %c0_14 = arith.constant 0 : index
    %c0_15 = arith.constant 0 : index
    %c0_16 = arith.constant 0 : index
    %33 = vector.load %arg6[%c0_14, %c0_15, %c0_16] : memref<1x128x128xbf16, #tpu.memory_space<vmem>>, vector<1x128x128xbf16>
    %34 = vector.shape_cast %33 : vector<1x128x128xbf16> to vector<128x128xbf16>
    %35 = vector.shape_cast %32 : vector<128x128xbf16> to vector<1x128x128xbf16>
    tpu.vector_store %arg6[%c0_14, %c0_15, %c0_16], %35 {strides = array<i32>} : memref<1x128x128xbf16, #tpu.memory_space<vmem>>, vector<1x128x128xbf16>,
    return
  }
  func.func @transform_0(%arg0: i32, %arg1: i32) -> (i32, i32, i32) {
    %c0_i32 = arith.constant 0 : i32
    %c0_i32_0 = arith.constant 0 : i32
    %c0_i32_1 = arith.constant 0 : i32
    return %arg0, %c0_i32, %c0_i32_0 : i32, i32, i32
  }
  func.func @transform_1(%arg0: i32, %arg1: i32) -> (i32, i32) {
    %c0_i32 = arith.constant 0 : i32
    %c0_i32_0 = arith.constant 0 : i32
    return %c0_i32, %arg1 : i32, i32
  }
  func.func @transform_2(%arg0: i32, %arg1: i32) -> (i32, i32) {
    %c0_i32 = arith.constant 0 : i32
    %c0_i32_0 = arith.constant 0 : i32
    return %c0_i32, %arg1 : i32, i32
  }
  func.func @transform_3(%arg0: i32, %arg1: i32) -> (i32, i32, i32) {
    %c0_i32 = arith.constant 0 : i32
    %c0_i32_0 = arith.constant 0 : i32
    %c0_i32_1 = arith.constant 0 : i32
    return %arg0, %c0_i32, %c0_i32_0 : i32, i32, i32
  }
  func.func @transform_4(%arg0: i32, %arg1: i32) -> (i32, i32, i32) {
    %c0_i32 = arith.constant 0 : i32
    %c0_i32_0 = arith.constant 0 : i32
    return %arg0, %c0_i32, %arg1 : i32, i32, i32
  }
}

module attributes {stable_mosaic.version = 11 : i64} {
  func.func @_dense_res_ln_kernel(%arg0: i32, %arg1: i32, %arg2: memref<128x128xbf16, #tpu.memory_space<vmem>>, %arg3: memref<128x256xbf16, #tpu.memory_space<vmem>>, %arg4: memref<1x256xf32, #tpu.memory_space<vmem>>, %arg5: memref<128x256xbf16, #tpu.memory_space<vmem>>, %arg6: memref<1x256xf32, #tpu.memory_space<vmem>>, %arg7: memref<1x256xf32, #tpu.memory_space<vmem>>, %arg8: memref<128x256xbf16, #tpu.memory_space<vmem>>, %arg9: memref<128x256xf32, #tpu.memory_space<vmem>>) attributes {dimension_semantics = [#tpu.dimension_semantics<parallel>, #tpu.dimension_semantics<arbitrary>], iteration_bounds = array<i64: 2, 2>, scalar_prefetch = 0 : i64, scratch_operands = 1 : i64, tpu.core_type = #tpu.core_type<tc>, window_params = [{transform_indices = @transform_0, window_bounds = array<i64: 128, 128>}, {transform_indices = @transform_1, window_bounds = array<i64: 128, 256>}, {pipeline_mode = #tpu.pipeline_mode<synchronous>, transform_indices = @transform_2, window_bounds = array<i64: 1, 256>}, {transform_indices = @transform_3, window_bounds = array<i64: 128, 256>}, {pipeline_mode = #tpu.pipeline_mode<synchronous>, transform_indices = @transform_4, window_bounds = array<i64: 1, 256>}, {pipeline_mode = #tpu.pipeline_mode<synchronous>, transform_indices = @transform_5, window_bounds = array<i64: 1, 256>}, {transform_indices = @transform_6, window_bounds = array<i64: 128, 256>}]} {
    %c0_i32 = arith.constant 0 : i32
    %0 = arith.cmpi eq, %arg1, %c0_i32 : i32
    %1 = arith.extui %0 : i1 to i32
    %c0_i32_0 = arith.constant 0 : i32
    %2 = arith.cmpi ne, %1, %c0_i32_0 : i32
    scf.if %2 {
      %cst_9 = arith.constant 0.000000e+00 : f32
      %12 = vector.broadcast %cst_9 : f32 to vector<128x256xf32>
      %c0_10 = arith.constant 0 : index
      %c0_11 = arith.constant 0 : index
      %13 = vector.load %arg9[%c0_10, %c0_11] : memref<128x256xf32, #tpu.memory_space<vmem>>, vector<128x256xf32>
      tpu.vector_store %arg9[%c0_10, %c0_11], %12 {strides = array<i32>} : memref<128x256xf32, #tpu.memory_space<vmem>>, vector<128x256xf32>,
    } else {
    }
    %c0 = arith.constant 0 : index
    %c0_1 = arith.constant 0 : index
    %3 = vector.load %arg9[%c0, %c0_1] : memref<128x256xf32, #tpu.memory_space<vmem>>, vector<128x256xf32>
    %c0_2 = arith.constant 0 : index
    %c0_3 = arith.constant 0 : index
    %4 = vector.load %arg2[%c0_2, %c0_3] : memref<128x128xbf16, #tpu.memory_space<vmem>>, vector<128x128xbf16>
    %c0_4 = arith.constant 0 : index
    %c0_5 = arith.constant 0 : index
    %5 = vector.load %arg3[%c0_4, %c0_5] : memref<128x256xbf16, #tpu.memory_space<vmem>>, vector<128x256xbf16>
    %cst = arith.constant dense<0.000000e+00> : vector<128x256xf32>
    %6 = tpu.matmul %4, %5, %cst {dimension_numbers = #tpu.dot_dimension_numbers<[1], [0], [0], [1], [0, 0, 1, 1], [], []>} : vector<128x128xbf16>, vector<128x256xbf16>, vector<128x256xf32> -> vector<128x256xf32>
    %7 = arith.addf %3, %6 : vector<128x256xf32>
    %c0_6 = arith.constant 0 : index
    %c0_7 = arith.constant 0 : index
    %8 = vector.load %arg9[%c0_6, %c0_7] : memref<128x256xf32, #tpu.memory_space<vmem>>, vector<128x256xf32>
    tpu.vector_store %arg9[%c0_6, %c0_7], %7 {strides = array<i32>} : memref<128x256xf32, #tpu.memory_space<vmem>>, vector<128x256xf32>,
    %c1_i32 = arith.constant 1 : i32
    %9 = arith.cmpi eq, %arg1, %c1_i32 : i32
    %10 = arith.extui %9 : i1 to i32
    %c0_i32_8 = arith.constant 0 : i32
    %11 = arith.cmpi ne, %10, %c0_i32_8 : i32
    scf.if %11 {
      %c0_9 = arith.constant 0 : index
      %c0_10 = arith.constant 0 : index
      %12 = vector.load %arg9[%c0_9, %c0_10] : memref<128x256xf32, #tpu.memory_space<vmem>>, vector<128x256xf32>
      %c0_11 = arith.constant 0 : index
      %c0_12 = arith.constant 0 : index
      %13 = vector.load %arg4[%c0_11, %c0_12] : memref<1x256xf32, #tpu.memory_space<vmem>>, vector<1x256xf32>
      %14 = vector.broadcast %13 : vector<1x256xf32> to vector<128x256xf32>
      %15 = arith.addf %12, %14 : vector<128x256xf32>
      %c0_13 = arith.constant 0 : index
      %c0_14 = arith.constant 0 : index
      %16 = vector.load %arg5[%c0_13, %c0_14] : memref<128x256xbf16, #tpu.memory_space<vmem>>, vector<128x256xbf16>
      %17 = arith.extf %16 : vector<128x256xbf16> to vector<128x256xf32>
      %18 = arith.addf %15, %17 : vector<128x256xf32>
      %c0_15 = arith.constant 0 : index
      %c0_16 = arith.constant 0 : index
      %19 = vector.load %arg6[%c0_15, %c0_16] : memref<1x256xf32, #tpu.memory_space<vmem>>, vector<1x256xf32>
      %c0_17 = arith.constant 0 : index
      %c0_18 = arith.constant 0 : index
      %20 = vector.load %arg7[%c0_17, %c0_18] : memref<1x256xf32, #tpu.memory_space<vmem>>, vector<1x256xf32>
      %cst_19 = arith.constant dense<0.000000e+00> : vector<128xf32>
      %21 = vector.multi_reduction <add>, %18, %cst_19 [1] : vector<128x256xf32> to vector<128xf32>
      %22 = vector.shape_cast %21 : vector<128xf32> to vector<128x1xf32>
      %cst_20 = arith.constant 2.560000e+02 : f32
      %23 = vector.broadcast %cst_20 : f32 to vector<128x1xf32>
      %24 = arith.divf %22, %23 : vector<128x1xf32>
      %25 = vector.broadcast %24 : vector<128x1xf32> to vector<128x256xf32>
      %26 = arith.subf %18, %25 : vector<128x256xf32>
      %27 = arith.mulf %26, %26 : vector<128x256xf32>
      %cst_21 = arith.constant dense<0.000000e+00> : vector<128xf32>
      %28 = vector.multi_reduction <add>, %27, %cst_21 [1] : vector<128x256xf32> to vector<128xf32>
      %29 = vector.shape_cast %28 : vector<128xf32> to vector<128x1xf32>
      %cst_22 = arith.constant 2.560000e+02 : f32
      %30 = vector.broadcast %cst_22 : f32 to vector<128x1xf32>
      %31 = arith.divf %29, %30 : vector<128x1xf32>
      %cst_23 = arith.constant 9.99999996E-13 : f32
      %32 = vector.broadcast %cst_23 : f32 to vector<128x1xf32>
      %33 = arith.addf %31, %32 : vector<128x1xf32>
      %34 = math.rsqrt %33 : vector<128x1xf32>
      %35 = vector.broadcast %34 : vector<128x1xf32> to vector<128x256xf32>
      %36 = arith.mulf %26, %35 : vector<128x256xf32>
      %37 = vector.broadcast %19 : vector<1x256xf32> to vector<128x256xf32>
      %38 = arith.mulf %36, %37 : vector<128x256xf32>
      %39 = vector.broadcast %20 : vector<1x256xf32> to vector<128x256xf32>
      %40 = arith.addf %38, %39 : vector<128x256xf32>
      %41 = arith.truncf %40 : vector<128x256xf32> to vector<128x256xbf16>
      %c0_24 = arith.constant 0 : index
      %c0_25 = arith.constant 0 : index
      %42 = vector.load %arg8[%c0_24, %c0_25] : memref<128x256xbf16, #tpu.memory_space<vmem>>, vector<128x256xbf16>
      tpu.vector_store %arg8[%c0_24, %c0_25], %41 {strides = array<i32>} : memref<128x256xbf16, #tpu.memory_space<vmem>>, vector<128x256xbf16>,
    } else {
    }
    return
  }
  func.func @transform_0(%arg0: i32, %arg1: i32) -> (i32, i32) {
    %c0_i32 = arith.constant 0 : i32
    return %arg0, %arg1 : i32, i32
  }
  func.func @transform_1(%arg0: i32, %arg1: i32) -> (i32, i32) {
    %c0_i32 = arith.constant 0 : i32
    %c0_i32_0 = arith.constant 0 : i32
    return %arg1, %c0_i32 : i32, i32
  }
  func.func @transform_2(%arg0: i32, %arg1: i32) -> (i32, i32) {
    %c0_i32 = arith.constant 0 : i32
    %c0_i32_0 = arith.constant 0 : i32
    %c0_i32_1 = arith.constant 0 : i32
    return %c0_i32, %c0_i32_0 : i32, i32
  }
  func.func @transform_3(%arg0: i32, %arg1: i32) -> (i32, i32) {
    %c0_i32 = arith.constant 0 : i32
    %c0_i32_0 = arith.constant 0 : i32
    return %arg0, %c0_i32 : i32, i32
  }
  func.func @transform_4(%arg0: i32, %arg1: i32) -> (i32, i32) {
    %c0_i32 = arith.constant 0 : i32
    %c0_i32_0 = arith.constant 0 : i32
    %c0_i32_1 = arith.constant 0 : i32
    return %c0_i32, %c0_i32_0 : i32, i32
  }
  func.func @transform_5(%arg0: i32, %arg1: i32) -> (i32, i32) {
    %c0_i32 = arith.constant 0 : i32
    %c0_i32_0 = arith.constant 0 : i32
    %c0_i32_1 = arith.constant 0 : i32
    return %c0_i32, %c0_i32_0 : i32, i32
  }
  func.func @transform_6(%arg0: i32, %arg1: i32) -> (i32, i32) {
    %c0_i32 = arith.constant 0 : i32
    %c0_i32_0 = arith.constant 0 : i32
    return %arg0, %c0_i32 : i32, i32
  }
}

module attributes {stable_mosaic.version = 11 : i64} {
  func.func @_bmm_kernel(%arg0: i32, %arg1: memref<1x16x128xf32, #tpu.memory_space<vmem>>, %arg2: memref<1x128x256xbf16, #tpu.memory_space<vmem>>, %arg3: memref<1x16x256xf32, #tpu.memory_space<vmem>>) attributes {dimension_semantics = [#tpu.dimension_semantics<parallel>], iteration_bounds = array<i64: 2>, scalar_prefetch = 0 : i64, scratch_operands = 0 : i64, tpu.core_type = #tpu.core_type<tc>, window_params = [{transform_indices = @transform_0, window_bounds = array<i64: 1, 16, 128>}, {transform_indices = @transform_1, window_bounds = array<i64: 1, 128, 256>}, {transform_indices = @transform_2, window_bounds = array<i64: 1, 16, 256>}]} {
    %c0 = arith.constant 0 : index
    %c0_0 = arith.constant 0 : index
    %c0_1 = arith.constant 0 : index
    %0 = vector.load %arg1[%c0, %c0_0, %c0_1] : memref<1x16x128xf32, #tpu.memory_space<vmem>>, vector<1x16x128xf32>
    %1 = vector.shape_cast %0 : vector<1x16x128xf32> to vector<16x128xf32>
    %2 = arith.truncf %1 : vector<16x128xf32> to vector<16x128xbf16>
    %c0_2 = arith.constant 0 : index
    %c0_3 = arith.constant 0 : index
    %c0_4 = arith.constant 0 : index
    %3 = vector.load %arg2[%c0_2, %c0_3, %c0_4] : memref<1x128x256xbf16, #tpu.memory_space<vmem>>, vector<1x128x256xbf16>
    %4 = vector.shape_cast %3 : vector<1x128x256xbf16> to vector<128x256xbf16>
    %cst = arith.constant dense<0.000000e+00> : vector<16x256xf32>
    %5 = tpu.matmul %2, %4, %cst {dimension_numbers = #tpu.dot_dimension_numbers<[1], [0], [0], [1], [0, 0, 1, 1], [], []>} : vector<16x128xbf16>, vector<128x256xbf16>, vector<16x256xf32> -> vector<16x256xf32>
    %c0_5 = arith.constant 0 : index
    %c0_6 = arith.constant 0 : index
    %c0_7 = arith.constant 0 : index
    %6 = vector.load %arg3[%c0_5, %c0_6, %c0_7] : memref<1x16x256xf32, #tpu.memory_space<vmem>>, vector<1x16x256xf32>
    %7 = vector.shape_cast %6 : vector<1x16x256xf32> to vector<16x256xf32>
    %8 = vector.shape_cast %5 : vector<16x256xf32> to vector<1x16x256xf32>
    tpu.vector_store %arg3[%c0_5, %c0_6, %c0_7], %8 {strides = array<i32>} : memref<1x16x256xf32, #tpu.memory_space<vmem>>, vector<1x16x256xf32>,
    return
  }
  func.func @transform_0(%arg0: i32) -> (i32, i32, i32) {
    %c0_i32 = arith.constant 0 : i32
    %c0_i32_0 = arith.constant 0 : i32
    %c0_i32_1 = arith.constant 0 : i32
    return %arg0, %c0_i32, %c0_i32_0 : i32, i32, i32
  }
  func.func @transform_1(%arg0: i32) -> (i32, i32, i32) {
    %c0_i32 = arith.constant 0 : i32
    %c0_i32_0 = arith.constant 0 : i32
    %c0_i32_1 = arith.constant 0 : i32
    return %arg0, %c0_i32, %c0_i32_0 : i32, i32, i32
  }
  func.func @transform_2(%arg0: i32) -> (i32, i32, i32) {
    %c0_i32 = arith.constant 0 : i32
    %c0_i32_0 = arith.constant 0 : i32
    %c0_i32_1 = arith.constant 0 : i32
    return %arg0, %c0_i32, %c0_i32_0 : i32, i32, i32
  }
}

module attributes {stable_mosaic.version = 11 : i64} {
  func.func @_ffn_kernel(%arg0: i32, %arg1: i32, %arg2: memref<128x256xbf16, #tpu.memory_space<vmem>>, %arg3: memref<256x256xbf16, #tpu.memory_space<vmem>>, %arg4: memref<1x256xf32, #tpu.memory_space<vmem>>, %arg5: memref<256x256xbf16, #tpu.memory_space<vmem>>, %arg6: memref<1x256xf32, #tpu.memory_space<vmem>>, %arg7: memref<128x256xbf16, #tpu.memory_space<vmem>>, %arg8: memref<1x256xf32, #tpu.memory_space<vmem>>, %arg9: memref<1x256xf32, #tpu.memory_space<vmem>>, %arg10: memref<128x256xbf16, #tpu.memory_space<vmem>>, %arg11: memref<128x256xf32, #tpu.memory_space<vmem>>) attributes {dimension_semantics = [#tpu.dimension_semantics<parallel>, #tpu.dimension_semantics<arbitrary>], iteration_bounds = array<i64: 2, 2>, scalar_prefetch = 0 : i64, scratch_operands = 1 : i64, tpu.core_type = #tpu.core_type<tc>, window_params = [{transform_indices = @transform_0, window_bounds = array<i64: 128, 256>}, {transform_indices = @transform_1, window_bounds = array<i64: 256, 256>}, {transform_indices = @transform_2, window_bounds = array<i64: 1, 256>}, {transform_indices = @transform_3, window_bounds = array<i64: 256, 256>}, {pipeline_mode = #tpu.pipeline_mode<synchronous>, transform_indices = @transform_4, window_bounds = array<i64: 1, 256>}, {transform_indices = @transform_5, window_bounds = array<i64: 128, 256>}, {pipeline_mode = #tpu.pipeline_mode<synchronous>, transform_indices = @transform_6, window_bounds = array<i64: 1, 256>}, {pipeline_mode = #tpu.pipeline_mode<synchronous>, transform_indices = @transform_7, window_bounds = array<i64: 1, 256>}, {transform_indices = @transform_8, window_bounds = array<i64: 128, 256>}]} {
    %c0_i32 = arith.constant 0 : i32
    %0 = arith.cmpi eq, %arg1, %c0_i32 : i32
    %1 = arith.extui %0 : i1 to i32
    %c0_i32_0 = arith.constant 0 : i32
    %2 = arith.cmpi ne, %1, %c0_i32_0 : i32
    scf.if %2 {
      %cst_30 = arith.constant 0.000000e+00 : f32
      %59 = vector.broadcast %cst_30 : f32 to vector<128x256xf32>
      %c0_31 = arith.constant 0 : index
      %c0_32 = arith.constant 0 : index
      %60 = vector.load %arg11[%c0_31, %c0_32] : memref<128x256xf32, #tpu.memory_space<vmem>>, vector<128x256xf32>
      tpu.vector_store %arg11[%c0_31, %c0_32], %59 {strides = array<i32>} : memref<128x256xf32, #tpu.memory_space<vmem>>, vector<128x256xf32>,
    } else {
    }
    %c0 = arith.constant 0 : index
    %c0_1 = arith.constant 0 : index
    %3 = vector.load %arg2[%c0, %c0_1] : memref<128x256xbf16, #tpu.memory_space<vmem>>, vector<128x256xbf16>
    %c0_2 = arith.constant 0 : index
    %c0_3 = arith.constant 0 : index
    %4 = vector.load %arg3[%c0_2, %c0_3] : memref<256x256xbf16, #tpu.memory_space<vmem>>, vector<256x256xbf16>
    %cst = arith.constant dense<0.000000e+00> : vector<128x256xf32>
    %5 = tpu.matmul %3, %4, %cst {dimension_numbers = #tpu.dot_dimension_numbers<[1], [0], [0], [1], [0, 0, 1, 1], [], []>} : vector<128x256xbf16>, vector<256x256xbf16>, vector<128x256xf32> -> vector<128x256xf32>
    %c0_4 = arith.constant 0 : index
    %c0_5 = arith.constant 0 : index
    %6 = vector.load %arg4[%c0_4, %c0_5] : memref<1x256xf32, #tpu.memory_space<vmem>>, vector<1x256xf32>
    %7 = vector.broadcast %6 : vector<1x256xf32> to vector<128x256xf32>
    %8 = arith.addf %5, %7 : vector<128x256xf32>
    %cst_6 = arith.constant 5.000000e-01 : f32
    %9 = vector.broadcast %cst_6 : f32 to vector<128x256xf32>
    %10 = arith.mulf %9, %8 : vector<128x256xf32>
    %cst_7 = arith.constant 0.707106769 : f32
    %11 = vector.broadcast %cst_7 : f32 to vector<128x256xf32>
    %12 = arith.mulf %8, %11 : vector<128x256xf32>
    %cst_8 = arith.constant 0.000000e+00 : f32
    %13 = vector.broadcast %cst_8 : f32 to vector<128x256xf32>
    %14 = arith.cmpf oge, %12, %13 : vector<128x256xf32>
    %cst_9 = arith.constant 1.000000e+00 : f32
    %cst_10 = arith.constant -1.000000e+00 : f32
    %15 = vector.broadcast %cst_9 : f32 to vector<128x256xf32>
    %16 = vector.broadcast %cst_10 : f32 to vector<128x256xf32>
    %17 = arith.select %14, %15, %16 : vector<128x256xi1>, vector<128x256xf32>
    %18 = math.absf %12 : vector<128x256xf32>
    %cst_11 = arith.constant 0.327591091 : f32
    %19 = vector.broadcast %cst_11 : f32 to vector<128x256xf32>
    %20 = arith.mulf %19, %18 : vector<128x256xf32>
    %cst_12 = arith.constant 1.000000e+00 : f32
    %21 = vector.broadcast %cst_12 : f32 to vector<128x256xf32>
    %22 = arith.addf %21, %20 : vector<128x256xf32>
    %cst_13 = arith.constant 1.000000e+00 : f32
    %23 = vector.broadcast %cst_13 : f32 to vector<128x256xf32>
    %24 = arith.divf %23, %22 : vector<128x256xf32>
    %cst_14 = arith.constant 1.06140542 : f32
    %25 = vector.broadcast %cst_14 : f32 to vector<128x256xf32>
    %26 = arith.mulf %25, %24 : vector<128x256xf32>
    %cst_15 = arith.constant -1.45315206 : f32
    %27 = vector.broadcast %cst_15 : f32 to vector<128x256xf32>
    %28 = arith.addf %26, %27 : vector<128x256xf32>
    %29 = arith.mulf %28, %24 : vector<128x256xf32>
    %cst_16 = arith.constant 1.42141378 : f32
    %30 = vector.broadcast %cst_16 : f32 to vector<128x256xf32>
    %31 = arith.addf %29, %30 : vector<128x256xf32>
    %32 = arith.mulf %31, %24 : vector<128x256xf32>
    %cst_17 = arith.constant -0.284496725 : f32
    %33 = vector.broadcast %cst_17 : f32 to vector<128x256xf32>
    %34 = arith.addf %32, %33 : vector<128x256xf32>
    %35 = arith.mulf %34, %24 : vector<128x256xf32>
    %cst_18 = arith.constant 0.254829586 : f32
    %36 = vector.broadcast %cst_18 : f32 to vector<128x256xf32>
    %37 = arith.addf %35, %36 : vector<128x256xf32>
    %38 = arith.mulf %37, %24 : vector<128x256xf32>
    %cst_19 = arith.constant 0.000000e+00 : f32
    %39 = vector.broadcast %cst_19 : f32 to vector<128x256xf32>
    %40 = arith.subf %39, %18 : vector<128x256xf32>
    %41 = arith.mulf %40, %18 : vector<128x256xf32>
    %42 = math.exp %41 : vector<128x256xf32>
    %43 = arith.mulf %38, %42 : vector<128x256xf32>
    %cst_20 = arith.constant 1.000000e+00 : f32
    %44 = vector.broadcast %cst_20 : f32 to vector<128x256xf32>
    %45 = arith.subf %44, %43 : vector<128x256xf32>
    %46 = arith.mulf %17, %45 : vector<128x256xf32>
    %cst_21 = arith.constant 1.000000e+00 : f32
    %47 = vector.broadcast %cst_21 : f32 to vector<128x256xf32>
    %48 = arith.addf %47, %46 : vector<128x256xf32>
    %49 = arith.mulf %10, %48 : vector<128x256xf32>
    %c0_22 = arith.constant 0 : index
    %c0_23 = arith.constant 0 : index
    %50 = vector.load %arg11[%c0_22, %c0_23] : memref<128x256xf32, #tpu.memory_space<vmem>>, vector<128x256xf32>
    %51 = arith.truncf %49 : vector<128x256xf32> to vector<128x256xbf16>
    %c0_24 = arith.constant 0 : index
    %c0_25 = arith.constant 0 : index
    %52 = vector.load %arg5[%c0_24, %c0_25] : memref<256x256xbf16, #tpu.memory_space<vmem>>, vector<256x256xbf16>
    %cst_26 = arith.constant dense<0.000000e+00> : vector<128x256xf32>
    %53 = tpu.matmul %51, %52, %cst_26 {dimension_numbers = #tpu.dot_dimension_numbers<[1], [0], [0], [1], [0, 0, 1, 1], [], []>} : vector<128x256xbf16>, vector<256x256xbf16>, vector<128x256xf32> -> vector<128x256xf32>
    %54 = arith.addf %50, %53 : vector<128x256xf32>
    %c0_27 = arith.constant 0 : index
    %c0_28 = arith.constant 0 : index
    %55 = vector.load %arg11[%c0_27, %c0_28] : memref<128x256xf32, #tpu.memory_space<vmem>>, vector<128x256xf32>
    tpu.vector_store %arg11[%c0_27, %c0_28], %54 {strides = array<i32>} : memref<128x256xf32, #tpu.memory_space<vmem>>, vector<128x256xf32>,
    %c1_i32 = arith.constant 1 : i32
    %56 = arith.cmpi eq, %arg1, %c1_i32 : i32
    %57 = arith.extui %56 : i1 to i32
    %c0_i32_29 = arith.constant 0 : i32
    %58 = arith.cmpi ne, %57, %c0_i32_29 : i32
    scf.if %58 {
      %c0_30 = arith.constant 0 : index
      %c0_31 = arith.constant 0 : index
      %59 = vector.load %arg11[%c0_30, %c0_31] : memref<128x256xf32, #tpu.memory_space<vmem>>, vector<128x256xf32>
      %c0_32 = arith.constant 0 : index
      %c0_33 = arith.constant 0 : index
      %60 = vector.load %arg6[%c0_32, %c0_33] : memref<1x256xf32, #tpu.memory_space<vmem>>, vector<1x256xf32>
      %61 = vector.broadcast %60 : vector<1x256xf32> to vector<128x256xf32>
      %62 = arith.addf %59, %61 : vector<128x256xf32>
      %c0_34 = arith.constant 0 : index
      %c0_35 = arith.constant 0 : index
      %63 = vector.load %arg7[%c0_34, %c0_35] : memref<128x256xbf16, #tpu.memory_space<vmem>>, vector<128x256xbf16>
      %64 = arith.extf %63 : vector<128x256xbf16> to vector<128x256xf32>
      %65 = arith.addf %62, %64 : vector<128x256xf32>
      %c0_36 = arith.constant 0 : index
      %c0_37 = arith.constant 0 : index
      %66 = vector.load %arg8[%c0_36, %c0_37] : memref<1x256xf32, #tpu.memory_space<vmem>>, vector<1x256xf32>
      %c0_38 = arith.constant 0 : index
      %c0_39 = arith.constant 0 : index
      %67 = vector.load %arg9[%c0_38, %c0_39] : memref<1x256xf32, #tpu.memory_space<vmem>>, vector<1x256xf32>
      %cst_40 = arith.constant dense<0.000000e+00> : vector<128xf32>
      %68 = vector.multi_reduction <add>, %65, %cst_40 [1] : vector<128x256xf32> to vector<128xf32>
      %69 = vector.shape_cast %68 : vector<128xf32> to vector<128x1xf32>
      %cst_41 = arith.constant 2.560000e+02 : f32
      %70 = vector.broadcast %cst_41 : f32 to vector<128x1xf32>
      %71 = arith.divf %69, %70 : vector<128x1xf32>
      %72 = vector.broadcast %71 : vector<128x1xf32> to vector<128x256xf32>
      %73 = arith.subf %65, %72 : vector<128x256xf32>
      %74 = arith.mulf %73, %73 : vector<128x256xf32>
      %cst_42 = arith.constant dense<0.000000e+00> : vector<128xf32>
      %75 = vector.multi_reduction <add>, %74, %cst_42 [1] : vector<128x256xf32> to vector<128xf32>
      %76 = vector.shape_cast %75 : vector<128xf32> to vector<128x1xf32>
      %cst_43 = arith.constant 2.560000e+02 : f32
      %77 = vector.broadcast %cst_43 : f32 to vector<128x1xf32>
      %78 = arith.divf %76, %77 : vector<128x1xf32>
      %cst_44 = arith.constant 9.99999996E-13 : f32
      %79 = vector.broadcast %cst_44 : f32 to vector<128x1xf32>
      %80 = arith.addf %78, %79 : vector<128x1xf32>
      %81 = math.rsqrt %80 : vector<128x1xf32>
      %82 = vector.broadcast %81 : vector<128x1xf32> to vector<128x256xf32>
      %83 = arith.mulf %73, %82 : vector<128x256xf32>
      %84 = vector.broadcast %66 : vector<1x256xf32> to vector<128x256xf32>
      %85 = arith.mulf %83, %84 : vector<128x256xf32>
      %86 = vector.broadcast %67 : vector<1x256xf32> to vector<128x256xf32>
      %87 = arith.addf %85, %86 : vector<128x256xf32>
      %88 = arith.truncf %87 : vector<128x256xf32> to vector<128x256xbf16>
      %c0_45 = arith.constant 0 : index
      %c0_46 = arith.constant 0 : index
      %89 = vector.load %arg10[%c0_45, %c0_46] : memref<128x256xbf16, #tpu.memory_space<vmem>>, vector<128x256xbf16>
      tpu.vector_store %arg10[%c0_45, %c0_46], %88 {strides = array<i32>} : memref<128x256xbf16, #tpu.memory_space<vmem>>, vector<128x256xbf16>,
    } else {
    }
    return
  }
  func.func @transform_0(%arg0: i32, %arg1: i32) -> (i32, i32) {
    %c0_i32 = arith.constant 0 : i32
    %c0_i32_0 = arith.constant 0 : i32
    return %arg0, %c0_i32 : i32, i32
  }
  func.func @transform_1(%arg0: i32, %arg1: i32) -> (i32, i32) {
    %c0_i32 = arith.constant 0 : i32
    %c0_i32_0 = arith.constant 0 : i32
    return %c0_i32, %arg1 : i32, i32
  }
  func.func @transform_2(%arg0: i32, %arg1: i32) -> (i32, i32) {
    %c0_i32 = arith.constant 0 : i32
    %c0_i32_0 = arith.constant 0 : i32
    return %c0_i32, %arg1 : i32, i32
  }
  func.func @transform_3(%arg0: i32, %arg1: i32) -> (i32, i32) {
    %c0_i32 = arith.constant 0 : i32
    %c0_i32_0 = arith.constant 0 : i32
    return %arg1, %c0_i32 : i32, i32
  }
  func.func @transform_4(%arg0: i32, %arg1: i32) -> (i32, i32) {
    %c0_i32 = arith.constant 0 : i32
    %c0_i32_0 = arith.constant 0 : i32
    %c0_i32_1 = arith.constant 0 : i32
    return %c0_i32, %c0_i32_0 : i32, i32
  }
  func.func @transform_5(%arg0: i32, %arg1: i32) -> (i32, i32) {
    %c0_i32 = arith.constant 0 : i32
    %c0_i32_0 = arith.constant 0 : i32
    return %arg0, %c0_i32 : i32, i32
  }
  func.func @transform_6(%arg0: i32, %arg1: i32) -> (i32, i32) {
    %c0_i32 = arith.constant 0 : i32
    %c0_i32_0 = arith.constant 0 : i32
    %c0_i32_1 = arith.constant 0 : i32
    return %c0_i32, %c0_i32_0 : i32, i32
  }
  func.func @transform_7(%arg0: i32, %arg1: i32) -> (i32, i32) {
    %c0_i32 = arith.constant 0 : i32
    %c0_i32_0 = arith.constant 0 : i32
    %c0_i32_1 = arith.constant 0 : i32
    return %c0_i32, %c0_i32_0 : i32, i32
  }
  func.func @transform_8(%arg0: i32, %arg1: i32) -> (i32, i32) {
    %c0_i32 = arith.constant 0 : i32
    %c0_i32_0 = arith.constant 0 : i32
    return %arg0, %c0_i32 : i32, i32
  }
}

</mosaic_0001>

<bundles_post_ra>
// kernel: bert_latin_forward.8
= control target key start
LH: loop header
LB: loop body
LE: loop exit
PB: predicated region body
PF: predicated region fallthrough
CT: control target
= control target key end

     0   :  { %s841_s12 = smov 0   ;;  %s1280_s0 = inlined_call_operand.vmem [shape: f32[256,256], index: 0, kind: input, shape index: {}]   ;;  %s1281_s1 = inlined_call_operand.vmem [shape: f32[1,256], index: 1, kind: input, shape index: {}]   ;;  %s1282_s2 = inlined_call_operand.vmem [shape: f32[1,256], index: 2, kind: input, shape index: {}]   ;;  %s1283_s3 = inlined_call_operand.vmem [shape: bf16[256,256], index: 3, kind: output, shape index: {}]  }
   0x1 LB: > { %s726_s13 = sadd.s32 4294967295, %s819_s12   ;;  %p730_p0 = scmp.ge.s32.totalorder %s819_s12, 1  ;;  %s819_s12 = sphi %s841_s12, %s13_s12  }
   0x2   : > { %p139_p1 = scmp.lt.s32.totalorder %s819_s12, 3 }
   0x4   : > { %p140_p2 = pnand %p730_p0, %p139_p1 }
   0x5   : > { %s731_s14 = sshll.u32 (!%p140_p2), %s726_s13, 4 }
   0x6   : > { %143 = sbr.rel (%p140_p2) target bundleno = 375 (0x177), region = 32  ;;  %p166_p3 = scmp.lt.s32.totalorder (!%p140_p2), %s731_s14, 31 }
   0xd   : > { %s1285_s14 = smov (!%p166_p3, %s731_s14), 31 }
   0xe   : > { %s755_s15 = sshll.u32 %s1285_s14, 4  ;;  %s756_s23 = sshll.u32 %s1285_s14, 3 }
   0xf   : > { %s855_s18 = scalar_lea.vmem %s1280_s0, %s755_s15  ;;  %s1171_s26 = scalar_lea.vmem %s1283_s3, %s756_s23 }
  0x10   : > { %v858_v0 = vld [vmem:[%s855_s18] sm:$0xff]  ;;  %v861_v1 = vld [vmem:[%s855_s18 + $0x8] sm:$0xff]  ;;  %v872_v5 = vld [vmem:[%s855_s18 + $0x10] sm:$0xff] }
  0x11   : > { %v864_v2 = vld [vmem:[%s855_s18 + $0x20] sm:$0xff]  ;;  %v213_v3 = vadd.f32 %v861_v1, %v858_v0  ;;  %v869_v4 = vld [vmem:[%s855_s18 + $0x28] sm:$0xff]  ;;  %v875_v6 = vld [vmem:[%s855_s18 + $0x18] sm:$0xff] }
  0x12   : > { %v219_v7 = vadd.f32 %v869_v4, %v864_v2  ;;  %v880_v8 = vld [vmem:[%s855_s18 + $0x30] sm:$0xff]  ;;  %v883_v9 = vld [vmem:[%s855_s18 + $0x38] sm:$0xff]  ;;  %v216_v10 = vadd.f32 %v875_v6, %v872_v5  ;;  %v890_v12 = vld [vmem:[%s855_s18 + $0x40] sm:$0xff] }
  0x13   : > { %214 = vadd.xlane.f32.xlu0 %v213_v3  ;;  %v222_v11 = vadd.f32 %v883_v9, %v880_v8  ;;  %v893_v13 = vld [vmem:[%s855_s18 + $0x48] sm:$0xff]  ;;  %v896_v14 = vld [vmem:[%s855_s18 + $0x50] sm:$0xff]  ;;  %v899_v15 = vld [vmem:[%s855_s18 + $0x58] sm:$0xff] }
  0x14   : > { %220 = vadd.xlane.f32.xlu1 %v219_v7  ;;  %v225_v16 = vadd.f32 %v893_v13, %v890_v12  ;;  %v228_v17 = vadd.f32 %v899_v15, %v896_v14  ;;  %v906_v18 = vld [vmem:[%s855_s18 + $0x60] sm:$0xff]  ;;  %v909_v19 = vld [vmem:[%s855_s18 + $0x68] sm:$0xff]  ;;  %v912_v20 = vld [vmem:[%s855_s18 + $0x70] sm:$0xff] }
  0x15   : > { %v915_v21 = vld [vmem:[%s855_s18 + $0x78] sm:$0xff]  ;;  %v231_v22 = vadd.f32 %v909_v19, %v906_v18  ;;  %v922_v24 = vld [vmem:[%s855_s18 + $0x80] sm:$0xff]  ;;  %v925_v25 = vld [vmem:[%s855_s18 + $0x88] sm:$0xff] }
  0x16   : > { %v234_v23 = vadd.f32 %v915_v21, %v912_v20  ;;  %v928_v26 = vld [vmem:[%s855_s18 + $0x90] sm:$0xff]  ;;  %v931_v27 = vld [vmem:[%s855_s18 + $0x98] sm:$0xff]  ;;  %v237_v28 = vadd.f32 %v925_v25, %v922_v24  ;;  %v938_v30 = vld [vmem:[%s855_s18 + $0xa0] sm:$0xff] }
  0x17   : > { %217 = vadd.xlane.f32.xlu0 %v216_v10  ;;  %v240_v29 = vadd.f32 %v931_v27, %v928_v26  ;;  %v941_v31 = vld [vmem:[%s855_s18 + $0xa8] sm:$0xff]  ;;  %v944_v32 = vld [vmem:[%s855_s18 + $0xb0] sm:$0xff]  ;;  %v947_v33 = vld [vmem:[%s855_s18 + $0xb8] sm:$0xff] }
  0x18   : > { %223 = vadd.xlane.f32.xlu1 %v222_v11  ;;  %v243_v34 = vadd.f32 %v941_v31, %v938_v30  ;;  %v246_v35 = vadd.f32 %v947_v33, %v944_v32  ;;  %v954_v36 = vld [vmem:[%s855_s18 + $0xc0] sm:$0xff]  ;;  %v957_v37 = vld [vmem:[%s855_s18 + $0xc8] sm:$0xff]  ;;  %v960_v38 = vld [vmem:[%s855_s18 + $0xd0] sm:$0xff] }
  0x19   : > { %v963_v39 = vld [vmem:[%s855_s18 + $0xd8] sm:$0xff]  ;;  %v249_v40 = vadd.f32 %v957_v37, %v954_v36  ;;  %v970_v42 = vld [vmem:[%s855_s18 + $0xe0] sm:$0xff]  ;;  %v973_v43 = vld [vmem:[%s855_s18 + $0xe8] sm:$0xff] }
  0x1a   : > { %v252_v41 = vadd.f32 %v963_v39, %v960_v38  ;;  %v976_v44 = vld [vmem:[%s855_s18 + $0xf0] sm:$0xff]  ;;  %v979_v45 = vld [vmem:[%s855_s18 + $0xf8] sm:$0xff]  ;;  %v255_v46 = vadd.f32 %v973_v43, %v970_v42 }
  0x1b   : > { %226 = vadd.xlane.f32.xlu0 %v225_v16  ;;  %v258_v47 = vadd.f32 %v979_v45, %v976_v44 }
  0x1c   : > { %229 = vadd.xlane.f32.xlu1 %v228_v17 }
  0x1f   : > { %232 = vadd.xlane.f32.xlu0 %v231_v22 }
  0x20   : > { %235 = vadd.xlane.f32.xlu1 %v234_v23 }
  0x23   : > { %238 = vadd.xlane.f32.xlu0 %v237_v28 }
  0x24   : > { %241 = vadd.xlane.f32.xlu1 %v240_v29 }
  0x27   : > { %244 = vadd.xlane.f32.xlu0 %v243_v34 }
  0x28   : > { %247 = vadd.xlane.f32.xlu1 %v246_v35 }
  0x2b   : > { %250 = vadd.xlane.f32.xlu0 %v249_v40 }
  0x2c   : > { %253 = vadd.xlane.f32.xlu1 %v252_v41 }
  0x2f   : > { %256 = vadd.xlane.f32.xlu0 %v255_v46 }
  0x30   : > { %259 = vadd.xlane.f32.xlu1 %v258_v47 }
  0xa0   : > { %v215_v48 = vpop.xlane.xlu0 %214 }
  0xa1   : > { %v262_v49 = vmul.f32 0.00390625, %v215_v48  ;;  %v221_v50 = vpop.xlane.xlu1 %220 }
  0xa2   : > { %v264_v51 = vmul.f32 0.00390625, %v221_v50 }
  0xa3   : > { %v986_v52 = vsub.f32 %v858_v0, %v262_v49  ;;  %v989_v53 = vsub.f32 %v861_v1, %v262_v49 }
  0xa4   : > { %v992_v54 = vsub.f32 %v864_v2, %v264_v51  ;;  %v995_v55 = vsub.f32 %v869_v4, %v264_v51  ;;  %v218_v56 = vpop.xlane.xlu0 %217 }
  0xa5   : > { %v263_v57 = vmul.f32 0.00390625, %v218_v56  ;;  %v224_v58 = vpop.xlane.xlu1 %223  ;;  %v310_v59 = vmul.f32 %v986_v52, %v986_v52  ;;  %v311_v60 = vmul.f32 %v989_v53, %v989_v53 }
  0xa6   : > { %v265_v61 = vmul.f32 0.00390625, %v224_v58  ;;  %v314_v62 = vmul.f32 %v992_v54, %v992_v54  ;;  %v315_v63 = vmul.f32 %v995_v55, %v995_v55 }
  0xa7   : > { %v1006_v0 = vsub.f32 %v872_v5, %v263_v57  ;;  %v1009_v1 = vsub.f32 %v875_v6, %v263_v57  ;;  %v342_v2 = vadd.f32 %v311_v60, %v310_v59 }
  0xa8   : > { %v1012_v3 = vsub.f32 %v880_v8, %v265_v61  ;;  %v1015_v4 = vsub.f32 %v883_v9, %v265_v61  ;;  %v227_v7 = vpop.xlane.xlu0 %226  ;;  %v348_v16 = vadd.f32 %v315_v63, %v314_v62 }
  0xa9   : > { %v266_v10 = vmul.f32 0.00390625, %v227_v7  ;;  %343 = vadd.xlane.f32.xlu0 %v342_v2  ;;  %v230_v11 = vpop.xlane.xlu1 %229  ;;  %v312_v17 = vmul.f32 %v1006_v0, %v1006_v0  ;;  %v313_v5 = vmul.f32 %v1009_v1, %v1009_v1 }
  0xaa   : > { %v267_v6 = vmul.f32 0.00390625, %v230_v11  ;;  %v316_v22 = vmul.f32 %v1012_v3, %v1012_v3  ;;  %v317_v8 = vmul.f32 %v1015_v4, %v1015_v4 }
  0xab   : > { %v1026_v9 = vsub.f32 %v890_v12, %v266_v10  ;;  %v1029_v23 = vsub.f32 %v893_v13, %v266_v10  ;;  %v345_v28 = vadd.f32 %v313_v5, %v312_v17 }
  0xac   : > { %v1032_v29 = vsub.f32 %v896_v14, %v267_v6  ;;  %v1035_v34 = vsub.f32 %v899_v15, %v267_v6  ;;  %v233_v35 = vpop.xlane.xlu0 %232  ;;  %v351_v46 = vadd.f32 %v317_v8, %v316_v22 }
  0xad   : > { %v268_v40 = vmul.f32 0.00390625, %v233_v35  ;;  %349 = vadd.xlane.f32.xlu0 %v348_v16  ;;  %346 = vadd.xlane.f32.xlu1 %v345_v28  ;;  %v236_v41 = vpop.xlane.xlu1 %235  ;;  %v318_v12 = vmul.f32 %v1026_v9, %v1026_v9  ;;  %v319_v13 = vmul.f32 %v1029_v23, %v1029_v23 }
  0xae   : > { %v269_v47 = vmul.f32 0.00390625, %v236_v41  ;;  %v320_v14 = vmul.f32 %v1032_v29, %v1032_v29  ;;  %v321_v15 = vmul.f32 %v1035_v34, %v1035_v34 }
  0xaf   : > { %v1046_v48 = vsub.f32 %v906_v18, %v268_v40  ;;  %v1049_v49 = vsub.f32 %v909_v19, %v268_v40  ;;  %v354_v50 = vadd.f32 %v319_v13, %v318_v12 }
  0xb0   : > { %v1052_v51 = vsub.f32 %v912_v20, %v269_v47  ;;  %v1055_v56 = vsub.f32 %v915_v21, %v269_v47  ;;  %v239_v57 = vpop.xlane.xlu0 %238  ;;  %v357_v60 = vadd.f32 %v321_v15, %v320_v14 }
  0xb1   : > { %v270_v58 = vmul.f32 0.00390625, %v239_v57  ;;  %352 = vadd.xlane.f32.xlu1 %v351_v46  ;;  %355 = vadd.xlane.f32.xlu0 %v354_v50  ;;  %v242_v59 = vpop.xlane.xlu1 %241  ;;  %v322_v18 = vmul.f32 %v1046_v48, %v1046_v48  ;;  %v323_v19 = vmul.f32 %v1049_v49, %v1049_v49 }
  0xb2   : > { %v271_v61 = vmul.f32 0.00390625, %v242_v59  ;;  %v324_v20 = vmul.f32 %v1052_v51, %v1052_v51  ;;  %v325_v21 = vmul.f32 %v1055_v56, %v1055_v56 }
  0xb3   : > { %v1066_v62 = vsub.f32 %v922_v24, %v270_v58  ;;  %v1069_v63 = vsub.f32 %v925_v25, %v270_v58  ;;  %v360_v2 = vadd.f32 %v323_v19, %v322_v18 }
  0xb4   : > { %v1072_v7 = vsub.f32 %v928_v26, %v271_v61  ;;  %v1075_v10 = vsub.f32 %v931_v27, %v271_v61  ;;  %v245_v11 = vpop.xlane.xlu0 %244  ;;  %v363_v5 = vadd.f32 %v325_v21, %v324_v20 }
  0xb5   : > { %v272_v16 = vmul.f32 0.00390625, %v245_v11  ;;  %358 = vadd.xlane.f32.xlu1 %v357_v60  ;;  %361 = vadd.xlane.f32.xlu0 %v360_v2  ;;  %v248_v17 = vpop.xlane.xlu1 %247  ;;  %v326_v24 = vmul.f32 %v1066_v62, %v1066_v62  ;;  %v327_v25 = vmul.f32 %v1069_v63, %v1069_v63 }
  0xb6   : > { %v273_v6 = vmul.f32 0.00390625, %v248_v17  ;;  %v328_v26 = vmul.f32 %v1072_v7, %v1072_v7  ;;  %v329_v27 = vmul.f32 %v1075_v10, %v1075_v10 }
  0xb7   : > { %v1086_v22 = vsub.f32 %v938_v30, %v272_v16  ;;  %v1089_v8 = vsub.f32 %v941_v31, %v272_v16  ;;  %v366_v28 = vadd.f32 %v327_v25, %v326_v24 }
  0xb8   : > { %v1092_v35 = vsub.f32 %v944_v32, %v273_v6  ;;  %v1095_v40 = vsub.f32 %v947_v33, %v273_v6  ;;  %v251_v41 = vpop.xlane.xlu0 %250  ;;  %v369_v13 = vadd.f32 %v329_v27, %v328_v26  ;;  %v471_v26 = vlaneseq }
  0xb9   : > { %v274_v46 = vmul.f32 0.00390625, %v251_v41  ;;  %364 = vadd.xlane.f32.xlu1 %v363_v5  ;;  %367 = vadd.xlane.f32.xlu0 %v366_v28  ;;  %v254_v12 = vpop.xlane.xlu1 %253  ;;  %v330_v30 = vmul.f32 %v1086_v22, %v1086_v22  ;;  %v331_v31 = vmul.f32 %v1089_v8, %v1089_v8 }
  0xba   : > { %v275_v47 = vmul.f32 0.00390625, %v254_v12  ;;  %v332_v32 = vmul.f32 %v1092_v35, %v1092_v35  ;;  %v333_v33 = vmul.f32 %v1095_v40, %v1095_v40 }
  0xbb   : > { %v1106_v14 = vsub.f32 %v954_v36, %v274_v46  ;;  %v1109_v15 = vsub.f32 %v957_v37, %v274_v46  ;;  %v372_v50 = vadd.f32 %v331_v31, %v330_v30 }
  0xbc   : > { %v1112_v57 = vsub.f32 %v960_v38, %v275_v47  ;;  %v1115_v58 = vsub.f32 %v963_v39, %v275_v47  ;;  %v257_v59 = vpop.xlane.xlu0 %256  ;;  %v375_v19 = vadd.f32 %v333_v33, %v332_v32 }
  0xbd   : > { %v276_v60 = vmul.f32 0.00390625, %v257_v59  ;;  %370 = vadd.xlane.f32.xlu1 %v369_v13  ;;  %373 = vadd.xlane.f32.xlu0 %v372_v50  ;;  %v260_v18 = vpop.xlane.xlu1 %259  ;;  %v334_v36 = vmul.f32 %v1106_v14, %v1106_v14  ;;  %v335_v37 = vmul.f32 %v1109_v15, %v1109_v15  ;;  %v472_v13 = vshrl.u32 %v471_v26, 7 }
  0xbe   : > { %v277_v61 = vmul.f32 0.00390625, %v260_v18  ;;  %v336_v38 = vmul.f32 %v1112_v57, %v1112_v57  ;;  %v337_v39 = vmul.f32 %v1115_v58, %v1115_v58  ;;  %v211_v18 = vld [vmem:[%s1281_s1] sm:$0x3] }
  0xbf   : > { %v1126_v20 = vsub.f32 %v970_v42, %v276_v60  ;;  %v1129_v21 = vsub.f32 %v973_v43, %v276_v60  ;;  %v378_v2 = vadd.f32 %v335_v37, %v334_v36  ;;  %v473_v59 = vsub.s32 0, %v472_v13 }
  0xc0   : > { %v1132_v11 = vsub.f32 %v976_v44, %v277_v61  ;;  %v1135_v16 = vsub.f32 %v979_v45, %v277_v61  ;;  %v381_v17 = vadd.f32 %v337_v39, %v336_v38  ;;  %v477_v60 = vsub.s32 1, %v472_v13  ;;  %v212_v38 = vld [vmem:[%s1282_s2] sm:$0x3] }
  0xc1   : > { %376 = vadd.xlane.f32.xlu1 %v375_v19  ;;  %379 = vadd.xlane.f32.xlu0 %v378_v2  ;;  %v338_v5 = vmul.f32 %v1126_v20, %v1126_v20  ;;  %v339_v42 = vmul.f32 %v1129_v21, %v1129_v21 }
  0xc2   : > { %v340_v43 = vmul.f32 %v1132_v11, %v1132_v11  ;;  %v341_v24 = vmul.f32 %v1135_v16, %v1135_v16 }
  0xc3   : > { %v384_v44 = vadd.f32 %v339_v42, %v338_v5  ;;  %v1153_v5 = vrot.slane %v211_v18, %v477_v60 }
  0xc4   : > { %v387_v45 = vadd.f32 %v341_v24, %v340_v43 }
  0xc5   : > { %382 = vadd.xlane.f32.xlu1 %v381_v17  ;;  %385 = vadd.xlane.f32.xlu0 %v384_v44  ;;  %v1151_v17 = vrot.slane %v211_v18, %v473_v59  ;;  %v1155_v44 = vrot.slane %v212_v38, %v473_v59 }
  0xc9   : > { %388 = vadd.xlane.f32.xlu1 %v387_v45  ;;  %v1157_v45 = vrot.slane %v212_v38, %v477_v60 }
 0x136   : > { %v344_v25 = vpop.xlane.xlu0 %343 }
 0x137   : > { %v390_v6 = vmul.f32 0.00390625, %v344_v25 }
 0x139   : > { %v406_v27 = vadd.f32 1e-12, %v390_v6 }
 0x13a   : > { %v347_v28 = vpop.xlane.xlu1 %346  ;;  %v350_v41 = vpop.xlane.xlu0 %349 }
 0x13b   : > { %781 = vrsqrt.f32 %v406_v27  ;;  %v391_v46 = vmul.f32 0.00390625, %v347_v28  ;;  %v392_v12 = vmul.f32 0.00390625, %v350_v41 }
 0x13d   : > { %v407_v30 = vadd.f32 1e-12, %v391_v46  ;;  %v408_v31 = vadd.f32 1e-12, %v392_v12 }
 0x13e   : > { %v353_v47 = vpop.xlane.xlu1 %352  ;;  %v356_v32 = vpop.xlane.xlu0 %355 }
 0x13f   : > { %783 = vrsqrt.f32 %v407_v30  ;;  %v393_v33 = vmul.f32 0.00390625, %v353_v47  ;;  %v394_v50 = vmul.f32 0.00390625, %v356_v32 }
 0x140   : > { %785 = vrsqrt.f32 %v408_v31 }
 0x141   : > { %v409_v19 = vadd.f32 1e-12, %v393_v33  ;;  %v410_v36 = vadd.f32 1e-12, %v394_v50 }
 0x142   : > { %v359_v37 = vpop.xlane.xlu1 %358  ;;  %v362_v61 = vpop.xlane.xlu0 %361 }
 0x143   : > { %787 = vrsqrt.f32 %v409_v19  ;;  %v395_v39 = vmul.f32 0.00390625, %v359_v37  ;;  %v396_v2 = vmul.f32 0.00390625, %v362_v61 }
 0x144   : > { %789 = vrsqrt.f32 %v410_v36 }
 0x145   : > { %v782_v42 = vpop.eup %781  ;;  %v411_v43 = vadd.f32 1e-12, %v395_v39  ;;  %v412_v24 = vadd.f32 1e-12, %v396_v2 }
 0x146   : > { %v438_v25 = vmul.f32 %v782_v42, %v986_v52  ;;  %v439_v6 = vmul.f32 %v782_v42, %v989_v53  ;;  %v365_v26 = vpop.xlane.xlu1 %364  ;;  %v368_v27 = vpop.xlane.xlu0 %367 }
 0x147   : > { %791 = vrsqrt.f32 %v411_v43  ;;  %v397_v28 = vmul.f32 0.00390625, %v365_v26  ;;  %v398_v41 = vmul.f32 0.00390625, %v368_v27 }
 0x148   : > { %v481_v46 = vmul.f32 %v1151_v17, %v438_v25  ;;  %v482_v12 = vmul.f32 %v1153_v5, %v439_v6  ;;  %793 = vrsqrt.f32 %v412_v24 }
 0x149   : > { %v784_v13 = vpop.eup %783  ;;  %v413_v30 = vadd.f32 1e-12, %v397_v28  ;;  %v414_v31 = vadd.f32 1e-12, %v398_v41 }
 0x14a   : > { %v786_v47 = vpop.eup %785  ;;  %v524_v32 = vadd.f32 %v1155_v44, %v481_v46  ;;  %v525_v52 = vadd.f32 %v1157_v45, %v482_v12  ;;  %v440_v53 = vmul.f32 %v784_v13, %v1006_v0  ;;  %v441_v33 = vmul.f32 %v784_v13, %v1009_v1  ;;  %v371_v50 = vpop.xlane.xlu1 %370 }
 0x14b   : > { %v374_v59 = vpop.xlane.xlu0 %373  ;;  %v442_v60 = vmul.f32 %v786_v47, %v992_v54  ;;  %v443_v18 = vmul.f32 %v786_v47, %v995_v55  ;;  %795 = vrsqrt.f32 %v413_v30  ;;  %v399_v19 = vmul.f32 0.00390625, %v371_v50 }
 0x14c   : > { %v757_v36 = vpack.c.bf16 %v525_v52, %v524_v32  ;;  %v483_v37 = vmul.f32 %v1151_v17, %v440_v53  ;;  %v484_v0 = vmul.f32 %v1153_v5, %v441_v33  ;;  %797 = vrsqrt.f32 %v414_v31 }
 0x14d   : > { %v788_v1 = vpop.eup %787  ;;  %v485_v61 = vmul.f32 %v1151_v17, %v442_v60  ;;  %v486_v38 = vmul.f32 %v1153_v5, %v443_v18  ;;  %v415_v39 = vadd.f32 1e-12, %v399_v19  ;;  %v400_v2 = vmul.f32 0.00390625, %v374_v59 }
 0x14e   : > { %v790_v42 = vpop.eup %789  ;;  %652 = vst [vmem:[%s1171_s26] sm:$0xff] %v757_v36  ;;  %v526_v54 = vadd.f32 %v1155_v44, %v483_v37  ;;  %v527_v55 = vadd.f32 %v1157_v45, %v484_v0  ;;  %v444_v43 = vmul.f32 %v788_v1, %v1012_v3  ;;  %v445_v24 = vmul.f32 %v788_v1, %v1015_v4  ;;  %v377_v25 = vpop.xlane.xlu1 %376 }
 0x14f   : > { %v528_v6 = vadd.f32 %v1155_v44, %v485_v61  ;;  %v529_v26 = vadd.f32 %v1157_v45, %v486_v38  ;;  %v446_v27 = vmul.f32 %v790_v42, %v1026_v9  ;;  %v447_v28 = vmul.f32 %v790_v42, %v1029_v23  ;;  %v380_v60 = vpop.xlane.xlu0 %379 }
 0x150   : > { %v758_v41 = vpack.c.bf16 %v527_v55, %v526_v54  ;;  %v487_v46 = vmul.f32 %v1151_v17, %v444_v43  ;;  %v488_v12 = vmul.f32 %v1153_v5, %v445_v24  ;;  %799 = vrsqrt.f32 %v415_v39 }
 0x151   : > { %v792_v3 = vpop.eup %791  ;;  %v759_v13 = vpack.c.bf16 %v529_v26, %v528_v6  ;;  %v489_v4 = vmul.f32 %v1151_v17, %v446_v27  ;;  %v490_v30 = vmul.f32 %v1153_v5, %v447_v28  ;;  %v416_v31 = vadd.f32 1e-12, %v400_v2 }
 0x152   : > { %v794_v47 = vpop.eup %793  ;;  %653 = vst [vmem:[%s1171_s26 + $0x8] sm:$0xff] %v758_v41  ;;  %v530_v9 = vadd.f32 %v1155_v44, %v487_v46  ;;  %v531_v23 = vadd.f32 %v1157_v45, %v488_v12  ;;  %v448_v32 = vmul.f32 %v792_v3, %v1032_v29  ;;  %v449_v52 = vmul.f32 %v792_v3, %v1035_v34  ;;  %v383_v29 = vpop.xlane.xlu1 %382 }
 0x153   : > { %654 = vst [vmem:[%s1171_s26 + $0x10] sm:$0xff] %v759_v13  ;;  %v532_v53 = vadd.f32 %v1155_v44, %v489_v4  ;;  %v533_v33 = vadd.f32 %v1157_v45, %v490_v30  ;;  %v450_v50 = vmul.f32 %v794_v47, %v1046_v48  ;;  %v451_v59 = vmul.f32 %v794_v47, %v1049_v49  ;;  %v386_v41 = vpop.xlane.xlu0 %385 }
 0x154   : > { %v760_v18 = vpack.c.bf16 %v531_v23, %v530_v9  ;;  %v491_v19 = vmul.f32 %v1151_v17, %v448_v32  ;;  %v492_v36 = vmul.f32 %v1153_v5, %v449_v52  ;;  %801 = vrsqrt.f32 %v416_v31 }
 0x155   : > { %v796_v34 = vpop.eup %795  ;;  %v761_v37 = vpack.c.bf16 %v533_v33, %v532_v53  ;;  %v493_v0 = vmul.f32 %v1151_v17, %v450_v50  ;;  %v494_v1 = vmul.f32 %v1153_v5, %v451_v59  ;;  %v401_v61 = vmul.f32 0.00390625, %v377_v25 }
 0x156   : > { %v798_v38 = vpop.eup %797  ;;  %655 = vst [vmem:[%s1171_s26 + $0x18] sm:$0xff] %v760_v18  ;;  %v534_v48 = vadd.f32 %v1155_v44, %v491_v19  ;;  %v535_v49 = vadd.f32 %v1157_v45, %v492_v36  ;;  %v452_v39 = vmul.f32 %v796_v34, %v1052_v51  ;;  %v453_v2 = vmul.f32 %v796_v34, %v1055_v56  ;;  %v389_v3 = vpop.xlane.xlu1 %388 }
 0x157   : > { %656 = vst [vmem:[%s1171_s26 + $0x20] sm:$0xff] %v761_v37  ;;  %v536_v42 = vadd.f32 %v1155_v44, %v493_v0  ;;  %v537_v54 = vadd.f32 %v1157_v45, %v494_v1  ;;  %v454_v55 = vmul.f32 %v798_v38, %v1066_v62  ;;  %v455_v43 = vmul.f32 %v798_v38, %v1069_v63 }
 0x158   : > { %v762_v24 = vpack.c.bf16 %v535_v49, %v534_v48  ;;  %v495_v25 = vmul.f32 %v1151_v17, %v452_v39  ;;  %v496_v6 = vmul.f32 %v1153_v5, %v453_v2  ;;  %v417_v26 = vadd.f32 1e-12, %v401_v61 }
 0x159   : > { %v763_v51 = vpack.c.bf16 %v537_v54, %v536_v42  ;;  %v497_v56 = vmul.f32 %v1151_v17, %v454_v55  ;;  %v498_v27 = vmul.f32 %v1153_v5, %v455_v43  ;;  %v402_v28 = vmul.f32 0.00390625, %v380_v60 }
 0x15a   : > { %v800_v46 = vpop.eup %799  ;;  %657 = vst [vmem:[%s1171_s26 + $0x28] sm:$0xff] %v762_v24  ;;  %v538_v62 = vadd.f32 %v1155_v44, %v495_v25  ;;  %v539_v63 = vadd.f32 %v1157_v45, %v496_v6  ;;  %803 = vrsqrt.f32 %v417_v26  ;;  %v403_v12 = vmul.f32 0.00390625, %v383_v29 }
 0x15b   : > { %658 = vst [vmem:[%s1171_s26 + $0x30] sm:$0xff] %v763_v51  ;;  %v540_v13 = vadd.f32 %v1155_v44, %v497_v56  ;;  %v541_v4 = vadd.f32 %v1157_v45, %v498_v27  ;;  %v456_v30 = vmul.f32 %v800_v46, %v1072_v7  ;;  %v457_v31 = vmul.f32 %v800_v46, %v1075_v10 }
 0x15c   : > { %v764_v47 = vpack.c.bf16 %v539_v63, %v538_v62  ;;  %v418_v9 = vadd.f32 1e-12, %v402_v28  ;;  %v419_v23 = vadd.f32 1e-12, %v403_v12  ;;  %v404_v32 = vmul.f32 0.00390625, %v386_v41 }
 0x15d   : > { %v765_v52 = vpack.c.bf16 %v541_v4, %v540_v13  ;;  %v499_v53 = vmul.f32 %v1151_v17, %v456_v30  ;;  %v500_v33 = vmul.f32 %v1153_v5, %v457_v31  ;;  %v405_v50 = vmul.f32 0.00390625, %v389_v3 }
 0x15e   : > { %v802_v59 = vpop.eup %801  ;;  %659 = vst [vmem:[%s1171_s26 + $0x38] sm:$0xff] %v764_v47  ;;  %805 = vrsqrt.f32 %v418_v9  ;;  %v420_v60 = vadd.f32 1e-12, %v404_v32 }
 0x15f   : > { %660 = vst [vmem:[%s1171_s26 + $0x40] sm:$0xff] %v765_v52  ;;  %v542_v7 = vadd.f32 %v1155_v44, %v499_v53  ;;  %v543_v10 = vadd.f32 %v1157_v45, %v500_v33  ;;  %v458_v18 = vmul.f32 %v802_v59, %v1086_v22  ;;  %v459_v19 = vmul.f32 %v802_v59, %v1089_v8 }
 0x160   : > { %807 = vrsqrt.f32 %v419_v23  ;;  %v421_v36 = vadd.f32 1e-12, %v405_v50 }
 0x161   : > { %v766_v29 = vpack.c.bf16 %v543_v10, %v542_v7  ;;  %v501_v34 = vmul.f32 %v1151_v17, %v458_v18  ;;  %v502_v37 = vmul.f32 %v1153_v5, %v459_v19  ;;  %809 = vrsqrt.f32 %v420_v60 }
 0x162   : > { %811 = vrsqrt.f32 %v421_v36 }
 0x163   : > { %661 = vst [vmem:[%s1171_s26 + $0x48] sm:$0xff] %v766_v29  ;;  %v544_v0 = vadd.f32 %v1155_v44, %v501_v34  ;;  %v545_v1 = vadd.f32 %v1157_v45, %v502_v37 }
 0x164   : > { %v804_v61 = vpop.eup %803 }
 0x165   : > { %v767_v38 = vpack.c.bf16 %v545_v1, %v544_v0  ;;  %v460_v22 = vmul.f32 %v804_v61, %v1092_v35  ;;  %v461_v8 = vmul.f32 %v804_v61, %v1095_v40 }
 0x167   : > { %662 = vst [vmem:[%s1171_s26 + $0x50] sm:$0xff] %v767_v38  ;;  %v503_v48 = vmul.f32 %v1151_v17, %v460_v22  ;;  %v504_v49 = vmul.f32 %v1153_v5, %v461_v8 }
 0x168   : > { %v806_v39 = vpop.eup %805 }
 0x169   : > { %v546_v2 = vadd.f32 %v1155_v44, %v503_v48  ;;  %v547_v42 = vadd.f32 %v1157_v45, %v504_v49  ;;  %v462_v54 = vmul.f32 %v806_v39, %v1106_v14  ;;  %v463_v55 = vmul.f32 %v806_v39, %v1109_v15 }
 0x16a   : > { %v808_v43 = vpop.eup %807 }
 0x16b   : > { %v810_v24 = vpop.eup %809  ;;  %v768_v35 = vpack.c.bf16 %v547_v42, %v546_v2  ;;  %v505_v40 = vmul.f32 %v1151_v17, %v462_v54  ;;  %v506_v25 = vmul.f32 %v1153_v5, %v463_v55  ;;  %v464_v6 = vmul.f32 %v808_v43, %v1112_v57 }
 0x16c   : > { %v812_v26 = vpop.eup %811  ;;  %v465_v51 = vmul.f32 %v808_v43, %v1115_v58  ;;  %v466_v56 = vmul.f32 %v810_v24, %v1126_v20  ;;  %v467_v27 = vmul.f32 %v810_v24, %v1129_v21 }
 0x16d   : > { %663 = vst [vmem:[%s1171_s26 + $0x58] sm:$0xff] %v768_v35  ;;  %v548_v14 = vadd.f32 %v1155_v44, %v505_v40  ;;  %v549_v15 = vadd.f32 %v1157_v45, %v506_v25  ;;  %v507_v28 = vmul.f32 %v1151_v17, %v464_v6  ;;  %v468_v41 = vmul.f32 %v812_v26, %v1132_v11 }
 0x16e   : > { %v508_v46 = vmul.f32 %v1153_v5, %v465_v51  ;;  %v509_v57 = vmul.f32 %v1151_v17, %v466_v56  ;;  %v510_v58 = vmul.f32 %v1153_v5, %v467_v27  ;;  %v469_v20 = vmul.f32 %v812_v26, %v1135_v16 }
 0x16f   : > { %v769_v21 = vpack.c.bf16 %v549_v15, %v548_v14  ;;  %v550_v62 = vadd.f32 %v1155_v44, %v507_v28  ;;  %v511_v63 = vmul.f32 %v1151_v17, %v468_v41 }
 0x170   : > { %v551_v12 = vadd.f32 %v1157_v45, %v508_v46  ;;  %v552_v11 = vadd.f32 %v1155_v44, %v509_v57  ;;  %v553_v3 = vadd.f32 %v1157_v45, %v510_v58  ;;  %v512_v13 = vmul.f32 %v1153_v5, %v469_v20 }
 0x171   : > { %664 = vst [vmem:[%s1171_s26 + $0x60] sm:$0xff] %v769_v21  ;;  %v554_v4 = vadd.f32 %v1155_v44, %v511_v63 }
 0x172   : > { %v770_v30 = vpack.c.bf16 %v551_v12, %v550_v62  ;;  %v771_v31 = vpack.c.bf16 %v553_v3, %v552_v11  ;;  %v555_v16 = vadd.f32 %v1157_v45, %v512_v13 }
 0x174   : > { %665 = vst [vmem:[%s1171_s26 + $0x68] sm:$0xff] %v770_v30  ;;  %666 = vst [vmem:[%s1171_s26 + $0x70] sm:$0xff] %v771_v31  ;;  %v772_v47 = vpack.c.bf16 %v555_v16, %v554_v4 }
 0x176   : > { %667 = vst [vmem:[%s1171_s26 + $0x78] sm:$0xff] %v772_v47 }
 0x177 PF: > { %s13_s12 = sadd.s32 1, %s819_s12  }
 0x178   : > { %p10_p4 = scmp.ge.s32.totalorder %s13_s12, 4  }
 0x17a   :  { %12 = sbr.rel (!%p10_p4) target bundleno = 1 (0x1), region = 62 }

// kernel: bert_latin_forward.9
= control target key start
LH: loop header
LB: loop body
LE: loop exit
PB: predicated region body
PF: predicated region fallthrough
CT: control target
= control target key end

     0   :  { %s2485_s15 = smov 0   ;;  %s2487_s16 = smov 0   ;;  %s3080_s0 = inlined_call_operand.vmem [shape: bf16[2,128,256], index: 0, kind: input, shape index: {}]   ;;  %s3081_s1 = inlined_call_operand.vmem [shape: bf16[256,768], index: 1, kind: input, shape index: {}]   ;;  %s3082_s2 = inlined_call_operand.vmem [shape: f32[1,768], index: 2, kind: input, shape index: {}]   ;;  %s3083_s3 = inlined_call_operand.vmem [shape: f32[2,1,128], index: 3, kind: input, shape index: {}]   ;;  %s3084_s4 = inlined_call_operand.vmem [shape: bf16[2,128,256], index: 4, kind: output, shape index: {}]  }
   0x1   :  { %s2489_s17 = smov 0   ;;  %s2491_s18 = smov 0  }
   0x2   :  { %s2493_s19 = smov 0   ;;  %s2495_s20 = smov 0  }
   0x3   :  { %s2497_s21 = smov 0   ;;  %s2499_s22 = smov 0  }
   0x4   :  { %s2501_s23 = smov 0  }
   0x5 LB: > { %s1762_s24 = sadd.s32 4294967295, %s2458_s23   ;;  %s23_s25 = sadd.s32 1, %s2450_s21  ;;  %s2458_s23 = sphi %s2501_s23, %s14_s23   ;;  %s2454_s22 = sphi %s2499_s22, %s3093_s22   ;;  %s2450_s21 = sphi %s2497_s21, %s3092_s21   ;;  %s2446_s20 = sphi %s2495_s20, %s3091_s20   ;;  %s2442_s19 = sphi %s2493_s19, %s3090_s19   ;;  %s2438_s18 = sphi %s2491_s18, %s3089_s18   ;;  %s2434_s17 = sphi %s2489_s17, %s3088_s17   ;;  %s2430_s16 = sphi %s2487_s16, %s3087_s16   ;;  %s2426_s15 = sphi %s2485_s15, %s3086_s15  }
   0x6   : > { %p24_p0 = scmp.ge.s32.totalorder %s23_s25, 2  ;;  %s26_s26 = sadd.s32 1, %s2454_s22 }
   0x7   : > { %s59_s27 = sadd.s32 1, %s2438_s18  ;;  %p66_p1 = scmp.ne.s32.totalorder %s2438_s18, %s2434_s17 }
   0x8   : > { %s3095_s25 = smov (%p24_p0, %s23_s25), 0  ;;  %s3097_s26 = smov (!%p24_p0, %s26_s26), %s2454_s22 }
   0x9   : > { %s56_s28 = ssub.s32 %s2450_s21, %s3095_s25  ;;  %p67_p2 = scmp.eq.s32.totalorder %s2458_s23, 0 }
   0xa   : > { %p28_p3 = scmp.ge.s32.totalorder %s3097_s26, 2  ;;  %p57_p4 = scmp.eq.s32.totalorder %s56_s28, 0 }
   0xb   : > { %p68_p5 = por %p67_p2, %p66_p1  ;;  %s139_s29 = sadd.s32 1, %s2430_s16 }
   0xc   : > { %s3099_s26 = smov (%p28_p3, %s3097_s26), 0  ;;  %p149_p6 = scmp.ne.s32.totalorder %s2430_s16, %s2426_s15 }
   0xd   : > { %s2546_s30 = scalar_select %p57_p4, %s2438_s18, %s59_s27  }
   0xe   : > { %s134_s5 = ssub.s32 %s2454_s22, %s3099_s26  ;;  %p150_p7 = scmp.eq.s32.totalorder %s1762_s24, 3 }
   0xf   : > { %s136_s6 = sor.u32 %s134_s5, %s56_s28  ;;  %p1765_p10 = scmp.ge.s32.totalorder %s2458_s23, 4 }
  0x10   : > { %p137_p8 = scmp.eq.s32.totalorder %s136_s6, 0  ;;  %p2552_p9 = por %p150_p7, %p149_p6 }
  0x11   : > { %172 = sbr.rel (%p1765_p10) target bundleno = 66 (0x42), region = 16 }
  0x12   : > { %s2557_s8 = scalar_select %p137_p8, %s2430_s16, %s139_s29  }
  0x18   : > { %183 = sbr.rel (!%p68_p5) target bundleno = 66 (0x42), region = 24  ;;  %s185_s9 = sand.u32 (%p68_p5), 1, %s2438_s18  }
  0x19   : > { %s1921_s10 = smul.u32 (%p68_p5), 12, %s2450_s21 }
  0x1a   : > { %s2162_s11 = smul.u32 (%p68_p5), 384, %s185_s9 }
  0x1b   : > { %s2565_s14 = scalar_lea.vmem (%p68_p5), %s3081_s1, %s1921_s10 }
  0x1c   : > { %v205_v0 = vld [vmem:[%s2565_s14] sm:$0xff] (%p68_p5)  ;;  %v207_v1 = vld [vmem:[%s2565_s14 + $0x18] sm:$0xff] (%p68_p5)  ;;  %v209_v2 = vld [vmem:[%s2565_s14 + $0x30] sm:$0xff] (%p68_p5)  ;;  %s2570_s24 = scalar_lea.vmem (%p68_p5), [#allocation2], %s2162_s11 }
  0x1d   : > { %206 = vst [vmem:[%s2570_s24] sm:$0xff] (%p68_p5), %v205_v0  ;;  %208 = vst [vmem:[%s2570_s24 + $0xc] sm:$0xff] (%p68_p5), %v207_v1  ;;  %v211_v3 = vld [vmem:[%s2565_s14 + $0x48] sm:$0xff] (%p68_p5)  ;;  %v213_v4 = vld [vmem:[%s2565_s14 + $0x60] sm:$0xff] (%p68_p5) }
  0x1e   : > { %210 = vst [vmem:[%s2570_s24 + $0x18] sm:$0xff] (%p68_p5), %v209_v2  ;;  %v215_v5 = vld [vmem:[%s2565_s14 + $0x78] sm:$0xff] (%p68_p5)  ;;  %212 = vst [vmem:[%s2570_s24 + $0x24] sm:$0xff] (%p68_p5), %v211_v3  ;;  %v217_v6 = vld [vmem:[%s2565_s14 + $0x90] sm:$0xff] (%p68_p5) }
  0x1f   : > { %214 = vst [vmem:[%s2570_s24 + $0x30] sm:$0xff] %v213_v4  ;;  %216 = vst [vmem:[%s2570_s24 + $0x3c] sm:$0xff] %v215_v5  ;;  %v219_v7 = vld [vmem:[%s2565_s14 + $0xa8] sm:$0xff]  ;;  %v221_v8 = vld [vmem:[%s2565_s14 + $0xc0] sm:$0xff] }
  0x20   : > { %218 = vst [vmem:[%s2570_s24 + $0x48] sm:$0xff] %v217_v6  ;;  %220 = vst [vmem:[%s2570_s24 + $0x54] sm:$0xff] %v219_v7  ;;  %v223_v9 = vld [vmem:[%s2565_s14 + $0xd8] sm:$0xff]  ;;  %v225_v10 = vld [vmem:[%s2565_s14 + $0xf0] sm:$0xff] }
  0x21   : > { %222 = vst [vmem:[%s2570_s24 + $0x60] sm:$0xff] %v221_v8  ;;  %v227_v11 = vld [vmem:[%s2565_s14 + $0x108] sm:$0xff]  ;;  %224 = vst [vmem:[%s2570_s24 + $0x6c] sm:$0xff] %v223_v9  ;;  %v229_v12 = vld [vmem:[%s2565_s14 + $0x120] sm:$0xff] }
  0x22   : > { %226 = vst [vmem:[%s2570_s24 + $0x78] sm:$0xff] %v225_v10  ;;  %228 = vst [vmem:[%s2570_s24 + $0x84] sm:$0xff] %v227_v11  ;;  %v231_v13 = vld [vmem:[%s2565_s14 + $0x138] sm:$0xff]  ;;  %v233_v14 = vld [vmem:[%s2565_s14 + $0x150] sm:$0xff] }
  0x23   : > { %230 = vst [vmem:[%s2570_s24 + $0x90] sm:$0xff] %v229_v12  ;;  %232 = vst [vmem:[%s2570_s24 + $0x9c] sm:$0xff] %v231_v13  ;;  %v235_v15 = vld [vmem:[%s2565_s14 + $0x168] sm:$0xff]  ;;  %v237_v16 = vld [vmem:[%s2565_s14 + $0x180] sm:$0xff] }
  0x24   : > { %234 = vst [vmem:[%s2570_s24 + $0xa8] sm:$0xff] %v233_v14  ;;  %v239_v17 = vld [vmem:[%s2565_s14 + $0x198] sm:$0xff]  ;;  %236 = vst [vmem:[%s2570_s24 + $0xb4] sm:$0xff] %v235_v15  ;;  %v241_v18 = vld [vmem:[%s2565_s14 + $0x1b0] sm:$0xff] }
  0x25   : > { %238 = vst [vmem:[%s2570_s24 + $0xc0] sm:$0xff] %v237_v16  ;;  %240 = vst [vmem:[%s2570_s24 + $0xcc] sm:$0xff] %v239_v17  ;;  %v243_v19 = vld [vmem:[%s2565_s14 + $0x1c8] sm:$0xff]  ;;  %v245_v20 = vld [vmem:[%s2565_s14 + $0x1e0] sm:$0xff] }
  0x26   : > { %242 = vst [vmem:[%s2570_s24 + $0xd8] sm:$0xff] %v241_v18  ;;  %244 = vst [vmem:[%s2570_s24 + $0xe4] sm:$0xff] %v243_v19  ;;  %v247_v21 = vld [vmem:[%s2565_s14 + $0x1f8] sm:$0xff]  ;;  %v249_v22 = vld [vmem:[%s2565_s14 + $0x210] sm:$0xff] }
  0x27   : > { %246 = vst [vmem:[%s2570_s24 + $0xf0] sm:$0xff] %v245_v20  ;;  %v251_v23 = vld [vmem:[%s2565_s14 + $0x228] sm:$0xff]  ;;  %248 = vst [vmem:[%s2570_s24 + $0xfc] sm:$0xff] %v247_v21  ;;  %v253_v24 = vld [vmem:[%s2565_s14 + $0x240] sm:$0xff] }
  0x28   : > { %250 = vst [vmem:[%s2570_s24 + $0x108] sm:$0xff] %v249_v22  ;;  %252 = vst [vmem:[%s2570_s24 + $0x114] sm:$0xff] %v251_v23  ;;  %v255_v25 = vld [vmem:[%s2565_s14 + $0x258] sm:$0xff]  ;;  %v257_v26 = vld [vmem:[%s2565_s14 + $0x270] sm:$0xff] }
  0x29   : > { %254 = vst [vmem:[%s2570_s24 + $0x120] sm:$0xff] %v253_v24  ;;  %256 = vst [vmem:[%s2570_s24 + $0x12c] sm:$0xff] %v255_v25  ;;  %v259_v27 = vld [vmem:[%s2565_s14 + $0x288] sm:$0xff]  ;;  %v261_v28 = vld [vmem:[%s2565_s14 + $0x2a0] sm:$0xff] }
  0x2a   : > { %258 = vst [vmem:[%s2570_s24 + $0x138] sm:$0xff] %v257_v26  ;;  %v263_v29 = vld [vmem:[%s2565_s14 + $0x2b8] sm:$0xff]  ;;  %260 = vst [vmem:[%s2570_s24 + $0x144] sm:$0xff] %v259_v27  ;;  %v265_v30 = vld [vmem:[%s2565_s14 + $0x2d0] sm:$0xff] }
  0x2b   : > { %262 = vst [vmem:[%s2570_s24 + $0x150] sm:$0xff] %v261_v28  ;;  %264 = vst [vmem:[%s2570_s24 + $0x15c] sm:$0xff] %v263_v29  ;;  %v267_v31 = vld [vmem:[%s2565_s14 + $0x2e8] sm:$0xff]  ;;  %v1769_v33 = vld [vmem:[%s2565_s14 + $0x20] sm:$0xf] }
  0x2c   : > { %v1767_v32 = vld [vmem:[%s2565_s14 + $0x8] sm:$0xf]  ;;  %266 = vst [vmem:[%s2570_s24 + $0x168] sm:$0xff] %v265_v30  ;;  %268 = vst [vmem:[%s2570_s24 + $0x174] sm:$0xff] %v267_v31  ;;  %v1771_v34 = vld [vmem:[%s2565_s14 + $0x38] sm:$0xf] }
  0x2d   : > { %1768 = vst [vmem:[%s2570_s24 + $0x8] sm:$0xf] %v1767_v32  ;;  %v1773_v35 = vld [vmem:[%s2565_s14 + $0x50] sm:$0xf]  ;;  %1770 = vst [vmem:[%s2570_s24 + $0x14] sm:$0xf] %v1769_v33 }
  0x2e   : > { %1772 = vst [vmem:[%s2570_s24 + $0x20] sm:$0xf] %v1771_v34  ;;  %1774 = vst [vmem:[%s2570_s24 + $0x2c] sm:$0xf] %v1773_v35  ;;  %v1775_v36 = vld [vmem:[%s2565_s14 + $0x68] sm:$0xf] }
  0x2f   : > { %v1777_v37 = vld [vmem:[%s2565_s14 + $0x80] sm:$0xf]  ;;  %v1779_v38 = vld [vmem:[%s2565_s14 + $0x98] sm:$0xf]  ;;  %1776 = vst [vmem:[%s2570_s24 + $0x38] sm:$0xf] %v1775_v36 }
  0x30   : > { %1778 = vst [vmem:[%s2570_s24 + $0x44] sm:$0xf] %v1777_v37  ;;  %1780 = vst [vmem:[%s2570_s24 + $0x50] sm:$0xf] %v1779_v38  ;;  %v1781_v39 = vld [vmem:[%s2565_s14 + $0xb0] sm:$0xf] }
  0x31   : > { %v1783_v40 = vld [vmem:[%s2565_s14 + $0xc8] sm:$0xf]  ;;  %v1785_v41 = vld [vmem:[%s2565_s14 + $0xe0] sm:$0xf]  ;;  %1782 = vst [vmem:[%s2570_s24 + $0x5c] sm:$0xf] %v1781_v39 }
  0x32   : > { %1784 = vst [vmem:[%s2570_s24 + $0x68] sm:$0xf] %v1783_v40  ;;  %1786 = vst [vmem:[%s2570_s24 + $0x74] sm:$0xf] %v1785_v41  ;;  %v1787_v42 = vld [vmem:[%s2565_s14 + $0xf8] sm:$0xf] }
  0x33   : > { %v1789_v43 = vld [vmem:[%s2565_s14 + $0x110] sm:$0xf]  ;;  %v1791_v44 = vld [vmem:[%s2565_s14 + $0x128] sm:$0xf]  ;;  %1788 = vst [vmem:[%s2570_s24 + $0x80] sm:$0xf] %v1787_v42 }
  0x34   : > { %1790 = vst [vmem:[%s2570_s24 + $0x8c] sm:$0xf] %v1789_v43  ;;  %1792 = vst [vmem:[%s2570_s24 + $0x98] sm:$0xf] %v1791_v44  ;;  %v1793_v45 = vld [vmem:[%s2565_s14 + $0x140] sm:$0xf] }
  0x35   : > { %v1795_v46 = vld [vmem:[%s2565_s14 + $0x158] sm:$0xf]  ;;  %v1797_v47 = vld [vmem:[%s2565_s14 + $0x170] sm:$0xf]  ;;  %1794 = vst [vmem:[%s2570_s24 + $0xa4] sm:$0xf] %v1793_v45 }
  0x36   : > { %1796 = vst [vmem:[%s2570_s24 + $0xb0] sm:$0xf] %v1795_v46  ;;  %1798 = vst [vmem:[%s2570_s24 + $0xbc] sm:$0xf] %v1797_v47  ;;  %v1799_v48 = vld [vmem:[%s2565_s14 + $0x188] sm:$0xf] }
  0x37   : > { %v1801_v49 = vld [vmem:[%s2565_s14 + $0x1a0] sm:$0xf]  ;;  %v1803_v50 = vld [vmem:[%s2565_s14 + $0x1b8] sm:$0xf]  ;;  %1800 = vst [vmem:[%s2570_s24 + $0xc8] sm:$0xf] %v1799_v48 }
  0x38   : > { %1802 = vst [vmem:[%s2570_s24 + $0xd4] sm:$0xf] %v1801_v49  ;;  %1804 = vst [vmem:[%s2570_s24 + $0xe0] sm:$0xf] %v1803_v50  ;;  %v1805_v51 = vld [vmem:[%s2565_s14 + $0x1d0] sm:$0xf] }
  0x39   : > { %v1807_v52 = vld [vmem:[%s2565_s14 + $0x1e8] sm:$0xf]  ;;  %v1809_v53 = vld [vmem:[%s2565_s14 + $0x200] sm:$0xf]  ;;  %1806 = vst [vmem:[%s2570_s24 + $0xec] sm:$0xf] %v1805_v51 }
  0x3a   : > { %1808 = vst [vmem:[%s2570_s24 + $0xf8] sm:$0xf] %v1807_v52  ;;  %1810 = vst [vmem:[%s2570_s24 + $0x104] sm:$0xf] %v1809_v53  ;;  %v1811_v54 = vld [vmem:[%s2565_s14 + $0x218] sm:$0xf] }
  0x3b   : > { %v1813_v55 = vld [vmem:[%s2565_s14 + $0x230] sm:$0xf]  ;;  %v1815_v56 = vld [vmem:[%s2565_s14 + $0x248] sm:$0xf]  ;;  %1812 = vst [vmem:[%s2570_s24 + $0x110] sm:$0xf] %v1811_v54 }
  0x3c   : > { %1814 = vst [vmem:[%s2570_s24 + $0x11c] sm:$0xf] %v1813_v55  ;;  %1816 = vst [vmem:[%s2570_s24 + $0x128] sm:$0xf] %v1815_v56  ;;  %v1817_v57 = vld [vmem:[%s2565_s14 + $0x260] sm:$0xf] }
  0x3d   : > { %v1819_v58 = vld [vmem:[%s2565_s14 + $0x278] sm:$0xf]  ;;  %v1821_v59 = vld [vmem:[%s2565_s14 + $0x290] sm:$0xf]  ;;  %1818 = vst [vmem:[%s2570_s24 + $0x134] sm:$0xf] %v1817_v57 }
  0x3e   : > { %1820 = vst [vmem:[%s2570_s24 + $0x140] sm:$0xf] %v1819_v58  ;;  %1822 = vst [vmem:[%s2570_s24 + $0x14c] sm:$0xf] %v1821_v59  ;;  %v1823_v60 = vld [vmem:[%s2565_s14 + $0x2a8] sm:$0xf] }
  0x3f   : > { %v1825_v61 = vld [vmem:[%s2565_s14 + $0x2c0] sm:$0xf]  ;;  %v1827_v62 = vld [vmem:[%s2565_s14 + $0x2d8] sm:$0xf]  ;;  %1824 = vst [vmem:[%s2570_s24 + $0x158] sm:$0xf] %v1823_v60 }
  0x40   : > { %1826 = vst [vmem:[%s2570_s24 + $0x164] sm:$0xf] %v1825_v61  ;;  %1828 = vst [vmem:[%s2570_s24 + $0x170] sm:$0xf] %v1827_v62  ;;  %v1829_v63 = vld [vmem:[%s2565_s14 + $0x2f0] sm:$0xf] }
  0x41   : > { %1830 = vst [vmem:[%s2570_s24 + $0x17c] sm:$0xf] %v1829_v63 }
  0x42 PF: > { %p1831_p11 = scmp.ge.s32.totalorder %s2458_s23, 1  ;;  %p358_p12 = scmp.lt.s32.totalorder %s2458_s23, 5 }
  0x44   : > { %p359_p13 = pnand %p1831_p11, %p358_p12 }
  0x45   : > { %s365_s27 = sand.u32 (!%p359_p13), 1, %s2434_s17   ;;  %p401_p0 = scmp.lt.s32.totalorder (!%p359_p13), %s2446_s20, 1 }
  0x46   : > { %362 = sbr.rel (%p359_p13) target bundleno = 1216 (0x4c0), region = 58 }
  0x47   : > { %s2163_s28 = smul.u32 (!%p359_p13), 384, %s365_s27 }
  0x48   : > { %s407_s11 = smul.u32 (!%p359_p13), 3, %s2442_s19 }
  0x49   : > { %s2700_s29 = scalar_lea.vmem (!%p359_p13), [#allocation2], %s2163_s28 }
  0x4a   : > { %v2236_v0 = vld [vmem:[%s2700_s29 + $0x4] ss:$12 sps:$4 sm:$0xff] (!%p359_p13)   ;;  %v2238_v1 = vld [vmem:[%s2700_s29] ss:$12 sps:$4 sm:$0xff] (!%p359_p13)   ;;  %v2239_v2 = vld [vmem:[%s2700_s29 + $0x1c] ss:$12 sps:$4 sm:$0xff] (!%p359_p13)  }
  0x4b   : > { %849 = vmatprep.subr.bf16.mxu0 (!%p359_p13), %v2236_v0  ;;  %v2241_v3 = vld [vmem:[%s2700_s29 + $0x18] ss:$12 sps:$4 sm:$0xff] (!%p359_p13)   ;;  %v2242_v4 = vld [vmem:[%s2700_s29 + $0x34] ss:$12 sps:$4 sm:$0xff] (!%p359_p13)   ;;  %v2244_v5 = vld [vmem:[%s2700_s29 + $0x30] ss:$12 sps:$4 sm:$0xff] (!%p359_p13)   ;;  %v498_v0 = vlaneseq (!%p359_p13) }
  0x4c   : > { %850 = vmatpush1.bf16.msra.mxu0 (!%p359_p13), %v2238_v1  ;;  %v2245_v6 = vld [vmem:[%s2700_s29 + $0x4c] ss:$12 sps:$4 sm:$0xff] (!%p359_p13)   ;;  %v2247_v7 = vld [vmem:[%s2700_s29 + $0x48] ss:$12 sps:$4 sm:$0xff] (!%p359_p13)   ;;  %v2248_v8 = vld [vmem:[%s2700_s29 + $0x64] ss:$12 sps:$4 sm:$0xff] (!%p359_p13)  }
  0x4d   : > { %851 = vmatprep.subr.bf16.mxu0 %v2239_v2  ;;  %s2713_s17 = scalar_select %p401_p0, %s2446_s20, 1  ;;  %v2250_v9 = vld [vmem:[%s2700_s29 + $0x60] ss:$12 sps:$4 sm:$0xff]   ;;  %v2251_v10 = vld [vmem:[%s2700_s29 + $0x7c] ss:$12 sps:$4 sm:$0xff]   ;;  %v499_v1 = vshrl.u32 %v498_v0, 7 }
  0x4e   : > { %v2253_v11 = vld [vmem:[%s2700_s29 + $0x78] ss:$12 sps:$4 sm:$0xff]   ;;  %v2254_v12 = vld [vmem:[%s2700_s29 + $0x94] ss:$12 sps:$4 sm:$0xff]   ;;  %v2256_v14 = vld [vmem:[%s2700_s29 + $0x90] ss:$12 sps:$4 sm:$0xff]  }
  0x4f   : > { %s1922_s5 = sshll.u32 %s2713_s17, 7  ;;  %v2257_v15 = vld [vmem:[%s2700_s29 + $0xac] ss:$12 sps:$4 sm:$0xff]   ;;  %v2259_v16 = vld [vmem:[%s2700_s29 + $0xa8] ss:$12 sps:$4 sm:$0xff]   ;;  %p408_p1 = scmp.lt.s32.totalorder %s407_s11, 5 }
  0x50   : > { %852 = vmatpush1.bf16.msra.mxu0 %v2241_v3  ;;  %s2722_s10 = scalar_lea.vmem %s3080_s0, %s1922_s5  ;;  %v2260_v17 = vld [vmem:[%s2700_s29 + $0xc4] ss:$12 sps:$4 sm:$0xff]   ;;  %v2262_v18 = vld [vmem:[%s2700_s29 + $0xc0] ss:$12 sps:$4 sm:$0xff]   ;;  %v2263_v19 = vld [vmem:[%s2700_s29 + $0xdc] ss:$12 sps:$4 sm:$0xff]   ;;  %s414_s28 = scalar_lea.vmem %s3083_s3, %s2713_s17 }
  0x51   : > { %853 = vmatprep.subr.bf16.mxu0 %v2242_v4  ;;  %v2286_v13 = vld [vmem:[%s2722_s10 + $0x4] ss:$8 sps:$4 sm:$0xff]   ;;  %v2308_v20 = vld [vmem:[%s2700_s29 + $0xc8] ss:$12 sps:$4 sm:$0xff]   ;;  %v2268_v27 = vld [vmem:[%s2700_s29 + $0xf0] ss:$12 sps:$4 sm:$0xff]  }
  0x52   : > { %881 = vmatprep.mubr.bf16.mxu0 %v2286_v13  ;;  %994 = vmatprep.mubr.bf16.mxu1 %v2286_v13  ;;  %v2265_v21 = vld [vmem:[%s2700_s29 + $0xd8] ss:$12 sps:$4 sm:$0xff]   ;;  %v2309_v22 = vld [vmem:[%s2700_s29 + $0x8] ss:$12 sps:$4 sm:$0xff]   ;;  %v2310_v24 = vld [vmem:[%s2700_s29 + $0xe0] ss:$12 sps:$4 sm:$0xff]  }
  0x53   : > { %v2266_v23 = vld [vmem:[%s2700_s29 + $0xf4] ss:$12 sps:$4 sm:$0xff]   ;;  %1986 = vmatprep.subr.bf16.mxu1 %v2308_v20  ;;  %v2312_v26 = vld [vmem:[%s2700_s29 + $0xf8] ss:$12 sps:$4 sm:$0xff]   ;;  %v2314_v30 = vld [vmem:[%s2700_s29 + $0x110] ss:$12 sps:$4 sm:$0xff]  }
  0x54   : > { %854 = vmatpush1.bf16.msra.mxu0 %v2244_v5  ;;  %1987 = vmatpush3.bf16.msra.mxu1 %v2309_v22  ;;  %v2311_v25 = vld [vmem:[%s2700_s29 + $0x20] ss:$12 sps:$4 sm:$0xff]   ;;  %v2313_v29 = vld [vmem:[%s2700_s29 + $0x38] ss:$12 sps:$4 sm:$0xff]   ;;  %v2271_v31 = vld [vmem:[%s2700_s29 + $0x108] ss:$12 sps:$4 sm:$0xff]  }
  0x55   : > { %855 = vmatprep.subr.bf16.mxu0 %v2245_v6  ;;  %1988 = vmatprep.subr.bf16.mxu1 %v2310_v24  ;;  %v2269_v28 = vld [vmem:[%s2700_s29 + $0x10c] ss:$12 sps:$4 sm:$0xff]   ;;  %v2272_v32 = vld [vmem:[%s2700_s29 + $0x124] ss:$12 sps:$4 sm:$0xff]   ;;  %v2316_v34 = vld [vmem:[%s2700_s29 + $0x128] ss:$12 sps:$4 sm:$0xff]  }
  0x56   : > { %v2315_v33 = vld [vmem:[%s2700_s29 + $0x50] ss:$12 sps:$4 sm:$0xff]   ;;  %v2274_v35 = vld [vmem:[%s2700_s29 + $0x120] ss:$12 sps:$4 sm:$0xff]   ;;  %v2317_v36 = vld [vmem:[%s2700_s29 + $0x68] ss:$12 sps:$4 sm:$0xff]  }
  0x57   : > { %v2275_v37 = vld [vmem:[%s2700_s29 + $0x13c] ss:$12 sps:$4 sm:$0xff]   ;;  %v2318_v38 = vld [vmem:[%s2700_s29 + $0x140] ss:$12 sps:$4 sm:$0xff]   ;;  %v2277_v39 = vld [vmem:[%s2700_s29 + $0x138] ss:$12 sps:$4 sm:$0xff]  }
  0x58   : > { %856 = vmatpush1.bf16.msra.mxu0 %v2247_v7  ;;  %1989 = vmatpush3.bf16.msra.mxu1 %v2311_v25  ;;  %v2319_v40 = vld [vmem:[%s2700_s29 + $0x80] ss:$12 sps:$4 sm:$0xff]   ;;  %v2320_v42 = vld [vmem:[%s2700_s29 + $0x158] ss:$12 sps:$4 sm:$0xff]   ;;  %v2280_v43 = vld [vmem:[%s2700_s29 + $0x150] ss:$12 sps:$4 sm:$0xff]  }
  0x59   : > { %857 = vmatprep.subr.bf16.mxu0 %v2248_v8  ;;  %1990 = vmatprep.subr.bf16.mxu1 %v2312_v26  ;;  %v2278_v41 = vld [vmem:[%s2700_s29 + $0x154] ss:$12 sps:$4 sm:$0xff]   ;;  %v2321_v44 = vld [vmem:[%s2700_s29 + $0x98] ss:$12 sps:$4 sm:$0xff]   ;;  %v2322_v46 = vld [vmem:[%s2700_s29 + $0x170] ss:$12 sps:$4 sm:$0xff]  }
  0x5a   : > { %v2281_v45 = vld [vmem:[%s2700_s29 + $0x16c] ss:$12 sps:$4 sm:$0xff]   ;;  %v2283_v47 = vld [vmem:[%s2700_s29 + $0x168] ss:$12 sps:$4 sm:$0xff]   ;;  %v2323_v48 = vld [vmem:[%s2700_s29 + $0xb0] ss:$12 sps:$4 sm:$0xff]  }
  0x5b   : > { %v2284_v49 = vld [vmem:[%s2722_s10] ss:$8 sps:$4 sm:$0xff]   ;;  %v2287_v50 = vld [vmem:[%s2722_s10 + $0x14] ss:$8 sps:$4 sm:$0xff]   ;;  %v2289_v51 = vld [vmem:[%s2722_s10 + $0x10] ss:$8 sps:$4 sm:$0xff]  }
  0x5c   : > { %858 = vmatpush1.bf16.msra.mxu0 %v2250_v9  ;;  %1991 = vmatpush3.bf16.msra.mxu1 %v2313_v29  ;;  %v2290_v52 = vld [vmem:[%s2722_s10 + $0x24] ss:$8 sps:$4 sm:$0xff]   ;;  %v2292_v53 = vld [vmem:[%s2722_s10 + $0x20] ss:$8 sps:$4 sm:$0xff]   ;;  %v2293_v54 = vld [vmem:[%s2722_s10 + $0x34] ss:$8 sps:$4 sm:$0xff]  }
  0x5d   : > { %859 = vmatprep.subr.bf16.mxu0 %v2251_v10  ;;  %1992 = vmatprep.subr.bf16.mxu1 %v2314_v30  ;;  %v2295_v55 = vld [vmem:[%s2722_s10 + $0x30] ss:$8 sps:$4 sm:$0xff]   ;;  %v2296_v56 = vld [vmem:[%s2722_s10 + $0x44] ss:$8 sps:$4 sm:$0xff]   ;;  %v2298_v57 = vld [vmem:[%s2722_s10 + $0x40] ss:$8 sps:$4 sm:$0xff]  }
  0x5e   : > { %v2299_v58 = vld [vmem:[%s2722_s10 + $0x54] ss:$8 sps:$4 sm:$0xff]   ;;  %v2301_v59 = vld [vmem:[%s2722_s10 + $0x50] ss:$8 sps:$4 sm:$0xff]   ;;  %v2302_v60 = vld [vmem:[%s2722_s10 + $0x64] ss:$8 sps:$4 sm:$0xff]  }
  0x5f   : > { %v2304_v61 = vld [vmem:[%s2722_s10 + $0x60] ss:$8 sps:$4 sm:$0xff]   ;;  %v2305_v62 = vld [vmem:[%s2722_s10 + $0x74] ss:$8 sps:$4 sm:$0xff]   ;;  %v2307_v63 = vld [vmem:[%s2722_s10 + $0x70] ss:$8 sps:$4 sm:$0xff]  }
  0x60   : > { %860 = vmatpush1.bf16.msra.mxu0 %v2253_v11  ;;  %1993 = vmatpush3.bf16.msra.mxu1 %v2315_v33  ;;  %s3101_s11 = smov (!%p408_p1, %s407_s11), 5  ;;  %v500_v2 = vsub.s32 0, %v499_v1  ;;  %v504_v4 = vsub.s32 1, %v499_v1  ;;  %v508_v5 = vsub.s32 2, %v499_v1  ;;  %s398_s29 = sand.u32 1, %s2426_s15  }
  0x61   : > { %861 = vmatprep.subr.bf16.mxu0 %v2254_v12  ;;  %1994 = vmatprep.subr.bf16.mxu1 %v2316_v34  ;;  %s410_s14 = scalar_lea.vmem %s3082_s2, %s3101_s11  ;;  %s1832_s17 = sshll.u32 %s398_s29, 6 }
  0x62   : > { %v496_v3 = vld [vmem:[%s410_s14] sm:$0x7]  ;;  %s3020_s5 = scalar_lea.vmem [#allocation3], %s1832_s17  ;;  %s1917_s15 = sshll.u32 (%p2552_p9), %s2446_s20, 5 }
  0x63   : > { %v2780_v6 = vrot.slane %v496_v3, %v500_v2  ;;  %v2782_v8 = vrot.slane %v496_v3, %v504_v4  ;;  %v2784_v10 = vrot.slane %v496_v3, %v508_v5  ;;  %s1556_s6 = sadd.s32 (%p2552_p9), %s2442_s19, %s1917_s15 }
  0x64   : > { %862 = vmatpush1.bf16.msra.mxu0 %v2256_v14  ;;  %1995 = vmatpush3.bf16.msra.mxu1 %v2317_v36  ;;  %s1918_s7 = sshll.u32 (%p2552_p9), %s1556_s6, 2 }
  0x65   : > { %863 = vmatprep.subr.bf16.mxu0 %v2257_v15  ;;  %1996 = vmatprep.subr.bf16.mxu1 %v2318_v38  ;;  %s1558_s11 = scalar_lea.vmem (%p2552_p9), %s3084_s4, %s1918_s7 }
  0x68   : > { %864 = vmatpush1.bf16.msra.mxu0 %v2259_v16  ;;  %1997 = vmatpush3.bf16.msra.mxu1 %v2319_v40 }
  0x69   : > { %865 = vmatprep.subr.bf16.mxu0 %v2260_v17  ;;  %1998 = vmatprep.subr.bf16.mxu1 %v2320_v42 }
  0x6c   : > { %866 = vmatpush1.bf16.msra.mxu0 %v2262_v18  ;;  %1999 = vmatpush3.bf16.msra.mxu1 %v2321_v44 }
  0x6d   : > { %867 = vmatprep.subr.bf16.mxu0 %v2263_v19  ;;  %2000 = vmatprep.subr.bf16.mxu1 %v2322_v46 }
  0x70   : > { %868 = vmatpush1.bf16.msra.mxu0 %v2265_v21  ;;  %2001 = vmatpush3.bf16.msra.mxu1 %v2323_v48 }
  0x71   : > { %869 = vmatprep.subr.bf16.mxu0 %v2266_v23 }
  0x73   : > { %995 = vmatmul.mubr.bf16.vlgmr.msra.gmra.mrb[0].mxu1 %v2284_v49 }
  0x74   : > { %870 = vmatpush1.bf16.msra.mxu0 %v2268_v27  ;;  %1002 = vmatprep.mubr.bf16.mxu1 %v2287_v50 }
  0x75   : > { %871 = vmatprep.subr.bf16.mxu0 %v2269_v28 }
  0x78   : > { %872 = vmatpush1.bf16.msra.mxu0 %v2271_v31 }
  0x79   : > { %873 = vmatprep.subr.bf16.mxu0 %v2272_v32 }
  0x7b   : > { %1003 = vmatmul.mubr.bf16.gmra.mrb[4].mxu1 %v2289_v51 }
  0x7c   : > { %874 = vmatpush1.bf16.msra.mxu0 %v2274_v35  ;;  %1010 = vmatprep.mubr.bf16.mxu1 %v2290_v52 }
  0x7d   : > { %875 = vmatprep.subr.bf16.mxu0 %v2275_v37 }
  0x80   : > { %876 = vmatpush1.bf16.msra.mxu0 %v2277_v39 }
  0x81   : > { %877 = vmatprep.subr.bf16.mxu0 %v2278_v41 }
  0x83   : > { %1011 = vmatmul.mubr.bf16.gmra.mrb[8].mxu1 %v2292_v53 }
  0x84   : > { %878 = vmatpush1.bf16.msra.mxu0 %v2280_v43  ;;  %1018 = vmatprep.mubr.bf16.mxu1 %v2293_v54 }
  0x85   : > { %879 = vmatprep.subr.bf16.mxu0 %v2281_v45 }
  0x88   : > { %880 = vmatpush1.bf16.msra.mxu0 %v2283_v47 }
  0x8b   : > { %882 = vmatmul.mubr.bf16.vlgmr.msra.gmra.mrb[0].mxu0 %v2284_v49  ;;  %1019 = vmatmul.mubr.bf16.gmra.mrb[12].mxu1 %v2295_v55 }
  0x8c   : > { %891 = vmatprep.mubr.bf16.mxu0 %v2287_v50  ;;  %1026 = vmatprep.mubr.bf16.mxu1 %v2296_v56 }
  0x93   : > { %892 = vmatmul.mubr.bf16.gmra.mrb[4].mxu0 %v2289_v51  ;;  %1027 = vmatmul.mubr.bf16.gmra.mrb[16].mxu1 %v2298_v57 }
  0x94   : > { %901 = vmatprep.mubr.bf16.mxu0 %v2290_v52  ;;  %1034 = vmatprep.mubr.bf16.mxu1 %v2299_v58 }
  0x9b   : > { %902 = vmatmul.mubr.bf16.gmra.mrb[8].mxu0 %v2292_v53  ;;  %1035 = vmatmul.mubr.bf16.gmra.mrb[20].mxu1 %v2301_v59 }
  0x9c   : > { %911 = vmatprep.mubr.bf16.mxu0 %v2293_v54  ;;  %1042 = vmatprep.mubr.bf16.mxu1 %v2302_v60 }
  0xa3   : > { %912 = vmatmul.mubr.bf16.gmra.mrb[12].mxu0 %v2295_v55  ;;  %1043 = vmatmul.mubr.bf16.gmra.mrb[24].mxu1 %v2304_v61 }
  0xa4   : > { %921 = vmatprep.mubr.bf16.mxu0 %v2296_v56  ;;  %1050 = vmatprep.mubr.bf16.mxu1 %v2305_v62 }
  0xab   : > { %922 = vmatmul.mubr.bf16.gmra.mrb[16].mxu0 %v2298_v57  ;;  %1051 = vmatmul.mubr.bf16.gmra.mrb[28].mxu1 %v2307_v63 }
  0xac   : > { %931 = vmatprep.mubr.bf16.mxu0 %v2299_v58 }
  0xb3   : > { %932 = vmatmul.mubr.bf16.gmra.mrb[20].mxu0 %v2301_v59 }
  0xb4   : > { %941 = vmatprep.mubr.bf16.mxu0 %v2302_v60 }
  0xbb   : > { %942 = vmatmul.mubr.bf16.gmra.mrb[24].mxu0 %v2304_v61 }
  0xbc   : > { %951 = vmatprep.mubr.bf16.mxu0 %v2305_v62 }
  0xc3   : > { %952 = vmatmul.mubr.bf16.gmra.mrb[28].mxu0 %v2307_v63 }
 0x146   : > { %v2002_v9 = vpop.f32.mrb[0].mxu1 }
 0x147   : > { %v2003_v12 = vpop.f32.mrb[1].mxu1 }
 0x148   : > { %v2004_v14 = vadd.f32 %v2003_v12, %v2002_v9  ;;  %v2005_v15 = vpop.f32.mrb[2].mxu1 }
 0x149   : > { %v2006_v19 = vpop.f32.mrb[3].mxu1 }
 0x14a   : > { %v997_v22 = vadd.f32 %v2004_v14, %v2784_v10  ;;  %v2007_v23 = vadd.f32 %v2006_v19, %v2005_v15 }
 0x14c   : > { %v1000_v26 = vadd.f32 %v2007_v23, %v2784_v10 }
 0x14e   : > { %v2792_v28 = vpack.c.bf16 %v1000_v26, %v997_v22  ;;  %v2008_v29 = vpop.f32.mrb[4].mxu1 }
 0x14f   : > { %v2009_v32 = vpop.f32.mrb[5].mxu1 }
 0x150   : > { %v2010_v34 = vadd.f32 %v2009_v32, %v2008_v29  ;;  %v2011_v35 = vpop.f32.mrb[6].mxu1  ;;  %2114 = vmatprep.subr.bf16.mxu0 %v2792_v28 }
 0x151   : > { %v2012_v38 = vpop.f32.mrb[7].mxu1  ;;  %2115 = vmatpush3.bf16.msra.mxu0 %v2792_v28 }
 0x152   : > { %v1005_v41 = vadd.f32 %v2010_v34, %v2784_v10  ;;  %v2013_v42 = vadd.f32 %v2012_v38, %v2011_v35 }
 0x154   : > { %v1008_v45 = vadd.f32 %v2013_v42, %v2784_v10 }
 0x156   : > { %v2808_v47 = vpack.c.bf16 %v1008_v45, %v1005_v41  ;;  %v2014_v48 = vpop.f32.mrb[8].mxu1 }
 0x157   : > { %v2015_v51 = vpop.f32.mrb[9].mxu1 }
 0x158   : > { %v2016_v53 = vadd.f32 %v2015_v51, %v2014_v48  ;;  %v2017_v54 = vpop.f32.mrb[10].mxu1  ;;  %2116 = vmatprep.subr.bf16.mxu0 %v2808_v47 }
 0x159   : > { %v2018_v57 = vpop.f32.mrb[11].mxu1  ;;  %2117 = vmatpush3.bf16.msra.mxu0 %v2808_v47 }
 0x15a   : > { %v1013_v60 = vadd.f32 %v2016_v53, %v2784_v10  ;;  %v2019_v61 = vadd.f32 %v2018_v57, %v2017_v54 }
 0x15c   : > { %v1016_v0 = vadd.f32 %v2019_v61, %v2784_v10 }
 0x15e   : > { %v883_v7 = vpop.f32.mrb[0].mxu0  ;;  %v2824_v2 = vpack.c.bf16 %v1016_v0, %v1013_v60  ;;  %v2020_v3 = vpop.f32.mrb[12].mxu1 }
 0x15f   : > { %v885_v11 = vpop.f32.mrb[1].mxu0  ;;  %v884_v16 = vadd.f32 %v883_v7, %v2780_v6  ;;  %v2021_v7 = vpop.f32.mrb[13].mxu1 }
 0x160   : > { %v887_v13 = vpop.f32.mrb[2].mxu0  ;;  %v886_v20 = vadd.f32 %v885_v11, %v2782_v8  ;;  %v2022_v11 = vadd.f32 %v2021_v7, %v2020_v3  ;;  %v2023_v12 = vpop.f32.mrb[14].mxu1  ;;  %2118 = vmatprep.subr.bf16.mxu0 %v2824_v2 }
 0x161   : > { %v888_v17 = vadd.f32 %v887_v13, %v2780_v6  ;;  %v889_v18 = vpop.f32.mrb[3].mxu0  ;;  %v2024_v15 = vpop.f32.mrb[15].mxu1  ;;  %2119 = vmatpush3.bf16.msra.mxu0 %v2824_v2 }
 0x162   : > { %v890_v21 = vadd.f32 %v889_v18, %v2782_v8  ;;  %v1021_v18 = vadd.f32 %v2022_v11, %v2784_v10  ;;  %v2025_v19 = vadd.f32 %v2024_v15, %v2023_v12 }
 0x163   : > { %v1059_v24 = vpack.c.bf16 %v888_v17, %v884_v16 }
 0x164   : > { %v1067_v25 = vpack.c.bf16 %v890_v21, %v886_v20  ;;  %v1024_v22 = vadd.f32 %v2025_v19, %v2784_v10 }
 0x165   : > { %2098 = vmatprep.mubr.bf16.mxu1 %v1059_v24 }
 0x166   : > { %v893_v27 = vpop.f32.mrb[4].mxu0  ;;  %2082 = vmatprep.subr.bf16.mxu1 %v1067_v25  ;;  %v2840_v24 = vpack.c.bf16 %v1024_v22, %v1021_v18 }
 0x167   : > { %v2795_v30 = vadd.f32 %v893_v27, %v2780_v6  ;;  %v895_v31 = vpop.f32.mrb[5].mxu0  ;;  %2083 = vmatpush3.bf16.xpose.msra.mxu1 %v1067_v25  ;;  %v2026_v25 = vpop.f32.mrb[16].mxu1 }
 0x168   : > { %v897_v33 = vpop.f32.mrb[6].mxu0  ;;  %v896_v39 = vadd.f32 %v895_v31, %v2782_v8  ;;  %v2027_v29 = vpop.f32.mrb[17].mxu1  ;;  %2120 = vmatprep.subr.bf16.mxu0 %v2840_v24 }
 0x169   : > { %v2799_v36 = vadd.f32 %v897_v33, %v2780_v6  ;;  %v899_v37 = vpop.f32.mrb[7].mxu0  ;;  %v2028_v32 = vadd.f32 %v2027_v29, %v2026_v25  ;;  %v2029_v33 = vpop.f32.mrb[18].mxu1  ;;  %2121 = vmatpush3.bf16.msra.mxu0 %v2840_v24 }
 0x16a   : > { %v900_v40 = vadd.f32 %v899_v37, %v2782_v8  ;;  %v2030_v37 = vpop.f32.mrb[19].mxu1 }
 0x16b   : > { %v1060_v43 = vpack.c.bf16 %v2799_v36, %v2795_v30  ;;  %v2031_v41 = vadd.f32 %v2030_v37, %v2029_v33 }
 0x16c   : > { %v1068_v44 = vpack.c.bf16 %v900_v40, %v896_v39  ;;  %v1029_v40 = vadd.f32 %v2028_v32, %v2784_v10 }
 0x16d   : > { %v1032_v45 = vadd.f32 %v2031_v41, %v2784_v10 }
 0x16e   : > { %v903_v46 = vpop.f32.mrb[8].mxu0  ;;  %2084 = vmatprep.subr.bf16.mxu1 %v1068_v44 }
 0x16f   : > { %v2811_v49 = vadd.f32 %v903_v46, %v2780_v6  ;;  %v905_v50 = vpop.f32.mrb[9].mxu0  ;;  %2085 = vmatpush3.bf16.xpose.msra.mxu1 %v1068_v44  ;;  %v2856_v48 = vpack.c.bf16 %v1032_v45, %v1029_v40 }
 0x170   : > { %v907_v52 = vpop.f32.mrb[10].mxu0  ;;  %v906_v58 = vadd.f32 %v905_v50, %v2782_v8  ;;  %v2032_v50 = vpop.f32.mrb[20].mxu1 }
 0x171   : > { %v2815_v55 = vadd.f32 %v907_v52, %v2780_v6  ;;  %v909_v56 = vpop.f32.mrb[11].mxu0  ;;  %v2033_v53 = vpop.f32.mrb[21].mxu1  ;;  %2122 = vmatprep.subr.bf16.mxu0 %v2856_v48 }
 0x172   : > { %v910_v59 = vadd.f32 %v909_v56, %v2782_v8  ;;  %v2034_v56 = vadd.f32 %v2033_v53, %v2032_v50  ;;  %v2035_v57 = vpop.f32.mrb[22].mxu1  ;;  %2123 = vmatpush3.bf16.msra.mxu0 %v2856_v48 }
 0x173   : > { %v1061_v62 = vpack.c.bf16 %v2815_v55, %v2811_v49  ;;  %v2036_v60 = vpop.f32.mrb[23].mxu1 }
 0x174   : > { %v1069_v63 = vpack.c.bf16 %v910_v59, %v906_v58  ;;  %v1037_v0 = vadd.f32 %v2034_v56, %v2784_v10 }
 0x176   : > { %v913_v1 = vpop.f32.mrb[12].mxu0  ;;  %2086 = vmatprep.subr.bf16.mxu1 %v1069_v63  ;;  %v2038_v12 = vpop.f32.mrb[24].mxu1 }
 0x177   : > { %v2827_v4 = vadd.f32 %v913_v1, %v2780_v6  ;;  %v915_v5 = vpop.f32.mrb[13].mxu0  ;;  %2087 = vmatpush3.bf16.xpose.msra.mxu1 %v1069_v63  ;;  %v2037_v1 = vadd.f32 %v2036_v60, %v2035_v57 }
 0x178   : > { %v917_v9 = vpop.f32.mrb[14].mxu0  ;;  %v916_v16 = vadd.f32 %v915_v5, %v2782_v8 }
 0x179   : > { %v2831_v13 = vadd.f32 %v917_v9, %v2780_v6  ;;  %v919_v14 = vpop.f32.mrb[15].mxu0  ;;  %v1040_v7 = vadd.f32 %v2037_v1, %v2784_v10 }
 0x17a   : > { %v920_v17 = vadd.f32 %v919_v14, %v2782_v8 }
 0x17b   : > { %v1062_v20 = vpack.c.bf16 %v2831_v13, %v2827_v4  ;;  %v2872_v11 = vpack.c.bf16 %v1040_v7, %v1037_v0 }
 0x17c   : > { %v1070_v21 = vpack.c.bf16 %v920_v17, %v916_v16  ;;  %v2039_v16 = vpop.f32.mrb[25].mxu1 }
 0x17d   : > { %v2040_v18 = vadd.f32 %v2039_v16, %v2038_v12  ;;  %v2041_v19 = vpop.f32.mrb[26].mxu1  ;;  %2124 = vmatprep.subr.bf16.mxu0 %v2872_v11 }
 0x17e   : > { %v923_v23 = vpop.f32.mrb[16].mxu0  ;;  %2088 = vmatprep.subr.bf16.mxu1 %v1070_v21  ;;  %2125 = vmatpush3.bf16.msra.mxu0 %v2872_v11 }
 0x17f   : > { %v2843_v26 = vadd.f32 %v923_v23, %v2780_v6  ;;  %v925_v27 = vpop.f32.mrb[17].mxu0  ;;  %2089 = vmatpush3.bf16.xpose.msra.mxu1 %v1070_v21  ;;  %v2042_v23 = vpop.f32.mrb[27].mxu1  ;;  %v1045_v29 = vadd.f32 %v2040_v18, %v2784_v10 }
 0x180   : > { %v927_v31 = vpop.f32.mrb[18].mxu0  ;;  %v926_v38 = vadd.f32 %v925_v27, %v2782_v8 }
 0x181   : > { %v2847_v34 = vadd.f32 %v927_v31, %v2780_v6  ;;  %v929_v35 = vpop.f32.mrb[19].mxu0  ;;  %v2043_v31 = vadd.f32 %v2042_v23, %v2041_v19 }
 0x182   : > { %v930_v39 = vadd.f32 %v929_v35, %v2782_v8 }
 0x183   : > { %v1063_v42 = vpack.c.bf16 %v2847_v34, %v2843_v26  ;;  %v1048_v35 = vadd.f32 %v2043_v31, %v2784_v10 }
 0x184   : > { %v1071_v44 = vpack.c.bf16 %v930_v39, %v926_v38  ;;  %v2044_v39 = vpop.f32.mrb[28].mxu1 }
 0x185   : > { %v1081_v38 = vpack.c.bf16 %v1048_v35, %v1045_v29 }
 0x186   : > { %v933_v46 = vpop.f32.mrb[20].mxu0  ;;  %2090 = vmatprep.subr.bf16.mxu1 %v1071_v44 }
 0x187   : > { %v2859_v51 = vadd.f32 %v933_v46, %v2780_v6  ;;  %v935_v52 = vpop.f32.mrb[21].mxu0  ;;  %2091 = vmatpush3.bf16.xpose.msra.mxu1 %v1071_v44  ;;  %v2045_v44 = vpop.f32.mrb[29].mxu1  ;;  %2126 = vmatprep.subr.bf16.mxu0 %v1081_v38 }
 0x188   : > { %v937_v54 = vpop.f32.mrb[22].mxu0  ;;  %v936_v61 = vadd.f32 %v935_v52, %v2782_v8  ;;  %v2046_v46 = vadd.f32 %v2045_v44, %v2044_v39  ;;  %v2047_v50 = vpop.f32.mrb[30].mxu1  ;;  %2127 = vmatpush3.bf16.msra.mxu0 %v1081_v38 }
 0x189   : > { %v2863_v58 = vadd.f32 %v937_v54, %v2780_v6  ;;  %v939_v59 = vpop.f32.mrb[23].mxu0  ;;  %v2048_v54 = vpop.f32.mrb[31].mxu1 }
 0x18a   : > { %v940_v63 = vadd.f32 %v939_v59, %v2782_v8  ;;  %v1053_v59 = vadd.f32 %v2046_v46, %v2784_v10  ;;  %v2049_v60 = vadd.f32 %v2048_v54, %v2047_v50 }
 0x18b   : > { %v1064_v3 = vpack.c.bf16 %v2863_v58, %v2859_v51 }
 0x18c   : > { %v1072_v5 = vpack.c.bf16 %v940_v63, %v936_v61  ;;  %v1056_v0 = vadd.f32 %v2049_v60, %v2784_v10 }
 0x18e   : > { %v943_v9 = vpop.f32.mrb[24].mxu0  ;;  %2092 = vmatprep.subr.bf16.mxu1 %v1072_v5  ;;  %v1082_v1 = vpack.c.bf16 %v1056_v0, %v1053_v59 }
 0x18f   : > { %v944_v14 = vadd.f32 %v943_v9, %v2780_v6  ;;  %v945_v15 = vpop.f32.mrb[25].mxu0  ;;  %2093 = vmatpush3.bf16.xpose.msra.mxu1 %v1072_v5 }
 0x190   : > { %v947_v17 = vpop.f32.mrb[26].mxu0  ;;  %v946_v25 = vadd.f32 %v945_v15, %v2782_v8  ;;  %2128 = vmatprep.subr.bf16.mxu0 %v1082_v1 }
 0x191   : > { %v948_v21 = vadd.f32 %v947_v17, %v2780_v6  ;;  %v949_v22 = vpop.f32.mrb[27].mxu0  ;;  %2129 = vmatpush3.bf16.msra.mxu0 %v1082_v1 }
 0x192   : > { %v950_v27 = vadd.f32 %v949_v22, %v2782_v8 }
 0x193   : > { %v1065_v32 = vpack.c.bf16 %v948_v21, %v944_v14 }
 0x194   : > { %v1073_v33 = vpack.c.bf16 %v950_v27, %v946_v25 }
 0x196   : > { %v953_v37 = vpop.f32.mrb[28].mxu0  ;;  %2094 = vmatprep.subr.bf16.mxu1 %v1073_v33 }
 0x197   : > { %v954_v40 = vadd.f32 %v953_v37, %v2780_v6  ;;  %v955_v41 = vpop.f32.mrb[29].mxu0  ;;  %2095 = vmatpush3.bf16.xpose.msra.mxu1 %v1073_v33 }
 0x198   : > { %v957_v45 = vpop.f32.mrb[30].mxu0  ;;  %v956_v56 = vadd.f32 %v955_v41, %v2782_v8 }
 0x199   : > { %v958_v52 = vadd.f32 %v957_v45, %v2780_v6  ;;  %v959_v53 = vpop.f32.mrb[31].mxu0 }
 0x19a   : > { %v960_v57 = vadd.f32 %v959_v53, %v2782_v8  ;;  %v1899_v8 = vld [vmem:[%s414_s28] ss:$0 sm:$0xff] }
 0x19b   : > { %v1066_v61 = vpack.c.bf16 %v958_v52, %v954_v40 }
 0x19c   : > { %v1074_v63 = vpack.c.bf16 %v960_v57, %v956_v56 }
 0x19e   : > { %2096 = vmatprep.subr.bf16.mxu1 %v1074_v63 }
 0x19f   : > { %2097 = vmatpush3.bf16.xpose.msra.mxu1 %v1074_v63 }
 0x1a0   : > { %2146 = vmatprep.subr.bf16.mxu1 %v2792_v28 }
 0x1a6   : > { %2099 = vmatmul.mubr.bf16.vlgmr.msra.gmra.mrb[32].mxu1 %v1060_v43 }
 0x1a7   : > { %2102 = vmatprep.mubr.bf16.mxu1 %v1061_v62  ;;  %2154 = vmatpush3.bf16.msra.mxu1 %v2792_v28 }
 0x1a8   : > { %2147 = vmatprep.subr.bf16.mxu1 %v2808_v47 }
 0x1ab   : > { %2155 = vmatpush3.bf16.msra.mxu1 %v2808_v47 }
 0x1ac   : > { %2148 = vmatprep.subr.bf16.mxu1 %v2824_v2 }
 0x1ae   : > { %2103 = vmatmul.mubr.bf16.gmra.mrb[36].mxu1 %v1062_v20 }
 0x1af   : > { %2106 = vmatprep.mubr.bf16.mxu1 %v1063_v42  ;;  %2156 = vmatpush3.bf16.msra.mxu1 %v2824_v2 }
 0x1b0   : > { %2149 = vmatprep.subr.bf16.mxu1 %v2840_v24 }
 0x1b3   : > { %2157 = vmatpush3.bf16.msra.mxu1 %v2840_v24 }
 0x1b4   : > { %2150 = vmatprep.subr.bf16.mxu1 %v2856_v48 }
 0x1b6   : > { %2107 = vmatmul.mubr.bf16.gmra.mrb[40].mxu1 %v1064_v3 }
 0x1b7   : > { %2110 = vmatprep.mubr.bf16.mxu1 %v1065_v32  ;;  %2158 = vmatpush3.bf16.msra.mxu1 %v2856_v48 }
 0x1b8   : > { %2151 = vmatprep.subr.bf16.mxu1 %v2872_v11 }
 0x1bb   : > { %2159 = vmatpush3.bf16.msra.mxu1 %v2872_v11 }
 0x1bc   : > { %2152 = vmatprep.subr.bf16.mxu1 %v1081_v38 }
 0x1be   : > { %2111 = vmatmul.mubr.bf16.gmra.mrb[44].mxu1 %v1066_v61 }
 0x1bf   : > { %2160 = vmatpush3.bf16.msra.mxu1 %v1081_v38 }
 0x1c0   : > { %2153 = vmatprep.subr.bf16.mxu1 %v1082_v1 }
 0x1c3   : > { %2161 = vmatpush3.bf16.msra.mxu1 %v1082_v1 }
 0x279   : > { %v2100_v6 = vpop.f32.mrb[32].mxu1 }
 0x27a   : > { %v1182_v10 = vmul.f32 0.088388346, %v2100_v6  ;;  %v1117_v28 = vpop.f32.mrb[33].mxu1 }
 0x27b   : > { %v2101_v30 = vpop.f32.mrb[34].mxu1  ;;  %v1180_v36 = vmul.f32 0.088388346, %v1117_v28 }
 0x27c   : > { %v1183_v43 = vmul.f32 0.088388346, %v2101_v30  ;;  %v1120_v47 = vpop.f32.mrb[35].mxu1  ;;  %v1205_v49 = vadd.f32 %v1899_v8, %v1182_v10 }
 0x27d   : > { %v1181_v62 = vmul.f32 0.088388346, %v1120_v47  ;;  %v1203_v2 = vadd.f32 %v1899_v8, %v1180_v36 }
 0x27e   : > { %1223 = vmax.xlane.f32.xlu0 %v1205_v49  ;;  %v1206_v55 = vadd.f32 %v1899_v8, %v1183_v43 }
 0x27f   : > { %v1204_v34 = vadd.f32 %v1899_v8, %v1181_v62 }
 0x280   : > { %1225 = vmax.xlane.f32.xlu1 %v1206_v55 }
 0x281   : > { %v2104_v4 = vpop.f32.mrb[36].mxu1 }
 0x282   : > { %1219 = vmax.xlane.f32.xlu0 %v1203_v2  ;;  %v1133_v13 = vpop.f32.mrb[37].mxu1  ;;  %v1186_v24 = vmul.f32 0.088388346, %v2104_v4 }
 0x283   : > { %v2105_v20 = vpop.f32.mrb[38].mxu1  ;;  %v1184_v51 = vmul.f32 0.088388346, %v1133_v13 }
 0x284   : > { %v1136_v26 = vpop.f32.mrb[39].mxu1  ;;  %v2919_v58 = vadd.f32 %v1899_v8, %v1186_v24  ;;  %v1187_v29 = vmul.f32 0.088388346, %v2105_v20 }
 0x285   : > { %v1185_v42 = vmul.f32 0.088388346, %v1136_v26  ;;  %v1207_v14 = vadd.f32 %v1899_v8, %v1184_v51 }
 0x286   : > { %1221 = vmax.xlane.f32.xlu0 %v1204_v34  ;;  %v2934_v37 = vadd.f32 %v1899_v8, %v1187_v29 }
 0x287   : > { %v1208_v48 = vadd.f32 %v1899_v8, %v1185_v42 }
 0x289   : > { %1229 = vmax.xlane.f32.xlu1 %v1208_v48  ;;  %v2108_v3 = vpop.f32.mrb[40].mxu1 }
 0x28a   : > { %1231 = vmax.xlane.f32.xlu0 %v2919_v58  ;;  %v1149_v5 = vpop.f32.mrb[41].mxu1  ;;  %v1190_v11 = vmul.f32 0.088388346, %v2108_v3 }
 0x28b   : > { %v1188_v7 = vmul.f32 0.088388346, %v1149_v5  ;;  %v2109_v9 = vpop.f32.mrb[42].mxu1 }
 0x28c   : > { %v1152_v12 = vpop.f32.mrb[43].mxu1  ;;  %v1191_v15 = vmul.f32 0.088388346, %v2109_v9  ;;  %v2925_v17 = vadd.f32 %v1899_v8, %v1190_v11 }
 0x28d   : > { %v2922_v16 = vadd.f32 %v1899_v8, %v1188_v7  ;;  %v1189_v18 = vmul.f32 0.088388346, %v1152_v12 }
 0x28e   : > { %1227 = vmax.xlane.f32.xlu0 %v1207_v14  ;;  %v1214_v21 = vadd.f32 %v1899_v8, %v1191_v15 }
 0x28f   : > { %1235 = vmax.xlane.f32.xlu1 %v2922_v16  ;;  %v2928_v32 = vadd.f32 %v1899_v8, %v1189_v18 }
 0x291   : > { %v2112_v19 = vpop.f32.mrb[44].mxu1 }
 0x292   : > { %1239 = vmax.xlane.f32.xlu0 %v2925_v17  ;;  %v1165_v22 = vpop.f32.mrb[45].mxu1  ;;  %v1194_v31 = vmul.f32 0.088388346, %v2112_v19 }
 0x293   : > { %v1192_v23 = vmul.f32 0.088388346, %v1165_v22  ;;  %1241 = vmax.xlane.f32.xlu1 %v1214_v21  ;;  %v2113_v25 = vpop.f32.mrb[46].mxu1 }
 0x294   : > { %v1168_v27 = vpop.f32.mrb[47].mxu1  ;;  %v2936_v38 = vadd.f32 %v1899_v8, %v1194_v31  ;;  %v1195_v39 = vmul.f32 0.088388346, %v2113_v25 }
 0x295   : > { %v2930_v33 = vadd.f32 %v1899_v8, %v1192_v23  ;;  %v1193_v35 = vmul.f32 0.088388346, %v1168_v27 }
 0x296   : > { %v2943_v41 = vadd.f32 %v1899_v8, %v1195_v39 }
 0x297   : > { %1237 = vmax.xlane.f32.xlu1 %v2928_v32  ;;  %1243 = vmax.xlane.f32.xlu0 %v2930_v33  ;;  %v2940_v40 = vadd.f32 %v1899_v8, %v1193_v35 }
 0x29b   : > { %1233 = vmax.xlane.f32.xlu1 %v2934_v37  ;;  %1247 = vmax.xlane.f32.xlu0 %v2936_v38 }
 0x29f   : > { %1245 = vmax.xlane.f32.xlu1 %v2940_v40 }
 0x2a3   : > { %1249 = vmax.xlane.f32.xlu1 %v2943_v41 }
 0x30b   : > { %v1224_v44 = vpop.xlane.xlu0 %1223 }
 0x30c   : > { %v1253_v45 = vsub.f32 %v1205_v49, %v1224_v44 }
 0x30d   : > { %v1226_v46 = vpop.xlane.xlu1 %1225 }
 0x30e   : > { %v1271_v50 = vmul.f32 1.442695, %v1253_v45  ;;  %v1254_v52 = vsub.f32 %v1206_v55, %v1226_v46 }
 0x30f   : > { %v1220_v53 = vpop.xlane.xlu0 %1219 }
 0x310   : > { %2324 = vpow2.f32 %v1271_v50  ;;  %v1273_v54 = vmul.f32 1.442695, %v1254_v52  ;;  %v1251_v56 = vsub.f32 %v1203_v2, %v1220_v53 }
 0x312   : > { %2326 = vpow2.f32 %v1273_v54  ;;  %v1267_v57 = vmul.f32 1.442695, %v1251_v56 }
 0x313   : > { %v1222_v59 = vpop.xlane.xlu0 %1221 }
 0x314   : > { %2328 = vpow2.f32 %v1267_v57  ;;  %v1252_v60 = vsub.f32 %v1204_v34, %v1222_v59 }
 0x316   : > { %v1269_v61 = vmul.f32 1.442695, %v1252_v60  ;;  %v1230_v63 = vpop.xlane.xlu1 %1229 }
 0x317   : > { %v1256_v0 = vsub.f32 %v1208_v48, %v1230_v63  ;;  %v1232_v1 = vpop.xlane.xlu0 %1231 }
 0x318   : > { %2330 = vpow2.f32 %v1269_v61  ;;  %v1257_v26 = vsub.f32 %v2919_v58, %v1232_v1 }
 0x319   : > { %v1277_v6 = vmul.f32 1.442695, %v1256_v0 }
 0x31a   : > { %v2946_v8 = vpop.eup %2324  ;;  %v1279_v7 = vmul.f32 1.442695, %v1257_v26 }
 0x31b   : > { %2332 = vpow2.f32 %v1277_v6  ;;  %v1228_v10 = vpop.xlane.xlu0 %1227  ;;  %1303 = vadd.xlane.f32.xlu0 %v2946_v8 }
 0x31c   : > { %v2949_v28 = vpop.eup %2326  ;;  %v1255_v30 = vsub.f32 %v1207_v14, %v1228_v10  ;;  %v1236_v36 = vpop.xlane.xlu1 %1235 }
 0x31d   : > { %1305 = vadd.xlane.f32.xlu1 %v2949_v28  ;;  %v1259_v55 = vsub.f32 %v2922_v16, %v1236_v36 }
 0x31e   : > { %v2952_v43 = vpop.eup %2328  ;;  %v1275_v47 = vmul.f32 1.442695, %v1255_v30 }
 0x31f   : > { %v1240_v49 = vpop.xlane.xlu0 %1239  ;;  %1299 = vadd.xlane.f32.xlu0 %v2952_v43  ;;  %v1283_v34 = vmul.f32 1.442695, %v1259_v55 }
 0x320   : > { %2334 = vpow2.f32 %v1275_v47  ;;  %v1261_v62 = vsub.f32 %v2925_v17, %v1240_v49  ;;  %v1242_v2 = vpop.xlane.xlu1 %1241 }
 0x321   : > { %v1262_v4 = vsub.f32 %v1214_v21, %v1242_v2 }
 0x322   : > { %v2957_v13 = vpop.eup %2330  ;;  %v1287_v20 = vmul.f32 1.442695, %v1261_v62 }
 0x323   : > { %v1289_v24 = vmul.f32 1.442695, %v1262_v4  ;;  %1301 = vadd.xlane.f32.xlu1 %v2957_v13 }
 0x324   : > { %2336 = vpow2.f32 %v1287_v20  ;;  %v1238_v42 = vpop.xlane.xlu1 %1237  ;;  %v1244_v48 = vpop.xlane.xlu0 %1243 }
 0x325   : > { %v2961_v51 = vpop.eup %2332  ;;  %2338 = vpow2.f32 %v1289_v24  ;;  %v1260_v3 = vsub.f32 %v2928_v32, %v1238_v42  ;;  %v1263_v9 = vsub.f32 %v2930_v33, %v1244_v48 }
 0x326   : > { %2340 = vpow2.f32 %v1283_v34 }
 0x327   : > { %v1285_v5 = vmul.f32 1.442695, %v1260_v3  ;;  %1309 = vadd.xlane.f32.xlu1 %v2961_v51  ;;  %v1291_v16 = vmul.f32 1.442695, %v1263_v9 }
 0x328   : > { %v1234_v11 = vpop.xlane.xlu1 %1233  ;;  %v1248_v12 = vpop.xlane.xlu0 %1247 }
 0x329   : > { %2342 = vpow2.f32 %v1285_v5  ;;  %v1258_v58 = vsub.f32 %v2934_v37, %v1234_v11  ;;  %v1265_v17 = vsub.f32 %v2936_v38, %v1248_v12 }
 0x32a   : > { %v2967_v14 = vpop.eup %2334  ;;  %2344 = vpow2.f32 %v1279_v7 }
 0x32b   : > { %v1281_v15 = vmul.f32 1.442695, %v1258_v58  ;;  %1307 = vadd.xlane.f32.xlu0 %v2967_v14  ;;  %v1295_v25 = vmul.f32 1.442695, %v1265_v17 }
 0x32c   : > { %v1246_v18 = vpop.xlane.xlu1 %1245 }
 0x32d   : > { %2346 = vpow2.f32 %v1281_v15  ;;  %v1264_v19 = vsub.f32 %v2940_v40, %v1246_v18 }
 0x32e   : > { %v2972_v21 = vpop.eup %2336  ;;  %2348 = vpow2.f32 %v1291_v16 }
 0x32f   : > { %v2974_v22 = vpop.eup %2338  ;;  %v1293_v23 = vmul.f32 1.442695, %v1264_v19  ;;  %1319 = vadd.xlane.f32.xlu0 %v2972_v21 }
 0x330   : > { %1321 = vadd.xlane.f32.xlu1 %v2974_v22  ;;  %v1250_v27 = vpop.xlane.xlu1 %1249  ;;  %v2979_v31 = vpop.eup %2340 }
 0x331   : > { %2350 = vpow2.f32 %v1293_v23  ;;  %v1266_v29 = vsub.f32 %v2943_v41, %v1250_v27 }
 0x332   : > { %2352 = vpow2.f32 %v1295_v25 }
 0x333   : > { %v2981_v32 = vpop.eup %2342  ;;  %v1297_v33 = vmul.f32 1.442695, %v1266_v29  ;;  %1315 = vadd.xlane.f32.xlu0 %v2979_v31 }
 0x334   : > { %1317 = vadd.xlane.f32.xlu1 %v2981_v32  ;;  %v2985_v35 = vpop.eup %2344 }
 0x335   : > { %2354 = vpow2.f32 %v1297_v33 }
 0x337   : > { %v2987_v37 = vpop.eup %2346  ;;  %1311 = vadd.xlane.f32.xlu0 %v2985_v35 }
 0x338   : > { %1313 = vadd.xlane.f32.xlu1 %v2987_v37  ;;  %v2991_v38 = vpop.eup %2348 }
 0x33b   : > { %v2993_v39 = vpop.eup %2350  ;;  %1323 = vadd.xlane.f32.xlu0 %v2991_v38 }
 0x33c   : > { %1325 = vadd.xlane.f32.xlu1 %v2993_v39  ;;  %v2997_v40 = vpop.eup %2352 }
 0x33f   : > { %v2999_v41 = vpop.eup %2354  ;;  %1327 = vadd.xlane.f32.xlu0 %v2997_v40 }
 0x340   : > { %1329 = vadd.xlane.f32.xlu1 %v2999_v41 }
 0x3a8   : > { %v1304_v44 = vpop.xlane.xlu0 %1303 }
 0x3aa   : > { %v1306_v45 = vpop.xlane.xlu1 %1305 }
 0x3ab   : > { %2356 = vrcp.f32 %v1306_v45 }
 0x3ac   : > { %v1300_v46 = vpop.xlane.xlu0 %1299 }
 0x3ad   : > { %2358 = vrcp.f32 %v1300_v46 }
 0x3ae   : > { %2360 = vrcp.f32 %v1304_v44 }
 0x3b0   : > { %v1302_v50 = vpop.xlane.xlu1 %1301 }
 0x3b1   : > { %2362 = vrcp.f32 %v1302_v50 }
 0x3b4   : > { %v1310_v52 = vpop.xlane.xlu1 %1309 }
 0x3b5   : > { %2364 = vrcp.f32 %v1310_v52  ;;  %v2357_v53 = vpop.eup %2356 }
 0x3b6   : > { %v1350_v60 = vmul.f32 %v2357_v53, %v2949_v28 }
 0x3b7   : > { %v2359_v56 = vpop.eup %2358 }
 0x3b8   : > { %v1308_v54 = vpop.xlane.xlu0 %1307  ;;  %v2361_v57 = vpop.eup %2360  ;;  %v1347_v63 = vmul.f32 %v2359_v56, %v2952_v43 }
 0x3b9   : > { %2366 = vrcp.f32 %v1308_v54  ;;  %v1349_v1 = vmul.f32 %v2361_v57, %v2946_v8 }
 0x3bb   : > { %v2363_v59 = vpop.eup %2362  ;;  %v1364_v30 = vpack.c.bf16 %v1350_v60, %v1349_v1 }
 0x3bc   : > { %v1320_v61 = vpop.xlane.xlu0 %1319  ;;  %v1348_v0 = vmul.f32 %v2363_v59, %v2957_v13 }
 0x3bd   : > { %v1322_v6 = vpop.xlane.xlu1 %1321  ;;  %2368 = vrcp.f32 %v1320_v61 }
 0x3be   : > { %v1363_v10 = vpack.c.bf16 %v1348_v0, %v1347_v63  ;;  %2370 = vrcp.f32 %v1322_v6 }
 0x3bf   : > { %v2365_v47 = vpop.eup %2364 }
 0x3c0   : > { %v1316_v36 = vpop.xlane.xlu0 %1315  ;;  %2130 = vmatprep.mubr.bf16.mxu0 %v1363_v10  ;;  %v1352_v62 = vmul.f32 %v2365_v47, %v2961_v51 }
 0x3c1   : > { %2372 = vrcp.f32 %v1316_v36  ;;  %2131 = vmatmul.mubr.bf16.vlgmr.msra.gmra.mrb[32].mxu0 %v1364_v30  ;;  %v1318_v49 = vpop.xlane.xlu1 %1317 }
 0x3c2   : > { %2374 = vrcp.f32 %v1318_v49 }
 0x3c3   : > { %v2367_v28 = vpop.eup %2366 }
 0x3c4   : > { %v1312_v55 = vpop.xlane.xlu0 %1311  ;;  %v1351_v43 = vmul.f32 %v2367_v28, %v2967_v14 }
 0x3c5   : > { %2376 = vrcp.f32 %v1312_v55  ;;  %v1314_v8 = vpop.xlane.xlu1 %1313 }
 0x3c6   : > { %2378 = vrcp.f32 %v1314_v8  ;;  %v1365_v2 = vpack.c.bf16 %v1352_v62, %v1351_v43 }
 0x3c7   : > { %v2369_v4 = vpop.eup %2368 }
 0x3c8   : > { %v1324_v13 = vpop.xlane.xlu0 %1323  ;;  %2134 = vmatprep.mubr.bf16.mxu0 %v1365_v2  ;;  %v2371_v20 = vpop.eup %2370  ;;  %v1357_v42 = vmul.f32 %v2369_v4, %v2972_v21 }
 0x3c9   : > { %2380 = vrcp.f32 %v1324_v13  ;;  %v1326_v24 = vpop.xlane.xlu1 %1325  ;;  %v1358_v48 = vmul.f32 %v2371_v20, %v2974_v22 }
 0x3ca   : > { %2382 = vrcp.f32 %v1326_v24 }
 0x3cb   : > { %v2373_v26 = vpop.eup %2372  ;;  %v1368_v12 = vpack.c.bf16 %v1358_v48, %v1357_v42 }
 0x3cc   : > { %v2375_v34 = vpop.eup %2374  ;;  %v1328_v3 = vpop.xlane.xlu0 %1327  ;;  %v1355_v51 = vmul.f32 %v2373_v26, %v2979_v31 }
 0x3cd   : > { %2384 = vrcp.f32 %v1328_v3  ;;  %v1330_v5 = vpop.xlane.xlu1 %1329  ;;  %v1356_v7 = vmul.f32 %v2375_v34, %v2981_v32 }
 0x3ce   : > { %2386 = vrcp.f32 %v1330_v5 }
 0x3cf   : > { %v2377_v9 = vpop.eup %2376  ;;  %v1367_v11 = vpack.c.bf16 %v1356_v7, %v1355_v51 }
 0x3d0   : > { %v2379_v58 = vpop.eup %2378  ;;  %v1353_v14 = vmul.f32 %v2377_v9, %v2985_v35 }
 0x3d1   : > { %2138 = vmatprep.mubr.bf16.mxu1 %v1367_v11  ;;  %v1354_v15 = vmul.f32 %v2379_v58, %v2987_v37 }
 0x3d2   : > { %2139 = vmatmul.mubr.bf16.vlgmr.msra.gmra.mrb[48].mxu1 %v1368_v12 }
 0x3d3   : > { %v2381_v16 = vpop.eup %2380  ;;  %v1366_v17 = vpack.c.bf16 %v1354_v15, %v1353_v14 }
 0x3d4   : > { %v2383_v18 = vpop.eup %2382  ;;  %v1359_v19 = vmul.f32 %v2381_v16, %v2991_v38 }
 0x3d5   : > { %2135 = vmatmul.mubr.bf16.gmra.mrb[36].mxu0 %v1366_v17  ;;  %v1360_v21 = vmul.f32 %v2383_v18, %v2993_v39 }
 0x3d7   : > { %v2385_v22 = vpop.eup %2384  ;;  %v1369_v23 = vpack.c.bf16 %v1360_v21, %v1359_v19 }
 0x3d8   : > { %v2387_v25 = vpop.eup %2386  ;;  %v1361_v27 = vmul.f32 %v2385_v22, %v2997_v40 }
 0x3d9   : > { %2142 = vmatprep.mubr.bf16.mxu1 %v1369_v23  ;;  %v1362_v29 = vmul.f32 %v2387_v25, %v2999_v41 }
 0x3db   : > { %v1370_v31 = vpack.c.bf16 %v1362_v29, %v1361_v27 }
 0x3dd   : > { %2143 = vmatmul.mubr.bf16.gmra.mrb[52].mxu1 %v1370_v31 }
 0x494   : > { %v2132_v32 = vpop.f32.mrb[32].mxu0 }
 0x495   : > { %v1405_v33 = vpop.f32.mrb[33].mxu0 }
 0x496   : > { %v2133_v35 = vpop.f32.mrb[34].mxu0 }
 0x497   : > { %v1947_v37 = vpack.c.bf16 %v2133_v35, %v2132_v32  ;;  %v1408_v38 = vpop.f32.mrb[35].mxu0 }
 0x498   : > { %v1942_v44 = vpack.c.bf16 %v1408_v38, %v1405_v33 }
 0x499   : > { %1979 = vst [vmem:[%s3020_s5 + $0x8] sm:$0xff] %v1947_v37  }
 0x49a   : > { %1943 = vst [vmem:[%s3020_s5] sm:$0xff] %v1942_v44  }
 0x4a0   : > { %v1578_v36 = vld [vmem:[%s3020_s5 + $0x8] sm:$0xf] (%p2552_p9)  ;;  %v1580_v47 = vld [vmem:[%s3020_s5 + $0xc] sm:$0xf] (%p2552_p9) }
 0x4a1   : > { %v1574_v10 = vld [vmem:[%s3020_s5] sm:$0xf] (%p2552_p9)  ;;  %v1576_v30 = vld [vmem:[%s3020_s5 + $0x4] sm:$0xf] (%p2552_p9)  ;;  %1579 = vst [vmem:[%s1558_s11 + $0x10] sm:$0xf] (%p2552_p9), %v1578_v36 }
 0x4a2   : > { %1575 = vst [vmem:[%s1558_s11] sm:$0xf] (%p2552_p9), %v1574_v10  ;;  %1577 = vst [vmem:[%s1558_s11 + $0x8] sm:$0xf] (%p2552_p9), %v1576_v30 }
 0x4a3   : > { %1581 = vst [vmem:[%s1558_s11 + $0x18] sm:$0xf] (%p2552_p9), %v1580_v47 }
 0x4a5   : > { %v2140_v39 = vpop.f32.mrb[48].mxu1 }
 0x4a6   : > { %v1437_v40 = vpop.f32.mrb[49].mxu1 }
 0x4a7   : > { %v2141_v41 = vpop.f32.mrb[50].mxu1 }
 0x4a8   : > { %v1967_v45 = vpack.c.bf16 %v2141_v41, %v2140_v39  ;;  %v2136_v46 = vpop.f32.mrb[36].mxu0  ;;  %v1440_v50 = vpop.f32.mrb[51].mxu1 }
 0x4a9   : > { %v1962_v52 = vpack.c.bf16 %v1440_v50, %v1437_v40  ;;  %v1421_v53 = vpop.f32.mrb[37].mxu0 }
 0x4aa   : > { %1983 = vst [vmem:[%s3020_s5 + $0x28] sm:$0xff] %v1967_v45   ;;  %v2137_v54 = vpop.f32.mrb[38].mxu0 }
 0x4ab   : > { %1982 = vst [vmem:[%s3020_s5 + $0x20] sm:$0xff] %v1962_v52   ;;  %v1957_v56 = vpack.c.bf16 %v2137_v54, %v2136_v46  ;;  %v1424_v57 = vpop.f32.mrb[39].mxu0 }
 0x4ac   : > { %v1952_v59 = vpack.c.bf16 %v1424_v57, %v1421_v53 }
 0x4ad   : > { %1981 = vst [vmem:[%s3020_s5 + $0x18] sm:$0xff] %v1957_v56  }
 0x4ae   : > { %1980 = vst [vmem:[%s3020_s5 + $0x10] sm:$0xff] %v1952_v59  }
 0x4b0   : > { %v2144_v60 = vpop.f32.mrb[52].mxu1  ;;  %1554 = sbr.rel (!%p2552_p9) target bundleno = 1216 (0x4c0), region = 66 }
 0x4b1   : > { %v1453_v61 = vpop.f32.mrb[53].mxu1  ;;  %v1594_v2 = vld [vmem:[%s3020_s5 + $0x28] sm:$0xf] (%p2552_p9)  ;;  %v1596_v4 = vld [vmem:[%s3020_s5 + $0x2c] sm:$0xf] (%p2552_p9) }
 0x4b2   : > { %v2145_v63 = vpop.f32.mrb[54].mxu1  ;;  %v1590_v62 = vld [vmem:[%s3020_s5 + $0x20] sm:$0xf] (%p2552_p9)  ;;  %v1592_v8 = vld [vmem:[%s3020_s5 + $0x24] sm:$0xf] (%p2552_p9) }
 0x4b3   : > { %v1977_v0 = vpack.c.bf16 %v2145_v63, %v2144_v60  ;;  %v1456_v1 = vpop.f32.mrb[55].mxu1  ;;  %1591 = vst [vmem:[%s1558_s11 + $0x40] sm:$0xf] (%p2552_p9), %v1590_v62  ;;  %1593 = vst [vmem:[%s1558_s11 + $0x48] sm:$0xf] (%p2552_p9), %v1592_v8 }
 0x4b4   : > { %v1972_v6 = vpack.c.bf16 %v1456_v1, %v1453_v61  ;;  %v1586_v55 = vld [vmem:[%s3020_s5 + $0x18] sm:$0xf] (%p2552_p9)  ;;  %v1588_v43 = vld [vmem:[%s3020_s5 + $0x1c] sm:$0xf] (%p2552_p9)  ;;  %1595 = vst [vmem:[%s1558_s11 + $0x50] sm:$0xf] (%p2552_p9), %v1594_v2 }
 0x4b5   : > { %1985 = vst [vmem:[%s3020_s5 + $0x38] sm:$0xff] %v1977_v0   ;;  %v1582_v49 = vld [vmem:[%s3020_s5 + $0x10] sm:$0xf] (%p2552_p9)  ;;  %v1584_v28 = vld [vmem:[%s3020_s5 + $0x14] sm:$0xf] (%p2552_p9) }
 0x4b6   : > { %1984 = vst [vmem:[%s3020_s5 + $0x30] sm:$0xff] %v1972_v6   ;;  %1583 = vst [vmem:[%s1558_s11 + $0x20] sm:$0xf] (%p2552_p9), %v1582_v49 }
 0x4b7   : > { %1585 = vst [vmem:[%s1558_s11 + $0x28] sm:$0xf] %v1584_v28  ;;  %1587 = vst [vmem:[%s1558_s11 + $0x30] sm:$0xf] %v1586_v55 }
 0x4b8   : > { %1589 = vst [vmem:[%s1558_s11 + $0x38] sm:$0xf] %v1588_v43  ;;  %1597 = vst [vmem:[%s1558_s11 + $0x58] sm:$0xf] %v1596_v4 }
 0x4bc   : > { %v1602_v24 = vld [vmem:[%s3020_s5 + $0x38] sm:$0xf]  ;;  %v1604_v26 = vld [vmem:[%s3020_s5 + $0x3c] sm:$0xf] }
 0x4bd   : > { %v1598_v13 = vld [vmem:[%s3020_s5 + $0x30] sm:$0xf]  ;;  %v1600_v20 = vld [vmem:[%s3020_s5 + $0x34] sm:$0xf]  ;;  %1603 = vst [vmem:[%s1558_s11 + $0x70] sm:$0xf] %v1602_v24 }
 0x4be   : > { %1599 = vst [vmem:[%s1558_s11 + $0x60] sm:$0xf] %v1598_v13  ;;  %1601 = vst [vmem:[%s1558_s11 + $0x68] sm:$0xf] %v1600_v20 }
 0x4bf   : > { %1605 = vst [vmem:[%s1558_s11 + $0x78] sm:$0xf] %v1604_v26 }
 0x4c0 PF: > { %s14_s23 = sadd.s32 1, %s2458_s23   ;;  %s3086_s15 = smov %s2430_s16 }
 0x4c1   : > { %p11_p2 = scmp.ge.s32.totalorder %s14_s23, 6   ;;  %s3087_s16 = smov %s2557_s8 }
 0x4c2   : > { %s3088_s17 = smov %s2438_s18  ;;  %s3089_s18 = smov %s2546_s30 }
 0x4c3   : > { %s3090_s19 = smov %s2450_s21  ;;  %s3091_s20 = smov %s2454_s22 }
 0x4c4   : > { %s3092_s21 = smov %s3095_s25  ;;  %s3093_s22 = smov %s3099_s26 }
 0x4c5   :  { %13 = sbr.rel (!%p11_p2) target bundleno = 5 (0x5), region = 153 }

// kernel: bert_latin_forward.10
= control target key start
LH: loop header
LB: loop body
LE: loop exit
PB: predicated region body
PF: predicated region fallthrough
CT: control target
= control target key end

     0   :  { %s1863_s21 = smov 0   ;;  %s1865_s22 = smov 0   ;;  %s2465_s0 = inlined_call_operand.vmem [shape: bf16[256,256], index: 0, kind: input, shape index: {}]   ;;  %s2466_s1 = inlined_call_operand.vmem [shape: bf16[256,256], index: 1, kind: input, shape index: {}]   ;;  %s2467_s2 = inlined_call_operand.vmem [shape: f32[1,256], index: 2, kind: input, shape index: {}]   ;;  %s2468_s3 = inlined_call_operand.vmem [shape: bf16[256,256], index: 3, kind: input, shape index: {}]   ;;  %s2469_s4 = inlined_call_operand.vmem [shape: f32[1,256], index: 4, kind: input, shape index: {}]   ;;  %s2470_s5 = inlined_call_operand.vmem [shape: f32[1,256], index: 5, kind: input, shape index: {}]   ;;  %s2471_s6 = inlined_call_operand.vmem [shape: bf16[256,256], index: 6, kind: output, shape index: {}]  }
   0x1   :  { %s1867_s23 = smov 0   ;;  %s1869_s24 = smov 0  }
   0x2   :  { %s1871_s25 = smov 0   ;;  %s1873_s26 = smov 0  }
   0x3   :  { %s1875_s27 = smov 0  }
   0x4 LB: > { %s25_s28 = sadd.s32 1, %s1816_s25  ;;  %s28_s29 = sadd.s32 1, %s1820_s26  ;;  %s1824_s27 = sphi %s1875_s27, %s16_s27   ;;  %s1820_s26 = sphi %s1873_s26, %s2477_s26   ;;  %s1816_s25 = sphi %s1871_s25, %s2476_s25   ;;  %s1812_s24 = sphi %s1869_s24, %s2475_s24   ;;  %s1808_s23 = sphi %s1867_s23, %s2474_s23   ;;  %s1804_s22 = sphi %s1865_s22, %s2473_s22   ;;  %s1800_s21 = sphi %s1863_s21, %s2472_s21  }
   0x5   : > { %p26_p0 = scmp.ge.s32.totalorder %s25_s28, 2  ;;  %p44_p1 = scmp.ne.s32.totalorder %s1804_s22, %s1800_s21 }
   0x6   : > { %p45_p2 = scmp.eq.s32.totalorder %s1824_s27, 0  ;;  %s37_s9 = sadd.s32 1, %s1804_s22 }
   0x7   : > { %s2479_s28 = smov (%p26_p0, %s25_s28), 0  ;;  %s2481_s29 = smov (!%p26_p0, %s28_s29), %s1820_s26 }
   0x8   : > { %p46_p3 = por %p45_p2, %p44_p1  ;;  %p30_p4 = scmp.ge.s32.totalorder %s2481_s29, 2 }
   0x9   : > { %s33_s30 = ssub.s32 %s1816_s25, %s2479_s28  ;;  %p1552_p6 = scmp.ge.s32.totalorder %s1824_s27, 4 }
   0xa   : > { %s2483_s29 = smov (%p30_p4, %s2481_s29), 0 }
   0xb   : > { %s32_s7 = ssub.s32 %s1820_s26, %s2483_s29  ;;  %220 = sbr.rel (%p1552_p6) target bundleno = 34 (0x22), region = 28 }
   0xc   : > { %s34_s8 = sor.u32 %s33_s30, %s32_s7 }
   0xd   : > { %p35_p5 = scmp.eq.s32.totalorder %s34_s8, 0 }
   0xf   : > { %s1914_s10 = scalar_select %p35_p5, %s1804_s22, %s37_s9  }
  0x12   : > { %223 = sbr.rel (!%p46_p3) target bundleno = 34 (0x22), region = 32  ;;  %s225_s11 = sand.u32 (%p46_p3), 1, %s1804_s22  }
  0x13   : > { %s1612_s12 = sshll.u32 (%p46_p3), %s1820_s26, 5  ;;  %s1553_s13 = sshll.u32 (%p46_p3), %s225_s11, 6 }
  0x14   : > { %s230_s14 = sadd.s32 (%p46_p3), %s1816_s25, %s1612_s12  ;;  %s227_s19 = scalar_lea.vmem (%p46_p3), [#allocation3], %s1553_s13 }
  0x15   : > { %s1556_s15 = sshll.u32 (%p46_p3), %s230_s14, 2 }
  0x16   : > { %s1923_s18 = scalar_lea.vmem (%p46_p3), %s2465_s0, %s1556_s15 }
  0x17   : > { %v248_v0 = vld [vmem:[%s1923_s18] sm:$0xf] (%p46_p3)  ;;  %v250_v1 = vld [vmem:[%s1923_s18 + $0x8] sm:$0xf] (%p46_p3)  ;;  %v252_v2 = vld [vmem:[%s1923_s18 + $0x10] sm:$0xf] (%p46_p3) }
  0x18   : > { %249 = vst [vmem:[%s227_s19] sm:$0xf] (%p46_p3), %v248_v0  ;;  %251 = vst [vmem:[%s227_s19 + $0x4] sm:$0xf] (%p46_p3), %v250_v1  ;;  %v254_v3 = vld [vmem:[%s1923_s18 + $0x18] sm:$0xf] (%p46_p3) }
  0x19   : > { %253 = vst [vmem:[%s227_s19 + $0x8] sm:$0xf] %v252_v2  ;;  %v256_v4 = vld [vmem:[%s1923_s18 + $0x20] sm:$0xf]  ;;  %v258_v5 = vld [vmem:[%s1923_s18 + $0x28] sm:$0xf] }
  0x1a   : > { %255 = vst [vmem:[%s227_s19 + $0xc] sm:$0xf] %v254_v3  ;;  %257 = vst [vmem:[%s227_s19 + $0x10] sm:$0xf] %v256_v4  ;;  %v260_v6 = vld [vmem:[%s1923_s18 + $0x30] sm:$0xf] }
  0x1b   : > { %259 = vst [vmem:[%s227_s19 + $0x14] sm:$0xf] %v258_v5  ;;  %v262_v7 = vld [vmem:[%s1923_s18 + $0x38] sm:$0xf]  ;;  %v264_v8 = vld [vmem:[%s1923_s18 + $0x40] sm:$0xf] }
  0x1c   : > { %261 = vst [vmem:[%s227_s19 + $0x18] sm:$0xf] %v260_v6  ;;  %263 = vst [vmem:[%s227_s19 + $0x1c] sm:$0xf] %v262_v7  ;;  %v266_v9 = vld [vmem:[%s1923_s18 + $0x48] sm:$0xf] }
  0x1d   : > { %265 = vst [vmem:[%s227_s19 + $0x20] sm:$0xf] %v264_v8  ;;  %v268_v10 = vld [vmem:[%s1923_s18 + $0x50] sm:$0xf]  ;;  %v270_v11 = vld [vmem:[%s1923_s18 + $0x58] sm:$0xf] }
  0x1e   : > { %267 = vst [vmem:[%s227_s19 + $0x24] sm:$0xf] %v266_v9  ;;  %269 = vst [vmem:[%s227_s19 + $0x28] sm:$0xf] %v268_v10  ;;  %v272_v12 = vld [vmem:[%s1923_s18 + $0x60] sm:$0xf] }
  0x1f   : > { %271 = vst [vmem:[%s227_s19 + $0x2c] sm:$0xf] %v270_v11  ;;  %v274_v13 = vld [vmem:[%s1923_s18 + $0x68] sm:$0xf]  ;;  %v276_v14 = vld [vmem:[%s1923_s18 + $0x70] sm:$0xf] }
  0x20   : > { %273 = vst [vmem:[%s227_s19 + $0x30] sm:$0xf] %v272_v12  ;;  %275 = vst [vmem:[%s227_s19 + $0x34] sm:$0xf] %v274_v13  ;;  %v278_v15 = vld [vmem:[%s1923_s18 + $0x78] sm:$0xf] }
  0x21   : > { %277 = vst [vmem:[%s227_s19 + $0x38] sm:$0xf] %v276_v14  ;;  %279 = vst [vmem:[%s227_s19 + $0x3c] sm:$0xf] %v278_v15 }
  0x22 PF: > { %p1557_p7 = scmp.ge.s32.totalorder %s1824_s27, 1  ;;  %p353_p8 = scmp.lt.s32.totalorder %s1824_s27, 5 }
  0x24   : > { %p354_p9 = pnand %p1557_p7, %p353_p8 }
  0x25   : > { %s360_s20 = sand.u32 (!%p354_p9), 1, %s1800_s21   ;;  %s1559_s30 = sshll.u32 (!%p354_p9), %s1808_s23, 4 }
  0x26   : > { %357 = sbr.rel (%p354_p9) target bundleno = 697 (0x2b9), region = 81  ;;  %s1558_s7 = sshll.u32 (!%p354_p9), %s360_s20, 6 }
  0x27   : > { %p404_p10 = scmp.lt.s32.totalorder (!%p354_p9), %s1559_s30, 31  ;;  %s1562_s8 = sshll.u32 (!%p354_p9), %s1812_s24, 4 }
  0x28   : > { %p411_p11 = scmp.lt.s32.totalorder (!%p354_p9), %s1562_s8, 31  ;;  %s1961_s24 = scalar_lea.vmem (!%p354_p9), [#allocation3], %s1558_s7 }
  0x29   : > { %p1568_p12 = scmp.ne.s32.totalorder (!%p354_p9), %s1808_s23, 0 }
  0x2d   : > { %s2485_s30 = smov (!%p404_p10, %s1559_s30), 31  ;;  %s2487_s8 = smov (!%p411_p11, %s1562_s8), 31 }
  0x2e   : > { %s1613_s9 = sshll.u32 %s2485_s30, 3  ;;  %s1614_s14 = sshll.u32 %s2487_s8, 3  ;;  %v1826_v16 = vmov (!%p1568_p12), 0.0  }
  0x2f   : > { %s1949_s13 = scalar_lea.vmem %s2466_s1, %s1613_s9  ;;  %s1954_s17 = scalar_lea.vmem %s2468_s3, %s1614_s14  ;;  %429 = vst [vmem:[#allocation2] sm:$0xff] (!%p1568_p12), %v1826_v16  ;;  %430 = vst [vmem:[#allocation2 + $0x8] sm:$0xff] (!%p1568_p12), %v1826_v16 }
  0x30   : > { %s1959_s19 = scalar_lea.vmem %s2471_s6, %s1614_s14  ;;  %428 = sbr.rel (%p1568_p12) target bundleno = 63 (0x3f), region = 89  ;;  %431 = vst [vmem:[#allocation2 + $0x10] sm:$0xff] (!%p1568_p12), %v1826_v16  ;;  %432 = vst [vmem:[#allocation2 + $0x18] sm:$0xff] (!%p1568_p12), %v1826_v16 }
  0x31   : > { %433 = vst [vmem:[#allocation2 + $0x20] sm:$0xff] (!%p1568_p12), %v1826_v16  ;;  %434 = vst [vmem:[#allocation2 + $0x28] sm:$0xff] (!%p1568_p12), %v1826_v16 }
  0x32   : > { %435 = vst [vmem:[#allocation2 + $0x30] sm:$0xff] (!%p1568_p12), %v1826_v16  ;;  %436 = vst [vmem:[#allocation2 + $0x38] sm:$0xff] (!%p1568_p12), %v1826_v16 }
  0x33   : > { %437 = vst [vmem:[#allocation2 + $0x40] sm:$0xff] (!%p1568_p12), %v1826_v16  ;;  %438 = vst [vmem:[#allocation2 + $0x48] sm:$0xff] (!%p1568_p12), %v1826_v16 }
  0x34   : > { %439 = vst [vmem:[#allocation2 + $0x50] sm:$0xff] (!%p1568_p12), %v1826_v16  ;;  %440 = vst [vmem:[#allocation2 + $0x58] sm:$0xff] (!%p1568_p12), %v1826_v16 }
  0x35   : > { %441 = vst [vmem:[#allocation2 + $0x60] sm:$0xff] (!%p1568_p12), %v1826_v16  ;;  %442 = vst [vmem:[#allocation2 + $0x68] sm:$0xff] (!%p1568_p12), %v1826_v16 }
  0x36   : > { %443 = vst [vmem:[#allocation2 + $0x70] sm:$0xff] (!%p1568_p12), %v1826_v16  ;;  %444 = vst [vmem:[#allocation2 + $0x78] sm:$0xff] (!%p1568_p12), %v1826_v16 }
  0x37   : > { %445 = vst [vmem:[#allocation2 + $0x80] sm:$0xff] %v1826_v16  ;;  %446 = vst [vmem:[#allocation2 + $0x88] sm:$0xff] %v1826_v16 }
  0x38   : > { %447 = vst [vmem:[#allocation2 + $0x90] sm:$0xff] %v1826_v16  ;;  %448 = vst [vmem:[#allocation2 + $0x98] sm:$0xff] %v1826_v16 }
  0x39   : > { %449 = vst [vmem:[#allocation2 + $0xa0] sm:$0xff] %v1826_v16  ;;  %450 = vst [vmem:[#allocation2 + $0xa8] sm:$0xff] %v1826_v16 }
  0x3a   : > { %451 = vst [vmem:[#allocation2 + $0xb0] sm:$0xff] %v1826_v16  ;;  %452 = vst [vmem:[#allocation2 + $0xb8] sm:$0xff] %v1826_v16 }
  0x3b   : > { %453 = vst [vmem:[#allocation2 + $0xc0] sm:$0xff] %v1826_v16  ;;  %454 = vst [vmem:[#allocation2 + $0xc8] sm:$0xff] %v1826_v16 }
  0x3c   : > { %455 = vst [vmem:[#allocation2 + $0xd0] sm:$0xff] %v1826_v16  ;;  %456 = vst [vmem:[#allocation2 + $0xd8] sm:$0xff] %v1826_v16 }
  0x3d   : > { %457 = vst [vmem:[#allocation2 + $0xe0] sm:$0xff] %v1826_v16  ;;  %458 = vst [vmem:[#allocation2 + $0xe8] sm:$0xff] %v1826_v16 }
  0x3e   : > { %459 = vst [vmem:[#allocation2 + $0xf0] sm:$0xff] %v1826_v16  ;;  %460 = vst [vmem:[#allocation2 + $0xf8] sm:$0xff] %v1826_v16 }
  0x3f PF: > { %v1706_v17 = vld [vmem:[%s1949_s13 + $0x4] ss:$8 sps:$4 sm:$0xff]   ;;  %v1708_v18 = vld [vmem:[%s1949_s13] ss:$8 sps:$4 sm:$0xff]   ;;  %v1827_v19 = vmov 0   ;;  %v1734_v38 = vld [vmem:[%s1961_s24 + $0x10] sm:$0xff]  }
  0x40   : > { %685 = vmatprep.mubr.bf16.mxu0 %v1827_v19  ;;  %725 = vmatprep.mubr.bf16.mxu1 %v1827_v19  ;;  %v1709_v20 = vld [vmem:[%s1949_s13 + $0x14] ss:$8 sps:$4 sm:$0xff]   ;;  %v1711_v21 = vld [vmem:[%s1949_s13 + $0x10] ss:$8 sps:$4 sm:$0xff]   ;;  %v1712_v22 = vld [vmem:[%s1949_s13 + $0x24] ss:$8 sps:$4 sm:$0xff]  }
  0x41   : > { %653 = vmatprep.subr.bf16.mxu0 %v1706_v17  ;;  %1632 = vmatprep.subr.bf16.mxu1 %v1706_v17  ;;  %v1714_v23 = vld [vmem:[%s1949_s13 + $0x20] ss:$8 sps:$4 sm:$0xff]   ;;  %v1715_v24 = vld [vmem:[%s1949_s13 + $0x34] ss:$8 sps:$4 sm:$0xff]   ;;  %v1717_v25 = vld [vmem:[%s1949_s13 + $0x30] ss:$8 sps:$4 sm:$0xff]  }
  0x42   : > { %654 = vmatpush1.bf16.msra.mxu0 %v1708_v18  ;;  %1640 = vmatpush1.bf16.msra.mxu1 %v1708_v18  ;;  %v1718_v26 = vld [vmem:[%s1949_s13 + $0x44] ss:$8 sps:$4 sm:$0xff]   ;;  %v1720_v27 = vld [vmem:[%s1949_s13 + $0x40] ss:$8 sps:$4 sm:$0xff]   ;;  %v1721_v28 = vld [vmem:[%s1949_s13 + $0x54] ss:$8 sps:$4 sm:$0xff]  }
  0x43   : > { %655 = vmatprep.subr.bf16.mxu0 %v1709_v20  ;;  %1633 = vmatprep.subr.bf16.mxu1 %v1709_v20  ;;  %v1723_v29 = vld [vmem:[%s1949_s13 + $0x50] ss:$8 sps:$4 sm:$0xff]   ;;  %v1724_v30 = vld [vmem:[%s1949_s13 + $0x64] ss:$8 sps:$4 sm:$0xff]   ;;  %v1726_v31 = vld [vmem:[%s1949_s13 + $0x60] ss:$8 sps:$4 sm:$0xff]  }
  0x44   : > { %v1727_v32 = vld [vmem:[%s1949_s13 + $0x74] ss:$8 sps:$4 sm:$0xff]   ;;  %v1729_v33 = vld [vmem:[%s1949_s13 + $0x70] ss:$8 sps:$4 sm:$0xff]   ;;  %v1730_v34 = vld [vmem:[%s1961_s24] sm:$0xff]   ;;  %p1593_p13 = scmp.ne.s32.totalorder %s1808_s23, 1 }
  0x45   : > { %v1731_v35 = vld [vmem:[%s1961_s24 + $0x20] sm:$0xff]   ;;  %v1732_v36 = vld [vmem:[%s1961_s24 + $0x8] sm:$0xff]   ;;  %v1735_v39 = vld [vmem:[%s1961_s24 + $0x30] sm:$0xff]  }
  0x46   : > { %656 = vmatpush1.bf16.msra.mxu0 %v1711_v21  ;;  %1641 = vmatpush1.bf16.msra.mxu1 %v1711_v21  ;;  %v1733_v37 = vld [vmem:[%s1961_s24 + $0x28] sm:$0xff]   ;;  %v1736_v40 = vld [vmem:[%s1961_s24 + $0x18] sm:$0xff]   ;;  %v461_v42 = vld [vmem:[#allocation2] sm:$0xff] }
  0x47   : > { %657 = vmatprep.subr.bf16.mxu0 %v1712_v22  ;;  %1634 = vmatprep.subr.bf16.mxu1 %v1712_v22  ;;  %v1737_v41 = vld [vmem:[%s1961_s24 + $0x38] sm:$0xff]   ;;  %v477_v43 = vld [vmem:[#allocation2 + $0x80] sm:$0xff]  ;;  %v462_v44 = vld [vmem:[#allocation2 + $0x8] sm:$0xff] }
  0x48   : > { %v478_v45 = vld [vmem:[#allocation2 + $0x88] sm:$0xff]  ;;  %v463_v48 = vld [vmem:[#allocation2 + $0x10] sm:$0xff]  ;;  %v464_v54 = vld [vmem:[#allocation2 + $0x18] sm:$0xff] }
  0x49   : > { %v479_v49 = vld [vmem:[#allocation2 + $0x90] sm:$0xff]  ;;  %v480_v55 = vld [vmem:[#allocation2 + $0x98] sm:$0xff]  ;;  %v465_v2 = vld [vmem:[#allocation2 + $0x20] sm:$0xff] }
  0x4a   : > { %658 = vmatpush1.bf16.msra.mxu0 %v1714_v23  ;;  %1642 = vmatpush1.bf16.msra.mxu1 %v1714_v23  ;;  %v481_v3 = vld [vmem:[#allocation2 + $0xa0] sm:$0xff]  ;;  %v466_v4 = vld [vmem:[#allocation2 + $0x28] sm:$0xff]  ;;  %v467_v8 = vld [vmem:[#allocation2 + $0x30] sm:$0xff] }
  0x4b   : > { %659 = vmatprep.subr.bf16.mxu0 %v1715_v24  ;;  %1635 = vmatprep.subr.bf16.mxu1 %v1715_v24  ;;  %v482_v5 = vld [vmem:[#allocation2 + $0xa8] sm:$0xff]  ;;  %v483_v9 = vld [vmem:[#allocation2 + $0xb0] sm:$0xff]  ;;  %v468_v14 = vld [vmem:[#allocation2 + $0x38] sm:$0xff] }
  0x4c   : > { %v484_v15 = vld [vmem:[#allocation2 + $0xb8] sm:$0xff] }
  0x4e   : > { %660 = vmatpush1.bf16.msra.mxu0 %v1717_v25  ;;  %1643 = vmatpush1.bf16.msra.mxu1 %v1717_v25 }
  0x4f   : > { %661 = vmatprep.subr.bf16.mxu0 %v1718_v26  ;;  %1636 = vmatprep.subr.bf16.mxu1 %v1718_v26  ;;  %v469_v26 = vld [vmem:[#allocation2 + $0x40] sm:$0xff] }
  0x52   : > { %662 = vmatpush1.bf16.msra.mxu0 %v1720_v27  ;;  %1644 = vmatpush1.bf16.msra.mxu1 %v1720_v27  ;;  %v485_v27 = vld [vmem:[#allocation2 + $0xc0] sm:$0xff] }
  0x53   : > { %663 = vmatprep.subr.bf16.mxu0 %v1721_v28  ;;  %1637 = vmatprep.subr.bf16.mxu1 %v1721_v28  ;;  %v470_v28 = vld [vmem:[#allocation2 + $0x48] sm:$0xff] }
  0x56   : > { %664 = vmatpush1.bf16.msra.mxu0 %v1723_v29  ;;  %1645 = vmatpush1.bf16.msra.mxu1 %v1723_v29  ;;  %v486_v29 = vld [vmem:[#allocation2 + $0xc8] sm:$0xff] }
  0x57   : > { %665 = vmatprep.subr.bf16.mxu0 %v1724_v30  ;;  %1638 = vmatprep.subr.bf16.mxu1 %v1724_v30 }
  0x5a   : > { %666 = vmatpush1.bf16.msra.mxu0 %v1726_v31  ;;  %1646 = vmatpush1.bf16.msra.mxu1 %v1726_v31 }
  0x5b   : > { %667 = vmatprep.subr.bf16.mxu0 %v1727_v32  ;;  %1639 = vmatprep.subr.bf16.mxu1 %v1727_v32  ;;  %v471_v32 = vld [vmem:[#allocation2 + $0x50] sm:$0xff] }
  0x5e   : > { %668 = vmatpush1.bf16.msra.mxu0 %v1729_v33  ;;  %1647 = vmatpush1.bf16.msra.mxu1 %v1729_v33  ;;  %v487_v33 = vld [vmem:[#allocation2 + $0xd0] sm:$0xff] }
  0x61   : > { %686 = vmatmul.mubr.bf16.vlgmr.msra.gmra.mrb[0].mxu0 %v1730_v34  ;;  %726 = vmatmul.mubr.bf16.vlgmr.msra.gmra.mrb[0].mxu1 %v1731_v35 }
  0x62   : > { %695 = vmatprep.mubr.bf16.mxu0 %v1827_v19  ;;  %735 = vmatprep.mubr.bf16.mxu1 %v1827_v19 }
  0x69   : > { %696 = vmatmul.mubr.bf16.gmra.mrb[4].mxu0 %v1732_v36  ;;  %736 = vmatmul.mubr.bf16.gmra.mrb[4].mxu1 %v1733_v37 }
  0x6a   : > { %705 = vmatprep.mubr.bf16.mxu0 %v1827_v19  ;;  %745 = vmatprep.mubr.bf16.mxu1 %v1827_v19 }
  0x71   : > { %706 = vmatmul.mubr.bf16.gmra.mrb[8].mxu0 %v1734_v38  ;;  %746 = vmatmul.mubr.bf16.gmra.mrb[8].mxu1 %v1735_v39  ;;  %v472_v38 = vld [vmem:[#allocation2 + $0x58] sm:$0xff] }
  0x72   : > { %715 = vmatprep.mubr.bf16.mxu0 %v1827_v19  ;;  %755 = vmatprep.mubr.bf16.mxu1 %v1827_v19  ;;  %v488_v39 = vld [vmem:[#allocation2 + $0xd8] sm:$0xff] }
  0x79   : > { %716 = vmatmul.mubr.bf16.gmra.mrb[12].mxu0 %v1736_v40  ;;  %756 = vmatmul.mubr.bf16.gmra.mrb[12].mxu1 %v1737_v41 }
 0x134   : > { %v687_v46 = vpop.f32.mrb[0].mxu0  ;;  %v727_v47 = vpop.f32.mrb[0].mxu1 }
 0x135   : > { %v766_v50 = vadd.f32 %v687_v46, %v461_v42  ;;  %v782_v51 = vadd.f32 %v727_v47, %v477_v43  ;;  %v689_v52 = vpop.f32.mrb[1].mxu0  ;;  %v729_v53 = vpop.f32.mrb[1].mxu1 }
 0x136   : > { %v767_v56 = vadd.f32 %v689_v52, %v462_v44  ;;  %v783_v57 = vadd.f32 %v729_v53, %v478_v45  ;;  %v691_v58 = vpop.f32.mrb[2].mxu0  ;;  %v731_v59 = vpop.f32.mrb[2].mxu1  ;;  %v474_v52 = vld [vmem:[#allocation2 + $0x68] sm:$0xff] }
 0x137   : > { %798 = vst [vmem:[#allocation2] sm:$0xff] %v766_v50  ;;  %814 = vst [vmem:[#allocation2 + $0x80] sm:$0xff] %v782_v51  ;;  %v768_v60 = vadd.f32 %v691_v58, %v463_v48  ;;  %v784_v61 = vadd.f32 %v731_v59, %v479_v49  ;;  %v693_v62 = vpop.f32.mrb[3].mxu0  ;;  %v733_v63 = vpop.f32.mrb[3].mxu1  ;;  %v473_v50 = vld [vmem:[#allocation2 + $0x60] sm:$0xff]  ;;  %v490_v53 = vld [vmem:[#allocation2 + $0xe8] sm:$0xff] }
 0x138   : > { %799 = vst [vmem:[#allocation2 + $0x8] sm:$0xff] %v767_v56  ;;  %815 = vst [vmem:[#allocation2 + $0x88] sm:$0xff] %v783_v57  ;;  %v769_v0 = vadd.f32 %v693_v62, %v464_v54  ;;  %v785_v1 = vadd.f32 %v733_v63, %v480_v55  ;;  %v489_v51 = vld [vmem:[#allocation2 + $0xe0] sm:$0xff]  ;;  %v475_v56 = vld [vmem:[#allocation2 + $0x70] sm:$0xff] }
 0x139   : > { %800 = vst [vmem:[#allocation2 + $0x10] sm:$0xff] %v768_v60  ;;  %816 = vst [vmem:[#allocation2 + $0x90] sm:$0xff] %v784_v61  ;;  %v491_v57 = vld [vmem:[#allocation2 + $0xf0] sm:$0xff]  ;;  %v476_v62 = vld [vmem:[#allocation2 + $0x78] sm:$0xff] }
 0x13a   : > { %801 = vst [vmem:[#allocation2 + $0x18] sm:$0xff] %v769_v0  ;;  %817 = vst [vmem:[#allocation2 + $0x98] sm:$0xff] %v785_v1  ;;  %v492_v63 = vld [vmem:[#allocation2 + $0xf8] sm:$0xff] }
 0x13c   : > { %v697_v6 = vpop.f32.mrb[4].mxu0  ;;  %v737_v7 = vpop.f32.mrb[4].mxu1 }
 0x13d   : > { %v770_v10 = vadd.f32 %v697_v6, %v465_v2  ;;  %v786_v11 = vadd.f32 %v737_v7, %v481_v3  ;;  %v699_v12 = vpop.f32.mrb[5].mxu0  ;;  %v739_v13 = vpop.f32.mrb[5].mxu1 }
 0x13e   : > { %v771_v16 = vadd.f32 %v699_v12, %v466_v4  ;;  %v787_v17 = vadd.f32 %v739_v13, %v482_v5  ;;  %v701_v18 = vpop.f32.mrb[6].mxu0  ;;  %v741_v19 = vpop.f32.mrb[6].mxu1  ;;  %v912_v13 = vld [vmem:[%s1954_s17 + $0x10] sm:$0xff] (!%p1593_p13) }
 0x13f   : > { %802 = vst [vmem:[#allocation2 + $0x20] sm:$0xff] %v770_v10  ;;  %818 = vst [vmem:[#allocation2 + $0xa0] sm:$0xff] %v786_v11  ;;  %v772_v20 = vadd.f32 %v701_v18, %v467_v8  ;;  %v788_v21 = vadd.f32 %v741_v19, %v483_v9  ;;  %v703_v22 = vpop.f32.mrb[7].mxu0  ;;  %v743_v23 = vpop.f32.mrb[7].mxu1  ;;  %v868_v10 = vlaneseq (!%p1593_p13)  ;;  %v910_v11 = vld [vmem:[%s1954_s17] sm:$0xff] (!%p1593_p13) }
 0x140   : > { %803 = vst [vmem:[#allocation2 + $0x28] sm:$0xff] %v771_v16  ;;  %819 = vst [vmem:[#allocation2 + $0xa8] sm:$0xff] %v787_v17  ;;  %v773_v24 = vadd.f32 %v703_v22, %v468_v14  ;;  %v789_v25 = vadd.f32 %v743_v23, %v484_v15  ;;  %v834_v14 = vld [vmem:[#allocation2] sm:$0xff] (!%p1593_p13)  ;;  %v835_v15 = vld [vmem:[#allocation2 + $0x8] sm:$0xff] (!%p1593_p13) }
 0x141   : > { %804 = vst [vmem:[#allocation2 + $0x30] sm:$0xff] %v772_v20  ;;  %820 = vst [vmem:[#allocation2 + $0xb0] sm:$0xff] %v788_v21  ;;  %v869_v12 = vshrl.u32 (!%p1593_p13), %v868_v10, 7  ;;  %v866_v16 = vld [vmem:[%s2467_s2] sm:$0x3] (!%p1593_p13)  ;;  %v911_v17 = vld [vmem:[%s1954_s17 + $0x8] sm:$0xff] (!%p1593_p13)  ;;  %v926_v20 = vunpack.c.l.bf16 (!%p1593_p13), %v910_v11  ;;  %v927_v21 = vunpack.c.h.bf16 (!%p1593_p13), %v910_v11 }
 0x142   : > { %805 = vst [vmem:[#allocation2 + $0x38] sm:$0xff] %v773_v24  ;;  %821 = vst [vmem:[#allocation2 + $0xb8] sm:$0xff] %v789_v25  ;;  %v913_v24 = vld [vmem:[%s1954_s17 + $0x18] sm:$0xff] (!%p1593_p13)  ;;  %v930_v25 = vunpack.c.l.bf16 (!%p1593_p13), %v912_v13 }
 0x143   : > { %v2003_v18 = vsub.s32 (!%p1593_p13), 0, %v869_v12  ;;  %v2005_v19 = vsub.s32 (!%p1593_p13), 1, %v869_v12 }
 0x144   : > { %v707_v30 = vpop.f32.mrb[8].mxu0  ;;  %v747_v31 = vpop.f32.mrb[8].mxu1 }
 0x145   : > { %v774_v34 = vadd.f32 %v707_v30, %v469_v26  ;;  %v790_v35 = vadd.f32 %v747_v31, %v485_v27  ;;  %v709_v36 = vpop.f32.mrb[9].mxu0  ;;  %v749_v37 = vpop.f32.mrb[9].mxu1  ;;  %v931_v26 = vunpack.c.h.bf16 (!%p1593_p13), %v912_v13  ;;  %v836_v27 = vld [vmem:[#allocation2 + $0x10] sm:$0xff] (!%p1593_p13)  ;;  %v929_v30 = vunpack.c.h.bf16 (!%p1593_p13), %v911_v17  ;;  %v914_v31 = vld [vmem:[%s1954_s17 + $0x20] sm:$0xff] (!%p1593_p13) }
 0x146   : > { %v775_v40 = vadd.f32 %v709_v36, %v470_v28  ;;  %v791_v41 = vadd.f32 %v749_v37, %v486_v29  ;;  %v711_v42 = vpop.f32.mrb[10].mxu0  ;;  %v751_v43 = vpop.f32.mrb[10].mxu1  ;;  %v838_v22 = vld [vmem:[#allocation2 + $0x20] sm:$0xff] (!%p1593_p13)  ;;  %v837_v28 = vld [vmem:[#allocation2 + $0x18] sm:$0xff] (!%p1593_p13)  ;;  %v928_v29 = vunpack.c.l.bf16 (!%p1593_p13), %v911_v17  ;;  %v932_v36 = vunpack.c.l.bf16 (!%p1593_p13), %v913_v24 }
 0x147   : > { %806 = vst [vmem:[#allocation2 + $0x40] sm:$0xff] %v774_v34  ;;  %822 = vst [vmem:[#allocation2 + $0xc0] sm:$0xff] %v790_v35  ;;  %v776_v44 = vadd.f32 %v711_v42, %v471_v32  ;;  %v792_v45 = vadd.f32 %v751_v43, %v487_v33  ;;  %v713_v46 = vpop.f32.mrb[11].mxu0  ;;  %v753_v47 = vpop.f32.mrb[11].mxu1  ;;  %v839_v23 = vld [vmem:[#allocation2 + $0x28] sm:$0xff] (!%p1593_p13)  ;;  %v2010_v32 = vrot.slane (!%p1593_p13), %v866_v16, %v2003_v18  ;;  %v933_v37 = vunpack.c.h.bf16 (!%p1593_p13), %v913_v24 }
 0x148   : > { %807 = vst [vmem:[#allocation2 + $0x48] sm:$0xff] %v775_v40  ;;  %823 = vst [vmem:[#allocation2 + $0xc8] sm:$0xff] %v791_v41  ;;  %v777_v48 = vadd.f32 %v713_v46, %v472_v38  ;;  %v793_v49 = vadd.f32 %v753_v47, %v488_v39  ;;  %v2013_v33 = vrot.slane (!%p1593_p13), %v866_v16, %v2005_v19  ;;  %v840_v34 = vld [vmem:[#allocation2 + $0x30] sm:$0xff] (!%p1593_p13)  ;;  %v915_v38 = vld [vmem:[%s1954_s17 + $0x28] sm:$0xff] (!%p1593_p13)  ;;  %v934_v39 = vunpack.c.l.bf16 (!%p1593_p13), %v914_v31 }
 0x149   : > { %808 = vst [vmem:[#allocation2 + $0x50] sm:$0xff] %v776_v44  ;;  %824 = vst [vmem:[#allocation2 + $0xd0] sm:$0xff] %v792_v45  ;;  %v841_v35 = vld [vmem:[#allocation2 + $0x38] sm:$0xff] (!%p1593_p13)  ;;  %v935_v40 = vunpack.c.h.bf16 (!%p1593_p13), %v914_v31  ;;  %v936_v41 = vunpack.c.l.bf16 (!%p1593_p13), %v915_v38  ;;  %v937_v42 = vunpack.c.h.bf16 (!%p1593_p13), %v915_v38  ;;  %v878_v43 = vadd.f32 (!%p1593_p13), %v2010_v32, %v834_v14  ;;  %v851_v24 = vld [vmem:[#allocation2 + $0x88] sm:$0xff] (!%p1593_p13) }
 0x14a   : > { %809 = vst [vmem:[#allocation2 + $0x58] sm:$0xff] %v777_v48  ;;  %825 = vst [vmem:[#allocation2 + $0xd8] sm:$0xff] %v793_v49  ;;  %v879_v44 = vadd.f32 (!%p1593_p13), %v2013_v33, %v835_v15  ;;  %v882_v45 = vadd.f32 (!%p1593_p13), %v2010_v32, %v838_v22  ;;  %v883_v46 = vadd.f32 (!%p1593_p13), %v2013_v33, %v839_v23  ;;  %v917_v16 = vld [vmem:[%s1954_s17 + $0x38] sm:$0xff] (!%p1593_p13)  ;;  %v850_v23 = vld [vmem:[#allocation2 + $0x80] sm:$0xff] (!%p1593_p13) }
 0x14b   : > { %v880_v47 = vadd.f32 (!%p1593_p13), %v2010_v32, %v836_v27  ;;  %v881_v48 = vadd.f32 (!%p1593_p13), %v2013_v33, %v837_v28  ;;  %v884_v49 = vadd.f32 (!%p1593_p13), %v2010_v32, %v840_v34  ;;  %v919_v38 = vld [vmem:[%s1954_s17 + $0x48] sm:$0xff] (!%p1593_p13) }
 0x14c   : > { %v717_v54 = vpop.f32.mrb[12].mxu0  ;;  %v757_v55 = vpop.f32.mrb[12].mxu1  ;;  %833 = sbr.rel (%p1593_p13) target bundleno = 697 (0x2b9), region = 93 }
 0x14d   : > { %v778_v58 = vadd.f32 %v717_v54, %v473_v50  ;;  %v794_v59 = vadd.f32 %v757_v55, %v489_v51  ;;  %v719_v60 = vpop.f32.mrb[13].mxu0  ;;  %v759_v61 = vpop.f32.mrb[13].mxu1  ;;  %v885_v50 = vadd.f32 (!%p1593_p13), %v2013_v33, %v841_v35  ;;  %v2026_v54 = vadd.f32 (!%p1593_p13), %v927_v21, %v879_v44  ;;  %v855_v44 = vld [vmem:[#allocation2 + $0xa8] sm:$0xff] (!%p1593_p13) }
 0x14e   : > { %v779_v0 = vadd.f32 %v719_v60, %v474_v52  ;;  %v795_v1 = vadd.f32 %v759_v61, %v490_v53  ;;  %v721_v2 = vpop.f32.mrb[14].mxu0  ;;  %v761_v3 = vpop.f32.mrb[14].mxu1  ;;  %v842_v51 = vld [vmem:[#allocation2 + $0x40] sm:$0xff] (!%p1593_p13)  ;;  %v2024_v53 = vadd.f32 (!%p1593_p13), %v926_v20, %v878_v43  ;;  %v2028_v55 = vadd.f32 (!%p1593_p13), %v930_v25, %v882_v45 }
 0x14f   : > { %810 = vst [vmem:[#allocation2 + $0x60] sm:$0xff] %v778_v58  ;;  %826 = vst [vmem:[#allocation2 + $0xe0] sm:$0xff] %v794_v59  ;;  %v780_v4 = vadd.f32 %v721_v2, %v475_v56  ;;  %v796_v5 = vadd.f32 %v761_v3, %v491_v57  ;;  %v723_v6 = vpop.f32.mrb[15].mxu0  ;;  %v763_v7 = vpop.f32.mrb[15].mxu1  ;;  %v843_v52 = vld [vmem:[#allocation2 + $0x48] sm:$0xff] (!%p1593_p13)  ;;  %v2030_v56 = vadd.f32 (!%p1593_p13), %v931_v26, %v883_v46  ;;  %v918_v25 = vld [vmem:[%s1954_s17 + $0x40] sm:$0xff] (!%p1593_p13)  ;;  %v940_v35 = vunpack.c.l.bf16 (!%p1593_p13), %v917_v16 }
 0x150   : > { %811 = vst [vmem:[#allocation2 + $0x68] sm:$0xff] %v779_v0  ;;  %827 = vst [vmem:[#allocation2 + $0xe8] sm:$0xff] %v795_v1  ;;  %v781_v8 = vadd.f32 %v723_v6, %v476_v62  ;;  %v797_v9 = vadd.f32 %v763_v7, %v492_v63  ;;  %v844_v57 = vld [vmem:[#allocation2 + $0x50] sm:$0xff] (!%p1593_p13)  ;;  %v2032_v59 = vadd.f32 (!%p1593_p13), %v928_v29, %v880_v47  ;;  %v854_v43 = vld [vmem:[#allocation2 + $0xa0] sm:$0xff] (!%p1593_p13) }
 0x151   : > { %812 = vst [vmem:[#allocation2 + $0x70] sm:$0xff] %v780_v4  ;;  %828 = vst [vmem:[#allocation2 + $0xf0] sm:$0xff] %v796_v5  ;;  %v845_v58 = vld [vmem:[#allocation2 + $0x58] sm:$0xff] (!%p1593_p13)  ;;  %v2034_v60 = vadd.f32 (!%p1593_p13), %v929_v30, %v881_v48  ;;  %v2036_v61 = vadd.f32 (!%p1593_p13), %v932_v36, %v884_v49  ;;  %v2038_v62 = vadd.f32 (!%p1593_p13), %v933_v37, %v885_v50  ;;  %v916_v0 = vld [vmem:[%s1954_s17 + $0x30] sm:$0xff] (!%p1593_p13)  ;;  %v941_v36 = vunpack.c.h.bf16 (!%p1593_p13), %v917_v16 }
 0x152   : > { %813 = vst [vmem:[#allocation2 + $0x78] sm:$0xff] %v781_v8  ;;  %829 = vst [vmem:[#allocation2 + $0xf8] sm:$0xff] %v797_v9  ;;  %v992_v1 = vadd.f32 (!%p1593_p13), %v2026_v54, %v2024_v53  ;;  %v998_v2 = vadd.f32 (!%p1593_p13), %v2030_v56, %v2028_v55  ;;  %v886_v3 = vadd.f32 (!%p1593_p13), %v2010_v32, %v842_v51  ;;  %v938_v15 = vunpack.c.l.bf16 (!%p1593_p13), %v916_v0  ;;  %v852_v30 = vld [vmem:[#allocation2 + $0x90] sm:$0xff] (!%p1593_p13)  ;;  %v853_v37 = vld [vmem:[#allocation2 + $0x98] sm:$0xff] (!%p1593_p13) }
 0x153   : > { %v887_v4 = vadd.f32 %v2013_v33, %v843_v52  ;;  %v995_v6 = vadd.f32 %v2034_v60, %v2032_v59  ;;  %v1001_v7 = vadd.f32 %v2038_v62, %v2036_v61  ;;  %v888_v8 = vadd.f32 %v2010_v32, %v844_v57  ;;  %v920_v48 = vld [vmem:[%s1954_s17 + $0x50] sm:$0xff] }
 0x154   : > { %v889_v9 = vadd.f32 %v2013_v33, %v845_v58  ;;  %993 = vadd.xlane.f32.xlu0 %v992_v1  ;;  %999 = vadd.xlane.f32.xlu1 %v998_v2  ;;  %v2053_v12 = vadd.f32 %v934_v39, %v886_v3  ;;  %v939_v22 = vunpack.c.h.bf16 %v916_v0  ;;  %v894_v39 = vadd.f32 %v2010_v32, %v850_v23  ;;  %v856_v57 = vld [vmem:[#allocation2 + $0xb0] sm:$0xff]  ;;  %v857_v58 = vld [vmem:[#allocation2 + $0xb8] sm:$0xff] }
 0x155   : > { %v2055_v13 = vadd.f32 %v935_v40, %v887_v4  ;;  %v2059_v17 = vadd.f32 %v936_v41, %v888_v8  ;;  %v895_v40 = vadd.f32 %v2013_v33, %v851_v24  ;;  %v942_v41 = vunpack.c.l.bf16 %v918_v25  ;;  %v858_v4 = vld [vmem:[#allocation2 + $0xc0] sm:$0xff] }
 0x156   : > { %v846_v63 = vld [vmem:[#allocation2 + $0x60] sm:$0xff]  ;;  %v2061_v20 = vadd.f32 %v937_v42, %v889_v9  ;;  %v943_v42 = vunpack.c.h.bf16 %v918_v25  ;;  %v896_v47 = vadd.f32 %v2010_v32, %v852_v30  ;;  %v897_v51 = vadd.f32 %v2013_v33, %v853_v37  ;;  %v859_v9 = vld [vmem:[#allocation2 + $0xc8] sm:$0xff] }
 0x157   : > { %v847_v5 = vld [vmem:[#allocation2 + $0x68] sm:$0xff]  ;;  %v890_v14 = vadd.f32 %v2010_v32, %v846_v63  ;;  %v1004_v26 = vadd.f32 %v2055_v13, %v2053_v12  ;;  %v2086_v50 = vadd.f32 %v942_v41, %v894_v39  ;;  %v944_v52 = vunpack.c.l.bf16 %v919_v38  ;;  %v921_v63 = vld [vmem:[%s1954_s17 + $0x58] sm:$0xff] }
 0x158   : > { %v848_v10 = vld [vmem:[#allocation2 + $0x70] sm:$0xff]  ;;  %v891_v21 = vadd.f32 %v2013_v33, %v847_v5  ;;  %v1007_v31 = vadd.f32 %v2061_v20, %v2059_v17  ;;  %996 = vadd.xlane.f32.xlu0 %v995_v6  ;;  %1002 = vadd.xlane.f32.xlu1 %v1001_v7  ;;  %v2090_v0 = vadd.f32 %v943_v42, %v895_v40  ;;  %v945_v1 = vunpack.c.h.bf16 %v919_v38  ;;  %v863_v41 = vld [vmem:[#allocation2 + $0xe8] sm:$0xff] }
 0x159   : > { %v849_v11 = vld [vmem:[#allocation2 + $0x78] sm:$0xff]  ;;  %v2067_v27 = vadd.f32 %v938_v15, %v890_v14  ;;  %v892_v28 = vadd.f32 %v2010_v32, %v848_v10  ;;  %v898_v2 = vadd.f32 %v2010_v32, %v854_v43  ;;  %v899_v3 = vadd.f32 %v2013_v33, %v855_v44  ;;  %v922_v10 = vld [vmem:[%s1954_s17 + $0x60] sm:$0xff]  ;;  %v924_v42 = vld [vmem:[%s1954_s17 + $0x70] sm:$0xff] }
 0x15a   : > { %v893_v29 = vadd.f32 %v2013_v33, %v849_v11  ;;  %v2073_v34 = vadd.f32 %v939_v22, %v891_v21  ;;  %v2096_v6 = vadd.f32 %v944_v52, %v896_v47  ;;  %v946_v7 = vunpack.c.l.bf16 %v920_v48  ;;  %v860_v21 = vld [vmem:[#allocation2 + $0xd0] sm:$0xff]  ;;  %v925_v52 = vld [vmem:[%s1954_s17 + $0x78] sm:$0xff] }
 0x15b   : > { %v2078_v45 = vadd.f32 %v940_v35, %v892_v28  ;;  %v947_v8 = vunpack.c.h.bf16 %v920_v48  ;;  %v2099_v11 = vadd.f32 %v945_v1, %v897_v51  ;;  %v900_v14 = vadd.f32 %v2010_v32, %v856_v57  ;;  %v923_v28 = vld [vmem:[%s1954_s17 + $0x68] sm:$0xff]  ;;  %v864_v51 = vld [vmem:[#allocation2 + $0xf0] sm:$0xff] }
 0x15c   : > { %v2080_v46 = vadd.f32 %v941_v36, %v893_v29  ;;  %v1010_v49 = vadd.f32 %v2073_v34, %v2067_v27  ;;  %1005 = vadd.xlane.f32.xlu0 %v1004_v26  ;;  %1008 = vadd.xlane.f32.xlu1 %v1007_v31  ;;  %v901_v15 = vadd.f32 %v2013_v33, %v857_v58  ;;  %v948_v16 = vunpack.c.l.bf16 %v921_v63  ;;  %v861_v26 = vld [vmem:[#allocation2 + $0xd8] sm:$0xff]  ;;  %v862_v36 = vld [vmem:[#allocation2 + $0xe0] sm:$0xff] }
 0x15d   : > { %v2103_v22 = vadd.f32 %v946_v7, %v898_v2  ;;  %v2105_v23 = vadd.f32 %v947_v8, %v899_v3  ;;  %v949_v24 = vunpack.c.h.bf16 %v921_v63  ;;  %v902_v25 = vadd.f32 %v2010_v32, %v858_v4 }
 0x15e   : > { %v1013_v5 = vadd.f32 %v2080_v46, %v2078_v45  ;;  %v1016_v29 = vadd.f32 %v2090_v0, %v2086_v50  ;;  %v2111_v30 = vadd.f32 %v948_v16, %v900_v14  ;;  %v903_v31 = vadd.f32 %v2013_v33, %v859_v9 }
 0x15f   : > { %v950_v35 = vunpack.c.l.bf16 %v922_v10  ;;  %v1019_v37 = vadd.f32 %v2099_v11, %v2096_v6  ;;  %v2116_v38 = vadd.f32 %v949_v24, %v901_v15  ;;  %v951_v39 = vunpack.c.h.bf16 %v922_v10 }
 0x160   : > { %1011 = vadd.xlane.f32.xlu0 %v1010_v49  ;;  %1014 = vadd.xlane.f32.xlu1 %v1013_v5  ;;  %v904_v40 = vadd.f32 %v2010_v32, %v860_v21  ;;  %v1022_v43 = vadd.f32 %v2105_v23, %v2103_v22  ;;  %v905_v44 = vadd.f32 %v2013_v33, %v861_v26  ;;  %v952_v47 = vunpack.c.l.bf16 %v923_v28  ;;  %v865_v49 = vld [vmem:[#allocation2 + $0xf8] sm:$0xff] }
 0x161   : > { %v953_v48 = vunpack.c.h.bf16 %v923_v28  ;;  %v1025_v57 = vadd.f32 %v2116_v38, %v2111_v30  ;;  %v2126_v58 = vadd.f32 %v950_v35, %v902_v25  ;;  %v2128_v63 = vadd.f32 %v951_v39, %v903_v31 }
 0x162   : > { %v906_v1 = vadd.f32 %v2010_v32, %v862_v36  ;;  %v2131_v2 = vadd.f32 %v952_v47, %v904_v40  ;;  %v907_v4 = vadd.f32 %v2013_v33, %v863_v41  ;;  %v954_v5 = vunpack.c.l.bf16 %v924_v42 }
 0x163   : > { %v2133_v3 = vadd.f32 %v953_v48, %v905_v44  ;;  %v955_v7 = vunpack.c.h.bf16 %v924_v42  ;;  %v908_v8 = vadd.f32 %v2010_v32, %v864_v51  ;;  %v909_v9 = vadd.f32 %v2013_v33, %v865_v49 }
 0x164   : > { %1017 = vadd.xlane.f32.xlu0 %v1016_v29  ;;  %1020 = vadd.xlane.f32.xlu1 %v1019_v37  ;;  %v956_v10 = vunpack.c.l.bf16 %v925_v52  ;;  %v957_v14 = vunpack.c.h.bf16 %v925_v52  ;;  %v1028_v15 = vadd.f32 %v2128_v63, %v2126_v58  ;;  %v2142_v21 = vadd.f32 %v954_v5, %v906_v1 }
 0x165   : > { %v1031_v16 = vadd.f32 %v2133_v3, %v2131_v2  ;;  %v2144_v24 = vadd.f32 %v955_v7, %v907_v4 }
 0x166   : > { %v2146_v25 = vadd.f32 %v956_v10, %v908_v8  ;;  %v2148_v26 = vadd.f32 %v957_v14, %v909_v9 }
 0x167   : > { %v1034_v32 = vadd.f32 %v2144_v24, %v2142_v21 }
 0x168   : > { %1023 = vadd.xlane.f32.xlu0 %v1022_v43  ;;  %1026 = vadd.xlane.f32.xlu1 %v1025_v57  ;;  %v1037_v33 = vadd.f32 %v2148_v26, %v2146_v25 }
 0x16c   : > { %1029 = vadd.xlane.f32.xlu0 %v1028_v15  ;;  %1032 = vadd.xlane.f32.xlu1 %v1031_v16 }
 0x170   : > { %1035 = vadd.xlane.f32.xlu0 %v1034_v32  ;;  %1038 = vadd.xlane.f32.xlu1 %v1037_v33 }
 0x1e1   : > { %v994_v28 = vpop.xlane.xlu0 %993  ;;  %v1000_v29 = vpop.xlane.xlu1 %999 }
 0x1e2   : > { %v1041_v31 = vmul.f32 0.00390625, %v994_v28  ;;  %v1043_v35 = vmul.f32 0.00390625, %v1000_v29 }
 0x1e4   : > { %v2155_v36 = vsub.f32 %v2024_v53, %v1041_v31  ;;  %v2158_v37 = vsub.f32 %v2026_v54, %v1041_v31  ;;  %v2161_v39 = vsub.f32 %v2028_v55, %v1043_v35  ;;  %v2164_v40 = vsub.f32 %v2030_v56, %v1043_v35 }
 0x1e5   : > { %v997_v41 = vpop.xlane.xlu0 %996  ;;  %v1003_v42 = vpop.xlane.xlu1 %1002 }
 0x1e6   : > { %v1042_v43 = vmul.f32 0.00390625, %v997_v41  ;;  %v1044_v44 = vmul.f32 0.00390625, %v1003_v42  ;;  %v1089_v47 = vmul.f32 %v2155_v36, %v2155_v36  ;;  %v1090_v53 = vmul.f32 %v2158_v37, %v2158_v37 }
 0x1e7   : > { %v1093_v54 = vmul.f32 %v2161_v39, %v2161_v39  ;;  %v1094_v55 = vmul.f32 %v2164_v40, %v2164_v40 }
 0x1e8   : > { %v2175_v48 = vsub.f32 %v2032_v59, %v1042_v43  ;;  %v2178_v56 = vsub.f32 %v2034_v60, %v1042_v43  ;;  %v2181_v51 = vsub.f32 %v2036_v61, %v1044_v44  ;;  %v2184_v49 = vsub.f32 %v2038_v62, %v1044_v44 }
 0x1e9   : > { %v1006_v52 = vpop.xlane.xlu0 %1005  ;;  %v1121_v57 = vadd.f32 %v1090_v53, %v1089_v47  ;;  %v1009_v1 = vpop.xlane.xlu1 %1008  ;;  %v1127_v60 = vadd.f32 %v1094_v55, %v1093_v54 }
 0x1ea   : > { %v1045_v4 = vmul.f32 0.00390625, %v1006_v52  ;;  %v1046_v5 = vmul.f32 0.00390625, %v1009_v1  ;;  %v1091_v7 = vmul.f32 %v2175_v48, %v2175_v48  ;;  %v1092_v59 = vmul.f32 %v2178_v56, %v2178_v56 }
 0x1eb   : > { %1122 = vadd.xlane.f32.xlu0 %v1121_v57  ;;  %v1095_v61 = vmul.f32 %v2181_v51, %v2181_v51  ;;  %v1096_v62 = vmul.f32 %v2184_v49, %v2184_v49 }
 0x1ec   : > { %v2195_v8 = vsub.f32 %v2053_v12, %v1045_v4  ;;  %v2198_v9 = vsub.f32 %v2055_v13, %v1045_v4  ;;  %v2201_v10 = vsub.f32 %v2059_v17, %v1046_v5  ;;  %v2204_v14 = vsub.f32 %v2061_v20, %v1046_v5 }
 0x1ed   : > { %v1012_v15 = vpop.xlane.xlu0 %1011  ;;  %v1124_v16 = vadd.f32 %v1092_v59, %v1091_v7  ;;  %v1015_v32 = vpop.xlane.xlu1 %1014  ;;  %v1130_v13 = vadd.f32 %v1096_v62, %v1095_v61 }
 0x1ee   : > { %v1047_v33 = vmul.f32 0.00390625, %v1012_v15  ;;  %v1048_v28 = vmul.f32 0.00390625, %v1015_v32  ;;  %v1097_v29 = vmul.f32 %v2195_v8, %v2195_v8  ;;  %v1098_v12 = vmul.f32 %v2198_v9, %v2198_v9 }
 0x1ef   : > { %1128 = vadd.xlane.f32.xlu0 %v1127_v60  ;;  %1125 = vadd.xlane.f32.xlu1 %v1124_v16  ;;  %v1099_v17 = vmul.f32 %v2201_v10, %v2201_v10  ;;  %v1100_v20 = vmul.f32 %v2204_v14, %v2204_v14 }
 0x1f0   : > { %v2215_v31 = vsub.f32 %v2067_v27, %v1047_v33  ;;  %v2218_v35 = vsub.f32 %v2073_v34, %v1047_v33  ;;  %v2221_v41 = vsub.f32 %v2078_v45, %v1048_v28  ;;  %v2224_v42 = vsub.f32 %v2080_v46, %v1048_v28 }
 0x1f1   : > { %v1018_v43 = vpop.xlane.xlu0 %1017  ;;  %v1133_v44 = vadd.f32 %v1098_v12, %v1097_v29  ;;  %v1021_v47 = vpop.xlane.xlu1 %1020  ;;  %v1136_v34 = vadd.f32 %v1100_v20, %v1099_v17 }
 0x1f2   : > { %v1049_v53 = vmul.f32 0.00390625, %v1018_v43  ;;  %v1050_v54 = vmul.f32 0.00390625, %v1021_v47  ;;  %v1101_v55 = vmul.f32 %v2215_v31, %v2215_v31  ;;  %v1102_v27 = vmul.f32 %v2218_v35, %v2218_v35 }
 0x1f3   : > { %1131 = vadd.xlane.f32.xlu1 %v1130_v13  ;;  %1134 = vadd.xlane.f32.xlu0 %v1133_v44  ;;  %v1103_v45 = vmul.f32 %v2221_v41, %v2221_v41  ;;  %v1104_v46 = vmul.f32 %v2224_v42, %v2224_v42 }
 0x1f4   : > { %v2235_v52 = vsub.f32 %v2086_v50, %v1049_v53  ;;  %v2238_v57 = vsub.f32 %v2090_v0, %v1049_v53  ;;  %v2241_v1 = vsub.f32 %v2096_v6, %v1050_v54  ;;  %v2244_v4 = vsub.f32 %v2099_v11, %v1050_v54 }
 0x1f5   : > { %v1024_v5 = vpop.xlane.xlu0 %1023  ;;  %v1139_v7 = vadd.f32 %v1102_v27, %v1101_v55  ;;  %v1027_v59 = vpop.xlane.xlu1 %1026  ;;  %v1142_v0 = vadd.f32 %v1104_v46, %v1103_v45 }
 0x1f6   : > { %v1051_v60 = vmul.f32 0.00390625, %v1024_v5  ;;  %v1052_v61 = vmul.f32 0.00390625, %v1027_v59  ;;  %v1105_v62 = vmul.f32 %v2235_v52, %v2235_v52  ;;  %v1106_v50 = vmul.f32 %v2238_v57, %v2238_v57 }
 0x1f7   : > { %1137 = vadd.xlane.f32.xlu1 %v1136_v34  ;;  %1140 = vadd.xlane.f32.xlu0 %v1139_v7  ;;  %v1107_v6 = vmul.f32 %v2241_v1, %v2241_v1  ;;  %v1108_v11 = vmul.f32 %v2244_v4, %v2244_v4 }
 0x1f8   : > { %v2255_v15 = vsub.f32 %v2103_v22, %v1051_v60  ;;  %v2258_v16 = vsub.f32 %v2105_v23, %v1051_v60  ;;  %v2261_v32 = vsub.f32 %v2111_v30, %v1052_v61  ;;  %v2264_v33 = vsub.f32 %v2116_v38, %v1052_v61 }
 0x1f9   : > { %v1030_v28 = vpop.xlane.xlu0 %1029  ;;  %v1145_v29 = vadd.f32 %v1106_v50, %v1105_v62  ;;  %v1033_v12 = vpop.xlane.xlu1 %1032  ;;  %v1148_v23 = vadd.f32 %v1108_v11, %v1107_v6 }
 0x1fa   : > { %v1053_v13 = vmul.f32 0.00390625, %v1030_v28  ;;  %v1054_v17 = vmul.f32 0.00390625, %v1033_v12  ;;  %v1109_v20 = vmul.f32 %v2255_v15, %v2255_v15  ;;  %v1110_v22 = vmul.f32 %v2258_v16, %v2258_v16 }
 0x1fb   : > { %1143 = vadd.xlane.f32.xlu1 %v1142_v0  ;;  %1146 = vadd.xlane.f32.xlu0 %v1145_v29  ;;  %v1111_v30 = vmul.f32 %v2261_v32, %v2261_v32  ;;  %v1112_v38 = vmul.f32 %v2264_v33, %v2264_v33 }
 0x1fc   : > { %v2275_v43 = vsub.f32 %v2126_v58, %v1053_v13  ;;  %v2278_v44 = vsub.f32 %v2128_v63, %v1053_v13  ;;  %v2281_v47 = vsub.f32 %v2131_v2, %v1054_v17  ;;  %v2284_v53 = vsub.f32 %v2133_v3, %v1054_v17 }
 0x1fd   : > { %v1036_v54 = vpop.xlane.xlu0 %1035  ;;  %v1151_v55 = vadd.f32 %v1110_v22, %v1109_v20  ;;  %v1039_v27 = vpop.xlane.xlu1 %1038  ;;  %v1154_v63 = vadd.f32 %v1112_v38, %v1111_v30 }
 0x1fe   : > { %v1055_v34 = vmul.f32 0.00390625, %v1036_v54  ;;  %v1056_v45 = vmul.f32 0.00390625, %v1039_v27  ;;  %v1113_v46 = vmul.f32 %v2275_v43, %v2275_v43  ;;  %v1114_v58 = vmul.f32 %v2278_v44, %v2278_v44 }
 0x1ff   : > { %1149 = vadd.xlane.f32.xlu1 %v1148_v23  ;;  %1152 = vadd.xlane.f32.xlu0 %v1151_v55  ;;  %v1115_v2 = vmul.f32 %v2281_v47, %v2281_v47  ;;  %v1116_v3 = vmul.f32 %v2284_v53, %v2284_v53  ;;  %v990_v55 = vld [vmem:[%s2469_s4] sm:$0x3] }
 0x200   : > { %v2295_v5 = vsub.f32 %v2142_v21, %v1055_v34  ;;  %v2298_v7 = vsub.f32 %v2144_v24, %v1055_v34  ;;  %v2301_v59 = vsub.f32 %v2146_v25, %v1056_v45  ;;  %v2304_v60 = vsub.f32 %v2148_v26, %v1056_v45 }
 0x201   : > { %v1157_v61 = vadd.f32 %v1114_v58, %v1113_v46  ;;  %v1160_v21 = vadd.f32 %v1116_v3, %v1115_v2  ;;  %v991_v58 = vld [vmem:[%s2470_s5] sm:$0x3]  ;;  %v2321_v3 = vrot.slane %v990_v55, %v2003_v18 }
 0x202   : > { %v1117_v62 = vmul.f32 %v2295_v5, %v2295_v5  ;;  %v1118_v50 = vmul.f32 %v2298_v7, %v2298_v7  ;;  %v1119_v24 = vmul.f32 %v2301_v59, %v2301_v59  ;;  %v1120_v25 = vmul.f32 %v2304_v60, %v2304_v60 }
 0x203   : > { %1155 = vadd.xlane.f32.xlu1 %v1154_v63  ;;  %1158 = vadd.xlane.f32.xlu0 %v1157_v61  ;;  %v2324_v61 = vrot.slane %v990_v55, %v2005_v19 }
 0x204   : > { %v1163_v0 = vadd.f32 %v1118_v50, %v1117_v62  ;;  %v1166_v26 = vadd.f32 %v1120_v25, %v1119_v24  ;;  %v2327_v24 = vrot.slane %v991_v58, %v2003_v18  ;;  %v2330_v25 = vrot.slane %v991_v58, %v2005_v19 }
 0x207   : > { %1161 = vadd.xlane.f32.xlu1 %v1160_v21  ;;  %1164 = vadd.xlane.f32.xlu0 %v1163_v0 }
 0x20b   : > { %1167 = vadd.xlane.f32.xlu1 %v1166_v26 }
 0x278   : > { %v1123_v6 = vpop.xlane.xlu0 %1122 }
 0x279   : > { %v1169_v11 = vmul.f32 0.00390625, %v1123_v6 }
 0x27b   : > { %v1185_v28 = vadd.f32 1e-12, %v1169_v11 }
 0x27c   : > { %v1126_v29 = vpop.xlane.xlu1 %1125  ;;  %v1129_v12 = vpop.xlane.xlu0 %1128 }
 0x27d   : > { %1738 = vrsqrt.f32 %v1185_v28  ;;  %v1170_v13 = vmul.f32 0.00390625, %v1126_v29  ;;  %v1171_v17 = vmul.f32 0.00390625, %v1129_v12 }
 0x27f   : > { %v1186_v20 = vadd.f32 1e-12, %v1170_v13  ;;  %v1187_v22 = vadd.f32 1e-12, %v1171_v17 }
 0x280   : > { %v1132_v23 = vpop.xlane.xlu1 %1131  ;;  %v1135_v30 = vpop.xlane.xlu0 %1134 }
 0x281   : > { %1740 = vrsqrt.f32 %v1186_v20  ;;  %v1172_v38 = vmul.f32 0.00390625, %v1132_v23  ;;  %v1173_v54 = vmul.f32 0.00390625, %v1135_v30 }
 0x282   : > { %1742 = vrsqrt.f32 %v1187_v22 }
 0x283   : > { %v1188_v27 = vadd.f32 1e-12, %v1172_v38  ;;  %v1189_v34 = vadd.f32 1e-12, %v1173_v54 }
 0x284   : > { %v1138_v45 = vpop.xlane.xlu1 %1137  ;;  %v1141_v46 = vpop.xlane.xlu0 %1140 }
 0x285   : > { %1744 = vrsqrt.f32 %v1188_v27  ;;  %v1174_v63 = vmul.f32 0.00390625, %v1138_v45  ;;  %v1175_v2 = vmul.f32 0.00390625, %v1141_v46 }
 0x286   : > { %1746 = vrsqrt.f32 %v1189_v34 }
 0x287   : > { %v1739_v62 = vpop.eup %1738  ;;  %v1190_v50 = vadd.f32 1e-12, %v1174_v63  ;;  %v1191_v21 = vadd.f32 1e-12, %v1175_v2 }
 0x288   : > { %v1217_v0 = vmul.f32 %v1739_v62, %v2155_v36  ;;  %v1218_v26 = vmul.f32 %v1739_v62, %v2158_v37  ;;  %v1144_v6 = vpop.xlane.xlu1 %1143  ;;  %v1147_v11 = vpop.xlane.xlu0 %1146 }
 0x289   : > { %1748 = vrsqrt.f32 %v1190_v50  ;;  %v1176_v28 = vmul.f32 0.00390625, %v1144_v6  ;;  %v1177_v29 = vmul.f32 0.00390625, %v1147_v11 }
 0x28a   : > { %v1260_v12 = vmul.f32 %v2321_v3, %v1217_v0  ;;  %v1261_v13 = vmul.f32 %v2324_v61, %v1218_v26  ;;  %1750 = vrsqrt.f32 %v1191_v21 }
 0x28b   : > { %v1741_v17 = vpop.eup %1740  ;;  %v1192_v18 = vadd.f32 1e-12, %v1176_v28  ;;  %v1193_v20 = vadd.f32 1e-12, %v1177_v29 }
 0x28c   : > { %v1743_v22 = vpop.eup %1742  ;;  %v1303_v19 = vadd.f32 %v2327_v24, %v1260_v12  ;;  %v1304_v36 = vadd.f32 %v2330_v25, %v1261_v13  ;;  %v1219_v37 = vmul.f32 %v1741_v17, %v2175_v48  ;;  %v1220_v23 = vmul.f32 %v1741_v17, %v2178_v56  ;;  %v1150_v30 = vpop.xlane.xlu1 %1149 }
 0x28d   : > { %v1153_v38 = vpop.xlane.xlu0 %1152  ;;  %v1221_v54 = vmul.f32 %v1743_v22, %v2161_v39  ;;  %v1222_v55 = vmul.f32 %v1743_v22, %v2164_v40  ;;  %1752 = vrsqrt.f32 %v1192_v18  ;;  %v1178_v27 = vmul.f32 0.00390625, %v1150_v30 }
 0x28e   : > { %v1616_v34 = vpack.c.bf16 %v1304_v36, %v1303_v19  ;;  %v1262_v45 = vmul.f32 %v2321_v3, %v1219_v37  ;;  %v1263_v46 = vmul.f32 %v2324_v61, %v1220_v23  ;;  %1754 = vrsqrt.f32 %v1193_v20 }
 0x28f   : > { %v1745_v58 = vpop.eup %1744  ;;  %v1264_v48 = vmul.f32 %v2321_v3, %v1221_v54  ;;  %v1265_v56 = vmul.f32 %v2324_v61, %v1222_v55  ;;  %v1194_v63 = vadd.f32 1e-12, %v1178_v27  ;;  %v1179_v2 = vmul.f32 0.00390625, %v1153_v38 }
 0x290   : > { %v1747_v62 = vpop.eup %1746  ;;  %1431 = vst [vmem:[%s1959_s19] sm:$0xff] %v1616_v34  ;;  %v1305_v39 = vadd.f32 %v2327_v24, %v1262_v45  ;;  %v1306_v40 = vadd.f32 %v2330_v25, %v1263_v46  ;;  %v1223_v50 = vmul.f32 %v1745_v58, %v2181_v51  ;;  %v1224_v21 = vmul.f32 %v1745_v58, %v2184_v49  ;;  %v1156_v0 = vpop.xlane.xlu1 %1155 }
 0x291   : > { %v1307_v26 = vadd.f32 %v2327_v24, %v1264_v48  ;;  %v1308_v6 = vadd.f32 %v2330_v25, %v1265_v56  ;;  %v1225_v11 = vmul.f32 %v1747_v62, %v2195_v8  ;;  %v1226_v28 = vmul.f32 %v1747_v62, %v2198_v9  ;;  %v1159_v54 = vpop.xlane.xlu0 %1158 }
 0x292   : > { %v1617_v29 = vpack.c.bf16 %v1306_v40, %v1305_v39  ;;  %v1266_v12 = vmul.f32 %v2321_v3, %v1223_v50  ;;  %v1267_v13 = vmul.f32 %v2324_v61, %v1224_v21  ;;  %1756 = vrsqrt.f32 %v1194_v63 }
 0x293   : > { %v1749_v51 = vpop.eup %1748  ;;  %v1618_v17 = vpack.c.bf16 %v1308_v6, %v1307_v26  ;;  %v1268_v49 = vmul.f32 %v2321_v3, %v1225_v11  ;;  %v1269_v18 = vmul.f32 %v2324_v61, %v1226_v28  ;;  %v1195_v20 = vadd.f32 1e-12, %v1179_v2 }
 0x294   : > { %v1751_v22 = vpop.eup %1750  ;;  %1432 = vst [vmem:[%s1959_s19 + $0x8] sm:$0xff] %v1617_v29  ;;  %v1309_v8 = vadd.f32 %v2327_v24, %v1266_v12  ;;  %v1310_v9 = vadd.f32 %v2330_v25, %v1267_v13  ;;  %v1227_v19 = vmul.f32 %v1749_v51, %v2201_v10  ;;  %v1228_v36 = vmul.f32 %v1749_v51, %v2204_v14  ;;  %v1162_v10 = vpop.xlane.xlu1 %1161 }
 0x295   : > { %1433 = vst [vmem:[%s1959_s19 + $0x10] sm:$0xff] %v1618_v17  ;;  %v1311_v37 = vadd.f32 %v2327_v24, %v1268_v49  ;;  %v1312_v23 = vadd.f32 %v2330_v25, %v1269_v18  ;;  %v1229_v30 = vmul.f32 %v1751_v22, %v2215_v31  ;;  %v1230_v38 = vmul.f32 %v1751_v22, %v2218_v35  ;;  %v1165_v29 = vpop.xlane.xlu0 %1164 }
 0x296   : > { %v1619_v55 = vpack.c.bf16 %v1310_v9, %v1309_v8  ;;  %v1270_v27 = vmul.f32 %v2321_v3, %v1227_v19  ;;  %v1271_v34 = vmul.f32 %v2324_v61, %v1228_v36  ;;  %1758 = vrsqrt.f32 %v1195_v20 }
 0x297   : > { %v1753_v14 = vpop.eup %1752  ;;  %v1620_v45 = vpack.c.bf16 %v1312_v23, %v1311_v37  ;;  %v1272_v46 = vmul.f32 %v2321_v3, %v1229_v30  ;;  %v1273_v58 = vmul.f32 %v2324_v61, %v1230_v38  ;;  %v1180_v48 = vmul.f32 0.00390625, %v1156_v0 }
 0x298   : > { %v1755_v56 = vpop.eup %1754  ;;  %1434 = vst [vmem:[%s1959_s19 + $0x18] sm:$0xff] %v1619_v55  ;;  %v1313_v31 = vadd.f32 %v2327_v24, %v1270_v27  ;;  %v1314_v35 = vadd.f32 %v2330_v25, %v1271_v34  ;;  %v1231_v63 = vmul.f32 %v1753_v14, %v2221_v41  ;;  %v1232_v2 = vmul.f32 %v1753_v14, %v2224_v42  ;;  %v1168_v51 = vpop.xlane.xlu1 %1167 }
 0x299   : > { %1435 = vst [vmem:[%s1959_s19 + $0x20] sm:$0xff] %v1620_v45  ;;  %v1315_v62 = vadd.f32 %v2327_v24, %v1272_v46  ;;  %v1316_v39 = vadd.f32 %v2330_v25, %v1273_v58  ;;  %v1233_v40 = vmul.f32 %v1755_v56, %v2235_v52  ;;  %v1234_v50 = vmul.f32 %v1755_v56, %v2238_v57 }
 0x29a   : > { %v1621_v21 = vpack.c.bf16 %v1314_v35, %v1313_v31  ;;  %v1274_v0 = vmul.f32 %v2321_v3, %v1231_v63  ;;  %v1275_v26 = vmul.f32 %v2324_v61, %v1232_v2  ;;  %v1196_v6 = vadd.f32 1e-12, %v1180_v48 }
 0x29b   : > { %v1622_v41 = vpack.c.bf16 %v1316_v39, %v1315_v62  ;;  %v1276_v42 = vmul.f32 %v2321_v3, %v1233_v40  ;;  %v1277_v11 = vmul.f32 %v2324_v61, %v1234_v50  ;;  %v1181_v28 = vmul.f32 0.00390625, %v1159_v54 }
 0x29c   : > { %v1757_v12 = vpop.eup %1756  ;;  %1436 = vst [vmem:[%s1959_s19 + $0x28] sm:$0xff] %v1621_v21  ;;  %v1317_v52 = vadd.f32 %v2327_v24, %v1274_v0  ;;  %v1318_v57 = vadd.f32 %v2330_v25, %v1275_v26  ;;  %1760 = vrsqrt.f32 %v1196_v6  ;;  %v1182_v13 = vmul.f32 0.00390625, %v1162_v10 }
 0x29d   : > { %1437 = vst [vmem:[%s1959_s19 + $0x30] sm:$0xff] %v1622_v41  ;;  %v1319_v17 = vadd.f32 %v2327_v24, %v1276_v42  ;;  %v1320_v49 = vadd.f32 %v2330_v25, %v1277_v11  ;;  %v1235_v18 = vmul.f32 %v1757_v12, %v2241_v1  ;;  %v1236_v20 = vmul.f32 %v1757_v12, %v2244_v4 }
 0x29e   : > { %v1623_v22 = vpack.c.bf16 %v1318_v57, %v1317_v52  ;;  %v1197_v8 = vadd.f32 1e-12, %v1181_v28  ;;  %v1198_v9 = vadd.f32 1e-12, %v1182_v13  ;;  %v1183_v19 = vmul.f32 0.00390625, %v1165_v29 }
 0x29f   : > { %v1624_v36 = vpack.c.bf16 %v1320_v49, %v1319_v17  ;;  %v1278_v37 = vmul.f32 %v2321_v3, %v1235_v18  ;;  %v1279_v23 = vmul.f32 %v2324_v61, %v1236_v20  ;;  %v1184_v30 = vmul.f32 0.00390625, %v1168_v51 }
 0x2a0   : > { %v1759_v38 = vpop.eup %1758  ;;  %1438 = vst [vmem:[%s1959_s19 + $0x38] sm:$0xff] %v1623_v22  ;;  %1762 = vrsqrt.f32 %v1197_v8  ;;  %v1199_v54 = vadd.f32 1e-12, %v1183_v19 }
 0x2a1   : > { %1439 = vst [vmem:[%s1959_s19 + $0x40] sm:$0xff] %v1624_v36  ;;  %v1321_v1 = vadd.f32 %v2327_v24, %v1278_v37  ;;  %v1322_v4 = vadd.f32 %v2330_v25, %v1279_v23  ;;  %v1237_v55 = vmul.f32 %v1759_v38, %v2255_v15  ;;  %v1238_v27 = vmul.f32 %v1759_v38, %v2258_v16 }
 0x2a2   : > { %1764 = vrsqrt.f32 %v1198_v9  ;;  %v1200_v34 = vadd.f32 1e-12, %v1184_v30 }
 0x2a3   : > { %v1625_v10 = vpack.c.bf16 %v1322_v4, %v1321_v1  ;;  %v1280_v14 = vmul.f32 %v2321_v3, %v1237_v55  ;;  %v1281_v45 = vmul.f32 %v2324_v61, %v1238_v27  ;;  %1766 = vrsqrt.f32 %v1199_v54 }
 0x2a4   : > { %1768 = vrsqrt.f32 %v1200_v34 }
 0x2a5   : > { %1440 = vst [vmem:[%s1959_s19 + $0x48] sm:$0xff] %v1625_v10  ;;  %v1323_v46 = vadd.f32 %v2327_v24, %v1280_v14  ;;  %v1324_v58 = vadd.f32 %v2330_v25, %v1281_v45 }
 0x2a6   : > { %v1761_v48 = vpop.eup %1760 }
 0x2a7   : > { %v1626_v56 = vpack.c.bf16 %v1324_v58, %v1323_v46  ;;  %v1239_v15 = vmul.f32 %v1761_v48, %v2261_v32  ;;  %v1240_v16 = vmul.f32 %v1761_v48, %v2264_v33 }
 0x2a9   : > { %1441 = vst [vmem:[%s1959_s19 + $0x50] sm:$0xff] %v1626_v56  ;;  %v1282_v31 = vmul.f32 %v2321_v3, %v1239_v15  ;;  %v1283_v35 = vmul.f32 %v2324_v61, %v1240_v16 }
 0x2aa   : > { %v1763_v63 = vpop.eup %1762 }
 0x2ab   : > { %v1325_v2 = vadd.f32 %v2327_v24, %v1282_v31  ;;  %v1326_v62 = vadd.f32 %v2330_v25, %v1283_v35  ;;  %v1241_v39 = vmul.f32 %v1763_v63, %v2275_v43  ;;  %v1242_v40 = vmul.f32 %v1763_v63, %v2278_v44 }
 0x2ac   : > { %v1765_v50 = vpop.eup %1764 }
 0x2ad   : > { %v1767_v21 = vpop.eup %1766  ;;  %v1627_v32 = vpack.c.bf16 %v1326_v62, %v1325_v2  ;;  %v1284_v33 = vmul.f32 %v2321_v3, %v1241_v39  ;;  %v1285_v0 = vmul.f32 %v2324_v61, %v1242_v40  ;;  %v1243_v26 = vmul.f32 %v1765_v50, %v2281_v47 }
 0x2ae   : > { %v1769_v6 = vpop.eup %1768  ;;  %v1244_v41 = vmul.f32 %v1765_v50, %v2284_v53  ;;  %v1245_v42 = vmul.f32 %v1767_v21, %v2295_v5  ;;  %v1246_v11 = vmul.f32 %v1767_v21, %v2298_v7 }
 0x2af   : > { %1442 = vst [vmem:[%s1959_s19 + $0x58] sm:$0xff] %v1627_v32  ;;  %v1327_v43 = vadd.f32 %v2327_v24, %v1284_v33  ;;  %v1328_v44 = vadd.f32 %v2330_v25, %v1285_v0  ;;  %v1286_v28 = vmul.f32 %v2321_v3, %v1243_v26  ;;  %v1247_v29 = vmul.f32 %v1769_v6, %v2301_v59 }
 0x2b0   : > { %v1287_v12 = vmul.f32 %v2324_v61, %v1244_v41  ;;  %v1288_v47 = vmul.f32 %v2321_v3, %v1245_v42  ;;  %v1289_v53 = vmul.f32 %v2324_v61, %v1246_v11  ;;  %v1248_v5 = vmul.f32 %v1769_v6, %v2304_v60 }
 0x2b1   : > { %v1628_v7 = vpack.c.bf16 %v1328_v44, %v1327_v43  ;;  %v1329_v52 = vadd.f32 %v2327_v24, %v1286_v28  ;;  %v1290_v57 = vmul.f32 %v2321_v3, %v1247_v29 }
 0x2b2   : > { %v1330_v13 = vadd.f32 %v2330_v25, %v1287_v12  ;;  %v1331_v59 = vadd.f32 %v2327_v24, %v1288_v47  ;;  %v1332_v51 = vadd.f32 %v2330_v25, %v1289_v53  ;;  %v1291_v17 = vmul.f32 %v2324_v61, %v1248_v5 }
 0x2b3   : > { %1443 = vst [vmem:[%s1959_s19 + $0x60] sm:$0xff] %v1628_v7  ;;  %v1333_v49 = vadd.f32 %v2327_v24, %v1290_v57 }
 0x2b4   : > { %v1629_v18 = vpack.c.bf16 %v1330_v13, %v1329_v52  ;;  %v1630_v20 = vpack.c.bf16 %v1332_v51, %v1331_v59  ;;  %v1334_v60 = vadd.f32 %v2330_v25, %v1291_v17 }
 0x2b6   : > { %1444 = vst [vmem:[%s1959_s19 + $0x68] sm:$0xff] %v1629_v18  ;;  %1445 = vst [vmem:[%s1959_s19 + $0x70] sm:$0xff] %v1630_v20  ;;  %v1631_v22 = vpack.c.bf16 %v1334_v60, %v1333_v49 }
 0x2b8   : > { %1446 = vst [vmem:[%s1959_s19 + $0x78] sm:$0xff] %v1631_v22 }
 0x2b9 PF: > { %s16_s27 = sadd.s32 1, %s1824_s27   ;;  %s2472_s21 = smov %s1804_s22 }
 0x2ba   : > { %p13_p0 = scmp.ge.s32.totalorder %s16_s27, 6   ;;  %s2473_s22 = smov %s1914_s10 }
 0x2bb   : > { %s2474_s23 = smov %s1816_s25  ;;  %s2475_s24 = smov %s1820_s26 }
 0x2bc   : > { %s2476_s25 = smov %s2479_s28  ;;  %s2477_s26 = smov %s2483_s29 }
 0x2bd   :  { %15 = sbr.rel (!%p13_p0) target bundleno = 4 (0x4), region = 134 }

// kernel: bert_latin_forward.15
= control target key start
LH: loop header
LB: loop body
LE: loop exit
PB: predicated region body
PF: predicated region fallthrough
CT: control target
= control target key end

     0   :  { %7 = vsyncpa [#allocation3], 0  ;;  %s707_s0 = inlined_call_operand.vmem [shape: f32[2,16,128], index: 0, kind: input, shape index: {}]   ;;  %s708_s1 = inlined_call_operand.vmem [shape: bf16[2,128,256], index: 1, kind: input, shape index: {}]   ;;  %s709_s2 = inlined_call_operand.hbm [shape: f32[2,16,256], index: 2, kind: output, shape index: {}]  }
   0x1   :  { %9 = vsyncpa [#allocation3 + $0x1], 0  ;;  %s579_s9 = smov 0   ;;  %s581_s10 = smov 0  }
   0x2   :  { %s583_s11 = smov 0   ;;  %s585_s12 = smov 0  }
   0x3 LB: > { %s600_s13 = sadd.s32 4294967295, %s558_s12   ;;  %s397_s14 = sadd.s32 4294967294, %s558_s12   ;;  %s558_s12 = sphi %s585_s12, %s715_s12   ;;  %s554_s11 = sphi %s583_s11, %s714_s11   ;;  %s550_s10 = sphi %s581_s10, %s713_s10   ;;  %s546_s9 = sphi %s579_s9, %s712_s9  }
   0x4   : > { %s604_s15 = sadd.s32 1, %s558_s12   ;;  %s74_s16 = sadd.s32 1, %s554_s11 }
   0x5   : > { %s71_s17 = ssub.s32 %s558_s12, %s604_s15  ;;  %p84_p0 = scmp.ne.s32.totalorder %s554_s11, %s550_s10 }
   0x6   : > { %p72_p1 = scmp.eq.s32.totalorder %s71_s17, 0  ;;  %p85_p2 = scmp.eq.s32.totalorder %s600_s13, 1 }
   0x7   : > { %p90_p3 = scmp.ne.s32.totalorder %s550_s10, %s546_s9  ;;  %p91_p4 = scmp.eq.s32.totalorder %s397_s14, 1 }
   0x8   : > { %s615_s18 = scalar_select %p72_p1, %s554_s11, %s74_s16  }
   0x9   : > { %p617_p5 = por %p85_p2, %p84_p0  ;;  %p621_p6 = por %p91_p4, %p90_p3 }
   0xa   : > { %p400_p7 = scmp.ge.s32.totalorder %s558_s12, 1  ;;  %p125_p8 = scmp.lt.s32.totalorder %s558_s12, 3 }
   0xc   : > { %p126_p9 = pnand %p400_p7, %p125_p8 }
   0xd   : > { %p152_p10 = scmp.lt.s32.totalorder (!%p126_p9), %s600_s13, 1  ;;  %v560_v0 = vmov (!%p126_p9), 0   ;;  %s149_s30 = sand.u32 (!%p126_p9), 1, %s550_s10  }
   0xe   : > { %129 = sbr.rel (%p126_p9) target bundleno = 288 (0x120), region = 28  ;;  %294 = vmatprep.mubr.bf16.mxu0 (!%p126_p9), %v560_v0  ;;  %s401_s3 = sshll.u32 (!%p126_p9), %s149_s30, 5 }
   0xf   : > { %s151_s4 = scalar_lea.vmem (!%p126_p9), [#allocation2], %s401_s3  ;;  %s429_s6 = sshll.u32 (!%p126_p9), %s600_s13, 9 }
  0x10   : > { %s323_s5 = sshll.u32 (!%p126_p9), %s151_s4, 4  ;;  %s664_s14 = scalar_lea.hbm (!%p126_p9), %s709_s2, %s429_s6  ;;  %s659_s5 = int_to_ptr.vmem [resolvable:$true] %s323_s5 }
  0x11   : > { %s666_s16 = scalar_lea.sflag (!%p126_p9), [#allocation3], %s149_s30  ;;  %s561_s17 = smov (!%p126_p9), [#allocation2]  }
  0x15   : > { %s629_s21 = scalar_select %p152_p10, %s600_s13, 1 }
  0x16   : > { %s496_s13 = scalar_lea.vmem %s659_s5, 512 }
  0x17   : > { %s428_s22 = sshll.u32 %s629_s21, 7  ;;  %s427_s26 = sshll.u32 %s629_s21, 4 }
  0x18   : > { %s635_s25 = scalar_lea.vmem %s708_s1, %s428_s22  ;;  %s156_s29 = scalar_lea.vmem %s707_s0, %s427_s26 }
  0x19   : > { %v472_v1 = vld [vmem:[%s635_s25 + $0x4] ss:$8 sps:$4 sm:$0xff]   ;;  %v474_v2 = vld [vmem:[%s635_s25] ss:$8 sps:$4 sm:$0xff]   ;;  %v475_v3 = vld [vmem:[%s635_s25 + $0x14] ss:$8 sps:$4 sm:$0xff]   ;;  %p497_p11 = scmp.ne.s32.totalorder %s659_s5, %s496_s13 }
  0x1a   : > { %262 = vmatprep.subr.bf16.mxu0 %v472_v1  ;;  %v477_v4 = vld [vmem:[%s635_s25 + $0x10] ss:$8 sps:$4 sm:$0xff]   ;;  %v478_v5 = vld [vmem:[%s635_s25 + $0x24] ss:$8 sps:$4 sm:$0xff]   ;;  %v480_v6 = vld [vmem:[%s635_s25 + $0x20] ss:$8 sps:$4 sm:$0xff]  }
  0x1b   : > { %263 = vmatpush1.bf16.msra.mxu0 %v474_v2  ;;  %v481_v7 = vld [vmem:[%s635_s25 + $0x34] ss:$8 sps:$4 sm:$0xff]   ;;  %v483_v8 = vld [vmem:[%s635_s25 + $0x30] ss:$8 sps:$4 sm:$0xff]   ;;  %v484_v9 = vld [vmem:[%s635_s25 + $0x44] ss:$8 sps:$4 sm:$0xff]   ;;  %p498_p12 = pnand %p497_p11, %p617_p5 }
  0x1c   : > { %264 = vmatprep.subr.bf16.mxu0 %v475_v3  ;;  %v486_v10 = vld [vmem:[%s635_s25 + $0x40] ss:$8 sps:$4 sm:$0xff]   ;;  %v487_v11 = vld [vmem:[%s635_s25 + $0x54] ss:$8 sps:$4 sm:$0xff]   ;;  %v489_v12 = vld [vmem:[%s635_s25 + $0x50] ss:$8 sps:$4 sm:$0xff]  }
  0x1d   : > { %v490_v13 = vld [vmem:[%s635_s25 + $0x64] ss:$8 sps:$4 sm:$0xff]   ;;  %v492_v14 = vld [vmem:[%s635_s25 + $0x60] ss:$8 sps:$4 sm:$0xff]   ;;  %v493_v15 = vld [vmem:[%s635_s25 + $0x74] ss:$8 sps:$4 sm:$0xff]   ;;  %p499_p13 = pneg %p498_p12 }
  0x1e   : > { %v495_v16 = vld [vmem:[%s635_s25 + $0x70] ss:$8 sps:$4 sm:$0xff]   ;;  %v163_v17 = vld [vmem:[%s156_s29] sm:$0xff]  ;;  %v164_v18 = vld [vmem:[%s156_s29 + $0x8] sm:$0xff]  ;;  %s500_s21 = sshll.u32 %s561_s17, 4  ;;  %s501_s21 = int_to_ptr.vmem [resolvable:$false] %s500_s21 }
  0x1f   : > { %265 = vmatpush1.bf16.msra.mxu0 %v477_v4  ;;  %v165_v19 = vpack.c.bf16 %v164_v18, %v163_v17  ;;  %s502_s22 = scalar_lea.vmem %s501_s21, 1024  ;;  %p503_p0 = scmp.lt.s32.totalorder %s659_s5, %s501_s21 }
  0x20   : > { %266 = vmatprep.subr.bf16.mxu0 %v478_v5  ;;  %p504_p1 = scmp.lt.s32.totalorder %s502_s22, %s496_s13 }
  0x22   : > { %p505_p2 = por %p504_p1, %p503_p0 }
  0x23   : > { %267 = vmatpush1.bf16.msra.mxu0 %v480_v6 }
  0x24   : > { %268 = vmatprep.subr.bf16.mxu0 %v481_v7  ;;  %p506_p3 = pnand %p505_p2, %p499_p13 }
  0x27   : > { %269 = vmatpush1.bf16.msra.mxu0 %v483_v8 }
  0x28   : > { %270 = vmatprep.subr.bf16.mxu0 %v484_v9 }
  0x2b   : > { %271 = vmatpush1.bf16.msra.mxu0 %v486_v10 }
  0x2c   : > { %272 = vmatprep.subr.bf16.mxu0 %v487_v11 }
  0x2f   : > { %273 = vmatpush1.bf16.msra.mxu0 %v489_v12 }
  0x30   : > { %274 = vmatprep.subr.bf16.mxu0 %v490_v13 }
  0x33   : > { %275 = vmatpush1.bf16.msra.mxu0 %v492_v14 }
  0x34   : > { %276 = vmatprep.subr.bf16.mxu0 %v493_v15 }
  0x37   : > { %277 = vmatpush1.bf16.msra.mxu0 %v495_v16 }
  0x3a   : > { %295 = vmatmul.mubr.bf16.vlgmr.msra.gmra.mrb[0].mxu0 %v165_v19 }
 0x10d   : > { %v296_v20 = vpop.f32.mrb[0].mxu0 }
 0x10e   : > { %305 = vst [vmem:[%s151_s4] sm:$0xff] %v296_v20  ;;  %v298_v21 = vpop.f32.mrb[1].mxu0 }
 0x10f   : > { %306 = vst [vmem:[%s151_s4 + $0x8] sm:$0xff] %v298_v21  ;;  %v300_v22 = vpop.f32.mrb[2].mxu0 }
 0x110   : > { %307 = vst [vmem:[%s151_s4 + $0x10] sm:$0xff] %v300_v22  ;;  %v302_v23 = vpop.f32.mrb[3].mxu0 }
 0x111   : > { %308 = vst [vmem:[%s151_s4 + $0x18] sm:$0xff] %v302_v23 }
 0x112   : > { %509 = shalt.err (!%p506_p3)
}
 0x113   : > { %s510_s23 = scalar_lea.hbm %s664_s14, 512  ;;  %s514_s26 = scalar_lea.hbm %s709_s2, 1024 }
 0x114   : > { %p511_p4 = scmp.ne.s32.totalorder %s664_s14, %s510_s23  ;;  %p515_p9 = scmp.lt.u32.totalorder %s664_s14, %s709_s2 }
 0x115   : > { %p516_p10 = scmp.lt.u32.totalorder %s514_s26, %s510_s23  ;;  %p518_p12 = scmp.lt.u32.totalorder %s510_s23, %s664_s14 }
 0x116   : > { %p512_p7 = pnand %p511_p4, %p617_p5 }
 0x117   : > { %p517_p11 = por %p516_p10, %p515_p9 }
 0x118   : > { %p513_p8 = pneg %p512_p7 }
 0x119   : > { %p519_p13 = por %p518_p12, %p517_p11 }
 0x11b   : > { %p520_p0 = pnand %p519_p13, %p513_p8 }
 0x11d   : > { %523 = shalt.err (!%p520_p0)
}
 0x11e   : > { %s562_s29 = smov 256   ;;  %s563_s30 = smov 16  }
 0x11f   : > { %430 = dma.vmem_to_hbm [thread:$0]  (%p617_p5), %s659_s5, 512, %s664_s14, %s666_s16, %s562_s29, %s562_s29, %s563_s30  }
 0x120 PF: > { %p436_p1 = scmp.ge.s32.totalorder %s558_s12, 2  ;;  %s338_s3 = sand.u32 1, %s546_s9  }
 0x121   : > { %s339_s4 = scalar_lea.sflag [#allocation3], %s338_s3 }
 0x122   : > { %p433_p2 = pnand %p436_p1, %p621_p6 }
 0x124   : > { %541 = dma.done.wait (!%p433_p2), %s339_s4, 512  }
 0x125   : > { %543 = vsyncadd (!%p433_p2), %s339_s4, 4294966784  ;;  %p12_p3 = scmp.ge.s32.totalorder %s604_s15, 4   ;;  %s712_s9 = smov %s550_s10 }
 0x126   : > { %s713_s10 = smov %s554_s11  ;;  %s714_s11 = smov %s615_s18 }
 0x127   : > { %s715_s12 = smov %s604_s15  ;;  %14 = sbr.rel (!%p12_p3) target bundleno = 3 (0x3), region = 66 }
 0x12e   :  { %344 = vsyncpa [#allocation3], 1 }
 0x12f   :  { %346 = vsyncpa [#allocation3 + $0x1], 1 }

// kernel: bert_latin_forward.11
= control target key start
LH: loop header
LB: loop body
LE: loop exit
PB: predicated region body
PF: predicated region fallthrough
CT: control target
= control target key end

     0   :  { %s5290_s0 = inlined_call_operand.vmem [shape: bf16[256,256], index: 0, kind: input, shape index: {}, may-alias: {0,5}]   ;;  %s5291_s1 = inlined_call_operand.vmem [shape: bf16[256,512], index: 1, kind: input, shape index: {}]   ;;  %s5292_s2 = inlined_call_operand.vmem [shape: f32[1,512], index: 2, kind: input, shape index: {}]   ;;  %s5293_s3 = inlined_call_operand.vmem [shape: bf16[512,256], index: 3, kind: input, shape index: {}]   ;;  %s5294_s4 = inlined_call_operand.vmem [shape: f32[1,256], index: 4, kind: input, shape index: {}]   ;;  %s5295_s5 = inlined_call_operand.vmem [shape: bf16[256,256], index: 5, kind: input, shape index: {}, may-alias: {0,5}]   ;;  %s5296_s6 = inlined_call_operand.vmem [shape: f32[1,256], index: 6, kind: input, shape index: {}]   ;;  %s5297_s7 = inlined_call_operand.vmem [shape: f32[1,256], index: 7, kind: input, shape index: {}]   ;;  %s5298_s8 = inlined_call_operand.vmem [shape: bf16[256,256], index: 8, kind: output, shape index: {}]  }
   0x1   :  { %5316 = sst [smem:[#allocation25_spill]] %s5290_s0 }
   0x2   :  { %5317 = sst [smem:[#allocation26_spill]] %s5291_s1 }
   0x3   :  { %s3627_s27 = smov 0   ;;  %s3629_s28 = smov 0  }
   0x4   :  { %s3631_s29 = smov 0   ;;  %s3633_s30 = smov 0  }
   0x5   :  { %s3635_s9 = smov 0   ;;  %s3637_s10 = smov 0  }
   0x6   :  { %s3639_s11 = smov 0  }
   0x7 LB: > { %s27_s12 = sadd.s32 1, %s3570_s9  ;;  %s30_s13 = sadd.s32 1, %s3574_s10  ;;  %s3578_s11 = sphi %s3639_s11, %s18_s11   ;;  %s3574_s10 = sphi %s3637_s10, %s5385_s10   ;;  %s3570_s9 = sphi %s3635_s9, %s5384_s9   ;;  %s3566_s30 = sphi %s3633_s30, %s5383_s30   ;;  %s3562_s29 = sphi %s3631_s29, %s5382_s29   ;;  %s3558_s28 = sphi %s3629_s28, %s5381_s28   ;;  %s3554_s27 = sphi %s3627_s27, %s5380_s27  }
   0x8   : > { %p28_p0 = scmp.ge.s32.totalorder %s27_s12, 2  ;;  %s63_s14 = sadd.s32 1, %s3558_s28 }
   0x9   : > { %p70_p1 = scmp.ne.s32.totalorder %s3558_s28, %s3554_s27  ;;  %p71_p2 = scmp.eq.s32.totalorder %s3578_s11, 0 }
   0xa   : > { %s5387_s12 = smov (%p28_p0, %s27_s12), 0  ;;  %s5389_s13 = smov (!%p28_p0, %s30_s13), %s3574_s10 }
   0xb   : > { %s60_s15 = ssub.s32 %s3570_s9, %s5387_s12  ;;  %p72_p3 = por %p71_p2, %p70_p1 }
   0xc   : > { %p32_p4 = scmp.ge.s32.totalorder %s5389_s13, 2  ;;  %p61_p5 = scmp.eq.s32.totalorder %s60_s15, 0 }
   0xd   : > { %p3046_p6 = scmp.ge.s32.totalorder %s3578_s11, 4 }
   0xe   : > { %s5391_s13 = smov (%p32_p4, %s5389_s13), 0 }
   0xf   : > { %5318 = sst [smem:[#allocation4_spill]] %s5391_s13  ;;  %272 = sbr.rel (%p3046_p6) target bundleno = 48 (0x30), region = 28 }
  0x10   : > { %s3676_s16 = scalar_select %p61_p5, %s3558_s28, %s63_s14  }
  0x16   : > { %285 = sbr.rel (!%p72_p3) target bundleno = 48 (0x30), region = 36  ;;  %s287_s17 = sand.u32 (%p72_p3), 1, %s3558_s28  }
  0x17   : > { %s3165_s18 = sshll.u32 (%p72_p3), %s3570_s9, 3  ;;  %s3047_s19 = sshll.u32 (%p72_p3), %s287_s17, 8 }
  0x18   : > { %s5319_s1 = sld [smem:[#allocation26_spill]] (%p72_p3)  ;;  %s3689_s23 = scalar_lea.vmem (%p72_p3), [#allocation3], %s3047_s19 }
  0x1e   : > { %s3684_s22 = scalar_lea.vmem %s5319_s1, %s3165_s18 }
  0x1f   : > { %v382_v0 = vld [vmem:[%s3684_s22] sm:$0xff]  ;;  %v384_v1 = vld [vmem:[%s3684_s22 + $0x10] sm:$0xff] }
  0x20   : > { %v386_v2 = vld [vmem:[%s3684_s22 + $0x20] sm:$0xff]  ;;  %383 = vst [vmem:[%s3689_s23] sm:$0xff] %v382_v0  ;;  %385 = vst [vmem:[%s3689_s23 + $0x8] sm:$0xff] %v384_v1  ;;  %v388_v3 = vld [vmem:[%s3684_s22 + $0x30] sm:$0xff] }
  0x21   : > { %387 = vst [vmem:[%s3689_s23 + $0x10] sm:$0xff] %v386_v2  ;;  %v390_v4 = vld [vmem:[%s3684_s22 + $0x40] sm:$0xff]  ;;  %v392_v5 = vld [vmem:[%s3684_s22 + $0x50] sm:$0xff]  ;;  %389 = vst [vmem:[%s3689_s23 + $0x18] sm:$0xff] %v388_v3 }
  0x22   : > { %391 = vst [vmem:[%s3689_s23 + $0x20] sm:$0xff] %v390_v4  ;;  %393 = vst [vmem:[%s3689_s23 + $0x28] sm:$0xff] %v392_v5  ;;  %v394_v6 = vld [vmem:[%s3684_s22 + $0x60] sm:$0xff]  ;;  %v396_v7 = vld [vmem:[%s3684_s22 + $0x70] sm:$0xff] }
  0x23   : > { %v398_v8 = vld [vmem:[%s3684_s22 + $0x80] sm:$0xff]  ;;  %395 = vst [vmem:[%s3689_s23 + $0x30] sm:$0xff] %v394_v6  ;;  %397 = vst [vmem:[%s3689_s23 + $0x38] sm:$0xff] %v396_v7  ;;  %v400_v9 = vld [vmem:[%s3684_s22 + $0x90] sm:$0xff] }
  0x24   : > { %399 = vst [vmem:[%s3689_s23 + $0x40] sm:$0xff] %v398_v8  ;;  %v402_v10 = vld [vmem:[%s3684_s22 + $0xa0] sm:$0xff]  ;;  %v404_v11 = vld [vmem:[%s3684_s22 + $0xb0] sm:$0xff]  ;;  %401 = vst [vmem:[%s3689_s23 + $0x48] sm:$0xff] %v400_v9 }
  0x25   : > { %403 = vst [vmem:[%s3689_s23 + $0x50] sm:$0xff] %v402_v10  ;;  %405 = vst [vmem:[%s3689_s23 + $0x58] sm:$0xff] %v404_v11  ;;  %v406_v12 = vld [vmem:[%s3684_s22 + $0xc0] sm:$0xff]  ;;  %v408_v13 = vld [vmem:[%s3684_s22 + $0xd0] sm:$0xff] }
  0x26   : > { %v410_v14 = vld [vmem:[%s3684_s22 + $0xe0] sm:$0xff]  ;;  %407 = vst [vmem:[%s3689_s23 + $0x60] sm:$0xff] %v406_v12  ;;  %409 = vst [vmem:[%s3689_s23 + $0x68] sm:$0xff] %v408_v13  ;;  %v412_v15 = vld [vmem:[%s3684_s22 + $0xf0] sm:$0xff] }
  0x27   : > { %411 = vst [vmem:[%s3689_s23 + $0x70] sm:$0xff] %v410_v14  ;;  %v414_v16 = vld [vmem:[%s3684_s22 + $0x100] sm:$0xff]  ;;  %v416_v17 = vld [vmem:[%s3684_s22 + $0x110] sm:$0xff]  ;;  %413 = vst [vmem:[%s3689_s23 + $0x78] sm:$0xff] %v412_v15 }
  0x28   : > { %415 = vst [vmem:[%s3689_s23 + $0x80] sm:$0xff] %v414_v16  ;;  %417 = vst [vmem:[%s3689_s23 + $0x88] sm:$0xff] %v416_v17  ;;  %v418_v18 = vld [vmem:[%s3684_s22 + $0x120] sm:$0xff]  ;;  %v420_v19 = vld [vmem:[%s3684_s22 + $0x130] sm:$0xff] }
  0x29   : > { %v422_v20 = vld [vmem:[%s3684_s22 + $0x140] sm:$0xff]  ;;  %419 = vst [vmem:[%s3689_s23 + $0x90] sm:$0xff] %v418_v18  ;;  %421 = vst [vmem:[%s3689_s23 + $0x98] sm:$0xff] %v420_v19  ;;  %v424_v21 = vld [vmem:[%s3684_s22 + $0x150] sm:$0xff] }
  0x2a   : > { %423 = vst [vmem:[%s3689_s23 + $0xa0] sm:$0xff] %v422_v20  ;;  %v426_v22 = vld [vmem:[%s3684_s22 + $0x160] sm:$0xff]  ;;  %v428_v23 = vld [vmem:[%s3684_s22 + $0x170] sm:$0xff]  ;;  %425 = vst [vmem:[%s3689_s23 + $0xa8] sm:$0xff] %v424_v21 }
  0x2b   : > { %427 = vst [vmem:[%s3689_s23 + $0xb0] sm:$0xff] %v426_v22  ;;  %429 = vst [vmem:[%s3689_s23 + $0xb8] sm:$0xff] %v428_v23  ;;  %v430_v24 = vld [vmem:[%s3684_s22 + $0x180] sm:$0xff]  ;;  %v432_v25 = vld [vmem:[%s3684_s22 + $0x190] sm:$0xff] }
  0x2c   : > { %v434_v26 = vld [vmem:[%s3684_s22 + $0x1a0] sm:$0xff]  ;;  %431 = vst [vmem:[%s3689_s23 + $0xc0] sm:$0xff] %v430_v24  ;;  %433 = vst [vmem:[%s3689_s23 + $0xc8] sm:$0xff] %v432_v25  ;;  %v436_v27 = vld [vmem:[%s3684_s22 + $0x1b0] sm:$0xff] }
  0x2d   : > { %435 = vst [vmem:[%s3689_s23 + $0xd0] sm:$0xff] %v434_v26  ;;  %v438_v28 = vld [vmem:[%s3684_s22 + $0x1c0] sm:$0xff]  ;;  %v440_v29 = vld [vmem:[%s3684_s22 + $0x1d0] sm:$0xff]  ;;  %437 = vst [vmem:[%s3689_s23 + $0xd8] sm:$0xff] %v436_v27 }
  0x2e   : > { %439 = vst [vmem:[%s3689_s23 + $0xe0] sm:$0xff] %v438_v28  ;;  %441 = vst [vmem:[%s3689_s23 + $0xe8] sm:$0xff] %v440_v29  ;;  %v442_v30 = vld [vmem:[%s3684_s22 + $0x1e0] sm:$0xff]  ;;  %v444_v31 = vld [vmem:[%s3684_s22 + $0x1f0] sm:$0xff] }
  0x2f   : > { %443 = vst [vmem:[%s3689_s23 + $0xf0] sm:$0xff] %v442_v30  ;;  %445 = vst [vmem:[%s3689_s23 + $0xf8] sm:$0xff] %v444_v31 }
  0x30 PF: > { %p3050_p7 = scmp.ge.s32.totalorder %s3578_s11, 1  ;;  %p478_p8 = scmp.lt.s32.totalorder %s3578_s11, 5 }
  0x32   : > { %p479_p9 = pnand %p3050_p7, %p478_p8 }
  0x34   : > { %482 = sbr.rel (%p479_p9) target bundleno = 1183 (0x49f), region = 86 }
  0x3b   : > { %s485_s24 = sand.u32 1, %s3554_s27   ;;  %s3052_s25 = sshll.u32 %s3566_s30, 4 }
  0x3c   : > { %s3051_s26 = sshll.u32 %s485_s24, 8  ;;  %p542_p10 = scmp.lt.s32.totalorder %s3052_s25, 31 }
  0x3d   : > { %s3055_s14 = sshll.u32 %s3562_s29, 1  ;;  %s3056_s15 = sshll.u32 %s3562_s29, 5 }
  0x3e   : > { %s5393_s25 = smov (!%p542_p10, %s3052_s25), 31  ;;  %p550_p11 = scmp.lt.s32.totalorder %s3055_s14, 3 }
  0x3f   : > { %s3166_s17 = sshll.u32 %s5393_s25, 3  ;;  %p555_p12 = scmp.lt.s32.totalorder %s3056_s15, 63 }
  0x40   : > { %s5320_s0 = sld [smem:[#allocation25_spill]]  ;;  %s3766_s23 = scalar_lea.vmem %s5295_s5, %s3166_s17 }
  0x41   : > { %s5395_s14 = smov (!%p550_p11, %s3055_s14), 3  ;;  %s5397_s15 = smov (!%p555_p12, %s3056_s15), 63 }
  0x42   : > { %s552_s24 = scalar_lea.vmem %s5292_s2, %s5395_s14  ;;  %s3777_s13 = scalar_lea.vmem %s5298_s8, %s3166_s17 }
  0x43   : > { %s3167_s18 = sshll.u32 %s5397_s15, 3  ;;  %s3784_s22 = scalar_lea.vmem [#allocation3], %s3051_s26 }
  0x44   : > { %s3782_s21 = scalar_lea.vmem %s5293_s3, %s3167_s18  ;;  %p3065_p13 = scmp.ne.s32.totalorder %s3562_s29, 0 }
  0x45   : > { %v3580_v32 = vmov (!%p3065_p13), 0.0  }
  0x46   : > { %s3761_s20 = scalar_lea.vmem %s5320_s0, %s3166_s17  ;;  %578 = sbr.rel (%p3065_p13) target bundleno = 86 (0x56), region = 94  ;;  %579 = vst [vmem:[#allocation2] sm:$0xff] (!%p3065_p13), %v3580_v32  ;;  %580 = vst [vmem:[#allocation2 + $0x8] sm:$0xff] (!%p3065_p13), %v3580_v32 }
  0x47   : > { %581 = vst [vmem:[#allocation2 + $0x10] sm:$0xff] (!%p3065_p13), %v3580_v32  ;;  %582 = vst [vmem:[#allocation2 + $0x18] sm:$0xff] (!%p3065_p13), %v3580_v32 }
  0x48   : > { %583 = vst [vmem:[#allocation2 + $0x20] sm:$0xff] (!%p3065_p13), %v3580_v32  ;;  %584 = vst [vmem:[#allocation2 + $0x28] sm:$0xff] (!%p3065_p13), %v3580_v32 }
  0x49   : > { %585 = vst [vmem:[#allocation2 + $0x30] sm:$0xff] (!%p3065_p13), %v3580_v32  ;;  %586 = vst [vmem:[#allocation2 + $0x38] sm:$0xff] (!%p3065_p13), %v3580_v32 }
  0x4a   : > { %587 = vst [vmem:[#allocation2 + $0x40] sm:$0xff] (!%p3065_p13), %v3580_v32  ;;  %588 = vst [vmem:[#allocation2 + $0x48] sm:$0xff] (!%p3065_p13), %v3580_v32 }
  0x4b   : > { %589 = vst [vmem:[#allocation2 + $0x50] sm:$0xff] (!%p3065_p13), %v3580_v32  ;;  %590 = vst [vmem:[#allocation2 + $0x58] sm:$0xff] (!%p3065_p13), %v3580_v32 }
  0x4c   : > { %591 = vst [vmem:[#allocation2 + $0x60] sm:$0xff] (!%p3065_p13), %v3580_v32  ;;  %592 = vst [vmem:[#allocation2 + $0x68] sm:$0xff] (!%p3065_p13), %v3580_v32 }
  0x4d   : > { %593 = vst [vmem:[#allocation2 + $0x70] sm:$0xff] %v3580_v32  ;;  %594 = vst [vmem:[#allocation2 + $0x78] sm:$0xff] %v3580_v32 }
  0x4e   : > { %595 = vst [vmem:[#allocation2 + $0x80] sm:$0xff] %v3580_v32  ;;  %596 = vst [vmem:[#allocation2 + $0x88] sm:$0xff] %v3580_v32 }
  0x4f   : > { %597 = vst [vmem:[#allocation2 + $0x90] sm:$0xff] %v3580_v32  ;;  %598 = vst [vmem:[#allocation2 + $0x98] sm:$0xff] %v3580_v32 }
  0x50   : > { %599 = vst [vmem:[#allocation2 + $0xa0] sm:$0xff] %v3580_v32  ;;  %600 = vst [vmem:[#allocation2 + $0xa8] sm:$0xff] %v3580_v32 }
  0x51   : > { %601 = vst [vmem:[#allocation2 + $0xb0] sm:$0xff] %v3580_v32  ;;  %602 = vst [vmem:[#allocation2 + $0xb8] sm:$0xff] %v3580_v32 }
  0x52   : > { %603 = vst [vmem:[#allocation2 + $0xc0] sm:$0xff] %v3580_v32  ;;  %604 = vst [vmem:[#allocation2 + $0xc8] sm:$0xff] %v3580_v32 }
  0x53   : > { %605 = vst [vmem:[#allocation2 + $0xd0] sm:$0xff] %v3580_v32  ;;  %606 = vst [vmem:[#allocation2 + $0xd8] sm:$0xff] %v3580_v32 }
  0x54   : > { %607 = vst [vmem:[#allocation2 + $0xe0] sm:$0xff] %v3580_v32  ;;  %608 = vst [vmem:[#allocation2 + $0xe8] sm:$0xff] %v3580_v32 }
  0x55   : > { %609 = vst [vmem:[#allocation2 + $0xf0] sm:$0xff] %v3580_v32  ;;  %610 = vst [vmem:[#allocation2 + $0xf8] sm:$0xff] %v3580_v32 }
  0x56 PF: > { %v3244_v33 = vld [vmem:[%s3784_s22 + $0x4] ss:$8 sps:$4 sm:$0xff]   ;;  %v3246_v34 = vld [vmem:[%s3784_s22] ss:$8 sps:$4 sm:$0xff]   ;;  %v3247_v35 = vld [vmem:[%s3784_s22 + $0x14] ss:$8 sps:$4 sm:$0xff]  }
  0x57   : > { %911 = vmatprep.subr.bf16.mxu0 %v3244_v33  ;;  %v3249_v36 = vld [vmem:[%s3784_s22 + $0x10] ss:$8 sps:$4 sm:$0xff]   ;;  %v3250_v37 = vld [vmem:[%s3784_s22 + $0x24] ss:$8 sps:$4 sm:$0xff]   ;;  %v3252_v38 = vld [vmem:[%s3784_s22 + $0x20] ss:$8 sps:$4 sm:$0xff]  }
  0x58   : > { %912 = vmatpush1.bf16.msra.mxu0 %v3246_v34  ;;  %v3253_v39 = vld [vmem:[%s3784_s22 + $0x34] ss:$8 sps:$4 sm:$0xff]   ;;  %v3255_v40 = vld [vmem:[%s3784_s22 + $0x30] ss:$8 sps:$4 sm:$0xff]   ;;  %v3256_v41 = vld [vmem:[%s3784_s22 + $0x44] ss:$8 sps:$4 sm:$0xff]  }
  0x59   : > { %913 = vmatprep.subr.bf16.mxu0 %v3247_v35  ;;  %v3258_v42 = vld [vmem:[%s3784_s22 + $0x40] ss:$8 sps:$4 sm:$0xff]   ;;  %v3259_v43 = vld [vmem:[%s3784_s22 + $0x54] ss:$8 sps:$4 sm:$0xff]   ;;  %v3261_v44 = vld [vmem:[%s3784_s22 + $0x50] ss:$8 sps:$4 sm:$0xff]  }
  0x5a   : > { %v3262_v45 = vld [vmem:[%s3784_s22 + $0x64] ss:$8 sps:$4 sm:$0xff]   ;;  %v3264_v47 = vld [vmem:[%s3784_s22 + $0x60] ss:$8 sps:$4 sm:$0xff]   ;;  %v3265_v48 = vld [vmem:[%s3784_s22 + $0x74] ss:$8 sps:$4 sm:$0xff]  }
  0x5b   : > { %v3294_v46 = vld [vmem:[%s3761_s20 + $0x4] ss:$8 sps:$4 sm:$0xff]   ;;  %v3267_v49 = vld [vmem:[%s3784_s22 + $0x70] ss:$8 sps:$4 sm:$0xff]   ;;  %v3270_v51 = vld [vmem:[%s3784_s22 + $0x80] ss:$8 sps:$4 sm:$0xff]  }
  0x5c   : > { %914 = vmatpush1.bf16.msra.mxu0 %v3249_v36  ;;  %943 = vmatprep.mubr.bf16.mxu0 %v3294_v46  ;;  %v3268_v50 = vld [vmem:[%s3784_s22 + $0x84] ss:$8 sps:$4 sm:$0xff]   ;;  %v3271_v52 = vld [vmem:[%s3784_s22 + $0x94] ss:$8 sps:$4 sm:$0xff]   ;;  %v3273_v54 = vld [vmem:[%s3784_s22 + $0x90] ss:$8 sps:$4 sm:$0xff]  }
  0x5d   : > { %915 = vmatprep.subr.bf16.mxu0 %v3250_v37  ;;  %v3316_v53 = vld [vmem:[%s3782_s21 + $0x4] ss:$8 sps:$4 sm:$0xff]   ;;  %v3318_v55 = vld [vmem:[%s3782_s21] ss:$8 sps:$4 sm:$0xff]   ;;  %v3319_v57 = vld [vmem:[%s3782_s21 + $0x14] ss:$8 sps:$4 sm:$0xff]  }
  0x5e   : > { %v3274_v56 = vld [vmem:[%s3784_s22 + $0xa4] ss:$8 sps:$4 sm:$0xff]   ;;  %2128 = vmatprep.subr.bf16.mxu1 %v3316_v53  ;;  %v3321_v58 = vld [vmem:[%s3782_s21 + $0x10] ss:$8 sps:$4 sm:$0xff]   ;;  %v3276_v59 = vld [vmem:[%s3784_s22 + $0xa0] ss:$8 sps:$4 sm:$0xff]  }
  0x5f   : > { %2129 = vmatpush1.bf16.msra.mxu1 %v3318_v55  ;;  %v3277_v60 = vld [vmem:[%s3784_s22 + $0xb4] ss:$8 sps:$4 sm:$0xff]   ;;  %v3279_v61 = vld [vmem:[%s3784_s22 + $0xb0] ss:$8 sps:$4 sm:$0xff]   ;;  %v3280_v62 = vld [vmem:[%s3784_s22 + $0xc4] ss:$8 sps:$4 sm:$0xff]  }
  0x60   : > { %916 = vmatpush1.bf16.msra.mxu0 %v3252_v38  ;;  %2130 = vmatprep.subr.bf16.mxu1 %v3319_v57  ;;  %v3282_v63 = vld [vmem:[%s3784_s22 + $0xc0] ss:$8 sps:$4 sm:$0xff]   ;;  %v3283_v0 = vld [vmem:[%s3784_s22 + $0xd4] ss:$8 sps:$4 sm:$0xff]   ;;  %v3285_v1 = vld [vmem:[%s3784_s22 + $0xd0] ss:$8 sps:$4 sm:$0xff]  }
  0x61   : > { %917 = vmatprep.subr.bf16.mxu0 %v3253_v39  ;;  %v3286_v2 = vld [vmem:[%s3784_s22 + $0xe4] ss:$8 sps:$4 sm:$0xff]   ;;  %v3288_v3 = vld [vmem:[%s3784_s22 + $0xe0] ss:$8 sps:$4 sm:$0xff]   ;;  %v3289_v4 = vld [vmem:[%s3784_s22 + $0xf4] ss:$8 sps:$4 sm:$0xff]  }
  0x62   : > { %v3291_v5 = vld [vmem:[%s3784_s22 + $0xf0] ss:$8 sps:$4 sm:$0xff]   ;;  %v3292_v6 = vld [vmem:[%s3761_s20] ss:$8 sps:$4 sm:$0xff]   ;;  %v3295_v7 = vld [vmem:[%s3761_s20 + $0x14] ss:$8 sps:$4 sm:$0xff]  }
  0x63   : > { %2131 = vmatpush1.bf16.msra.mxu1 %v3321_v58  ;;  %v3297_v8 = vld [vmem:[%s3761_s20 + $0x10] ss:$8 sps:$4 sm:$0xff]   ;;  %v3298_v9 = vld [vmem:[%s3761_s20 + $0x24] ss:$8 sps:$4 sm:$0xff]   ;;  %v3300_v10 = vld [vmem:[%s3761_s20 + $0x20] ss:$8 sps:$4 sm:$0xff]  }
  0x64   : > { %918 = vmatpush1.bf16.msra.mxu0 %v3255_v40  ;;  %v3301_v11 = vld [vmem:[%s3761_s20 + $0x34] ss:$8 sps:$4 sm:$0xff]   ;;  %v3303_v12 = vld [vmem:[%s3761_s20 + $0x30] ss:$8 sps:$4 sm:$0xff]   ;;  %v3304_v13 = vld [vmem:[%s3761_s20 + $0x44] ss:$8 sps:$4 sm:$0xff]  }
  0x65   : > { %919 = vmatprep.subr.bf16.mxu0 %v3256_v41  ;;  %v3306_v14 = vld [vmem:[%s3761_s20 + $0x40] ss:$8 sps:$4 sm:$0xff]   ;;  %v3307_v15 = vld [vmem:[%s3761_s20 + $0x54] ss:$8 sps:$4 sm:$0xff]   ;;  %v3309_v16 = vld [vmem:[%s3761_s20 + $0x50] ss:$8 sps:$4 sm:$0xff]  }
  0x66   : > { %v3310_v17 = vld [vmem:[%s3761_s20 + $0x64] ss:$8 sps:$4 sm:$0xff]   ;;  %v3312_v18 = vld [vmem:[%s3761_s20 + $0x60] ss:$8 sps:$4 sm:$0xff]   ;;  %v3313_v19 = vld [vmem:[%s3761_s20 + $0x74] ss:$8 sps:$4 sm:$0xff]  }
  0x67   : > { %v3315_v20 = vld [vmem:[%s3761_s20 + $0x70] ss:$8 sps:$4 sm:$0xff]   ;;  %v3322_v21 = vld [vmem:[%s3782_s21 + $0x24] ss:$8 sps:$4 sm:$0xff]   ;;  %v3324_v22 = vld [vmem:[%s3782_s21 + $0x20] ss:$8 sps:$4 sm:$0xff]  }
  0x68   : > { %920 = vmatpush1.bf16.msra.mxu0 %v3258_v42  ;;  %2132 = vmatprep.subr.bf16.mxu1 %v3322_v21  ;;  %v3325_v23 = vld [vmem:[%s3782_s21 + $0x34] ss:$8 sps:$4 sm:$0xff]   ;;  %v3327_v24 = vld [vmem:[%s3782_s21 + $0x30] ss:$8 sps:$4 sm:$0xff]   ;;  %v3328_v25 = vld [vmem:[%s3782_s21 + $0x44] ss:$8 sps:$4 sm:$0xff]   ;;  %v661_v42 = vlaneseq }
  0x69   : > { %921 = vmatprep.subr.bf16.mxu0 %v3259_v43  ;;  %2133 = vmatpush1.bf16.msra.mxu1 %v3324_v22  ;;  %v3330_v26 = vld [vmem:[%s3782_s21 + $0x40] ss:$8 sps:$4 sm:$0xff]   ;;  %v3331_v27 = vld [vmem:[%s3782_s21 + $0x54] ss:$8 sps:$4 sm:$0xff]   ;;  %v3333_v28 = vld [vmem:[%s3782_s21 + $0x50] ss:$8 sps:$4 sm:$0xff]  }
  0x6a   : > { %2134 = vmatprep.subr.bf16.mxu1 %v3325_v23  ;;  %v3334_v29 = vld [vmem:[%s3782_s21 + $0x64] ss:$8 sps:$4 sm:$0xff]   ;;  %v3336_v30 = vld [vmem:[%s3782_s21 + $0x60] ss:$8 sps:$4 sm:$0xff]   ;;  %v3337_v31 = vld [vmem:[%s3782_s21 + $0x74] ss:$8 sps:$4 sm:$0xff]  }
  0x6b   : > { %v3339_v32 = vld [vmem:[%s3782_s21 + $0x70] ss:$8 sps:$4 sm:$0xff]   ;;  %v3340_v33 = vld [vmem:[%s3782_s21 + $0x84] ss:$8 sps:$4 sm:$0xff]   ;;  %v3342_v34 = vld [vmem:[%s3782_s21 + $0x80] ss:$8 sps:$4 sm:$0xff]  }
  0x6c   : > { %922 = vmatpush1.bf16.msra.mxu0 %v3261_v44  ;;  %v3343_v35 = vld [vmem:[%s3782_s21 + $0x94] ss:$8 sps:$4 sm:$0xff]   ;;  %v3345_v36 = vld [vmem:[%s3782_s21 + $0x90] ss:$8 sps:$4 sm:$0xff]   ;;  %v3346_v37 = vld [vmem:[%s3782_s21 + $0xa4] ss:$8 sps:$4 sm:$0xff]  }
  0x6d   : > { %923 = vmatprep.subr.bf16.mxu0 %v3262_v45  ;;  %2135 = vmatpush1.bf16.msra.mxu1 %v3327_v24  ;;  %v3348_v38 = vld [vmem:[%s3782_s21 + $0xa0] ss:$8 sps:$4 sm:$0xff]   ;;  %v3349_v39 = vld [vmem:[%s3782_s21 + $0xb4] ss:$8 sps:$4 sm:$0xff]   ;;  %v3351_v40 = vld [vmem:[%s3782_s21 + $0xb0] ss:$8 sps:$4 sm:$0xff]  }
  0x6e   : > { %2136 = vmatprep.subr.bf16.mxu1 %v3328_v25  ;;  %v3352_v41 = vld [vmem:[%s3782_s21 + $0xc4] ss:$8 sps:$4 sm:$0xff]   ;;  %v662_v43 = vshrl.u32 %v661_v42, 7  ;;  %v3354_v44 = vld [vmem:[%s3782_s21 + $0xc0] ss:$8 sps:$4 sm:$0xff]   ;;  %p3146_p0 = scmp.ne.s32.totalorder %s3562_s29, 1 }
  0x6f   : > { %v659_v46 = vld [vmem:[%s552_s24] sm:$0x3] }
  0x70   : > { %924 = vmatpush1.bf16.msra.mxu0 %v3264_v47  ;;  %v3861_v45 = vsub.s32 0, %v662_v43  ;;  %v3868_v47 = vsub.s32 1, %v662_v43  ;;  %v3360_v23 = vld [vmem:[%s3782_s21 + $0xe0] ss:$8 sps:$4 sm:$0xff]  }
  0x71   : > { %925 = vmatprep.subr.bf16.mxu0 %v3265_v48  ;;  %2137 = vmatpush1.bf16.msra.mxu1 %v3330_v26 }
  0x72   : > { %2138 = vmatprep.subr.bf16.mxu1 %v3331_v27  ;;  %5321 = vst [vmem:[#allocation5_spill] sm:$0xff] %v3861_v45  ;;  %5322 = vst [vmem:[#allocation6_spill] sm:$0xff] %v3868_v47  ;;  %v3871_v48 = vrot.slane %v659_v46, %v3861_v45 }
  0x74   : > { %926 = vmatpush1.bf16.msra.mxu0 %v3267_v49  ;;  %v3874_v49 = vrot.slane %v659_v46, %v3868_v47 }
  0x75   : > { %927 = vmatprep.subr.bf16.mxu0 %v3268_v50  ;;  %2139 = vmatpush1.bf16.msra.mxu1 %v3333_v28 }
  0x76   : > { %2140 = vmatprep.subr.bf16.mxu1 %v3334_v29 }
  0x78   : > { %928 = vmatpush1.bf16.msra.mxu0 %v3270_v51 }
  0x79   : > { %929 = vmatprep.subr.bf16.mxu0 %v3271_v52  ;;  %2141 = vmatpush1.bf16.msra.mxu1 %v3336_v30 }
  0x7a   : > { %2142 = vmatprep.subr.bf16.mxu1 %v3337_v31 }
  0x7c   : > { %930 = vmatpush1.bf16.msra.mxu0 %v3273_v54 }
  0x7d   : > { %931 = vmatprep.subr.bf16.mxu0 %v3274_v56  ;;  %2143 = vmatpush1.bf16.msra.mxu1 %v3339_v32  ;;  %v5301_v32 = vmov -1.0  }
  0x7e   : > { %2144 = vmatprep.subr.bf16.mxu1 %v3340_v33 }
  0x80   : > { %932 = vmatpush1.bf16.msra.mxu0 %v3276_v59  ;;  %v3355_v59 = vld [vmem:[%s3782_s21 + $0xd4] ss:$8 sps:$4 sm:$0xff]  }
  0x81   : > { %933 = vmatprep.subr.bf16.mxu0 %v3277_v60  ;;  %2145 = vmatpush1.bf16.msra.mxu1 %v3342_v34 }
  0x82   : > { %2146 = vmatprep.subr.bf16.mxu1 %v3343_v35 }
  0x84   : > { %934 = vmatpush1.bf16.msra.mxu0 %v3279_v61 }
  0x85   : > { %935 = vmatprep.subr.bf16.mxu0 %v3280_v62  ;;  %2147 = vmatpush1.bf16.msra.mxu1 %v3345_v36 }
  0x86   : > { %2148 = vmatprep.subr.bf16.mxu1 %v3346_v37 }
  0x88   : > { %936 = vmatpush1.bf16.msra.mxu0 %v3282_v63 }
  0x89   : > { %937 = vmatprep.subr.bf16.mxu0 %v3283_v0  ;;  %2149 = vmatpush1.bf16.msra.mxu1 %v3348_v38 }
  0x8a   : > { %2150 = vmatprep.subr.bf16.mxu1 %v3349_v39 }
  0x8c   : > { %938 = vmatpush1.bf16.msra.mxu0 %v3285_v1 }
  0x8d   : > { %939 = vmatprep.subr.bf16.mxu0 %v3286_v2  ;;  %2151 = vmatpush1.bf16.msra.mxu1 %v3351_v40 }
  0x8e   : > { %2152 = vmatprep.subr.bf16.mxu1 %v3352_v41 }
  0x90   : > { %940 = vmatpush1.bf16.msra.mxu0 %v3288_v3 }
  0x91   : > { %941 = vmatprep.subr.bf16.mxu0 %v3289_v4  ;;  %2153 = vmatpush1.bf16.msra.mxu1 %v3354_v44 }
  0x92   : > { %2154 = vmatprep.subr.bf16.mxu1 %v3355_v59 }
  0x94   : > { %942 = vmatpush1.bf16.msra.mxu0 %v3291_v5 }
  0x97   : > { %944 = vmatmul.mubr.bf16.vlgmr.msra.gmra.mrb[0].mxu0 %v3292_v6 }
  0x98   : > { %953 = vmatprep.mubr.bf16.mxu0 %v3295_v7 }
  0x9f   : > { %954 = vmatmul.mubr.bf16.gmra.mrb[4].mxu0 %v3297_v8 }
  0xa0   : > { %963 = vmatprep.mubr.bf16.mxu0 %v3298_v9 }
  0xa7   : > { %964 = vmatmul.mubr.bf16.gmra.mrb[8].mxu0 %v3300_v10 }
  0xa8   : > { %973 = vmatprep.mubr.bf16.mxu0 %v3301_v11  ;;  %v3357_v11 = vld [vmem:[%s3782_s21 + $0xd0] ss:$8 sps:$4 sm:$0xff]  }
  0xa9   : > { %2155 = vmatpush1.bf16.msra.mxu1 %v3357_v11 }
  0xaf   : > { %974 = vmatmul.mubr.bf16.gmra.mrb[12].mxu0 %v3303_v12 }
  0xb0   : > { %983 = vmatprep.mubr.bf16.mxu0 %v3304_v13 }
  0xb7   : > { %984 = vmatmul.mubr.bf16.gmra.mrb[16].mxu0 %v3306_v14 }
  0xb8   : > { %993 = vmatprep.mubr.bf16.mxu0 %v3307_v15 }
  0xbf   : > { %994 = vmatmul.mubr.bf16.gmra.mrb[20].mxu0 %v3309_v16 }
  0xc0   : > { %1003 = vmatprep.mubr.bf16.mxu0 %v3310_v17  ;;  %v3358_v17 = vld [vmem:[%s3782_s21 + $0xe4] ss:$8 sps:$4 sm:$0xff]  }
  0xc1   : > { %2156 = vmatprep.subr.bf16.mxu1 %v3358_v17 }
  0xc2   : > { %2157 = vmatpush1.bf16.msra.mxu1 %v3360_v23 }
  0xc7   : > { %1004 = vmatmul.mubr.bf16.gmra.mrb[24].mxu0 %v3312_v18 }
  0xc8   : > { %1013 = vmatprep.mubr.bf16.mxu0 %v3313_v19 }
  0xcf   : > { %1014 = vmatmul.mubr.bf16.gmra.mrb[28].mxu0 %v3315_v20 }
 0x16a   : > { %v945_v50 = vpop.f32.mrb[0].mxu0 }
 0x16b   : > { %v946_v51 = vadd.f32 %v945_v50, %v3871_v48  ;;  %v947_v52 = vpop.f32.mrb[1].mxu0 }
 0x16c   : > { %v948_v53 = vadd.f32 %v947_v52, %v3874_v49  ;;  %v949_v54 = vpop.f32.mrb[2].mxu0 }
 0x16d   : > { %v1056_v55 = vmul.f32 0.70710677, %v946_v51  ;;  %v950_v56 = vadd.f32 %v949_v54, %v3871_v48  ;;  %v951_v57 = vpop.f32.mrb[3].mxu0  ;;  %v3905_v28 = vmul.f32 0.5, %v946_v51 }
 0x16e   : > { %v3879_v58 = vmul.f32 0.70710677, %v948_v53  ;;  %v952_v1 = vadd.f32 %v951_v57, %v3874_v49  ;;  %v3917_v34 = vmul.f32 0.5, %v948_v53 }
 0x16f   : > { %v1152_v60 = vand.u32 2147483647, %v1056_v55  ;;  %v3882_v61 = vmul.f32 0.70710677, %v950_v56  ;;  %vm1088_vm0 = vcmp.ge.f32.partialorder %v1056_v55, 0.0  ;;  %v3919_v35 = vmul.f32 0.5, %v950_v56 }
 0x170   : > { %5323 = vst [vmem:[#allocation7_spill] sm:$0xff] %v3879_v58  ;;  %v1153_v62 = vand.u32 2147483647, %v3879_v58  ;;  %v3887_v9 = vmul.f32 0.70710677, %v952_v1  ;;  %v3915_v33 = vsel %vm1088_vm0, 1.0, %v5301_v32 }
 0x171   : > { %v1184_v63 = vmul.f32 0.3275911, %v1152_v60  ;;  %v1154_v0 = vand.u32 2147483647, %v3882_v61  ;;  %v1600_v2 = vsub.f32 0.0, %v1152_v60  ;;  %5325 = vst [vmem:[#allocation9_spill] sm:$0xff] %v3917_v34 }
 0x172   : > { %v955_v5 = vpop.f32.mrb[4].mxu0  ;;  %v1601_v6 = vsub.f32 0.0, %v1153_v62  ;;  %5324 = vst [vmem:[#allocation8_spill] sm:$0xff] %v3887_v9  ;;  %v1185_v13 = vmul.f32 0.3275911, %v1153_v62  ;;  %vm1090_vm1 = vcmp.ge.f32.partialorder %v3882_v61, 0.0 }
 0x173   : > { %v1216_v3 = vadd.f32 1.0, %v1184_v63  ;;  %v1186_v4 = vmul.f32 0.3275911, %v1154_v0  ;;  %v957_v7 = vpop.f32.mrb[5].mxu0  ;;  %v1632_v12 = vmul.f32 %v1600_v2, %v1152_v60  ;;  %v956_v15 = vadd.f32 %v955_v5, %v3871_v48 }
 0x174   : > { %v959_v10 = vpop.f32.mrb[6].mxu0  ;;  %v3892_v16 = vadd.f32 %v957_v7, %v3874_v49  ;;  %v1602_v18 = vsub.f32 0.0, %v1154_v0  ;;  %v1633_v20 = vmul.f32 %v1601_v6, %v1153_v62  ;;  %v1155_v21 = vand.u32 2147483647, %v3887_v9 }
 0x175   : > { %3364 = vrcp.f32 %v1216_v3  ;;  %v1218_v8 = vadd.f32 1.0, %v1186_v4  ;;  %v961_v14 = vpop.f32.mrb[7].mxu0  ;;  %v3896_v19 = vadd.f32 %v959_v10, %v3871_v48  ;;  %v3899_v22 = vmul.f32 0.70710677, %v956_v15 }
 0x176   : > { %v1664_v24 = vmul.f32 1.442695, %v1632_v12  ;;  %v1217_v25 = vadd.f32 1.0, %v1185_v13  ;;  %v3903_v26 = vmul.f32 0.70710677, %v3892_v16  ;;  %v1634_v39 = vmul.f32 %v1602_v18, %v1154_v0 }
 0x177   : > { %3366 = vrcp.f32 %v1218_v8  ;;  %v1156_v29 = vand.u32 2147483647, %v3899_v22  ;;  %v3909_v30 = vmul.f32 0.70710677, %v3896_v19  ;;  %v1666_v38 = vmul.f32 1.442695, %v1633_v20 }
 0x178   : > { %v3922_v36 = vand.u32 2147483647, %v3903_v26  ;;  %3368 = vrcp.f32 %v1217_v25  ;;  %v1603_v42 = vsub.f32 0.0, %v1155_v21  ;;  %v1187_v50 = vmul.f32 0.3275911, %v1155_v21 }
 0x179   : > { %v1188_v40 = vmul.f32 0.3275911, %v1156_v29  ;;  %v3931_v44 = vand.u32 2147483647, %v3909_v30  ;;  %3370 = vpow2.f32 %v1664_v24  ;;  %v3936_v52 = vadd.f32 %v961_v14, %v3874_v49 }
 0x17a   : > { %v965_v27 = vpop.f32.mrb[8].mxu0  ;;  %v1189_v43 = vmul.f32 0.3275911, %v3922_v36  ;;  %v3946_v57 = vsel %vm1090_vm1, 1.0, %v5301_v32  ;;  %v1668_v59 = vmul.f32 1.442695, %v1634_v39  ;;  %v1635_v63 = vmul.f32 %v1603_v42, %v1155_v21 }
 0x17b   : > { %v3911_v31 = vpop.f32.mrb[9].mxu0  ;;  %v1220_v51 = vadd.f32 1.0, %v1188_v40  ;;  %v1190_v55 = vmul.f32 0.3275911, %v3931_v44  ;;  %v3941_v56 = vadd.f32 %v965_v27, %v3871_v48  ;;  %v3948_v60 = vmul.f32 0.5, %v952_v1 }
 0x17c   : > { %v3924_v37 = vpop.f32.mrb[10].mxu0  ;;  %v1221_v54 = vadd.f32 1.0, %v1189_v43  ;;  %v1219_v4 = vadd.f32 1.0, %v1187_v50  ;;  %v1604_v5 = vsub.f32 0.0, %v1156_v29  ;;  %v3955_v6 = vmul.f32 0.70710677, %v3936_v52 }
 0x17d   : > { %v3927_v41 = vpop.f32.mrb[11].mxu0  ;;  %5326 = vst [vmem:[#allocation10_spill] sm:$0xff] %v3948_v60  ;;  %3372 = vrcp.f32 %v1220_v51  ;;  %v1222_v0 = vadd.f32 1.0, %v1190_v55  ;;  %v3961_v8 = vmul.f32 0.5, %v956_v15  ;;  %v3964_v10 = vmul.f32 0.70710677, %v3941_v56 }
 0x17e   : > { %3374 = vrcp.f32 %v1221_v54  ;;  %vm1092_vm2 = vcmp.ge.f32.partialorder %v3899_v22, 0.0  ;;  %v3970_v12 = vmul.f32 0.5, %v3892_v16  ;;  %v3973_v13 = vand.u32 2147483647, %v3955_v6  ;;  %v3361_v43 = vld [vmem:[%s3782_s21 + $0xf4] ss:$8 sps:$4 sm:$0xff]  }
 0x17f   : > { %v3933_v46 = vpop.eup %3364  ;;  %3376 = vpow2.f32 %v1666_v38  ;;  %v1670_v15 = vmul.f32 1.442695, %v1635_v63  ;;  %v1636_v20 = vmul.f32 %v1604_v5, %v1156_v29  ;;  %v1605_v21 = vsub.f32 0.0, %v3922_v36  ;;  %2158 = vmatprep.subr.bf16.mxu1 %v3361_v43 }
 0x180   : > { %v1312_v53 = vmul.f32 1.0614054, %v3933_v46  ;;  %3378 = vrcp.f32 %v1222_v0  ;;  %v3979_v23 = vmul.f32 0.5, %v3896_v19  ;;  %v1191_v16 = vmul.f32 0.3275911, %v3973_v13 }
 0x181   : > { %v3952_v3 = vpop.eup %3366  ;;  %3380 = vpow2.f32 %v1668_v59  ;;  %v3989_v38 = vsel %vm1092_vm2, 1.0, %v5301_v32  ;;  %v3992_v29 = vand.u32 2147483647, %v3964_v10  ;;  %vm1093_vm3 = vcmp.ge.f32.partialorder %v3903_v26, 0.0 }
 0x182   : > { %v1344_v62 = vadd.f32 -1.4531521, %v1312_v53  ;;  %v3950_v2 = vpop.f32.mrb[12].mxu0  ;;  %v1314_v7 = vmul.f32 1.0614054, %v3952_v3  ;;  %v3982_v24 = vpop.eup %3368  ;;  %v1606_v19 = vsub.f32 0.0, %v3931_v44  ;;  %v4000_v42 = vadd.f32 %v3911_v31, %v3874_v49 }
 0x183   : > { %v3957_v61 = vpop.f32.mrb[13].mxu0  ;;  %5327 = vst [vmem:[#allocation11_spill] sm:$0xff] %v3982_v24  ;;  %v3994_v39 = vpop.eup %3370  ;;  %v1223_v40 = vadd.f32 1.0, %v1191_v16  ;;  %3382 = vrcp.f32 %v1219_v4  ;;  %v1192_v22 = vmul.f32 0.3275911, %v3992_v29  ;;  %v1637_v55 = vmul.f32 %v1605_v21, %v3922_v36 }
 0x184   : > { %v1376_v1 = vmul.f32 %v3933_v46, %v1344_v62  ;;  %v3966_v11 = vpop.f32.mrb[14].mxu0  ;;  %v1346_v18 = vadd.f32 -1.4531521, %v1314_v7  ;;  %v1672_v54 = vmul.f32 1.442695, %v1636_v20  ;;  %vm1094_vm4 = vcmp.ge.f32.partialorder %v3909_v30, 0.0 }
 0x185   : > { %v3975_v14 = vpop.f32.mrb[15].mxu0  ;;  %3384 = vrcp.f32 %v1223_v40  ;;  %v1224_v4 = vadd.f32 1.0, %v1192_v22  ;;  %v4023_v36 = vsel %vm1093_vm3, 1.0, %v5301_v32  ;;  %v1674_v40 = vmul.f32 1.442695, %v1637_v55 }
 0x186   : > { %v1408_v17 = vadd.f32 1.4214138, %v1376_v1  ;;  %v1378_v27 = vmul.f32 %v3952_v3, %v1346_v18  ;;  %v3363_v1 = vld [vmem:[%s3782_s21 + $0xf0] ss:$8 sps:$4 sm:$0xff]   ;;  %3386 = vpow2.f32 %v1670_v15  ;;  %v4027_v18 = vmul.f32 0.70710677, %v4000_v42 }
 0x187   : > { %v4004_v53 = vpop.eup %3372  ;;  %3388 = vrcp.f32 %v1224_v4  ;;  %2159 = vmatpush1.bf16.msra.mxu1 %v3363_v1  ;;  %v4037_v26 = vsel %vm1094_vm4, 1.0, %v5301_v32  ;;  %v4040_v43 = vmul.f32 0.5, %v3936_v52  ;;  %vm1095_vm5 = vcmp.ge.f32.partialorder %v3955_v6, 0.0 }
 0x188   : > { %v1440_v25 = vmul.f32 %v3933_v46, %v1408_v17  ;;  %v1410_v51 = vadd.f32 1.4214138, %v1378_v27  ;;  %v4010_v31 = vpop.eup %3374  ;;  %v1316_v0 = vmul.f32 1.0614054, %v4004_v53  ;;  %v4055_v52 = vand.u32 2147483647, %v4027_v18 }
 0x189   : > { %v4018_v7 = vpop.eup %3376  ;;  %v1317_v17 = vmul.f32 1.0614054, %v4010_v31  ;;  %3390 = vpow2.f32 %v1672_v54  ;;  %v4065_v47 = vsel %vm1095_vm5, 1.0, %v5301_v32  ;;  %vm1096_vm6 = vcmp.ge.f32.partialorder %v3964_v10, 0.0 }
 0x18a   : > { %v1472_v50 = vadd.f32 -0.28449672, %v1440_v25  ;;  %v4008_v59 = vpop.f32.mrb[16].mxu0  ;;  %v1442_v63 = vmul.f32 %v3952_v3, %v1410_v51  ;;  %5328 = vst [vmem:[#allocation12_spill] sm:$0xff] %v4018_v7  ;;  %v1348_v16 = vadd.f32 -1.4531521, %v1316_v0  ;;  %v1638_v25 = vmul.f32 %v1606_v19, %v3931_v44  ;;  %v4032_v27 = vpop.eup %3378 }
 0x18b   : > { %v4015_v5 = vpop.f32.mrb[17].mxu0  ;;  %v1349_v15 = vadd.f32 -1.4531521, %v1317_v17  ;;  %v1318_v44 = vmul.f32 1.0614054, %v4032_v27  ;;  %v4047_v19 = vmul.f32 0.5, %v3941_v56  ;;  %3392 = vpow2.f32 %v1674_v40 }
 0x18c   : > { %v1504_v62 = vmul.f32 %v3933_v46, %v1472_v50  ;;  %v4029_v20 = vpop.f32.mrb[18].mxu0  ;;  %v1474_v21 = vadd.f32 -0.28449672, %v1442_v63  ;;  %v4042_v50 = vpop.eup %3380  ;;  %v1380_v22 = vmul.f32 %v4004_v53, %v1348_v16  ;;  %v1676_v4 = vmul.f32 1.442695, %v1638_v25 }
 0x18d   : > { %v4049_v63 = vpop.f32.mrb[19].mxu0  ;;  %v1381_v30 = vmul.f32 %v4010_v31, %v1349_v15  ;;  %v1607_v56 = vsub.f32 0.0, %v3973_v13  ;;  %v1193_v17 = vmul.f32 0.3275911, %v4055_v52  ;;  %v4059_v16 = vpop.eup %3382  ;;  %v972_v9 = vadd.f32 %v3927_v41, %v3874_v49 }
 0x18e   : > { %v1536_v51 = vadd.f32 0.2548296, %v1504_v62  ;;  %v1506_v55 = vmul.f32 %v3952_v3, %v1474_v21  ;;  %v1412_v0 = vadd.f32 1.4214138, %v1380_v22  ;;  %v1350_v62 = vadd.f32 -1.4531521, %v1318_v44 }
 0x18f   : > { %v1413_v1 = vadd.f32 1.4214138, %v1381_v30  ;;  %5329 = vst [vmem:[#allocation13_spill] sm:$0xff] %v4059_v16  ;;  %v4069_v25 = vpop.eup %3384  ;;  %v1225_v44 = vadd.f32 1.0, %v1193_v17  ;;  %v4074_v30 = vadd.f32 %v3924_v37, %v3871_v48  ;;  %3394 = vpow2.f32 %v1676_v4 }
 0x190   : > { %v1568_v21 = vmul.f32 %v3933_v46, %v1536_v51  ;;  %v1444_v15 = vmul.f32 %v4004_v53, %v1412_v0  ;;  %v1382_v6 = vmul.f32 %v4032_v27, %v1350_v62  ;;  %v1538_v40 = vadd.f32 0.2548296, %v1506_v55  ;;  %v4081_v32 = vpop.eup %3386 }
 0x191   : > { %v1445_v22 = vmul.f32 %v4010_v31, %v1413_v1  ;;  %5330 = vst [vmem:[#allocation14_spill] sm:$0xff] %v4081_v32  ;;  %v1319_v55 = vmul.f32 1.0614054, %v4069_v25  ;;  %v1639_v1 = vmul.f32 %v1607_v56, %v3973_v13  ;;  %3396 = vrcp.f32 %v1225_v44  ;;  %v4085_v17 = vpop.eup %3388 }
 0x192   : > { %v4067_v54 = vpop.f32.mrb[20].mxu0  ;;  %v1476_v51 = vadd.f32 -0.28449672, %v1444_v15  ;;  %v1414_v0 = vadd.f32 1.4214138, %v1382_v6  ;;  %v1728_v37 = vmul.f32 %v3994_v39, %v1568_v21  ;;  %v1608_v6 = vsub.f32 0.0, %v3992_v29 }
 0x193   : > { %v4076_v46 = vpop.f32.mrb[21].mxu0  ;;  %v1477_v45 = vadd.f32 -0.28449672, %v1445_v22  ;;  %v1351_v22 = vadd.f32 -1.4531521, %v1319_v55  ;;  %v1570_v56 = vmul.f32 %v3952_v3, %v1538_v40  ;;  %v5332_v21 = vmov -1.0   ;;  %v3391_v24 = vpop.eup %3390 }
 0x194   : > { %v4079_v62 = vpop.f32.mrb[22].mxu0  ;;  %v1508_v15 = vmul.f32 %v4004_v53, %v1476_v51  ;;  %v1446_v4 = vmul.f32 %v4032_v27, %v1414_v0  ;;  %v1320_v32 = vmul.f32 1.0614054, %v4085_v17  ;;  %v4096_v13 = vmul.f32 0.70710677, %v4074_v30 }
 0x195   : > { %v4091_v60 = vpop.f32.mrb[23].mxu0  ;;  %v1509_v34 = vmul.f32 %v4010_v31, %v1477_v45  ;;  %v4102_v51 = vsel %vm1096_vm6, 1.0, %v5332_v21  ;;  %v1383_v7 = vmul.f32 %v4069_v25, %v1351_v22  ;;  %v1678_v45 = vmul.f32 1.442695, %v1639_v1  ;;  %v3393_v58 = vpop.eup %3392 }
 0x196   : > { %5331 = vst [vmem:[#allocation15_spill] sm:$0xff] %v4091_v60  ;;  %v1540_v44 = vadd.f32 0.2548296, %v1508_v15  ;;  %v1478_v39 = vadd.f32 -0.28449672, %v1446_v4  ;;  %v1760_v3 = vsub.f32 1.0, %v1728_v37  ;;  %v1640_v15 = vmul.f32 %v1608_v6, %v3992_v29 }
 0x197   : > { %v1352_v55 = vadd.f32 -1.4531521, %v1320_v32  ;;  %v1541_v40 = vadd.f32 0.2548296, %v1509_v34  ;;  %v1609_v10 = vsub.f32 0.0, %v4055_v52  ;;  %v4119_v41 = vadd.f32 %v3950_v2, %v3871_v48 }
 0x198   : > { %v1162_v32 = vand.u32 2147483647, %v4096_v13  ;;  %v1730_v34 = vmul.f32 %v4042_v50, %v1570_v56  ;;  %v1572_v29 = vmul.f32 %v4004_v53, %v1540_v44  ;;  %v1510_v37 = vmul.f32 %v4032_v27, %v1478_v39 }
 0x199   : > { %v1384_v22 = vmul.f32 %v4085_v17, %v1352_v55  ;;  %v4127_v6 = vmul.f32 0.5, %v4000_v42  ;;  %3398 = vpow2.f32 %v1678_v45  ;;  %v1792_v2 = vmul.f32 %v1760_v3, %v3915_v33 }
 0x19a   : > { %v4104_v0 = vpop.f32.mrb[24].mxu0  ;;  %v1680_v60 = vmul.f32 1.442695, %v1640_v15  ;;  %vm1097_vm7 = vcmp.ge.f32.partialorder %v4027_v18, 0.0  ;;  %v1641_v50 = vmul.f32 %v1609_v10, %v4055_v52  ;;  %v1573_v53 = vmul.f32 %v4010_v31, %v1541_v40 }
 0x19b   : > { %5333 = vst [vmem:[#allocation16_spill] sm:$0xff] %v4104_v0  ;;  %v4109_v16 = vpop.f32.mrb[25].mxu0  ;;  %v1415_v0 = vadd.f32 1.4214138, %v1383_v7  ;;  %v1416_v55 = vadd.f32 1.4214138, %v1384_v22  ;;  %v1732_v45 = vmul.f32 %v3391_v24, %v1572_v29 }
 0x19c   : > { %5334 = vst [vmem:[#allocation17_spill] sm:$0xff] %v4109_v16  ;;  %v4113_v4 = vpop.f32.mrb[26].mxu0  ;;  %v3395_v16 = vpop.eup %3394  ;;  %v1542_v22 = vadd.f32 0.2548296, %v1510_v37  ;;  %v1067_v15 = vmul.f32 0.70710677, %v972_v9  ;;  %v1733_v10 = vmul.f32 %v3393_v58, %v1573_v53 }
 0x19d   : > { %5335 = vst [vmem:[#allocation18_spill] sm:$0xff] %v4113_v4  ;;  %v4121_v1 = vpop.f32.mrb[27].mxu0  ;;  %v1447_v7 = vmul.f32 %v4069_v25, %v1415_v0  ;;  %v1194_v4 = vmul.f32 0.3275911, %v1162_v32  ;;  %v4133_v56 = vpop.eup %3396  ;;  %v1448_v42 = vmul.f32 %v4085_v17, %v1416_v55  ;;  %v1762_v0 = vsub.f32 1.0, %v1730_v34 }
 0x19e   : > { %5336 = vst [vmem:[#allocation19_spill] sm:$0xff] %v4121_v1  ;;  %v1321_v1 = vmul.f32 1.0614054, %v4133_v56  ;;  %v4142_v52 = vsel %vm1097_vm7, 1.0, %v5332_v21  ;;  %v4145_v40 = vmul.f32 0.5, %v4074_v30  ;;  %v1764_v29 = vsub.f32 1.0, %v1732_v45 }
 0x19f   : > { %v1479_v44 = vadd.f32 -0.28449672, %v1447_v7  ;;  %v1226_v39 = vadd.f32 1.0, %v1194_v4  ;;  %v1480_v3 = vadd.f32 -0.28449672, %v1448_v42  ;;  %v1574_v37 = vmul.f32 %v4032_v27, %v1542_v22 }
 0x1a0   : > { %v1353_v31 = vadd.f32 -1.4531521, %v1321_v1  ;;  %v1682_v34 = vmul.f32 1.442695, %v1641_v50  ;;  %v1824_v55 = vadd.f32 1.0, %v1792_v2  ;;  %v1794_v18 = vmul.f32 %v1762_v0, %v3946_v57 }
 0x1a1   : > { %v1511_v33 = vmul.f32 %v4069_v25, %v1479_v44  ;;  %3400 = vrcp.f32 %v1226_v39  ;;  %v1512_v4 = vmul.f32 %v4085_v17, %v1480_v3  ;;  %v1610_v44 = vsub.f32 0.0, %v1162_v32 }
 0x1a2   : > { %3402 = vpow2.f32 %v1680_v60  ;;  %v1385_v7 = vmul.f32 %v4133_v56, %v1353_v31  ;;  %v4150_v60 = vmul.f32 0.5, %v972_v9  ;;  %v1163_v1 = vand.u32 2147483647, %v1067_v15 }
 0x1a3   : > { %v1543_v24 = vadd.f32 0.2548296, %v1511_v33  ;;  %v1544_v42 = vadd.f32 0.2548296, %v1512_v4  ;;  %v4155_v53 = vmul.f32 0.70710677, %v4119_v41  ;;  %v3399_v50 = vpop.eup %3398  ;;  %3404 = vpow2.f32 %v1682_v34 }
 0x1a4   : > { %v1417_v58 = vadd.f32 1.4214138, %v1385_v7  ;;  %v1765_v39 = vsub.f32 1.0, %v1733_v10  ;;  %vm1098_vm8 = vcmp.ge.f32.partialorder %v4096_v13, 0.0  ;;  %v1195_v27 = vmul.f32 0.3275911, %v1163_v1 }
 0x1a5   : > { %v1575_v30 = vmul.f32 %v4069_v25, %v1543_v24  ;;  %v1796_v9 = vmul.f32 %v1764_v29, %v3989_v38  ;;  %v1734_v2 = vmul.f32 %v3395_v16, %v1574_v37  ;;  %v1164_v0 = vand.u32 2147483647, %v4155_v53 }
 0x1a6   : > { %v1449_v57 = vmul.f32 %v4133_v56, %v1417_v58  ;;  %v4162_v25 = vmul.f32 %v1824_v55, %v3905_v28  ;;  %v1826_v45 = vadd.f32 1.0, %v1794_v18  ;;  %v1642_v22 = vmul.f32 %v1610_v44, %v1162_v32 }
 0x1a7   : > { %v1227_v33 = vadd.f32 1.0, %v1195_v27  ;;  %v1735_v3 = vmul.f32 %v3399_v50, %v1575_v30  ;;  %v1576_v31 = vmul.f32 %v4085_v17, %v1544_v42  ;;  %v1196_v24 = vmul.f32 0.3275911, %v1164_v0 }
 0x1a8   : > { %v1481_v10 = vadd.f32 -0.28449672, %v1449_v57  ;;  %v1797_v38 = vmul.f32 %v1765_v39, %v4023_v36  ;;  %v4171_v16 = vsel %vm1098_vm8, 1.0, %v5332_v21  ;;  %vm1099_vm9 = vcmp.ge.f32.partialorder %v1067_v15, 0.0 }
 0x1a9   : > { %3406 = vrcp.f32 %v1227_v33  ;;  %v1828_v34 = vadd.f32 1.0, %v1796_v9  ;;  %v1766_v32 = vsub.f32 1.0, %v1734_v2  ;;  %v1228_v37 = vadd.f32 1.0, %v1196_v24 }
 0x1aa   : > { %v1513_v17 = vmul.f32 %v4133_v56, %v1481_v10  ;;  %v1684_v7 = vmul.f32 1.442695, %v1642_v22  ;;  %v1611_v55 = vsub.f32 0.0, %v1163_v1  ;;  %v978_v36 = vadd.f32 %v3957_v61, %v3874_v49 }
 0x1ab   : > { %v4165_v4 = vpop.eup %3400  ;;  %v1767_v18 = vsub.f32 1.0, %v1735_v3  ;;  %3408 = vrcp.f32 %v1228_v37  ;;  %v4178_v30 = vmul.f32 %v1826_v45, %v3919_v35  ;;  %v1829_v42 = vadd.f32 1.0, %v1797_v38 }
 0x1ac   : > { %v3403_v28 = vpop.eup %3402  ;;  %v1322_v29 = vmul.f32 1.0614054, %v4165_v4  ;;  %v4182_v58 = vsel %vm1099_vm9, 1.0, %v5332_v21  ;;  %v4184_v50 = vmul.f32 0.70710677, %v978_v36  ;;  %v4187_v39 = vmul.f32 %v1828_v34, %v3961_v8 }
 0x1ad   : > { %v1736_v44 = vmul.f32 %v3403_v28, %v1576_v31  ;;  %v1798_v27 = vmul.f32 %v1766_v32, %v4037_v26  ;;  %v4193_v9 = vadd.f32 %v3966_v11, %v3871_v48  ;;  %v3405_v35 = vpop.eup %3404  ;;  %v1545_v2 = vadd.f32 0.2548296, %v1513_v17 }
 0x1ae   : > { %v1354_v13 = vadd.f32 -1.4531521, %v1322_v29  ;;  %5337 = vst [vmem:[#allocation20_spill] sm:$0xff] %v4187_v39  ;;  %3410 = vpow2.f32 %v1684_v7  ;;  %v1643_v57 = vmul.f32 %v1611_v55, %v1163_v1  ;;  %v4196_v15 = vand.u32 2147483647, %v4184_v50 }
 0x1af   : > { %v1799_v45 = vmul.f32 %v1767_v18, %v4065_v47  ;;  %v1768_v22 = vsub.f32 1.0, %v1736_v44  ;;  %v1612_v33 = vsub.f32 0.0, %v1164_v0  ;;  %v4200_v26 = vmul.f32 %v1829_v42, %v3970_v12 }
 0x1b0   : > { %v1386_v61 = vmul.f32 %v4165_v4, %v1354_v13  ;;  %v1197_v3 = vmul.f32 0.3275911, %v4196_v15  ;;  %v4204_v11 = vmul.f32 0.70710677, %v4193_v9  ;;  %v4208_v31 = vadd.f32 %v3975_v14, %v3874_v49 }
 0x1b1   : > { %v1830_v1 = vadd.f32 1.0, %v1798_v27  ;;  %v4212_v47 = vmul.f32 0.5, %v4119_v41  ;;  %vm1100_vm10 = vcmp.ge.f32.partialorder %v4155_v53, 0.0  ;;  %v1577_v12 = vmul.f32 %v4133_v56, %v1545_v2 }
 0x1b2   : > { %v1418_v8 = vadd.f32 1.4214138, %v1386_v61  ;;  %v1686_v38 = vmul.f32 1.442695, %v1643_v57  ;;  %v1229_v28 = vadd.f32 1.0, %v1197_v3  ;;  %v1831_v32 = vadd.f32 1.0, %v1799_v45 }
 0x1b3   : > { %v4215_v24 = vpop.eup %3406  ;;  %v1166_v34 = vand.u32 2147483647, %v4204_v11  ;;  %v1800_v14 = vmul.f32 %v1768_v22, %v4102_v51  ;;  %v1644_v37 = vmul.f32 %v1612_v33, %v1164_v0  ;;  %v4222_v7 = vmul.f32 0.70710677, %v4208_v31  ;;  %v4238_v0 = vpop.f32.mrb[28].mxu0 }
 0x1b4   : > { %v1450_v10 = vmul.f32 %v4165_v4, %v1418_v8  ;;  %v1323_v29 = vmul.f32 1.0614054, %v4215_v24  ;;  %3412 = vrcp.f32 %v1229_v28  ;;  %v4227_v56 = vmul.f32 %v1830_v1, %v3979_v23 }
 0x1b5   : > { %v1198_v41 = vmul.f32 0.3275911, %v1166_v34  ;;  %v4224_v55 = vpop.eup %3408  ;;  %v4232_v44 = vsel %vm1100_vm10, 1.0, %v5332_v21  ;;  %v4236_v51 = vadd.f32 %v4008_v59, %v3871_v48  ;;  %v1737_v13 = vmul.f32 %v3405_v35, %v1577_v12  ;;  %v4258_v12 = vpop.f32.mrb[29].mxu0 }
 0x1b6   : > { %v1482_v17 = vadd.f32 -0.28449672, %v1450_v10  ;;  %5338 = vst [vmem:[#allocation21_spill] sm:$0xff] %v4227_v56  ;;  %v1355_v18 = vadd.f32 -1.4531521, %v1323_v29  ;;  %3414 = vpow2.f32 %v1686_v38  ;;  %v4242_v23 = vmul.f32 %v1831_v32, %v4040_v43  ;;  %v4262_v32 = vpop.f32.mrb[30].mxu0 }
 0x1b7   : > { %v1324_v42 = vmul.f32 1.0614054, %v4224_v55  ;;  %v1230_v27 = vadd.f32 1.0, %v1198_v41  ;;  %v1832_v61 = vadd.f32 1.0, %v1800_v14  ;;  %v1688_v53 = vmul.f32 1.442695, %v1644_v37 }
 0x1b8   : > { %v1387_v2 = vmul.f32 %v4215_v24, %v1355_v18  ;;  %v3411_v57 = vpop.eup %3410  ;;  %v1514_v45 = vmul.f32 %v4165_v4, %v1482_v17  ;;  %v4247_v59 = vand.u32 2147483647, %v4222_v7  ;;  %v4249_v8 = vmul.f32 0.5, %v978_v36  ;;  %v4267_v41 = vpop.f32.mrb[31].mxu0 }
 0x1b9   : > { %v1356_v22 = vadd.f32 -1.4531521, %v1324_v42  ;;  %3416 = vrcp.f32 %v1230_v27  ;;  %v1613_v33 = vsub.f32 0.0, %v4196_v15  ;;  %v4253_v43 = vmul.f32 0.70710677, %v4236_v51 }
 0x1ba   : > { %v1419_v35 = vadd.f32 1.4214138, %v1387_v2  ;;  %v1769_v3 = vsub.f32 1.0, %v1737_v13  ;;  %vm1101_vm11 = vcmp.ge.f32.partialorder %v4184_v50, 0.0  ;;  %v1199_v10 = vmul.f32 0.3275911, %v4247_v59 }
 0x1bb   : > { %v1388_v1 = vmul.f32 %v4224_v55, %v1356_v22  ;;  %3418 = vpow2.f32 %v1688_v53  ;;  %v1614_v28 = vsub.f32 0.0, %v1166_v34  ;;  %v1168_v36 = vand.u32 2147483647, %v4253_v43 }
 0x1bc   : > { %v1451_v38 = vmul.f32 %v4215_v24, %v1419_v35  ;;  %v4265_v14 = vmul.f32 %v1832_v61, %v4047_v19  ;;  %v1546_v29 = vadd.f32 0.2548296, %v1514_v45  ;;  %v1231_v17 = vadd.f32 1.0, %v1199_v10 }
 0x1bd   : > { %v1420_v37 = vadd.f32 1.4214138, %v1388_v1  ;;  %v4270_v18 = vsel %vm1101_vm11, 1.0, %v5332_v21  ;;  %v1645_v13 = vmul.f32 %v1613_v33, %v4196_v15  ;;  %v1200_v42 = vmul.f32 0.3275911, %v1168_v36 }
 0x1be   : > { %5339 = vst [vmem:[#allocation22_spill] sm:$0xff] %v4265_v14  ;;  %v1483_v50 = vadd.f32 -0.28449672, %v1451_v38  ;;  %v4273_v27 = vpop.eup %3412  ;;  %v1801_v2 = vmul.f32 %v1769_v3, %v4142_v52  ;;  %3420 = vrcp.f32 %v1231_v17  ;;  %v4279_v19 = vadd.f32 %v4015_v5, %v3874_v49 }
 0x1bf   : > { %v1452_v53 = vmul.f32 %v4224_v55, %v1420_v37  ;;  %v1325_v61 = vmul.f32 1.0614054, %v4273_v27  ;;  %vm1102_vm12 = vcmp.ge.f32.partialorder %v4204_v11, 0.0  ;;  %v1646_v45 = vmul.f32 %v1614_v28, %v1166_v34 }
 0x1c0   : > { %v1232_v22 = vadd.f32 1.0, %v1200_v42  ;;  %v3415_v35 = vpop.eup %3414  ;;  %v1578_v15 = vmul.f32 %v4165_v4, %v1546_v29  ;;  %v4285_v1 = vmul.f32 0.5, %v4193_v9  ;;  %v4288_v52 = vmul.f32 0.5, %v4208_v31 }
 0x1c1   : > { %v1484_v33 = vadd.f32 -0.28449672, %v1452_v53  ;;  %v1515_v3 = vmul.f32 %v4215_v24, %v1483_v50  ;;  %v1357_v5 = vadd.f32 -1.4531521, %v1325_v61  ;;  %v1690_v10 = vmul.f32 1.442695, %v1645_v13 }
 0x1c2   : > { %3422 = vrcp.f32 %v1232_v22  ;;  %v1833_v11 = vadd.f32 1.0, %v1801_v2  ;;  %v4294_v34 = vsel %vm1102_vm12, 1.0, %v5332_v21  ;;  %vm1103_vm13 = vcmp.ge.f32.partialorder %v4222_v7, 0.0 }
 0x1c3   : > { %v4291_v38 = vpop.eup %3416  ;;  %v4298_v4 = vmul.f32 0.70710677, %v4279_v19  ;;  %v1389_v9 = vmul.f32 %v4273_v27, %v1357_v5  ;;  %v1692_v28 = vmul.f32 1.442695, %v1646_v45  ;;  %v1615_v29 = vsub.f32 0.0, %v4247_v59 }
 0x1c4   : > { %v1326_v31 = vmul.f32 1.0614054, %v4291_v38  ;;  %v1738_v37 = vmul.f32 %v3411_v57, %v1578_v15  ;;  %v1516_v17 = vmul.f32 %v4224_v55, %v1484_v33  ;;  %v1616_v50 = vsub.f32 0.0, %v1168_v36 }
 0x1c5   : > { %v4305_v13 = vand.u32 2147483647, %v4298_v4  ;;  %v3419_v42 = vpop.eup %3418  ;;  %v1547_v2 = vadd.f32 0.2548296, %v1515_v3  ;;  %v1421_v53 = vadd.f32 1.4214138, %v1389_v9  ;;  %3424 = vpow2.f32 %v1690_v10 }
 0x1c6   : > { %v1358_v61 = vadd.f32 -1.4531521, %v1326_v31  ;;  %v4308_v22 = vmul.f32 %v1833_v11, %v4127_v6  ;;  %v4313_v45 = vsel %vm1103_vm13, 1.0, %v5332_v21  ;;  %v4318_v15 = vadd.f32 %v4029_v20, %v3871_v48 }
 0x1c7   : > { %v1201_v57 = vmul.f32 0.3275911, %v4305_v13  ;;  %v1453_v33 = vmul.f32 %v4273_v27, %v1421_v53  ;;  %3426 = vpow2.f32 %v1692_v28  ;;  %v1647_v5 = vmul.f32 %v1615_v29, %v4247_v59 }
 0x1c8   : > { %5340 = vst [vmem:[#allocation23_spill] sm:$0xff] %v4308_v22  ;;  %v1390_v3 = vmul.f32 %v4291_v38, %v1358_v61  ;;  %v4323_v6 = vpop.eup %3420  ;;  %v1770_v10 = vsub.f32 1.0, %v1738_v37  ;;  %v1548_v11 = vadd.f32 0.2548296, %v1516_v17  ;;  %v1648_v7 = vmul.f32 %v1616_v50, %v1168_v36 }
 0x1c9   : > { %v1233_v9 = vadd.f32 1.0, %v1201_v57  ;;  %v1579_v31 = vmul.f32 %v4215_v24, %v1547_v2  ;;  %v1485_v14 = vadd.f32 -0.28449672, %v1453_v33  ;;  %v1327_v20 = vmul.f32 1.0614054, %v4323_v6 }
 0x1ca   : > { %v1422_v22 = vadd.f32 1.4214138, %v1390_v3  ;;  %v4328_v56 = vmul.f32 0.5, %v4236_v51  ;;  %vm1104_vm14 = vcmp.ge.f32.partialorder %v4253_v43, 0.0  ;;  %v4332_v59 = vmul.f32 0.70710677, %v4318_v15 }
 0x1cb   : > { %3428 = vrcp.f32 %v1233_v9  ;;  %v1517_v36 = vmul.f32 %v4273_v27, %v1485_v14  ;;  %v1359_v24 = vadd.f32 -1.4531521, %v1327_v20  ;;  %v4340_v37 = vadd.f32 %v4049_v63, %v3874_v49 }
 0x1cc   : > { %v4334_v28 = vpop.eup %3422  ;;  %v1454_v29 = vmul.f32 %v4291_v38, %v1422_v22  ;;  %v1802_v51 = vmul.f32 %v1770_v10, %v4171_v16  ;;  %v1694_v17 = vmul.f32 1.442695, %v1647_v5  ;;  %v1696_v2 = vmul.f32 1.442695, %v1648_v7 }
 0x1cd   : > { %v1328_v50 = vmul.f32 1.0614054, %v4334_v28  ;;  %v1739_v53 = vmul.f32 %v3415_v35, %v1579_v31  ;;  %v1580_v61 = vmul.f32 %v4224_v55, %v1548_v11  ;;  %v1391_v33 = vmul.f32 %v4323_v6, %v1359_v24 }
 0x1ce   : > { %v1486_v57 = vadd.f32 -0.28449672, %v1454_v29  ;;  %v4349_v14 = vsel %vm1104_vm14, 1.0, %v5332_v21  ;;  %v1617_v63 = vsub.f32 0.0, %v4305_v13  ;;  %v4353_v16 = vand.u32 2147483647, %v4332_v59 }
 0x1cf   : > { %v1360_v22 = vadd.f32 -1.4531521, %v1328_v50  ;;  %v3425_v3 = vpop.eup %3424  ;;  %v1549_v5 = vadd.f32 0.2548296, %v1517_v36  ;;  %v1423_v10 = vadd.f32 1.4214138, %v1391_v33  ;;  %3430 = vpow2.f32 %v1694_v17 }
 0x1d0   : > { %v1518_v35 = vmul.f32 %v4291_v38, %v1486_v57  ;;  %v4357_v55 = vmul.f32 0.70710677, %v4340_v37  ;;  %v1834_v11 = vadd.f32 1.0, %v1802_v51  ;;  %v1202_v7 = vmul.f32 0.3275911, %v4353_v16 }
 0x1d1   : > { %v1392_v43 = vmul.f32 %v4334_v28, %v1360_v22  ;;  %v3427_v9 = vpop.eup %3426  ;;  %v1771_v31 = vsub.f32 1.0, %v1739_v53  ;;  %v1740_v20 = vmul.f32 %v3419_v42, %v1580_v61  ;;  %v1455_v29 = vmul.f32 %v4323_v6, %v1423_v10 }
 0x1d2   : > { %v4363_v24 = vmul.f32 0.5, %v4279_v19  ;;  %v1550_v36 = vadd.f32 0.2548296, %v1518_v35  ;;  %3432 = vpow2.f32 %v1696_v2  ;;  %v1234_v57 = vadd.f32 1.0, %v1202_v7 }
 0x1d3   : > { %v1424_v50 = vadd.f32 1.4214138, %v1392_v43  ;;  %v1581_v33 = vmul.f32 %v4273_v27, %v1549_v5  ;;  %v1487_v51 = vadd.f32 -0.28449672, %v1455_v29  ;;  %v1649_v17 = vmul.f32 %v1617_v63, %v4305_v13 }
 0x1d4   : > { %v1171_v22 = vand.u32 2147483647, %v4357_v55  ;;  %v4371_v42 = vmul.f32 %v1834_v11, %v4145_v40  ;;  %vm1105_vm15 = vcmp.ge.f32.partialorder %v4298_v4, 0.0  ;;  %3434 = vrcp.f32 %v1234_v57 }
 0x1d5   : > { %v4368_v39 = vpop.eup %3428  ;;  %v1456_v53 = vmul.f32 %v4334_v28, %v1424_v50  ;;  %v1803_v19 = vmul.f32 %v1771_v31, %v4182_v58  ;;  %v1772_v2 = vsub.f32 1.0, %v1740_v20  ;;  %v1519_v27 = vmul.f32 %v4323_v6, %v1487_v51 }
 0x1d6   : > { %v1329_v61 = vmul.f32 1.0614054, %v4368_v39  ;;  %v1582_v13 = vmul.f32 %v4291_v38, %v1550_v36  ;;  %v1203_v5 = vmul.f32 0.3275911, %v1171_v22  ;;  %v4381_v40 = vadd.f32 %v4067_v54, %v3871_v48 }
 0x1d7   : > { %v1488_v63 = vadd.f32 -0.28449672, %v1456_v53  ;;  %v1741_v35 = vmul.f32 %v3425_v3, %v1581_v33  ;;  %v4384_v10 = vsel %vm1105_vm15, 1.0, %v5332_v21  ;;  %v1698_v11 = vmul.f32 1.442695, %v1649_v17 }
 0x1d8   : > { %v1361_v4 = vadd.f32 -1.4531521, %v1329_v61  ;;  %v1551_v58 = vadd.f32 0.2548296, %v1519_v27  ;;  %v4387_v43 = vmul.f32 0.5, %v4318_v15  ;;  %vm1106_vm0 = vcmp.ge.f32.partialorder %v4332_v59, 0.0 }
 0x1d9   : > { %v1235_v7 = vadd.f32 1.0, %v1203_v5  ;;  %v1835_v38 = vadd.f32 1.0, %v1803_v19  ;;  %v1804_v31 = vmul.f32 %v1772_v2, %v4232_v44  ;;  %v1618_v54 = vsub.f32 0.0, %v4353_v16  ;;  %v3431_v3 = vpop.eup %3430 }
 0x1da   : > { %v1393_v20 = vmul.f32 %v4368_v39, %v1361_v4  ;;  %v1742_v29 = vmul.f32 %v3427_v9, %v1582_v13  ;;  %v1520_v36 = vmul.f32 %v4334_v28, %v1488_v63  ;;  %v4395_v50 = vmul.f32 0.70710677, %v4381_v40 }
 0x1db   : > { %3436 = vrcp.f32 %v1235_v7  ;;  %v1773_v15 = vsub.f32 1.0, %v1741_v35  ;;  %v4399_v33 = vadd.f32 %v4076_v46, %v3874_v49  ;;  %v1583_v51 = vmul.f32 %v4323_v6, %v1551_v58 }
 0x1dc   : > { %v1425_v57 = vadd.f32 1.4214138, %v1393_v20  ;;  %3438 = vpow2.f32 %v1698_v11  ;;  %v3433_v44 = vpop.eup %3432  ;;  %v4405_v9 = vsel %vm1106_vm0, 1.0, %v5332_v21  ;;  %v1619_v17 = vsub.f32 0.0, %v1171_v22 }
 0x1dd   : > { %v1172_v53 = vand.u32 2147483647, %v4395_v50  ;;  %v4409_v19 = vmul.f32 %v1835_v38, %v4150_v60  ;;  %v1836_v2 = vadd.f32 1.0, %v1804_v31  ;;  %v1650_v46 = vmul.f32 %v1618_v54, %v4353_v16 }
 0x1de   : > { %v1457_v27 = vmul.f32 %v4368_v39, %v1425_v57  ;;  %v4413_v61 = vpop.eup %3434  ;;  %v1774_v13 = vsub.f32 1.0, %v1742_v29  ;;  %v1552_v6 = vadd.f32 0.2548296, %v1520_v36  ;;  %vm1107_vm1 = vcmp.ge.f32.partialorder %v4357_v55, 0.0 }
 0x1df   : > { %v1204_v59 = vmul.f32 0.3275911, %v1172_v53  ;;  %v1805_v63 = vmul.f32 %v1773_v15, %v4270_v18  ;;  %v1330_v35 = vmul.f32 1.0614054, %v4413_v61  ;;  %v4419_v60 = vmul.f32 0.70710677, %v4399_v33 }
 0x1e0   : > { %v1489_v5 = vadd.f32 -0.28449672, %v1457_v27  ;;  %v1743_v4 = vmul.f32 %v3431_v3, %v1583_v51  ;;  %v1651_v11 = vmul.f32 %v1619_v17, %v1171_v22  ;;  %v4423_v16 = vadd.f32 %v4079_v62, %v3871_v48 }
 0x1e1   : > { %v1236_v58 = vadd.f32 1.0, %v1204_v59  ;;  %v4426_v7 = vmul.f32 %v1836_v2, %v4212_v47  ;;  %v1362_v38 = vadd.f32 -1.4531521, %v1330_v35  ;;  %v1700_v31 = vmul.f32 1.442695, %v1650_v46 }
 0x1e2   : > { %v4429_v18 = vmul.f32 0.5, %v4340_v37  ;;  %v1806_v20 = vmul.f32 %v1774_v13, %v4294_v34  ;;  %v1521_v54 = vmul.f32 %v4368_v39, %v1489_v5  ;;  %v4436_v22 = vsel %vm1107_vm1, 1.0, %v5332_v21 }
 0x1e3   : > { %3440 = vrcp.f32 %v1236_v58  ;;  %v1837_v62 = vadd.f32 1.0, %v1805_v63  ;;  %v1584_v3 = vmul.f32 %v4334_v28, %v1552_v6  ;;  %v1394_v47 = vmul.f32 %v4413_v61, %v1362_v38 }
 0x1e4   : > { %v4441_v29 = vand.u32 2147483647, %v4419_v60  ;;  %v1775_v36 = vsub.f32 1.0, %v1743_v4  ;;  %v1702_v34 = vmul.f32 1.442695, %v1651_v11  ;;  %v1620_v15 = vsub.f32 0.0, %v1172_v53 }
 0x1e5   : > { %v4443_v37 = vpop.eup %3436  ;;  %v4446_v57 = vmul.f32 0.70710677, %v4423_v16  ;;  %v1426_v51 = vadd.f32 1.4214138, %v1394_v47  ;;  %3442 = vpow2.f32 %v1700_v31  ;;  %v1838_v2 = vadd.f32 1.0, %v1806_v20  ;;  %v5341_v20 = vld [vmem:[#allocation15_spill] sm:$0xff] }
 0x1e6   : > { %v3439_v55 = vpop.eup %3438  ;;  %v1331_v17 = vmul.f32 1.0614054, %v4443_v37  ;;  %v1205_v28 = vmul.f32 0.3275911, %v4441_v29  ;;  %v1553_v27 = vadd.f32 0.2548296, %v1521_v54  ;;  %v1744_v6 = vmul.f32 %v3433_v44, %v1584_v3 }
 0x1e7   : > { %v4451_v46 = vmul.f32 0.5, %v4381_v40  ;;  %v4454_v13 = vand.u32 2147483647, %v4446_v57  ;;  %v1458_v59 = vmul.f32 %v4413_v61, %v1426_v51  ;;  %v4458_v35 = vmul.f32 %v1837_v62, %v4249_v8  ;;  %v5343_v51 = vld [vmem:[#allocation16_spill] sm:$0xff] }
 0x1e8   : > { %v1363_v63 = vadd.f32 -1.4531521, %v1331_v17  ;;  %v1237_v5 = vadd.f32 1.0, %v1205_v28  ;;  %v1807_v4 = vmul.f32 %v1775_v36, %v4313_v45  ;;  %vm1108_vm2 = vcmp.ge.f32.partialorder %v4395_v50, 0.0 }
 0x1e9   : > { %v1206_v11 = vmul.f32 0.3275911, %v4454_v13  ;;  %v1490_v58 = vadd.f32 -0.28449672, %v1458_v59  ;;  %v1652_v38 = vmul.f32 %v1620_v15, %v1172_v53  ;;  %v1585_v44 = vmul.f32 %v4368_v39, %v1553_v27 }
 0x1ea   : > { %v1395_v40 = vmul.f32 %v4443_v37, %v1363_v63  ;;  %3444 = vrcp.f32 %v1237_v5  ;;  %v4467_v54 = vadd.f32 %v5341_v20, %v3874_v49  ;;  %v4470_v8 = vmul.f32 %v1838_v2, %v4285_v1  ;;  %v5344_v20 = vld [vmem:[#allocation17_spill] sm:$0xff] }
 0x1eb   : > { %3446 = vpow2.f32 %v1702_v34  ;;  %v1238_v31 = vadd.f32 1.0, %v1206_v11  ;;  %v1776_v45 = vsub.f32 1.0, %v1744_v6  ;;  %v1522_v62 = vmul.f32 %v4413_v61, %v1490_v58 }
 0x1ec   : > { %5342 = vst [vmem:[#allocation15_spill] sm:$0xff] %v4470_v8  ;;  %v1427_v3 = vadd.f32 1.4214138, %v1395_v40  ;;  %v1839_v36 = vadd.f32 1.0, %v1807_v4  ;;  %v4478_v39 = vsel %vm1108_vm2, 1.0, %v5332_v21  ;;  %vm1109_vm3 = vcmp.ge.f32.partialorder %v4419_v60, 0.0 }
 0x1ed   : > { %v4473_v47 = vpop.eup %3440  ;;  %v4482_v53 = vmul.f32 0.70710677, %v4467_v54  ;;  %v1704_v15 = vmul.f32 1.442695, %v1652_v38  ;;  %v4488_v17 = vadd.f32 %v5343_v51, %v3871_v48  ;;  %v1745_v28 = vmul.f32 %v3439_v55, %v1585_v44 }
 0x1ee   : > { %v1459_v1 = vmul.f32 %v4443_v37, %v1427_v3  ;;  %v1332_v34 = vmul.f32 1.0614054, %v4473_v47  ;;  %v1554_v2 = vadd.f32 0.2548296, %v1522_v62  ;;  %3448 = vrcp.f32 %v1238_v31 }
 0x1ef   : > { %v4491_v50 = vand.u32 2147483647, %v4482_v53  ;;  %v3443_v27 = vpop.eup %3442  ;;  %v1808_v6 = vmul.f32 %v1776_v45, %v4349_v14  ;;  %v1621_v5 = vsub.f32 0.0, %v4441_v29  ;;  %v4496_v4 = vmul.f32 %v1839_v36, %v4288_v52 }
 0x1f0   : > { %v1491_v59 = vadd.f32 -0.28449672, %v1459_v1  ;;  %v1364_v63 = vadd.f32 -1.4531521, %v1332_v34  ;;  %v4499_v11 = vmul.f32 0.5, %v4399_v33  ;;  %v4504_v55 = vsel %vm1109_vm3, 1.0, %v5332_v21 }
 0x1f1   : > { %v1207_v58 = vmul.f32 0.3275911, %v4491_v50  ;;  %v1622_v38 = vsub.f32 0.0, %v4454_v13  ;;  %v4511_v44 = vmul.f32 0.70710677, %v4488_v17  ;;  %v1777_v52 = vsub.f32 1.0, %v1745_v28 }
 0x1f2   : > { %v1523_v40 = vmul.f32 %v4443_v37, %v1491_v59  ;;  %v1396_v14 = vmul.f32 %v4473_v47, %v1364_v63  ;;  %v1586_v33 = vmul.f32 %v4413_v61, %v1554_v2  ;;  %v4516_v60 = vadd.f32 %v5344_v20, %v3874_v49 }
 0x1f3   : > { %v1239_v31 = vadd.f32 1.0, %v1207_v58  ;;  %v1840_v62 = vadd.f32 1.0, %v1808_v6  ;;  %3450 = vpow2.f32 %v1704_v15  ;;  %v1653_v36 = vmul.f32 %v1621_v5, %v4441_v29 }
 0x1f4   : > { %v4518_v45 = vpop.eup %3444  ;;  %v1428_v3 = vadd.f32 1.4214138, %v1396_v14  ;;  %v1555_v34 = vadd.f32 0.2548296, %v1523_v40  ;;  %v4523_v28 = vmul.f32 0.5, %v4423_v16  ;;  %vm1110_vm4 = vcmp.ge.f32.partialorder %v4446_v57, 0.0 }
 0x1f5   : > { %v3447_v1 = vpop.eup %3446  ;;  %v1333_v51 = vmul.f32 1.0614054, %v4518_v45  ;;  %3452 = vrcp.f32 %v1239_v31  ;;  %v1654_v2 = vmul.f32 %v1622_v38, %v4454_v13  ;;  %v1176_v6 = vand.u32 2147483647, %v4511_v44 }
 0x1f6   : > { %v1460_v61 = vmul.f32 %v4473_v47, %v1428_v3  ;;  %v1809_v15 = vmul.f32 %v1777_v52, %v4384_v10  ;;  %v1746_v59 = vmul.f32 %v3443_v27, %v1586_v33  ;;  %v4531_v63 = vmul.f32 0.70710677, %v4516_v60 }
 0x1f7   : > { %v1365_v29 = vadd.f32 -1.4531521, %v1333_v51  ;;  %v4534_v5 = vmul.f32 %v1840_v62, %v4328_v56  ;;  %v1706_v58 = vmul.f32 1.442695, %v1653_v36  ;;  %v1208_v40 = vmul.f32 0.3275911, %v1176_v6 }
 0x1f8   : > { %v1492_v16 = vadd.f32 -0.28449672, %v1460_v61  ;;  %v4536_v14 = vpop.eup %3448  ;;  %v1587_v57 = vmul.f32 %v4443_v37, %v1555_v34  ;;  %v4541_v38 = vsel %vm1110_vm4, 1.0, %v5332_v21  ;;  %v1177_v10 = vand.u32 2147483647, %v4531_v63 }
 0x1f9   : > { %5345 = vst [vmem:[#allocation16_spill] sm:$0xff] %v4534_v5  ;;  %v1397_v13 = vmul.f32 %v4518_v45, %v1365_v29  ;;  %v1334_v52 = vmul.f32 1.0614054, %v4536_v14  ;;  %v1708_v56 = vmul.f32 1.442695, %v1654_v2  ;;  %v1623_v33 = vsub.f32 0.0, %v4491_v50 }
 0x1fa   : > { %v1524_v27 = vmul.f32 %v4473_v47, %v1492_v16  ;;  %v1841_v31 = vadd.f32 1.0, %v1809_v15  ;;  %v1778_v20 = vsub.f32 1.0, %v1746_v59  ;;  %v1240_v3 = vadd.f32 1.0, %v1208_v40  ;;  %v5346_v29 = vld [vmem:[#allocation18_spill] sm:$0xff] }
 0x1fb   : > { %v1429_v62 = vadd.f32 1.4214138, %v1397_v13  ;;  %3454 = vpow2.f32 %v1706_v58  ;;  %v1366_v37 = vadd.f32 -1.4531521, %v1334_v52  ;;  %v1209_v34 = vmul.f32 0.3275911, %v1177_v10 }
 0x1fc   : > { %v1556_v36 = vadd.f32 0.2548296, %v1524_v27  ;;  %v1747_v51 = vmul.f32 %v3447_v1, %v1587_v57  ;;  %3456 = vrcp.f32 %v1240_v3  ;;  %v1010_v16 = vadd.f32 %v5346_v29, %v3871_v48 }
 0x1fd   : > { %v1461_v61 = vmul.f32 %v4518_v45, %v1429_v62  ;;  %v3451_v5 = vpop.eup %3450  ;;  %v4551_v2 = vmul.f32 0.5, %v4467_v54  ;;  %v1655_v15 = vmul.f32 %v1623_v33, %v4491_v50  ;;  %v1624_v59 = vsub.f32 0.0, %v1176_v6 }
 0x1fe   : > { %v1241_v13 = vadd.f32 1.0, %v1209_v34  ;;  %v4557_v58 = vmul.f32 %v1841_v31, %v4363_v24  ;;  %v1588_v1 = vmul.f32 %v4473_v47, %v1556_v36  ;;  %vm1111_vm5 = vcmp.ge.f32.partialorder %v4482_v53, 0.0 }
 0x1ff   : > { %v4554_v40 = vpop.eup %3452  ;;  %v4562_v57 = vmul.f32 0.5, %v4488_v17  ;;  %v1810_v27 = vmul.f32 %v1778_v20, %v4405_v9  ;;  %v1493_v54 = vadd.f32 -0.28449672, %v1461_v61  ;;  %v1398_v52 = vmul.f32 %v4536_v14, %v1366_v37  ;;  %v5348_v9 = vld [vmem:[#allocation19_spill] sm:$0xff] }
 0x200   : > { %5347 = vst [vmem:[#allocation17_spill] sm:$0xff] %v4557_v58  ;;  %v1335_v50 = vmul.f32 1.0614054, %v4554_v40  ;;  %v1779_v33 = vsub.f32 1.0, %v1747_v51  ;;  %3458 = vrcp.f32 %v1241_v13  ;;  %v1625_v62 = vsub.f32 0.0, %v1177_v10 }
 0x201   : > { %v1082_v3 = vmul.f32 0.70710677, %v1010_v16  ;;  %3460 = vpow2.f32 %v1708_v56  ;;  %v1710_v31 = vmul.f32 1.442695, %v1655_v15  ;;  %v1656_v47 = vmul.f32 %v1624_v59, %v1176_v6 }
 0x202   : > { %v1367_v24 = vadd.f32 -1.4531521, %v1335_v50  ;;  %v1748_v36 = vmul.f32 %v3451_v5, %v1588_v1  ;;  %vm1112_vm6 = vcmp.ge.f32.partialorder %v4511_v44, 0.0  ;;  %v1012_v20 = vadd.f32 %v5348_v9, %v3874_v49 }
 0x203   : > { %v4568_v17 = vand.u32 2147483647, %v1082_v3  ;;  %v1525_v37 = vmul.f32 %v4518_v45, %v1493_v54  ;;  %v1430_v34 = vadd.f32 1.4214138, %v1398_v52  ;;  %v4576_v51 = vsel %vm1111_vm5, 1.0, %v5332_v21 }
 0x204   : > { %v1399_v56 = vmul.f32 %v4554_v40, %v1367_v24  ;;  %v1842_v61 = vadd.f32 1.0, %v1810_v27  ;;  %v1811_v6 = vmul.f32 %v1779_v33, %v4436_v22  ;;  %v1657_v5 = vmul.f32 %v1625_v62, %v1177_v10  ;;  %v5349_v27 = vld [vmem:[#allocation7_spill] sm:$0xff] }
 0x205   : > { %v1210_v44 = vmul.f32 0.3275911, %v4568_v17  ;;  %v3455_v29 = vpop.eup %3454  ;;  %3462 = vpow2.f32 %v1710_v31  ;;  %v4582_v59 = vsel %vm1112_vm6, 1.0, %v5332_v21  ;;  %v1712_v13 = vmul.f32 1.442695, %v1656_v47 }
 0x206   : > { %v1431_v15 = vadd.f32 1.4214138, %v1399_v56  ;;  %v4584_v1 = vpop.eup %3456  ;;  %v1780_v53 = vsub.f32 1.0, %v1748_v36  ;;  %vm1113_vm7 = vcmp.ge.f32.partialorder %v4531_v63, 0.0  ;;  %v4587_v52 = vmul.f32 0.70710677, %v1012_v20 }
 0x207   : > { %v1242_v54 = vadd.f32 1.0, %v1210_v44  ;;  %vm1089_vm8 = vcmp.ge.f32.partialorder %v5349_v27, 0.0  ;;  %v1557_v22 = vadd.f32 0.2548296, %v1525_v37  ;;  %v1462_v10 = vmul.f32 %v4536_v14, %v1430_v34 }
 0x208   : > { %v1336_v50 = vmul.f32 1.0614054, %v4584_v1  ;;  %v4593_v33 = vmul.f32 0.5, %v4516_v60  ;;  %v4596_v62 = vmul.f32 %v1842_v61, %v4387_v43  ;;  %v1843_v24 = vadd.f32 1.0, %v1811_v6 }
 0x209   : > { %v1714_v31 = vmul.f32 1.442695, %v1657_v5  ;;  %3464 = vrcp.f32 %v1242_v54  ;;  %v1463_v63 = vmul.f32 %v4554_v40, %v1431_v15  ;;  %v4600_v36 = vsel %vm1113_vm7, 1.0, %v5332_v21 }
 0x20a   : > { %5350 = vst [vmem:[#allocation18_spill] sm:$0xff] %v4596_v62  ;;  %v1368_v47 = vadd.f32 -1.4531521, %v1336_v50  ;;  %3466 = vpow2.f32 %v1712_v13  ;;  %v4602_v9 = vpop.eup %3458  ;;  %v1812_v37 = vmul.f32 %v1780_v53, %v4478_v39  ;;  %v4605_v34 = vmul.f32 0.5, %v1010_v16  ;;  %v5352_v16 = vld [vmem:[#allocation11_spill] sm:$0xff]  ;;  %v5354_v62 = vld [vmem:[#allocation13_spill] sm:$0xff] }
 0x20b   : > { %vm1114_vm9 = vcmp.ge.f32.partialorder %v1082_v3, 0.0  ;;  %v4608_v43 = vand.u32 2147483647, %v4587_v52  ;;  %v4610_v60 = vpop.eup %3460  ;;  %v1589_v56 = vmul.f32 %v4518_v45, %v1557_v22  ;;  %v1494_v61 = vadd.f32 -0.28449672, %v1462_v10 }
 0x20c   : > { %v1400_v6 = vmul.f32 %v4584_v1, %v1368_v47  ;;  %v1337_v5 = vmul.f32 1.0614054, %v4602_v9  ;;  %v4616_v44 = vmul.f32 %v1843_v24, %v4429_v18  ;;  %3468 = vpow2.f32 %v1714_v31 }
 0x20d   : > { %v1211_v39 = vmul.f32 0.3275911, %v4608_v43  ;;  %v1313_v3 = vmul.f32 1.0614054, %v5352_v16  ;;  %v1495_v15 = vadd.f32 -0.28449672, %v1463_v63  ;;  %v1749_v18 = vmul.f32 %v3455_v29, %v1589_v56 }
 0x20e   : > { %5351 = vst [vmem:[#allocation19_spill] sm:$0xff] %v4616_v44  ;;  %v1432_v13 = vadd.f32 1.4214138, %v1400_v6  ;;  %v4621_v53 = vsel %vm1114_vm9, 1.0, %v5332_v21  ;;  %v1626_v45 = vsub.f32 0.0, %v4568_v17  ;;  %v1844_v54 = vadd.f32 1.0, %v1812_v37 }
 0x20f   : > { %v1369_v22 = vadd.f32 -1.4531521, %v1337_v5  ;;  %v4624_v10 = vmul.f32 0.5, %v1012_v20  ;;  %v1243_v50 = vadd.f32 1.0, %v1211_v39  ;;  %v3463_v47 = vpop.eup %3462  ;;  %v1526_v24 = vmul.f32 %v4536_v14, %v1494_v61 }
 0x210   : > { %v1464_v31 = vmul.f32 %v4584_v1, %v1432_v13  ;;  %v1315_v44 = vmul.f32 1.0614054, %v5354_v62  ;;  %v1345_v6 = vadd.f32 -1.4531521, %v1313_v3  ;;  %v4632_v58 = vadd.f32 %v4238_v0, %v3871_v48 }
 0x211   : > { %5353 = vst [vmem:[#allocation7_spill] sm:$0xff] %v4624_v10  ;;  %v1401_v63 = vmul.f32 %v4602_v9, %v1369_v22  ;;  %3470 = vrcp.f32 %v1243_v50  ;;  %v1527_v20 = vmul.f32 %v4554_v40, %v1495_v15  ;;  %v1658_v5 = vmul.f32 %v1626_v45, %v4568_v17 }
 0x212   : > { %5355 = vst [vmem:[#allocation11_spill] sm:$0xff] %v4632_v58  ;;  %v1496_v37 = vadd.f32 -0.28449672, %v1464_v31  ;;  %v1347_v29 = vadd.f32 -1.4531521, %v1315_v44  ;;  %v4639_v61 = vmul.f32 %v1844_v54, %v4451_v46  ;;  %v4644_v3 = vsel %vm1089_vm8, 1.0, %v5332_v21 }
 0x213   : > { %v4636_v56 = vpop.eup %3464  ;;  %v1433_v39 = vadd.f32 1.4214138, %v1401_v63  ;;  %v1377_v0 = vmul.f32 %v5352_v16, %v1345_v6  ;;  %v1781_v22 = vsub.f32 1.0, %v1749_v18  ;;  %v1558_v15 = vadd.f32 0.2548296, %v1526_v24 }
 0x214   : > { %5356 = vst [vmem:[#allocation13_spill] sm:$0xff] %v4639_v61  ;;  %v3467_v13 = vpop.eup %3466  ;;  %v1528_v50 = vmul.f32 %v4584_v1, %v1496_v37  ;;  %v1338_v17 = vmul.f32 1.0614054, %v4636_v56  ;;  %v1379_v46 = vmul.f32 %v5354_v62, %v1347_v29  ;;  %v4652_v54 = vmul.f32 0.70710677, %v4632_v58 }
 0x215   : > { %v1465_v44 = vmul.f32 %v4602_v9, %v1433_v39  ;;  %v1409_v45 = vadd.f32 1.4214138, %v1377_v0  ;;  %v1559_v27 = vadd.f32 0.2548296, %v1527_v20  ;;  %v1627_v63 = vsub.f32 0.0, %v4608_v43  ;;  %v5358_v20 = vld [vmem:[#allocation8_spill] sm:$0xff] }
 0x216   : > { %5357 = vst [vmem:[#allocation24_spill] sm:$0xff] %v4652_v54  ;;  %v1370_v31 = vadd.f32 -1.4531521, %v1338_v17  ;;  %v3469_v24 = vpop.eup %3468  ;;  %v1716_v37 = vmul.f32 1.442695, %v1658_v5  ;;  %v1590_v39 = vmul.f32 %v4536_v14, %v1558_v15  ;;  %vm1115_vm10 = vcmp.ge.f32.partialorder %v4587_v52, 0.0 }
 0x217   : > { %v1497_v6 = vadd.f32 -0.28449672, %v1465_v44  ;;  %v1411_v61 = vadd.f32 1.4214138, %v1379_v46  ;;  %v1441_v10 = vmul.f32 %v5352_v16, %v1409_v45  ;;  %v1560_v29 = vadd.f32 0.2548296, %v1528_v50 }
 0x218   : > { %v1402_v0 = vmul.f32 %v4636_v56, %v1370_v31  ;;  %vm1091_vm11 = vcmp.ge.f32.partialorder %v5358_v20, 0.0  ;;  %v4665_v44 = vand.u32 2147483647, %v4652_v54  ;;  %v1813_v5 = vmul.f32 %v1781_v22, %v4504_v55 }
 0x219   : > { %v1529_v17 = vmul.f32 %v4602_v9, %v1497_v6  ;;  %v1443_v58 = vmul.f32 %v5354_v62, %v1411_v61  ;;  %v1473_v18 = vadd.f32 -0.28449672, %v1441_v10  ;;  %v1591_v46 = vmul.f32 %v4554_v40, %v1559_v27 }
 0x21a   : > { %v1434_v14 = vadd.f32 1.4214138, %v1402_v0  ;;  %v1659_v15 = vmul.f32 %v1627_v63, %v4608_v43  ;;  %3472 = vpow2.f32 %v1716_v37  ;;  %v1212_v6 = vmul.f32 0.3275911, %v4665_v44 }
 0x21b   : > { %v4670_v50 = vpop.eup %3470  ;;  %v1475_v45 = vadd.f32 -0.28449672, %v1443_v58  ;;  %v1505_v31 = vmul.f32 %v5352_v16, %v1473_v18  ;;  %v1750_v10 = vmul.f32 %v4610_v60, %v1590_v39  ;;  %v1561_v61 = vadd.f32 0.2548296, %v1529_v17 }
 0x21c   : > { %v1466_v54 = vmul.f32 %v4636_v56, %v1434_v14  ;;  %v1339_v55 = vmul.f32 1.0614054, %v4670_v50  ;;  %v1592_v40 = vmul.f32 %v4584_v1, %v1560_v29  ;;  %v1244_v27 = vadd.f32 1.0, %v1212_v6 }
 0x21d   : > { %v1507_v22 = vmul.f32 %v5354_v62, %v1475_v45  ;;  %v1537_v43 = vadd.f32 0.2548296, %v1505_v31  ;;  %v1751_v63 = vmul.f32 %v3463_v47, %v1591_v46  ;;  %v1718_v0 = vmul.f32 1.442695, %v1659_v15  ;;  %v5359_v46 = vld [vmem:[#allocation12_spill] sm:$0xff]  ;;  %v5360_v31 = vld [vmem:[#allocation14_spill] sm:$0xff] }
 0x21e   : > { %v1498_v37 = vadd.f32 -0.28449672, %v1466_v54  ;;  %v1371_v58 = vadd.f32 -1.4531521, %v1339_v55  ;;  %3474 = vrcp.f32 %v1244_v27  ;;  %v4682_v60 = vadd.f32 %v4258_v12, %v3874_v49 }
 0x21f   : > { %v1539_v18 = vadd.f32 0.2548296, %v1507_v22  ;;  %v1569_v8 = vmul.f32 %v5352_v16, %v1537_v43  ;;  %v1593_v39 = vmul.f32 %v4602_v9, %v1561_v61  ;;  %v4689_v29 = vsel %vm1115_vm10, 1.0, %v5332_v21 }
 0x220   : > { %v1530_v1 = vmul.f32 %v4636_v56, %v1498_v37  ;;  %v1403_v47 = vmul.f32 %v4670_v50, %v1371_v58  ;;  %v1845_v54 = vadd.f32 1.0, %v1813_v5  ;;  %v1752_v17 = vmul.f32 %v3467_v13, %v1592_v40 }
 0x221   : > { %v1571_v16 = vmul.f32 %v5354_v62, %v1539_v18  ;;  %v1729_v14 = vmul.f32 %v5359_v46, %v1569_v8  ;;  %v1782_v15 = vsub.f32 1.0, %v1750_v10  ;;  %3476 = vpow2.f32 %v1718_v0 }
 0x222   : > { %v1562_v12 = vadd.f32 0.2548296, %v1530_v1  ;;  %v1435_v45 = vadd.f32 1.4214138, %v1403_v47  ;;  %v1783_v9 = vsub.f32 1.0, %v1751_v63  ;;  %v1753_v55 = vmul.f32 %v3469_v24, %v1593_v39 }
 0x223   : > { %v1731_v6 = vmul.f32 %v5360_v31, %v1571_v16  ;;  %v1761_v61 = vsub.f32 1.0, %v1729_v14  ;;  %v4696_v52 = vmul.f32 0.70710677, %v4682_v60  ;;  %v1123_v8 = vsel %vm1091_vm11, 1.0, %v5332_v21  ;;  %v5361_v14 = vld [vmem:[#allocation9_spill] sm:$0xff] }
 0x224   : > { %v1594_v22 = vmul.f32 %v4636_v56, %v1562_v12  ;;  %v1467_v13 = vmul.f32 %v4670_v50, %v1435_v45  ;;  %v3473_v62 = vpop.eup %3472  ;;  %v1784_v5 = vsub.f32 1.0, %v1752_v17  ;;  %v4706_v43 = vadd.f32 %v4262_v32, %v3871_v48  ;;  %v5362_v12 = vld [vmem:[#allocation10_spill] sm:$0xff] }
 0x225   : > { %v1763_v10 = vsub.f32 1.0, %v1731_v6  ;;  %v1793_v40 = vmul.f32 %v1761_v61, %v4644_v3  ;;  %v4709_v27 = vmul.f32 %v1845_v54, %v4499_v11  ;;  %v4712_v63 = vand.u32 2147483647, %v4696_v52 }
 0x226   : > { %v1754_v24 = vmul.f32 %v3473_v62, %v1594_v22  ;;  %v1499_v56 = vadd.f32 -0.28449672, %v1467_v13  ;;  %v1814_v20 = vmul.f32 %v1782_v15, %v4541_v38  ;;  %v1815_v37 = vmul.f32 %v1783_v9, %v4576_v51 }
 0x227   : > { %v1795_v58 = vmul.f32 %v1763_v10, %v1123_v8  ;;  %v1825_v0 = vadd.f32 1.0, %v1793_v40  ;;  %v1785_v18 = vsub.f32 1.0, %v1753_v55  ;;  %v1213_v48 = vmul.f32 0.3275911, %v4712_v63 }
 0x228   : > { %v1786_v3 = vsub.f32 1.0, %v1754_v24  ;;  %v1531_v39 = vmul.f32 %v4670_v50, %v1499_v56  ;;  %v4718_v32 = vpop.eup %3474  ;;  %v1816_v11 = vmul.f32 %v1784_v5, %v4582_v59  ;;  %v1628_v47 = vsub.f32 0.0, %v4665_v44 }
 0x229   : > { %v1827_v1 = vadd.f32 1.0, %v1795_v58  ;;  %v4723_v54 = vmul.f32 0.70710677, %v4706_v43  ;;  %v1340_v51 = vmul.f32 1.0614054, %v4718_v32  ;;  %v1245_v17 = vadd.f32 1.0, %v1213_v48 }
 0x22a   : > { %v1563_v38 = vadd.f32 0.2548296, %v1531_v39  ;;  %v4728_v16 = vadd.f32 %v4267_v41, %v3874_v49  ;;  %v1818_v46 = vmul.f32 %v1786_v3, %v4621_v53  ;;  %v1857_v15 = vmul.f32 %v1825_v0, %v5361_v14  ;;  %v5365_v58 = vld [vmem:[#allocation21_spill] sm:$0xff]  ;;  %v5366_v3 = vld [vmem:[#allocation23_spill] sm:$0xff] }
 0x22b   : > { %v1859_v59 = vmul.f32 %v1827_v1, %v5362_v12  ;;  %v4734_v45 = vand.u32 2147483647, %v4723_v54  ;;  %v3477_v9 = vpop.eup %3476  ;;  %v1817_v31 = vmul.f32 %v1785_v18, %v4600_v36  ;;  %v1372_v61 = vadd.f32 -1.4531521, %v1340_v51  ;;  %v5370_v14 = vld [vmem:[#allocation19_spill] sm:$0xff]  ;;  %v5372_v12 = vld [vmem:[#allocation18_spill] sm:$0xff] }
 0x22c   : > { %v1595_v6 = vmul.f32 %v4670_v50, %v1563_v38  ;;  %3478 = vrcp.f32 %v1245_v17  ;;  %v1846_v55 = vadd.f32 1.0, %v1814_v20  ;;  %v1847_v22 = vadd.f32 1.0, %v1815_v37  ;;  %v5364_v37 = vld [vmem:[#allocation20_spill] sm:$0xff]  ;;  %v5368_v38 = vld [vmem:[#allocation15_spill] sm:$0xff] }
 0x22d   : > { %v1921_v49 = vpack.c.bf16 %v1859_v59, %v1857_v15  ;;  %v1214_v41 = vmul.f32 0.3275911, %v4734_v45  ;;  %v1848_v53 = vadd.f32 1.0, %v1816_v11  ;;  %v1404_v8 = vmul.f32 %v4718_v32, %v1372_v61  ;;  %v5367_v11 = vld [vmem:[#allocation22_spill] sm:$0xff] }
 0x22e   : > { %v1755_v13 = vmul.f32 %v3477_v9, %v1595_v6  ;;  %v1660_v62 = vmul.f32 %v1628_v47, %v4665_v44  ;;  %v1850_v5 = vadd.f32 1.0, %v1818_v46  ;;  %v4742_v36 = vmul.f32 0.70710677, %v4728_v16  ;;  %v5369_v46 = vld [vmem:[#allocation17_spill] sm:$0xff] }
 0x22f   : > { %2160 = vmatprep.mubr.bf16.mxu1 %v1921_v49  ;;  %v1246_v10 = vadd.f32 1.0, %v1214_v41  ;;  %v1923_v50 = vpack.c.bf16 %v4242_v23, %v4200_v26  ;;  %v1849_v40 = vadd.f32 1.0, %v1817_v31  ;;  %v1436_v56 = vadd.f32 1.4214138, %v1404_v8  ;;  %v5374_v31 = vld [vmem:[#allocation13_spill] sm:$0xff] }
 0x230   : > { %v1787_v24 = vsub.f32 1.0, %v1755_v13  ;;  %v5363_v20 = vpack.c.bf16 %v4178_v30, %v4162_v25  ;;  %v1922_v0 = vpack.c.bf16 %v5365_v58, %v5364_v37  ;;  %v4752_v44 = vmul.f32 %v1846_v55, %v4523_v28 }
 0x231   : > { %3480 = vrcp.f32 %v1246_v10  ;;  %v1183_v18 = vand.u32 2147483647, %v4742_v36  ;;  %v1925_v26 = vpack.c.bf16 %v4409_v19, %v5366_v3  ;;  %v4758_v23 = vmul.f32 %v1847_v22, %v4551_v2 }
 0x232   : > { %2161 = vmatmul.mubr.bf16.vlgmr.msra.gmra.mrb[0].mxu1 %v5363_v20  ;;  %v1819_v39 = vmul.f32 %v1787_v24, %v4689_v29  ;;  %v1468_v25 = vmul.f32 %v4718_v32, %v1436_v56  ;;  %v1720_v30 = vmul.f32 1.442695, %v1660_v62  ;;  %v4763_v48 = vmul.f32 %v1850_v5, %v4605_v34 }
 0x233   : > { %2170 = vmatprep.mubr.bf16.mxu1 %v1923_v50  ;;  %v1215_v28 = vmul.f32 0.3275911, %v1183_v18  ;;  %v1924_v1 = vpack.c.bf16 %v4371_v42, %v5367_v11  ;;  %v1927_v47 = vpack.c.bf16 %v4496_v4, %v4458_v35  ;;  %v4770_v19 = vmul.f32 %v1848_v53, %v4562_v57  ;;  %v5371_v42 = vld [vmem:[#allocation16_spill] sm:$0xff]  ;;  %v5373_v4 = vld [vmem:[#allocation7_spill] sm:$0xff] }
 0x234   : > { %v4773_v2 = vmul.f32 %v1849_v40, %v4593_v33  ;;  %v1851_v29 = vadd.f32 1.0, %v1819_v39  ;;  %v1926_v51 = vpack.c.bf16 %v5368_v38, %v4426_v7  ;;  %v1629_v34 = vsub.f32 0.0, %v4712_v63 }
 0x235   : > { %v1247_v17 = vadd.f32 1.0, %v1215_v28  ;;  %v1929_v15 = vpack.c.bf16 %v5370_v14, %v5369_v46  ;;  %v1928_v59 = vpack.c.bf16 %v5372_v12, %v5371_v42  ;;  %v1500_v9 = vadd.f32 -0.28449672, %v1468_v25 }
 0x236   : > { %v3479_v35 = vpop.eup %3478  ;;  %v4783_v57 = vmul.f32 %v1851_v29, %v5373_v4  ;;  %v1931_v33 = vpack.c.bf16 %v4758_v23, %v4709_v27  ;;  %v1930_v7 = vpack.c.bf16 %v4752_v44, %v5374_v31  ;;  %v1630_v61 = vsub.f32 0.0, %v4734_v45  ;;  %v1889_v44 = vld [vmem:[#allocation2 + $0x8] sm:$0xff] }
 0x237   : > { %v1341_v6 = vmul.f32 1.0614054, %v3479_v35  ;;  %3482 = vrcp.f32 %v1247_v17  ;;  %v1932_v55 = vpack.c.bf16 %v4763_v48, %v4770_v19  ;;  %v1661_v41 = vmul.f32 %v1629_v34, %v4712_v63  ;;  %v1892_v48 = vld [vmem:[#allocation2 + $0x20] sm:$0xff]  ;;  %v1893_v19 = vld [vmem:[#allocation2 + $0x28] sm:$0xff] }
 0x238   : > { %v1933_v22 = vpack.c.bf16 %v4783_v57, %v4773_v2  ;;  %v1532_v53 = vmul.f32 %v4718_v32, %v1500_v9  ;;  %3484 = vpow2.f32 %v1720_v30  ;;  %v1662_v62 = vmul.f32 %v1630_v61, %v4734_v45 }
 0x239   : > { %v1373_v49 = vadd.f32 -1.4531521, %v1341_v6  ;;  %v1722_v50 = vmul.f32 1.442695, %v1661_v41  ;;  %v1631_v40 = vsub.f32 0.0, %v1183_v18  ;;  %vm1118_vm13 = vcmp.ge.f32.partialorder %v4723_v54, 0.0 }
 0x23a   : > { %2171 = vmatmul.mubr.bf16.gmra.mrb[4].mxu1 %v1922_v0  ;;  %v1564_v24 = vadd.f32 0.2548296, %v1532_v53  ;;  %v1724_v37 = vmul.f32 1.442695, %v1662_v62  ;;  %vm1117_vm14 = vcmp.ge.f32.partialorder %v4696_v52, 0.0  ;;  %vm1119_vm15 = vcmp.ge.f32.partialorder %v4742_v36, 0.0 }
 0x23b   : > { %2180 = vmatprep.mubr.bf16.mxu1 %v1925_v26  ;;  %v3481_v13 = vpop.eup %3480  ;;  %v1405_v8 = vmul.f32 %v3479_v35, %v1373_v49  ;;  %3486 = vpow2.f32 %v1722_v50  ;;  %v1663_v3 = vmul.f32 %v1631_v40, %v1183_v18  ;;  %v5375_v18 = vld [vmem:[#allocation24_spill] sm:$0xff]  ;;  %v1149_v52 = vsel %vm1117_vm14, 1.0, %v5332_v21 }
 0x23c   : > { %v1342_v5 = vmul.f32 1.0614054, %v3481_v13  ;;  %v1596_v26 = vmul.f32 %v4718_v32, %v1564_v24  ;;  %3488 = vpow2.f32 %v1724_v37  ;;  %vm1116_vm12 = vcmp.ge.f32.partialorder %v5375_v18, 0.0 }
 0x23d   : > { %v1437_v10 = vadd.f32 1.4214138, %v1405_v8  ;;  %v1726_v38 = vmul.f32 1.442695, %v1663_v3  ;;  %v1148_v8 = vsel %vm1116_vm12, 1.0, %v5332_v21  ;;  %v1054_v37 = vmul.f32 0.5, %v4706_v43 }
 0x23e   : > { %v1374_v56 = vadd.f32 -1.4531521, %v1342_v5  ;;  %v1151_v27 = vsel %vm1119_vm15, 1.0, %v5332_v21  ;;  %v1053_v43 = vmul.f32 0.5, %v4682_v60  ;;  %v1055_v36 = vmul.f32 0.5, %v4728_v16 }
 0x23f   : > { %v1469_v20 = vmul.f32 %v3479_v35, %v1437_v10  ;;  %3490 = vpow2.f32 %v1726_v38 }
 0x240   : > { %v1406_v58 = vmul.f32 %v3481_v13, %v1374_v56  ;;  %v5376_v56 = vld [vmem:[#allocation11_spill] sm:$0xff] }
 0x241   : > { %v3483_v0 = vpop.eup %3482  ;;  %v1501_v63 = vadd.f32 -0.28449672, %v1469_v20  ;;  %v1052_v20 = vmul.f32 0.5, %v5376_v56 }
 0x242   : > { %2181 = vmatmul.mubr.bf16.gmra.mrb[8].mxu1 %v1924_v1  ;;  %v1438_v39 = vadd.f32 1.4214138, %v1406_v58  ;;  %v1343_v25 = vmul.f32 1.0614054, %v3483_v0  ;;  %v3485_v11 = vpop.eup %3484 }
 0x243   : > { %2190 = vmatprep.mubr.bf16.mxu1 %v1927_v47  ;;  %v1533_v45 = vmul.f32 %v3479_v35, %v1501_v63  ;;  %v1756_v34 = vmul.f32 %v3485_v11, %v1596_v26 }
 0x244   : > { %v1470_v30 = vmul.f32 %v3481_v13, %v1438_v39  ;;  %v1375_v28 = vadd.f32 -1.4531521, %v1343_v25 }
 0x245   : > { %v1565_v29 = vadd.f32 0.2548296, %v1533_v45  ;;  %v1788_v32 = vsub.f32 1.0, %v1756_v34  ;;  %v3487_v6 = vpop.eup %3486 }
 0x246   : > { %v1502_v17 = vadd.f32 -0.28449672, %v1470_v30  ;;  %v1407_v46 = vmul.f32 %v3483_v0, %v1375_v28  ;;  %v3489_v53 = vpop.eup %3488 }
 0x247   : > { %v1597_v1 = vmul.f32 %v3479_v35, %v1565_v29  ;;  %v1820_v62 = vmul.f32 %v1788_v32, %v1148_v8  ;;  %v1894_v29 = vld [vmem:[#allocation2 + $0x30] sm:$0xff]  ;;  %v1896_v32 = vld [vmem:[#allocation2 + $0x40] sm:$0xff] }
 0x248   : > { %v1534_v14 = vmul.f32 %v3481_v13, %v1502_v17  ;;  %v1439_v4 = vadd.f32 1.4214138, %v1407_v46  ;;  %v1895_v17 = vld [vmem:[#allocation2 + $0x38] sm:$0xff] }
 0x249   : > { %v1757_v61 = vmul.f32 %v3487_v6, %v1597_v1  ;;  %v1852_v50 = vadd.f32 1.0, %v1820_v62  ;;  %v3491_v24 = vpop.eup %3490  ;;  %v1898_v6 = vld [vmem:[#allocation2 + $0x50] sm:$0xff] }
 0x24a   : > { %2191 = vmatmul.mubr.bf16.gmra.mrb[12].mxu1 %v1926_v51  ;;  %v1566_v47 = vadd.f32 0.2548296, %v1534_v14  ;;  %v1471_v9 = vmul.f32 %v3483_v0, %v1439_v4 }
 0x24b   : > { %2200 = vmatprep.mubr.bf16.mxu1 %v1929_v15  ;;  %v1789_v51 = vsub.f32 1.0, %v1757_v61  ;;  %v1884_v12 = vmul.f32 %v1852_v50, %v1052_v20 }
 0x24c   : > { %v1598_v49 = vmul.f32 %v3481_v13, %v1566_v47  ;;  %v1503_v41 = vadd.f32 -0.28449672, %v1471_v9  ;;  %v1150_v13 = vsel %vm1118_vm13, 1.0, %v5332_v21  ;;  %v1888_v21 = vld [vmem:[#allocation2] sm:$0xff]  ;;  %v1897_v47 = vld [vmem:[#allocation2 + $0x48] sm:$0xff] }
 0x24d   : > { %v1821_v58 = vmul.f32 %v1789_v51, %v1149_v52  ;;  %v1900_v51 = vld [vmem:[#allocation2 + $0x60] sm:$0xff] }
 0x24e   : > { %v1758_v35 = vmul.f32 %v3489_v53, %v1598_v49  ;;  %v1535_v5 = vmul.f32 %v3483_v0, %v1503_v41  ;;  %v1899_v41 = vld [vmem:[#allocation2 + $0x58] sm:$0xff] }
 0x24f   : > { %v1853_v23 = vadd.f32 1.0, %v1821_v58  ;;  %v1904_v58 = vld [vmem:[#allocation2 + $0x80] sm:$0xff] }
 0x250   : > { %v1790_v15 = vsub.f32 1.0, %v1758_v35  ;;  %v1567_v10 = vadd.f32 0.2548296, %v1535_v5 }
 0x251   : > { %v1885_v39 = vmul.f32 %v1853_v23, %v1053_v43 }
 0x252   : > { %2201 = vmatmul.mubr.bf16.gmra.mrb[16].mxu1 %v1928_v59  ;;  %v1822_v40 = vmul.f32 %v1790_v15, %v1150_v13  ;;  %v1599_v54 = vmul.f32 %v3483_v0, %v1567_v10  ;;  %v1901_v15 = vld [vmem:[#allocation2 + $0x68] sm:$0xff]  ;;  %v1902_v13 = vld [vmem:[#allocation2 + $0x70] sm:$0xff] }
 0x253   : > { %2210 = vmatprep.mubr.bf16.mxu1 %v1931_v33 }
 0x254   : > { %v1854_v63 = vadd.f32 1.0, %v1822_v40  ;;  %v1759_v42 = vmul.f32 %v3491_v24, %v1599_v54  ;;  %v1903_v54 = vld [vmem:[#allocation2 + $0x78] sm:$0xff] }
 0x256   : > { %v1886_v59 = vmul.f32 %v1854_v63, %v1054_v37  ;;  %v1791_v3 = vsub.f32 1.0, %v1759_v42  ;;  %v1905_v63 = vld [vmem:[#allocation2 + $0x88] sm:$0xff] }
 0x258   : > { %v1823_v33 = vmul.f32 %v1791_v3, %v1151_v27  ;;  %v1934_v0 = vpack.c.bf16 %v1886_v59, %v1884_v12  ;;  %v1906_v12 = vld [vmem:[#allocation2 + $0x90] sm:$0xff]  ;;  %v1907_v27 = vld [vmem:[#allocation2 + $0x98] sm:$0xff] }
 0x25a   : > { %2211 = vmatmul.mubr.bf16.gmra.mrb[20].mxu1 %v1930_v7  ;;  %v1855_v26 = vadd.f32 1.0, %v1823_v33  ;;  %v1890_v7 = vld [vmem:[#allocation2 + $0x10] sm:$0xff] }
 0x25b   : > { %2220 = vmatprep.mubr.bf16.mxu1 %v1933_v22  ;;  %v1891_v22 = vld [vmem:[#allocation2 + $0x18] sm:$0xff] }
 0x25c   : > { %v1887_v25 = vmul.f32 %v1855_v26, %v1055_v36  ;;  %v1908_v26 = vld [vmem:[#allocation2 + $0xa0] sm:$0xff] }
 0x25e   : > { %v1935_v45 = vpack.c.bf16 %v1887_v25, %v1885_v39  ;;  %v1909_v39 = vld [vmem:[#allocation2 + $0xa8] sm:$0xff] }
 0x262   : > { %2221 = vmatmul.mubr.bf16.gmra.mrb[24].mxu1 %v1932_v55 }
 0x263   : > { %2230 = vmatprep.mubr.bf16.mxu1 %v1935_v45  ;;  %v1910_v45 = vld [vmem:[#allocation2 + $0xb0] sm:$0xff] }
 0x26a   : > { %2231 = vmatmul.mubr.bf16.gmra.mrb[28].mxu1 %v1934_v0 }
 0x305   : > { %v2162_v31 = vpop.f32.mrb[0].mxu1 }
 0x306   : > { %v2241_v2 = vadd.f32 %v2162_v31, %v1888_v21  ;;  %v2164_v57 = vpop.f32.mrb[1].mxu1  ;;  %v1911_v31 = vld [vmem:[#allocation2 + $0xb8] sm:$0xff] }
 0x307   : > { %v2242_v60 = vadd.f32 %v2164_v57, %v1889_v44  ;;  %v2166_v30 = vpop.f32.mrb[2].mxu1 }
 0x308   : > { %2273 = vst [vmem:[#allocation2] sm:$0xff] %v2241_v2  ;;  %v2243_v16 = vadd.f32 %v2166_v30, %v1890_v7  ;;  %v2168_v28 = vpop.f32.mrb[3].mxu1  ;;  %v1912_v30 = vld [vmem:[#allocation2 + $0xc0] sm:$0xff] }
 0x309   : > { %2274 = vst [vmem:[#allocation2 + $0x8] sm:$0xff] %v2242_v60  ;;  %v2244_v11 = vadd.f32 %v2168_v28, %v1891_v22 }
 0x30a   : > { %2275 = vst [vmem:[#allocation2 + $0x10] sm:$0xff] %v2243_v16  ;;  %v1913_v16 = vld [vmem:[#allocation2 + $0xc8] sm:$0xff] }
 0x30b   : > { %2276 = vst [vmem:[#allocation2 + $0x18] sm:$0xff] %v2244_v11  ;;  %v1914_v11 = vld [vmem:[#allocation2 + $0xd0] sm:$0xff] }
 0x30d   : > { %v2172_v55 = vpop.f32.mrb[4].mxu1 }
 0x30e   : > { %v2245_v38 = vadd.f32 %v2172_v55, %v1892_v48  ;;  %v2174_v34 = vpop.f32.mrb[5].mxu1  ;;  %v1915_v55 = vld [vmem:[#allocation2 + $0xd8] sm:$0xff] }
 0x30f   : > { %v2246_v46 = vadd.f32 %v2174_v34, %v1893_v19  ;;  %v2176_v1 = vpop.f32.mrb[6].mxu1 }
 0x310   : > { %2277 = vst [vmem:[#allocation2 + $0x20] sm:$0xff] %v2245_v38  ;;  %v2247_v14 = vadd.f32 %v2176_v1, %v1894_v29  ;;  %v2178_v4 = vpop.f32.mrb[7].mxu1  ;;  %v1916_v1 = vld [vmem:[#allocation2 + $0xe0] sm:$0xff] }
 0x311   : > { %2278 = vst [vmem:[#allocation2 + $0x28] sm:$0xff] %v2246_v46  ;;  %v2248_v18 = vadd.f32 %v2178_v4, %v1895_v17 }
 0x312   : > { %2279 = vst [vmem:[#allocation2 + $0x30] sm:$0xff] %v2247_v14  ;;  %v1917_v14 = vld [vmem:[#allocation2 + $0xe8] sm:$0xff] }
 0x313   : > { %2280 = vst [vmem:[#allocation2 + $0x38] sm:$0xff] %v2248_v18  ;;  %v1918_v18 = vld [vmem:[#allocation2 + $0xf0] sm:$0xff] }
 0x315   : > { %v2182_v9 = vpop.f32.mrb[8].mxu1 }
 0x316   : > { %v2249_v61 = vadd.f32 %v2182_v9, %v1896_v32  ;;  %v2184_v49 = vpop.f32.mrb[9].mxu1  ;;  %v1919_v9 = vld [vmem:[#allocation2 + $0xf8] sm:$0xff] }
 0x317   : > { %v2250_v53 = vadd.f32 %v2184_v49, %v1897_v47  ;;  %v2186_v8 = vpop.f32.mrb[10].mxu1 }
 0x318   : > { %2281 = vst [vmem:[#allocation2 + $0x40] sm:$0xff] %v2249_v61  ;;  %v2251_v62 = vadd.f32 %v2186_v8, %v1898_v6  ;;  %v2188_v35 = vpop.f32.mrb[11].mxu1  ;;  %v2309_v8 = vld [vmem:[#allocation2] sm:$0xff] (!%p3146_p0) }
 0x319   : > { %2282 = vst [vmem:[#allocation2 + $0x48] sm:$0xff] %v2250_v53  ;;  %v2252_v5 = vadd.f32 %v2188_v35, %v1899_v41  ;;  %v2341_v35 = vld [vmem:[%s5294_s4] sm:$0x3] (!%p3146_p0) }
 0x31a   : > { %2283 = vst [vmem:[#allocation2 + $0x50] sm:$0xff] %v2251_v62  ;;  %v2310_v62 = vld [vmem:[#allocation2 + $0x8] sm:$0xff] (!%p3146_p0) }
 0x31b   : > { %2284 = vst [vmem:[#allocation2 + $0x58] sm:$0xff] %v2252_v5  ;;  %v5377_v5 = vld [vmem:[#allocation5_spill] sm:$0xff] (!%p3146_p0) }
 0x31d   : > { %v2192_v10 = vpop.f32.mrb[12].mxu1 }
 0x31e   : > { %v2253_v50 = vadd.f32 %v2192_v10, %v1900_v51  ;;  %v2194_v40 = vpop.f32.mrb[13].mxu1  ;;  %v4830_v51 = vrot.slane (!%p3146_p0), %v2341_v35, %v5377_v5 }
 0x31f   : > { %v2254_v24 = vadd.f32 %v2194_v40, %v1901_v15  ;;  %v2196_v56 = vpop.f32.mrb[14].mxu1  ;;  %v5378_v15 = vld [vmem:[#allocation6_spill] sm:$0xff] (!%p3146_p0) }
 0x320   : > { %2285 = vst [vmem:[#allocation2 + $0x60] sm:$0xff] %v2253_v50  ;;  %v2255_v20 = vadd.f32 %v2196_v56, %v1902_v13  ;;  %v2198_v52 = vpop.f32.mrb[15].mxu1  ;;  %v4833_v10 = vrot.slane (!%p3146_p0), %v2341_v35, %v5378_v15  ;;  %v2385_v13 = vld [vmem:[%s3766_s23] sm:$0xff] (!%p3146_p0)  ;;  %v2314_v40 = vld [vmem:[#allocation2 + $0x28] sm:$0xff] (!%p3146_p0)  ;;  %v2387_v56 = vld [vmem:[%s3766_s23 + $0x10] sm:$0xff] (!%p3146_p0) }
 0x321   : > { %2286 = vst [vmem:[#allocation2 + $0x68] sm:$0xff] %v2254_v24  ;;  %v2256_v37 = vadd.f32 %v2198_v52, %v1903_v54  ;;  %v2313_v50 = vld [vmem:[#allocation2 + $0x20] sm:$0xff] (!%p3146_p0)  ;;  %v2401_v54 = vunpack.c.l.bf16 (!%p3146_p0), %v2385_v13  ;;  %v2402_v24 = vunpack.c.h.bf16 (!%p3146_p0), %v2385_v13  ;;  %v2312_v52 = vld [vmem:[#allocation2 + $0x18] sm:$0xff] (!%p3146_p0) }
 0x322   : > { %2287 = vst [vmem:[#allocation2 + $0x70] sm:$0xff] %v2255_v20  ;;  %v2311_v20 = vld [vmem:[#allocation2 + $0x10] sm:$0xff] (!%p3146_p0)  ;;  %v2392_v35 = vld [vmem:[%s3766_s23 + $0x38] sm:$0xff] (!%p3146_p0) }
 0x323   : > { %2288 = vst [vmem:[#allocation2 + $0x78] sm:$0xff] %v2256_v37  ;;  %v2353_v37 = vadd.f32 (!%p3146_p0), %v4830_v51, %v2309_v8 }
 0x325   : > { %v2202_v42 = vpop.f32.mrb[16].mxu1 }
 0x326   : > { %v2257_v59 = vadd.f32 %v2202_v42, %v1904_v58  ;;  %v2204_v3 = vpop.f32.mrb[17].mxu1  ;;  %v2354_v58 = vadd.f32 (!%p3146_p0), %v4833_v10, %v2310_v62  ;;  %v2358_v42 = vadd.f32 (!%p3146_p0), %v4833_v10, %v2314_v40 }
 0x327   : > { %v2258_v23 = vadd.f32 %v2204_v3, %v1905_v63  ;;  %v2206_v33 = vpop.f32.mrb[18].mxu1  ;;  %v2357_v63 = vadd.f32 (!%p3146_p0), %v4830_v51, %v2313_v50  ;;  %v2316_v3 = vld [vmem:[#allocation2 + $0x38] sm:$0xff] (!%p3146_p0) }
 0x328   : > { %2289 = vst [vmem:[#allocation2 + $0x80] sm:$0xff] %v2257_v59  ;;  %v2259_v0 = vadd.f32 %v2206_v33, %v1906_v12  ;;  %v2208_v43 = vpop.f32.mrb[19].mxu1  ;;  %v2386_v12 = vld [vmem:[%s3766_s23 + $0x8] sm:$0xff] (!%p3146_p0)  ;;  %v2315_v59 = vld [vmem:[#allocation2 + $0x30] sm:$0xff] (!%p3146_p0)  ;;  %v2355_v33 = vadd.f32 (!%p3146_p0), %v4830_v51, %v2311_v20 }
 0x329   : > { %2290 = vst [vmem:[#allocation2 + $0x88] sm:$0xff] %v2258_v23  ;;  %v2260_v36 = vadd.f32 %v2208_v43, %v1907_v27  ;;  %v2405_v27 = vunpack.c.l.bf16 (!%p3146_p0), %v2387_v56  ;;  %v2406_v23 = vunpack.c.h.bf16 (!%p3146_p0), %v2387_v56  ;;  %v2388_v43 = vld [vmem:[%s3766_s23 + $0x18] sm:$0xff] (!%p3146_p0) }
 0x32a   : > { %2291 = vst [vmem:[#allocation2 + $0x90] sm:$0xff] %v2259_v0  ;;  %v2356_v0 = vadd.f32 (!%p3146_p0), %v4833_v10, %v2312_v52  ;;  %v2324_v62 = vld [vmem:[#allocation2 + $0x78] sm:$0xff] (!%p3146_p0) }
 0x32b   : > { %2292 = vst [vmem:[#allocation2 + $0x98] sm:$0xff] %v2260_v36  ;;  %v4845_v36 = vadd.f32 (!%p3146_p0), %v2401_v54, %v2353_v37 }
 0x32d   : > { %v2212_v25 = vpop.f32.mrb[20].mxu1 }
 0x32e   : > { %v2261_v21 = vadd.f32 %v2212_v25, %v1908_v26  ;;  %v2214_v44 = vpop.f32.mrb[21].mxu1  ;;  %v4847_v26 = vadd.f32 (!%p3146_p0), %v2402_v24, %v2354_v58  ;;  %v2404_v25 = vunpack.c.h.bf16 (!%p3146_p0), %v2386_v12 }
 0x32f   : > { %v2262_v7 = vadd.f32 %v2214_v44, %v1909_v39  ;;  %v2216_v2 = vpop.f32.mrb[22].mxu1  ;;  %v2403_v39 = vunpack.c.l.bf16 (!%p3146_p0), %v2386_v12  ;;  %v4849_v44 = vadd.f32 (!%p3146_p0), %v2405_v27, %v2357_v63  ;;  %v2325_v24 = vld [vmem:[#allocation2 + $0x80] sm:$0xff] (!%p3146_p0)  ;;  %v2368_v12 = vadd.f32 (!%p3146_p0), %v4833_v10, %v2324_v62 }
 0x330   : > { %2293 = vst [vmem:[#allocation2 + $0xa0] sm:$0xff] %v2261_v21  ;;  %v2263_v57 = vadd.f32 %v2216_v2, %v1910_v45  ;;  %v2218_v22 = vpop.f32.mrb[23].mxu1  ;;  %v2317_v45 = vld [vmem:[#allocation2 + $0x40] sm:$0xff] (!%p3146_p0)  ;;  %v2318_v21 = vld [vmem:[#allocation2 + $0x48] sm:$0xff] (!%p3146_p0)  ;;  %v2360_v2 = vadd.f32 (!%p3146_p0), %v4833_v10, %v2316_v3  ;;  %v2416_v3 = vunpack.c.h.bf16 (!%p3146_p0), %v2392_v35 }
 0x331   : > { %2294 = vst [vmem:[#allocation2 + $0xa8] sm:$0xff] %v2262_v7  ;;  %v2264_v60 = vadd.f32 %v2218_v22, %v1911_v31  ;;  %v4851_v31 = vadd.f32 (!%p3146_p0), %v2406_v23, %v2358_v42  ;;  %v2359_v7 = vadd.f32 (!%p3146_p0), %v4830_v51, %v2315_v59  ;;  %v2467_v22 = vadd.f32 (!%p3146_p0), %v4847_v26, %v4845_v36  ;;  %v2326_v56 = vld [vmem:[#allocation2 + $0x88] sm:$0xff] (!%p3146_p0)  ;;  %v2393_v63 = vld [vmem:[%s3766_s23 + $0x40] sm:$0xff] (!%p3146_p0)  ;;  %v2327_v27 = vld [vmem:[#allocation2 + $0x90] sm:$0xff] (!%p3146_p0) }
 0x332   : > { %2295 = vst [vmem:[#allocation2 + $0xb0] sm:$0xff] %v2263_v57  ;;  %v2389_v57 = vld [vmem:[%s3766_s23 + $0x20] sm:$0xff] (!%p3146_p0)  ;;  %v2415_v59 = vunpack.c.l.bf16 (!%p3146_p0), %v2392_v35  ;;  %v2328_v23 = vld [vmem:[#allocation2 + $0x98] sm:$0xff] (!%p3146_p0) }
 0x333   : > { %2296 = vst [vmem:[#allocation2 + $0xb8] sm:$0xff] %v2264_v60  ;;  %v4858_v60 = vadd.f32 (!%p3146_p0), %v2403_v39, %v2355_v33  ;;  %2468 = vadd.xlane.f32.xlu0 (!%p3146_p0), %v2467_v22  ;;  %v2394_v33 = vld [vmem:[%s3766_s23 + $0x48] sm:$0xff] (!%p3146_p0)  ;;  %v2369_v39 = vadd.f32 (!%p3146_p0), %v4830_v51, %v2325_v24 }
 0x335   : > { %v2222_v28 = vpop.f32.mrb[24].mxu1 }
 0x336   : > { %v2265_v48 = vadd.f32 %v2222_v28, %v1912_v30  ;;  %v2224_v19 = vpop.f32.mrb[25].mxu1  ;;  %v4860_v30 = vadd.f32 (!%p3146_p0), %v2404_v25, %v2356_v0  ;;  %v2319_v28 = vld [vmem:[#allocation2 + $0x50] sm:$0xff] (!%p3146_p0)  ;;  %v2370_v25 = vadd.f32 (!%p3146_p0), %v4833_v10, %v2326_v56 }
 0x337   : > { %v2266_v29 = vadd.f32 %v2224_v19, %v1913_v16  ;;  %v2226_v38 = vpop.f32.mrb[26].mxu1  ;;  %v2407_v16 = vunpack.c.l.bf16 (!%p3146_p0), %v2388_v43  ;;  %v2473_v19 = vadd.f32 (!%p3146_p0), %v4851_v31, %v4849_v44 }
 0x338   : > { %2297 = vst [vmem:[#allocation2 + $0xc0] sm:$0xff] %v2265_v48  ;;  %v2267_v34 = vadd.f32 %v2226_v38, %v1914_v11  ;;  %v2228_v17 = vpop.f32.mrb[27].mxu1  ;;  %v2320_v11 = vld [vmem:[#allocation2 + $0x58] sm:$0xff] (!%p3146_p0)  ;;  %v2390_v48 = vld [vmem:[%s3766_s23 + $0x28] sm:$0xff] (!%p3146_p0)  ;;  %v2362_v38 = vadd.f32 (!%p3146_p0), %v4833_v10, %v2318_v21  ;;  %v4905_v21 = vadd.f32 (!%p3146_p0), %v2416_v3, %v2368_v12 }
 0x339   : > { %2298 = vst [vmem:[#allocation2 + $0xc8] sm:$0xff] %v2266_v29  ;;  %v2268_v46 = vadd.f32 %v2228_v17, %v1915_v55  ;;  %v2408_v55 = vunpack.c.h.bf16 (!%p3146_p0), %v2388_v43  ;;  %v2361_v29 = vadd.f32 (!%p3146_p0), %v4830_v51, %v2317_v45  ;;  %v2470_v17 = vadd.f32 (!%p3146_p0), %v4860_v30, %v4858_v60  ;;  %2474 = vadd.xlane.f32.xlu1 (!%p3146_p0), %v2473_v19  ;;  %v2330_v22 = vld [vmem:[#allocation2 + $0xa8] sm:$0xff] (!%p3146_p0) }
 0x33a   : > { %2299 = vst [vmem:[#allocation2 + $0xd0] sm:$0xff] %v2267_v34  ;;  %v2321_v34 = vld [vmem:[#allocation2 + $0x60] sm:$0xff] (!%p3146_p0)  ;;  %v2419_v19 = vunpack.c.l.bf16 (!%p3146_p0), %v2394_v33 }
 0x33b   : > { %2300 = vst [vmem:[#allocation2 + $0xd8] sm:$0xff] %v2268_v46  ;;  %v4869_v46 = vadd.f32 (!%p3146_p0), %v2407_v16, %v2359_v7  ;;  %v2365_v8 = vadd.f32 (!%p3146_p0), %v4830_v51, %v2321_v34  ;;  %2471 = vadd.xlane.f32.xlu0 (!%p3146_p0), %v2470_v17  ;;  %v2417_v7 = vunpack.c.l.bf16 (!%p3146_p0), %v2393_v63  ;;  %v2395_v16 = vld [vmem:[%s3766_s23 + $0x50] sm:$0xff] (!%p3146_p0)  ;;  %v2420_v17 = vunpack.c.h.bf16 (!%p3146_p0), %v2394_v33 }
 0x33c   : > { %v2422_v62 = vunpack.c.h.bf16 (!%p3146_p0), %v2395_v16 }
 0x33d   : > { %v2232_v4 = vpop.f32.mrb[28].mxu1  ;;  %2308 = sbr.rel (%p3146_p0) target bundleno = 1183 (0x49f), region = 98 }
 0x33e   : > { %v2269_v32 = vadd.f32 %v2232_v4, %v1916_v1  ;;  %v2234_v47 = vpop.f32.mrb[29].mxu1  ;;  %v2409_v1 = vunpack.c.l.bf16 (!%p3146_p0), %v2389_v57  ;;  %v2322_v4 = vld [vmem:[#allocation2 + $0x68] sm:$0xff] (!%p3146_p0) }
 0x33f   : > { %v2270_v6 = vadd.f32 %v2234_v47, %v1917_v14  ;;  %v2236_v61 = vpop.f32.mrb[30].mxu1  ;;  %v2410_v14 = vunpack.c.h.bf16 (!%p3146_p0), %v2389_v57  ;;  %v2363_v47 = vadd.f32 (!%p3146_p0), %v4830_v51, %v2319_v28  ;;  %v2366_v40 = vadd.f32 (!%p3146_p0), %v4833_v10, %v2322_v4  ;;  %v2329_v57 = vld [vmem:[#allocation2 + $0xa0] sm:$0xff] (!%p3146_p0) }
 0x340   : > { %2301 = vst [vmem:[#allocation2 + $0xe0] sm:$0xff] %v2269_v32  ;;  %v2271_v49 = vadd.f32 %v2236_v61, %v1918_v18  ;;  %v2238_v41 = vpop.f32.mrb[31].mxu1  ;;  %v2391_v18 = vld [vmem:[%s3766_s23 + $0x30] sm:$0xff] (!%p3146_p0)  ;;  %v4872_v32 = vadd.f32 (!%p3146_p0), %v2408_v55, %v2360_v2  ;;  %v2418_v2 = vunpack.c.h.bf16 (!%p3146_p0), %v2393_v63 }
 0x341   : > { %2302 = vst [vmem:[#allocation2 + $0xe8] sm:$0xff] %v2270_v6  ;;  %v2272_v53 = vadd.f32 %v2238_v41, %v1919_v9  ;;  %v2364_v9 = vadd.f32 (!%p3146_p0), %v4833_v10, %v2320_v11  ;;  %v2411_v6 = vunpack.c.l.bf16 (!%p3146_p0), %v2390_v48  ;;  %v2323_v61 = vld [vmem:[#allocation2 + $0x70] sm:$0xff] (!%p3146_p0)  ;;  %v4878_v41 = vadd.f32 (!%p3146_p0), %v2410_v14, %v2362_v38  ;;  %v2396_v14 = vld [vmem:[%s3766_s23 + $0x58] sm:$0xff] (!%p3146_p0) }
 0x342   : > { %2303 = vst [vmem:[#allocation2 + $0xf0] sm:$0xff] %v2271_v49  ;;  %v4876_v49 = vadd.f32 (!%p3146_p0), %v2409_v1, %v2361_v29  ;;  %v2476_v13 = vadd.f32 (!%p3146_p0), %v4872_v32, %v4869_v46  ;;  %v2413_v54 = vunpack.c.l.bf16 (!%p3146_p0), %v2391_v18  ;;  %v2414_v37 = vunpack.c.h.bf16 (!%p3146_p0), %v2391_v18  ;;  %v2331_v55 = vld [vmem:[#allocation2 + $0xb0] sm:$0xff] (!%p3146_p0)  ;;  %v2332_v1 = vld [vmem:[#allocation2 + $0xb8] sm:$0xff] (!%p3146_p0) }
 0x343   : > { %2304 = vst [vmem:[#allocation2 + $0xf8] sm:$0xff] %v2272_v53  ;;  %v2412_v53 = vunpack.c.h.bf16 (!%p3146_p0), %v2390_v48  ;;  %v4884_v50 = vadd.f32 (!%p3146_p0), %v2411_v6, %v2363_v47  ;;  %v2367_v58 = vadd.f32 (!%p3146_p0), %v4830_v51, %v2323_v61  ;;  %v2371_v11 = vadd.f32 (!%p3146_p0), %v4830_v51, %v2327_v27  ;;  %v2333_v6 = vld [vmem:[#allocation2 + $0xc0] sm:$0xff] (!%p3146_p0)  ;;  %v2334_v61 = vld [vmem:[#allocation2 + $0xc8] sm:$0xff] (!%p3146_p0) }
 0x344   : > { %v2479_v20 = vadd.f32 %v4878_v41, %v4876_v49  ;;  %2477 = vadd.xlane.f32.xlu1 %v2476_v13  ;;  %v4893_v42 = vadd.f32 %v2413_v54, %v2365_v8  ;;  %v4899_v43 = vadd.f32 %v2414_v37, %v2366_v40  ;;  %v2372_v48 = vadd.f32 %v4833_v10, %v2328_v23  ;;  %v2397_v13 = vld [vmem:[%s3766_s23 + $0x60] sm:$0xff]  ;;  %v2336_v37 = vld [vmem:[#allocation2 + $0xd8] sm:$0xff] }
 0x345   : > { %v4889_v52 = vadd.f32 %v2412_v53, %v2364_v9  ;;  %v4903_v45 = vadd.f32 %v2415_v59, %v2367_v58  ;;  %v4914_v38 = vadd.f32 %v2417_v7, %v2369_v39  ;;  %v4916_v34 = vadd.f32 %v2418_v2, %v2370_v25  ;;  %v2398_v58 = vld [vmem:[%s3766_s23 + $0x68] sm:$0xff]  ;;  %v2399_v7 = vld [vmem:[%s3766_s23 + $0x70] sm:$0xff] }
 0x346   : > { %2480 = vadd.xlane.f32.xlu0 %v2479_v20  ;;  %v2485_v28 = vadd.f32 %v4899_v43, %v4893_v42  ;;  %v4919_v4 = vadd.f32 %v2419_v19, %v2371_v11  ;;  %v2373_v18 = vadd.f32 %v4830_v51, %v2329_v57  ;;  %v2374_v47 = vadd.f32 %v4833_v10, %v2330_v22  ;;  %v2335_v20 = vld [vmem:[#allocation2 + $0xd0] sm:$0xff] }
 0x347   : > { %v2482_v0 = vadd.f32 %v4889_v52, %v4884_v50  ;;  %v2488_v29 = vadd.f32 %v4905_v21, %v4903_v45  ;;  %v2421_v9 = vunpack.c.l.bf16 %v2395_v16  ;;  %v2491_v53 = vadd.f32 %v4916_v34, %v4914_v38  ;;  %v2337_v39 = vld [vmem:[#allocation2 + $0xe0] sm:$0xff] }
 0x348   : > { %v4925_v8 = vadd.f32 %v2420_v17, %v2372_v48  ;;  %v2375_v35 = vadd.f32 %v4830_v51, %v2331_v55  ;;  %v2376_v54 = vadd.f32 %v4833_v10, %v2332_v1  ;;  %v2423_v24 = vunpack.c.l.bf16 %v2396_v14  ;;  %v2338_v25 = vld [vmem:[#allocation2 + $0xe8] sm:$0xff]  ;;  %v2400_v17 = vld [vmem:[%s3766_s23 + $0x78] sm:$0xff] }
 0x349   : > { %2483 = vadd.xlane.f32.xlu1 %v2482_v0  ;;  %v4929_v40 = vadd.f32 %v2421_v9, %v2373_v18  ;;  %v2424_v56 = vunpack.c.h.bf16 %v2396_v14  ;;  %v4935_v12 = vadd.f32 %v2422_v62, %v2374_v47  ;;  %v2377_v59 = vadd.f32 %v4830_v51, %v2333_v6 }
 0x34a   : > { %2486 = vadd.xlane.f32.xlu0 %v2485_v28  ;;  %v2494_v63 = vadd.f32 %v4925_v8, %v4919_v4  ;;  %v2378_v3 = vadd.f32 %v4833_v10, %v2334_v61  ;;  %v4939_v27 = vadd.f32 %v2423_v24, %v2375_v35  ;;  %v2425_v33 = vunpack.c.l.bf16 %v2397_v13  ;;  %v2339_v28 = vld [vmem:[#allocation2 + $0xf0] sm:$0xff] }
 0x34b   : > { %v4941_v23 = vadd.f32 %v2424_v56, %v2376_v54  ;;  %v2426_v0 = vunpack.c.h.bf16 %v2397_v13  ;;  %v2497_v2 = vadd.f32 %v4935_v12, %v4929_v40  ;;  %v2379_v57 = vadd.f32 %v4830_v51, %v2335_v20 }
 0x34c   : > { %v2380_v22 = vadd.f32 %v4833_v10, %v2336_v37  ;;  %v2427_v16 = vunpack.c.l.bf16 %v2398_v58  ;;  %v4950_v48 = vadd.f32 %v2425_v33, %v2377_v59  ;;  %v2428_v55 = vunpack.c.h.bf16 %v2398_v58 }
 0x34d   : > { %2489 = vadd.xlane.f32.xlu1 %v2488_v29  ;;  %v2500_v11 = vadd.f32 %v4941_v23, %v4939_v27  ;;  %v4952_v19 = vadd.f32 %v2426_v0, %v2378_v3  ;;  %v2340_v29 = vld [vmem:[#allocation2 + $0xf8] sm:$0xff]  ;;  %v2381_v14 = vadd.f32 %v4830_v51, %v2337_v39  ;;  %v2382_v18 = vadd.f32 %v4833_v10, %v2338_v25 }
 0x34e   : > { %2492 = vadd.xlane.f32.xlu0 %v2491_v53  ;;  %v4955_v1 = vadd.f32 %v2427_v16, %v2379_v57  ;;  %v2429_v47 = vunpack.c.l.bf16 %v2399_v7  ;;  %v4959_v9 = vadd.f32 %v2428_v55, %v2380_v22  ;;  %v2430_v6 = vunpack.c.h.bf16 %v2399_v7 }
 0x34f   : > { %v2383_v61 = vadd.f32 %v4830_v51, %v2339_v28  ;;  %v2384_v53 = vadd.f32 %v4833_v10, %v2340_v29  ;;  %v2431_v62 = vunpack.c.l.bf16 %v2400_v17  ;;  %v2432_v35 = vunpack.c.h.bf16 %v2400_v17 }
 0x350   : > { %v2503_v13 = vadd.f32 %v4952_v19, %v4950_v48  ;;  %v4965_v54 = vadd.f32 %v2429_v47, %v2381_v14  ;;  %v4967_v24 = vadd.f32 %v2430_v6, %v2382_v18  ;;  %v2506_v56 = vadd.f32 %v4959_v9, %v4955_v1 }
 0x351   : > { %2495 = vadd.xlane.f32.xlu1 %v2494_v63  ;;  %v4971_v20 = vadd.f32 %v2431_v62, %v2383_v61  ;;  %v4973_v37 = vadd.f32 %v2432_v35, %v2384_v53 }
 0x352   : > { %2498 = vadd.xlane.f32.xlu0 %v2497_v2  ;;  %v2509_v51 = vadd.f32 %v4967_v24, %v4965_v54 }
 0x353   : > { %v2512_v10 = vadd.f32 %v4973_v37, %v4971_v20 }
 0x355   : > { %2501 = vadd.xlane.f32.xlu1 %v2500_v11 }
 0x356   : > { %2504 = vadd.xlane.f32.xlu0 %v2503_v13 }
 0x359   : > { %2507 = vadd.xlane.f32.xlu1 %v2506_v56 }
 0x35a   : > { %2510 = vadd.xlane.f32.xlu0 %v2509_v51 }
 0x35d   : > { %2513 = vadd.xlane.f32.xlu1 %v2512_v10 }
 0x3c0   : > { %v2469_v58 = vpop.xlane.xlu0 %2468 }
 0x3c1   : > { %v2516_v63 = vmul.f32 0.00390625, %v2469_v58 }
 0x3c3   : > { %v4980_v33 = vsub.f32 %v4845_v36, %v2516_v63  ;;  %v4983_v0 = vsub.f32 %v4847_v26, %v2516_v63 }
 0x3c5   : > { %v2564_v22 = vmul.f32 %v4980_v33, %v4980_v33  ;;  %v2565_v16 = vmul.f32 %v4983_v0, %v4983_v0 }
 0x3c6   : > { %v2475_v59 = vpop.xlane.xlu1 %2474 }
 0x3c7   : > { %v2518_v3 = vmul.f32 0.00390625, %v2475_v59  ;;  %v2596_v11 = vadd.f32 %v2565_v16, %v2564_v22 }
 0x3c8   : > { %v2472_v7 = vpop.xlane.xlu0 %2471 }
 0x3c9   : > { %v4986_v39 = vsub.f32 %v4849_v44, %v2518_v3  ;;  %v4989_v25 = vsub.f32 %v4851_v31, %v2518_v3  ;;  %v2517_v2 = vmul.f32 0.00390625, %v2472_v7  ;;  %2597 = vadd.xlane.f32.xlu0 %v2596_v11 }
 0x3cb   : > { %v2568_v26 = vmul.f32 %v4986_v39, %v4986_v39  ;;  %v2569_v44 = vmul.f32 %v4989_v25, %v4989_v25  ;;  %v5000_v28 = vsub.f32 %v4858_v60, %v2517_v2  ;;  %v5003_v31 = vsub.f32 %v4860_v30, %v2517_v2 }
 0x3cd   : > { %v2602_v47 = vadd.f32 %v2569_v44, %v2568_v26  ;;  %v2566_v6 = vmul.f32 %v5000_v28, %v5000_v28  ;;  %v2567_v60 = vmul.f32 %v5003_v31, %v5003_v31 }
 0x3cf   : > { %v2599_v62 = vadd.f32 %v2567_v60, %v2566_v6  ;;  %2603 = vadd.xlane.f32.xlu0 %v2602_v47 }
 0x3d1   : > { %v2478_v57 = vpop.xlane.xlu1 %2477  ;;  %2600 = vadd.xlane.f32.xlu1 %v2599_v62 }
 0x3d2   : > { %v2519_v36 = vmul.f32 0.00390625, %v2478_v57 }
 0x3d3   : > { %v2481_v17 = vpop.xlane.xlu0 %2480 }
 0x3d4   : > { %v5006_v55 = vsub.f32 %v4869_v46, %v2519_v36  ;;  %v5009_v29 = vsub.f32 %v4872_v32, %v2519_v36  ;;  %v2520_v14 = vmul.f32 0.00390625, %v2481_v17 }
 0x3d6   : > { %v2484_v18 = vpop.xlane.xlu1 %2483  ;;  %v2570_v61 = vmul.f32 %v5006_v55, %v5006_v55  ;;  %v2571_v46 = vmul.f32 %v5009_v29, %v5009_v29  ;;  %v5020_v32 = vsub.f32 %v4876_v49, %v2520_v14  ;;  %v5023_v53 = vsub.f32 %v4878_v41, %v2520_v14 }
 0x3d7   : > { %v2521_v30 = vmul.f32 0.00390625, %v2484_v18  ;;  %v2487_v56 = vpop.xlane.xlu0 %2486 }
 0x3d8   : > { %v2522_v51 = vmul.f32 0.00390625, %v2487_v56  ;;  %v2605_v58 = vadd.f32 %v2571_v46, %v2570_v61  ;;  %v2572_v49 = vmul.f32 %v5020_v32, %v5020_v32  ;;  %v2573_v41 = vmul.f32 %v5023_v53, %v5023_v53 }
 0x3d9   : > { %v5026_v35 = vsub.f32 %v4884_v50, %v2521_v30  ;;  %v5029_v13 = vsub.f32 %v4889_v52, %v2521_v30 }
 0x3da   : > { %v2490_v10 = vpop.xlane.xlu1 %2489  ;;  %v5040_v59 = vsub.f32 %v4893_v42, %v2522_v51  ;;  %v5043_v3 = vsub.f32 %v4899_v43, %v2522_v51  ;;  %v2608_v7 = vadd.f32 %v2573_v41, %v2572_v49  ;;  %2606 = vadd.xlane.f32.xlu1 %v2605_v58 }
 0x3db   : > { %v2523_v63 = vmul.f32 0.00390625, %v2490_v10  ;;  %v2574_v50 = vmul.f32 %v5026_v35, %v5026_v35  ;;  %v2575_v52 = vmul.f32 %v5029_v13, %v5029_v13  ;;  %v2493_v22 = vpop.xlane.xlu0 %2492 }
 0x3dc   : > { %v2524_v16 = vmul.f32 0.00390625, %v2493_v22  ;;  %2609 = vadd.xlane.f32.xlu0 %v2608_v7  ;;  %v2576_v42 = vmul.f32 %v5040_v59, %v5040_v59  ;;  %v2577_v43 = vmul.f32 %v5043_v3, %v5043_v3 }
 0x3dd   : > { %v5046_v2 = vsub.f32 %v4903_v45, %v2523_v63  ;;  %v5049_v57 = vsub.f32 %v4905_v21, %v2523_v63  ;;  %v2611_v26 = vadd.f32 %v2575_v52, %v2574_v50 }
 0x3de   : > { %v2496_v36 = vpop.xlane.xlu1 %2495  ;;  %v5060_v11 = vsub.f32 %v4914_v38, %v2524_v16  ;;  %v5063_v17 = vsub.f32 %v4916_v34, %v2524_v16  ;;  %v2614_v14 = vadd.f32 %v2577_v43, %v2576_v42 }
 0x3df   : > { %v2525_v44 = vmul.f32 0.00390625, %v2496_v36  ;;  %v2578_v45 = vmul.f32 %v5046_v2, %v5046_v2  ;;  %v2579_v21 = vmul.f32 %v5049_v57, %v5049_v57  ;;  %v2499_v6 = vpop.xlane.xlu0 %2498  ;;  %2612 = vadd.xlane.f32.xlu1 %v2611_v26 }
 0x3e0   : > { %v2526_v60 = vmul.f32 0.00390625, %v2499_v6  ;;  %2615 = vadd.xlane.f32.xlu0 %v2614_v14  ;;  %v2580_v38 = vmul.f32 %v5060_v11, %v5060_v11  ;;  %v2581_v34 = vmul.f32 %v5063_v17, %v5063_v17 }
 0x3e1   : > { %v5066_v18 = vsub.f32 %v4919_v4, %v2525_v44  ;;  %v5069_v47 = vsub.f32 %v4925_v8, %v2525_v44  ;;  %v2617_v61 = vadd.f32 %v2579_v21, %v2578_v45 }
 0x3e2   : > { %v2502_v30 = vpop.xlane.xlu1 %2501  ;;  %v5080_v62 = vsub.f32 %v4929_v40, %v2526_v60  ;;  %v5083_v56 = vsub.f32 %v4935_v12, %v2526_v60  ;;  %v2620_v51 = vadd.f32 %v2581_v34, %v2580_v38 }
 0x3e3   : > { %v2527_v46 = vmul.f32 0.00390625, %v2502_v30  ;;  %v2582_v4 = vmul.f32 %v5066_v18, %v5066_v18  ;;  %v2583_v8 = vmul.f32 %v5069_v47, %v5069_v47  ;;  %v2505_v49 = vpop.xlane.xlu0 %2504  ;;  %2618 = vadd.xlane.f32.xlu1 %v2617_v61 }
 0x3e4   : > { %v2528_v41 = vmul.f32 0.00390625, %v2505_v49  ;;  %2621 = vadd.xlane.f32.xlu0 %v2620_v51  ;;  %v2584_v40 = vmul.f32 %v5080_v62, %v5080_v62  ;;  %v2585_v12 = vmul.f32 %v5083_v56, %v5083_v56 }
 0x3e5   : > { %v5086_v10 = vsub.f32 %v4939_v27, %v2527_v46  ;;  %v5089_v58 = vsub.f32 %v4941_v23, %v2527_v46  ;;  %v2623_v50 = vadd.f32 %v2583_v8, %v2582_v4 }
 0x3e6   : > { %v2508_v63 = vpop.xlane.xlu1 %2507  ;;  %v5100_v7 = vsub.f32 %v4950_v48, %v2528_v41  ;;  %v5103_v22 = vsub.f32 %v4952_v19, %v2528_v41  ;;  %v2626_v16 = vadd.f32 %v2585_v12, %v2584_v40 }
 0x3e7   : > { %v2529_v52 = vmul.f32 0.00390625, %v2508_v63  ;;  %v2586_v27 = vmul.f32 %v5086_v10, %v5086_v10  ;;  %v2587_v23 = vmul.f32 %v5089_v58, %v5089_v58  ;;  %v2511_v42 = vpop.xlane.xlu0 %2510  ;;  %2624 = vadd.xlane.f32.xlu1 %v2623_v50 }
 0x3e8   : > { %v2530_v43 = vmul.f32 0.00390625, %v2511_v42  ;;  %2627 = vadd.xlane.f32.xlu0 %v2626_v16  ;;  %v2588_v48 = vmul.f32 %v5100_v7, %v5100_v7  ;;  %v2589_v19 = vmul.f32 %v5103_v22, %v5103_v22  ;;  %v2465_v42 = vld [vmem:[%s5296_s6] sm:$0x3] }
 0x3e9   : > { %v5106_v36 = vsub.f32 %v4955_v1, %v2529_v52  ;;  %v5109_v26 = vsub.f32 %v4959_v9, %v2529_v52  ;;  %v2629_v45 = vadd.f32 %v2587_v23, %v2586_v27 }
 0x3ea   : > { %v2514_v44 = vpop.xlane.xlu1 %2513  ;;  %v5120_v14 = vsub.f32 %v4965_v54, %v2530_v43  ;;  %v5123_v6 = vsub.f32 %v4967_v24, %v2530_v43  ;;  %v2632_v60 = vadd.f32 %v2589_v19, %v2588_v48  ;;  %v2466_v19 = vld [vmem:[%s5297_s7] sm:$0x3] }
 0x3eb   : > { %v2531_v21 = vmul.f32 0.00390625, %v2514_v44  ;;  %v2590_v1 = vmul.f32 %v5106_v36, %v5106_v36  ;;  %v2591_v9 = vmul.f32 %v5109_v26, %v5109_v26  ;;  %2630 = vadd.xlane.f32.xlu1 %v2629_v45 }
 0x3ec   : > { %2633 = vadd.xlane.f32.xlu0 %v2632_v60  ;;  %v2592_v34 = vmul.f32 %v5120_v14, %v5120_v14  ;;  %v2593_v54 = vmul.f32 %v5123_v6, %v5123_v6  ;;  %v5149_v60 = vrot.slane %v2465_v42, %v5378_v15 }
 0x3ed   : > { %v5126_v30 = vsub.f32 %v4971_v20, %v2531_v21  ;;  %v5129_v61 = vsub.f32 %v4973_v37, %v2531_v21  ;;  %v2635_v38 = vadd.f32 %v2591_v9, %v2590_v1  ;;  %v5146_v9 = vrot.slane %v2465_v42, %v5377_v5 }
 0x3ee   : > { %v2638_v20 = vadd.f32 %v2593_v54, %v2592_v34 }
 0x3ef   : > { %v2594_v24 = vmul.f32 %v5126_v30, %v5126_v30  ;;  %v2595_v46 = vmul.f32 %v5129_v61, %v5129_v61  ;;  %2636 = vadd.xlane.f32.xlu1 %v2635_v38 }
 0x3f0   : > { %2639 = vadd.xlane.f32.xlu0 %v2638_v20 }
 0x3f1   : > { %v2641_v37 = vadd.f32 %v2595_v46, %v2594_v24  ;;  %v5152_v24 = vrot.slane %v2466_v19, %v5377_v5  ;;  %v5155_v46 = vrot.slane %v2466_v19, %v5378_v15 }
 0x3f3   : > { %2642 = vadd.xlane.f32.xlu1 %v2641_v37 }
 0x456   : > { %v2598_v4 = vpop.xlane.xlu0 %2597 }
 0x457   : > { %v2644_v8 = vmul.f32 0.00390625, %v2598_v4 }
 0x459   : > { %v2660_v51 = vadd.f32 1e-12, %v2644_v8 }
 0x45b   : > { %3492 = vrsqrt.f32 %v2660_v51 }
 0x45c   : > { %v2604_v41 = vpop.xlane.xlu0 %2603 }
 0x45d   : > { %v2646_v50 = vmul.f32 0.00390625, %v2604_v41 }
 0x45e   : > { %v2601_v49 = vpop.xlane.xlu1 %2600 }
 0x45f   : > { %v2645_v63 = vmul.f32 0.00390625, %v2601_v49  ;;  %v2662_v12 = vadd.f32 1e-12, %v2646_v50 }
 0x461   : > { %v2661_v40 = vadd.f32 1e-12, %v2645_v63 }
 0x463   : > { %3494 = vrsqrt.f32 %v2661_v40 }
 0x464   : > { %3496 = vrsqrt.f32 %v2662_v12 }
 0x465   : > { %v3493_v38 = vpop.eup %3492 }
 0x466   : > { %v2692_v20 = vmul.f32 %v3493_v38, %v4980_v33  ;;  %v2693_v37 = vmul.f32 %v3493_v38, %v4983_v0 }
 0x467   : > { %v2607_v52 = vpop.xlane.xlu1 %2606 }
 0x468   : > { %v2647_v23 = vmul.f32 0.00390625, %v2607_v52  ;;  %v2735_v41 = vmul.f32 %v5146_v9, %v2692_v20  ;;  %v2736_v63 = vmul.f32 %v5149_v60, %v2693_v37 }
 0x469   : > { %v2610_v27 = vpop.xlane.xlu0 %2609 }
 0x46a   : > { %v2648_v16 = vmul.f32 0.00390625, %v2610_v27  ;;  %v2663_v43 = vadd.f32 1e-12, %v2647_v23  ;;  %v2778_v15 = vadd.f32 %v5152_v24, %v2735_v41  ;;  %v2779_v33 = vadd.f32 %v5155_v46, %v2736_v63 }
 0x46c   : > { %v2664_v44 = vadd.f32 1e-12, %v2648_v16  ;;  %v2613_v45 = vpop.xlane.xlu1 %2612  ;;  %3498 = vrsqrt.f32 %v2663_v43 }
 0x46d   : > { %v2616_v48 = vpop.xlane.xlu0 %2615  ;;  %v2649_v21 = vmul.f32 0.00390625, %v2613_v45  ;;  %v3495_v50 = vpop.eup %3494 }
 0x46e   : > { %v2650_v1 = vmul.f32 0.00390625, %v2616_v48  ;;  %3500 = vrsqrt.f32 %v2664_v44  ;;  %v3497_v12 = vpop.eup %3496  ;;  %v2694_v0 = vmul.f32 %v3495_v50, %v5000_v28  ;;  %v2695_v52 = vmul.f32 %v3495_v50, %v5003_v31 }
 0x46f   : > { %v2665_v34 = vadd.f32 1e-12, %v2649_v21  ;;  %v2696_v16 = vmul.f32 %v3497_v12, %v4986_v39  ;;  %v2697_v42 = vmul.f32 %v3497_v12, %v4989_v25  ;;  %v3170_v44 = vpack.c.bf16 %v2779_v33, %v2778_v15 }
 0x470   : > { %v2666_v54 = vadd.f32 1e-12, %v2650_v1  ;;  %v2619_v4 = vpop.xlane.xlu1 %2618  ;;  %v2737_v45 = vmul.f32 %v5146_v9, %v2694_v0  ;;  %v2738_v48 = vmul.f32 %v5149_v60, %v2695_v52 }
 0x471   : > { %v2622_v8 = vpop.xlane.xlu0 %2621  ;;  %3502 = vrsqrt.f32 %v2665_v34  ;;  %v2651_v51 = vmul.f32 0.00390625, %v2619_v4  ;;  %v2739_v28 = vmul.f32 %v5146_v9, %v2696_v16  ;;  %v2740_v31 = vmul.f32 %v5149_v60, %v2697_v42  ;;  %2906 = vst [vmem:[%s3777_s13] sm:$0xff] %v3170_v44 }
 0x472   : > { %v2652_v49 = vmul.f32 0.00390625, %v2622_v8  ;;  %3504 = vrsqrt.f32 %v2666_v54  ;;  %v2780_v39 = vadd.f32 %v5152_v24, %v2737_v45  ;;  %v2781_v25 = vadd.f32 %v5155_v46, %v2738_v48 }
 0x473   : > { %v2667_v5 = vadd.f32 1e-12, %v2651_v51  ;;  %v2782_v37 = vadd.f32 %v5152_v24, %v2739_v28  ;;  %v2783_v4 = vadd.f32 %v5155_v46, %v2740_v31 }
 0x474   : > { %v2668_v40 = vadd.f32 1e-12, %v2652_v49  ;;  %v2625_v27 = vpop.xlane.xlu1 %2624  ;;  %v3171_v49 = vpack.c.bf16 %v2781_v25, %v2780_v39 }
 0x475   : > { %v2628_v23 = vpop.xlane.xlu0 %2627  ;;  %3506 = vrsqrt.f32 %v2667_v5  ;;  %v2653_v43 = vmul.f32 0.00390625, %v2625_v27  ;;  %v3172_v50 = vpack.c.bf16 %v2783_v4, %v2782_v37 }
 0x476   : > { %3508 = vrsqrt.f32 %v2668_v40  ;;  %v3499_v19 = vpop.eup %3498  ;;  %v2654_v1 = vmul.f32 0.00390625, %v2628_v23  ;;  %2907 = vst [vmem:[%s3777_s13 + $0x8] sm:$0xff] %v3171_v49 }
 0x477   : > { %v2669_v21 = vadd.f32 1e-12, %v2653_v43  ;;  %v2698_v34 = vmul.f32 %v3499_v19, %v5006_v55  ;;  %v2699_v54 = vmul.f32 %v3499_v19, %v5009_v29  ;;  %2908 = vst [vmem:[%s3777_s13 + $0x10] sm:$0xff] %v3172_v50 }
 0x478   : > { %v3501_v38 = vpop.eup %3500  ;;  %v2631_v20 = vpop.xlane.xlu1 %2630  ;;  %v2670_v40 = vadd.f32 1e-12, %v2654_v1 }
 0x479   : > { %v2700_v8 = vmul.f32 %v3501_v38, %v5020_v32  ;;  %v2701_v51 = vmul.f32 %v3501_v38, %v5023_v53  ;;  %v2741_v41 = vmul.f32 %v5146_v9, %v2698_v34  ;;  %v2742_v63 = vmul.f32 %v5149_v60, %v2699_v54  ;;  %v2634_v16 = vpop.xlane.xlu0 %2633 }
 0x47a   : > { %3510 = vrsqrt.f32 %v2669_v21  ;;  %v2655_v28 = vmul.f32 0.00390625, %v2631_v20 }
 0x47b   : > { %v3503_v55 = vpop.eup %3502  ;;  %v2743_v29 = vmul.f32 %v5146_v9, %v2700_v8  ;;  %v2744_v5 = vmul.f32 %v5149_v60, %v2701_v51  ;;  %v2784_v32 = vadd.f32 %v5152_v24, %v2741_v41  ;;  %v2785_v53 = vadd.f32 %v5155_v46, %v2742_v63 }
 0x47c   : > { %v3505_v12 = vpop.eup %3504  ;;  %v2702_v15 = vmul.f32 %v3503_v55, %v5026_v35  ;;  %v2703_v33 = vmul.f32 %v3503_v55, %v5029_v13  ;;  %3512 = vrsqrt.f32 %v2670_v40  ;;  %v2637_v35 = vpop.xlane.xlu1 %2636  ;;  %v2671_v4 = vadd.f32 1e-12, %v2655_v28 }
 0x47d   : > { %v2786_v0 = vadd.f32 %v5152_v24, %v2743_v29  ;;  %v2787_v52 = vadd.f32 %v5155_v46, %v2744_v5  ;;  %v2704_v27 = vmul.f32 %v3505_v12, %v5040_v59  ;;  %v2705_v23 = vmul.f32 %v3505_v12, %v5043_v3  ;;  %v2640_v49 = vpop.xlane.xlu0 %2639 }
 0x47e   : > { %v3173_v42 = vpack.c.bf16 %v2785_v53, %v2784_v32  ;;  %v2745_v43 = vmul.f32 %v5146_v9, %v2702_v15  ;;  %v2746_v44 = vmul.f32 %v5149_v60, %v2703_v33  ;;  %v2656_v51 = vmul.f32 0.00390625, %v2634_v16 }
 0x47f   : > { %v3507_v13 = vpop.eup %3506  ;;  %v3174_v45 = vpack.c.bf16 %v2787_v52, %v2786_v0  ;;  %v2747_v48 = vmul.f32 %v5146_v9, %v2704_v27  ;;  %v2748_v19 = vmul.f32 %v5149_v60, %v2705_v23  ;;  %3514 = vrsqrt.f32 %v2671_v4 }
 0x480   : > { %v3509_v31 = vpop.eup %3508  ;;  %2909 = vst [vmem:[%s3777_s13 + $0x18] sm:$0xff] %v3173_v42  ;;  %v2788_v59 = vadd.f32 %v5152_v24, %v2745_v43  ;;  %v2789_v3 = vadd.f32 %v5155_v46, %v2746_v44  ;;  %v2706_v21 = vmul.f32 %v3507_v13, %v5046_v2  ;;  %v2707_v1 = vmul.f32 %v3507_v13, %v5049_v57  ;;  %v2643_v55 = vpop.xlane.xlu1 %2642 }
 0x481   : > { %2910 = vst [vmem:[%s3777_s13 + $0x20] sm:$0xff] %v3174_v45  ;;  %v2790_v38 = vadd.f32 %v5152_v24, %v2747_v48  ;;  %v2791_v39 = vadd.f32 %v5155_v46, %v2748_v19  ;;  %v2708_v25 = vmul.f32 %v3509_v31, %v5060_v11  ;;  %v2709_v34 = vmul.f32 %v3509_v31, %v5063_v17 }
 0x482   : > { %v3175_v54 = vpack.c.bf16 %v2789_v3, %v2788_v59  ;;  %v2749_v20 = vmul.f32 %v5146_v9, %v2706_v21  ;;  %v2750_v37 = vmul.f32 %v5149_v60, %v2707_v1  ;;  %v2657_v63 = vmul.f32 0.00390625, %v2637_v35 }
 0x483   : > { %v3176_v2 = vpack.c.bf16 %v2791_v39, %v2790_v38  ;;  %v2751_v57 = vmul.f32 %v5146_v9, %v2708_v25  ;;  %v2752_v8 = vmul.f32 %v5149_v60, %v2709_v34  ;;  %v2672_v32 = vadd.f32 1e-12, %v2656_v51 }
 0x484   : > { %v3511_v41 = vpop.eup %3510  ;;  %2911 = vst [vmem:[%s3777_s13 + $0x28] sm:$0xff] %v3175_v54  ;;  %v2792_v11 = vadd.f32 %v5152_v24, %v2749_v20  ;;  %v2793_v17 = vadd.f32 %v5155_v46, %v2750_v37  ;;  %v2673_v53 = vadd.f32 1e-12, %v2657_v63  ;;  %v2658_v15 = vmul.f32 0.00390625, %v2640_v49 }
 0x485   : > { %2912 = vst [vmem:[%s3777_s13 + $0x30] sm:$0xff] %v3176_v2  ;;  %v2794_v50 = vadd.f32 %v5152_v24, %v2751_v57  ;;  %v2795_v29 = vadd.f32 %v5155_v46, %v2752_v8  ;;  %v2710_v5 = vmul.f32 %v3511_v41, %v5066_v18  ;;  %v2711_v40 = vmul.f32 %v3511_v41, %v5069_v47 }
 0x486   : > { %v3177_v12 = vpack.c.bf16 %v2793_v17, %v2792_v11  ;;  %v2659_v27 = vmul.f32 0.00390625, %v2643_v55  ;;  %v3513_v23 = vpop.eup %3512  ;;  %3516 = vrsqrt.f32 %v2672_v32  ;;  %v2674_v16 = vadd.f32 1e-12, %v2658_v15 }
 0x487   : > { %v3178_v33 = vpack.c.bf16 %v2795_v29, %v2794_v50  ;;  %v2753_v0 = vmul.f32 %v5146_v9, %v2710_v5  ;;  %v2754_v52 = vmul.f32 %v5149_v60, %v2711_v40  ;;  %v2712_v42 = vmul.f32 %v3513_v23, %v5080_v62 }
 0x488   : > { %2913 = vst [vmem:[%s3777_s13 + $0x38] sm:$0xff] %v3177_v12  ;;  %v2713_v43 = vmul.f32 %v3513_v23, %v5083_v56  ;;  %3518 = vrsqrt.f32 %v2673_v53  ;;  %v2675_v44 = vadd.f32 1e-12, %v2659_v27 }
 0x489   : > { %2914 = vst [vmem:[%s3777_s13 + $0x40] sm:$0xff] %v3178_v33  ;;  %v2796_v18 = vadd.f32 %v5152_v24, %v2753_v0  ;;  %v2797_v47 = vadd.f32 %v5155_v46, %v2754_v52  ;;  %v2755_v13 = vmul.f32 %v5146_v9, %v2712_v42  ;;  %3520 = vrsqrt.f32 %v2674_v16  ;;  %v3515_v28 = vpop.eup %3514 }
 0x48a   : > { %v2756_v45 = vmul.f32 %v5149_v60, %v2713_v43  ;;  %3522 = vrsqrt.f32 %v2675_v44  ;;  %v2714_v62 = vmul.f32 %v3515_v28, %v5086_v10  ;;  %v2715_v56 = vmul.f32 %v3515_v28, %v5089_v58 }
 0x48b   : > { %v3179_v35 = vpack.c.bf16 %v2797_v47, %v2796_v18  ;;  %v2798_v48 = vadd.f32 %v5152_v24, %v2755_v13 }
 0x48c   : > { %v2799_v19 = vadd.f32 %v5155_v46, %v2756_v45  ;;  %v2757_v59 = vmul.f32 %v5146_v9, %v2714_v62  ;;  %v2758_v3 = vmul.f32 %v5149_v60, %v2715_v56 }
 0x48d   : > { %2915 = vst [vmem:[%s3777_s13 + $0x48] sm:$0xff] %v3179_v35 }
 0x48e   : > { %v3180_v31 = vpack.c.bf16 %v2799_v19, %v2798_v48  ;;  %v2800_v1 = vadd.f32 %v5152_v24, %v2757_v59  ;;  %v2801_v38 = vadd.f32 %v5155_v46, %v2758_v3 }
 0x490   : > { %2916 = vst [vmem:[%s3777_s13 + $0x50] sm:$0xff] %v3180_v31  ;;  %v3517_v21 = vpop.eup %3516  ;;  %v3181_v10 = vpack.c.bf16 %v2801_v38, %v2800_v1 }
 0x491   : > { %v2716_v39 = vmul.f32 %v3517_v21, %v5100_v7  ;;  %v2717_v25 = vmul.f32 %v3517_v21, %v5103_v22 }
 0x492   : > { %v3519_v34 = vpop.eup %3518  ;;  %2917 = vst [vmem:[%s3777_s13 + $0x58] sm:$0xff] %v3181_v10 }
 0x493   : > { %v3521_v54 = vpop.eup %3520  ;;  %v2759_v58 = vmul.f32 %v5146_v9, %v2716_v39  ;;  %v2760_v20 = vmul.f32 %v5149_v60, %v2717_v25  ;;  %v2718_v37 = vmul.f32 %v3519_v34, %v5106_v36  ;;  %v2719_v2 = vmul.f32 %v3519_v34, %v5109_v26 }
 0x494   : > { %v3523_v4 = vpop.eup %3522  ;;  %v2720_v57 = vmul.f32 %v3521_v54, %v5120_v14  ;;  %v2721_v8 = vmul.f32 %v3521_v54, %v5123_v6 }
 0x495   : > { %v2802_v7 = vadd.f32 %v5152_v24, %v2759_v58  ;;  %v2803_v22 = vadd.f32 %v5155_v46, %v2760_v20  ;;  %v2761_v51 = vmul.f32 %v5146_v9, %v2718_v37  ;;  %v2722_v49 = vmul.f32 %v3523_v4, %v5126_v30 }
 0x496   : > { %v2762_v41 = vmul.f32 %v5149_v60, %v2719_v2  ;;  %v2763_v36 = vmul.f32 %v5146_v9, %v2720_v57  ;;  %v2764_v26 = vmul.f32 %v5149_v60, %v2721_v8  ;;  %v2723_v14 = vmul.f32 %v3523_v4, %v5129_v61 }
 0x497   : > { %v3182_v6 = vpack.c.bf16 %v2803_v22, %v2802_v7  ;;  %v2804_v11 = vadd.f32 %v5152_v24, %v2761_v51  ;;  %v2765_v17 = vmul.f32 %v5146_v9, %v2722_v49 }
 0x498   : > { %v2805_v63 = vadd.f32 %v5155_v46, %v2762_v41  ;;  %v2806_v30 = vadd.f32 %v5152_v24, %v2763_v36  ;;  %v2807_v55 = vadd.f32 %v5155_v46, %v2764_v26  ;;  %v2766_v50 = vmul.f32 %v5149_v60, %v2723_v14 }
 0x499   : > { %2918 = vst [vmem:[%s3777_s13 + $0x60] sm:$0xff] %v3182_v6  ;;  %v2808_v29 = vadd.f32 %v5152_v24, %v2765_v17 }
 0x49a   : > { %v3183_v5 = vpack.c.bf16 %v2805_v63, %v2804_v11  ;;  %v3184_v40 = vpack.c.bf16 %v2807_v55, %v2806_v30  ;;  %v2809_v61 = vadd.f32 %v5155_v46, %v2766_v50 }
 0x49c   : > { %2919 = vst [vmem:[%s3777_s13 + $0x68] sm:$0xff] %v3183_v5  ;;  %2920 = vst [vmem:[%s3777_s13 + $0x70] sm:$0xff] %v3184_v40  ;;  %v3185_v12 = vpack.c.bf16 %v2809_v61, %v2808_v29 }
 0x49e   : > { %2921 = vst [vmem:[%s3777_s13 + $0x78] sm:$0xff] %v3185_v12 }
 0x49f PF: > { %s18_s11 = sadd.s32 1, %s3578_s11   ;;  %s5379_s23 = sld [smem:[#allocation4_spill]] }
 0x4a0   : > { %p15_p1 = scmp.ge.s32.totalorder %s18_s11, 6   ;;  %s5380_s27 = smov %s3558_s28 }
 0x4a1   : > { %s5381_s28 = smov %s3676_s16  ;;  %s5382_s29 = smov %s3570_s9 }
 0x4a2   : > { %s5383_s30 = smov %s3574_s10  ;;  %s5384_s9 = smov %s5387_s12 }
 0x4a3   :  { %17 = sbr.rel (!%p15_p1) target bundleno = 7 (0x7), region = 145 }
 0x4a5   : > { %s5385_s10 = smov %s5379_s23 }

</bundles_post_ra>
